<compile_context>
chip_gen: v5e
topology: v5e:2x2
jax: 0.10.0
libtpu: 0.0.40
codegen_flags: <defaults>
</compile_context>

<pallas_src>
import math
import functools

import jax
import jax.numpy as jnp
from jax import lax
from jax.experimental import pallas as pl
from jax.experimental.pallas import tpu as pltpu


# ----------------------------------------------------------------------------
# In-kernel building blocks (pure functions of VMEM values)
# ----------------------------------------------------------------------------

def _ln(x, g, b, eps=1e-5):
    """LayerNorm over last dim. x: [S, E], g/b: [1, E]."""
    mu = jnp.mean(x, axis=-1, keepdims=True)
    var = jnp.mean((x - mu) ** 2, axis=-1, keepdims=True)
    return (x - mu) * lax.rsqrt(var + eps) * g + b


def _mha(x_q, x_kv, wq, bq, wk, bk, wv, bv, wo, bo, nhead):
    """Multi-head attention, fully in VMEM.  1/sqrt(Dh) is pre-folded into wq/bq.
    x_q: [Sq, E], x_kv: [Sk, E]; weights [E, E], biases [1, E]."""
    E = x_q.shape[-1]
    Dh = E // nhead
    q = jnp.dot(x_q, wq, preferred_element_type=jnp.float32) + bq
    k = jnp.dot(x_kv, wk, preferred_element_type=jnp.float32) + bk
    v = jnp.dot(x_kv, wv, preferred_element_type=jnp.float32) + bv
    out = None
    for h in range(nhead):  # static unroll, heads stay in vregs
        lo = h * Dh
        qh = q[:, lo:lo + Dh]
        kh = k[:, lo:lo + Dh]
        vh = v[:, lo:lo + Dh]
        # scores[s, t] = sum_d qh[s, d] * kh[t, d]   (contract last dims; no transpose)
        s = lax.dot_general(qh, kh, (((1,), (1,)), ((), ())),
                            preferred_element_type=jnp.float32)
        s = s - jnp.max(s, axis=-1, keepdims=True)
        p = jnp.exp(s)
        p = p * pl.reciprocal(jnp.sum(p, axis=-1, keepdims=True), approx=True)
        oh = jnp.dot(p, vh, preferred_element_type=jnp.float32)            # [Sq, Dh]
        # concat-then-project == sum_h (head_h @ Wo[h*Dh:(h+1)*Dh, :])  (sublane-aligned slice)
        contrib = jnp.dot(oh, wo[lo:lo + Dh, :], preferred_element_type=jnp.float32)
        out = contrib if out is None else out + contrib
    return out + bo


def _ffn(x, w1, b1, w2, b2):
    h = jnp.maximum(jnp.dot(x, w1, preferred_element_type=jnp.float32) + b1, 0.0)
    return jnp.dot(h, w2, preferred_element_type=jnp.float32) + b2


# ----------------------------------------------------------------------------
# Fused per-layer Pallas kernels
# ----------------------------------------------------------------------------

def _const_spec(a):
    nd = a.ndim
    return pl.BlockSpec(a.shape, lambda *_: (0,) * nd)


def _row(a):
    return a.reshape(1, -1)


def _make_encoder_kernel(nhead, final_norm):
    def kernel(*refs):
        x_ref = refs[0]
        wq, bq, wk, bk, wv, bv, wo, bo = refs[1:9]
        g1, be1 = refs[9:11]
        w1, bf1, w2, bf2 = refs[11:15]
        g2, be2 = refs[15:17]
        o_ref = refs[-1]

        x = x_ref[0]                                               # [S, E]
        sa = _mha(x, x, wq[...], bq[...], wk[...], bk[...],
                  wv[...], bv[...], wo[...], bo[...], nhead)       # dropout = identity (eval)
        x = _ln(x + sa, g1[...], be1[...])                         # residual fused into LN
        ff = _ffn(x, w1[...], bf1[...], w2[...], bf2[...])
        x = _ln(x + ff, g2[...], be2[...])
        if final_norm:                                             # encoder.norm folded in
            fg, fb = refs[17:19]
            x = _ln(x, fg[...], fb[...])
        o_ref[0] = x
    return kernel


def encoder_layer_pallas(x, p, nhead, final_g=None, final_b=None):
    B, S, E = x.shape
    final_norm = final_g is not None
    sa = p["self_attn"]
    inputs = [
        x,
        sa["wq"], _row(sa["bq"]), sa["wk"], _row(sa["bk"]),
        sa["wv"], _row(sa["bv"]), sa["wo"], _row(sa["bo"]),
        _row(p["ln1_g"]), _row(p["ln1_b"]),
        p["w1"], _row(p["b1"]), p["w2"], _row(p["b2"]),
        _row(p["ln2_g"]), _row(p["ln2_b"]),
    ]
    if final_norm:
        inputs += [_row(final_g), _row(final_b)]

    in_specs = [pl.BlockSpec((1, S, E), lambda b: (b, 0, 0))]
    in_specs += [_const_spec(a) for a in inputs[1:]]

    return pl.pallas_call(
        _make_encoder_kernel(nhead, final_norm),
        out_shape=jax.ShapeDtypeStruct((B, S, E), jnp.float32),
        grid=(B,),
        in_specs=in_specs,
        out_specs=pl.BlockSpec((1, S, E), lambda b: (b, 0, 0)),
        compiler_params=pltpu.CompilerParams(dimension_semantics=("parallel",)),
    )(*inputs)


def _make_decoder_kernel(nhead):
    def kernel(*refs):
        y_ref, m_ref = refs[0], refs[1]
        swq, sbq, swk, sbk, swv, sbv, swo, sbo = refs[2:10]
        g1, be1 = refs[10:12]
        cwq, cbq, cwk, cbk, cwv, cbv, cwo, cbo = refs[12:20]
        g2, be2 = refs[20:22]
        w1, bf1, w2, bf2 = refs[22:26]
        g3, be3 = refs[26:28]
        o_ref = refs[-1]

        y = y_ref[0]                                               # [St, E]
        m = m_ref[0]                                               # [Ss, E]
        sa = _mha(y, y, swq[...], sbq[...], swk[...], sbk[...],
                  swv[...], sbv[...], swo[...], sbo[...], nhead)   # no tgt mask (matches ref)
        y = _ln(y + sa, g1[...], be1[...])
        ca = _mha(y, m, cwq[...], cbq[...], cwk[...], cbk[...],
                  cwv[...], cbv[...], cwo[...], cbo[...], nhead)
        y = _ln(y + ca, g2[...], be2[...])
        ff = _ffn(y, w1[...], bf1[...], w2[...], bf2[...])
        y = _ln(y + ff, g3[...], be3[...])
        o_ref[0] = y
    return kernel


def decoder_layer_pallas(y, mem, p, nhead):
    B, St, E = y.shape
    Ss = mem.shape[1]
    sa, ca = p["self_attn"], p["cross_attn"]
    inputs = [
        y, mem,
        sa["wq"], _row(sa["bq"]), sa["wk"], _row(sa["bk"]),
        sa["wv"], _row(sa["bv"]), sa["wo"], _row(sa["bo"]),
        _row(p["ln1_g"]), _row(p["ln1_b"]),
        ca["wq"], _row(ca["bq"]), ca["wk"], _row(ca["bk"]),
        ca["wv"], _row(ca["bv"]), ca["wo"], _row(ca["bo"]),
        _row(p["ln2_g"]), _row(p["ln2_b"]),
        p["w1"], _row(p["b1"]), p["w2"], _row(p["b2"]),
        _row(p["ln3_g"]), _row(p["ln3_b"]),
    ]
    in_specs = [
        pl.BlockSpec((1, St, E), lambda b: (b, 0, 0)),
        pl.BlockSpec((1, Ss, E), lambda b: (b, 0, 0)),
    ] + [_const_spec(a) for a in inputs[2:]]

    return pl.pallas_call(
        _make_decoder_kernel(nhead),
        out_shape=jax.ShapeDtypeStruct((B, St, E), jnp.float32),
        grid=(B,),
        in_specs=in_specs,
        out_specs=pl.BlockSpec((1, St, E), lambda b: (b, 0, 0)),
        compiler_params=pltpu.CompilerParams(dimension_semantics=("parallel",)),
    )(*inputs)


def final_head_pallas(y, norm_g, norm_b, fc_w, fc_b, mask):
    """Fused: decoder final LayerNorm -> fc_out -> apply_logit_mask. y: [B, S, E]."""
    B, S, E = y.shape
    V = fc_w.shape[1]

    def kernel(y_ref, g_ref, b_ref, w_ref, fb_ref, m_ref, o_ref):
        yv = _ln(y_ref[0], g_ref[...], b_ref[...])                             # [S, E]
        lg = jnp.dot(yv, w_ref[...], preferred_element_type=jnp.float32) + fb_ref[...]
        # result[s, i] = sum_j mask[i, j] * lg[s, j]  (contract last dims; no transpose)
        res = lax.dot_general(lg, m_ref[...], (((1,), (1,)), ((), ())),
                              preferred_element_type=jnp.float32)
        # Note: `res != 0` reproduces the (numerically fragile) reference semantics.
        o_ref[0] = jnp.where(res != 0.0, lg, jnp.float32(-1e10))

    inputs = [y, _row(norm_g), _row(norm_b), fc_w, _row(fc_b), mask]
    in_specs = [pl.BlockSpec((1, S, E), lambda b: (b, 0, 0))]
    in_specs += [_const_spec(a) for a in inputs[1:]]

    return pl.pallas_call(
        kernel,
        out_shape=jax.ShapeDtypeStruct((B, S, V), jnp.float32),
        grid=(B,),
        in_specs=in_specs,
        out_specs=pl.BlockSpec((1, S, V), lambda b: (b, 0, 0)),
        compiler_params=pltpu.CompilerParams(dimension_semantics=("parallel",)),
    )(*inputs)


# ----------------------------------------------------------------------------
# Model glue (plain JAX): parameters, positional encodings, embedding gather
# ----------------------------------------------------------------------------

def positional_encodings(max_len, embed_size):
    pos = jnp.arange(max_len, dtype=jnp.float32)[:, None]
    div = jnp.exp(jnp.arange(0, embed_size, 2, dtype=jnp.float32)
                  * (-math.log(10000.0) / embed_size))
    pe = jnp.zeros((max_len, embed_size), jnp.float32)
    pe = pe.at[:, 0::2].set(jnp.sin(pos * div))
    pe = pe.at[:, 1::2].set(jnp.cos(pos * div))
    return pe[None]  # [1, max_len, E]


def _w(key, shape, scale=0.02):
    return scale * jax.random.normal(key, shape, dtype=jnp.float32)


def init_attn_params(key, E, nhead):
    ks = jax.random.split(key, 4)
    scale = 1.0 / math.sqrt(E // nhead)
    # Fold the 1/sqrt(Dh) attention scale into the q projection (identical forward math,
    # one fewer VPU multiply per grid step).
    return {
        "wq": _w(ks[0], (E, E)) * scale, "bq": jnp.zeros((E,), jnp.float32) * scale,
        "wk": _w(ks[1], (E, E)), "bk": jnp.zeros((E,), jnp.float32),
        "wv": _w(ks[2], (E, E)), "bv": jnp.zeros((E,), jnp.float32),
        "wo": _w(ks[3], (E, E)), "bo": jnp.zeros((E,), jnp.float32),
    }


def init_encoder_layer(key, E, FF, nhead):
    ks = jax.random.split(key, 3)
    return {
        "self_attn": init_attn_params(ks[0], E, nhead),
        "ln1_g": jnp.ones((E,), jnp.float32), "ln1_b": jnp.zeros((E,), jnp.float32),
        "w1": _w(ks[1], (E, FF)), "b1": jnp.zeros((FF,), jnp.float32),
        "w2": _w(ks[2], (FF, E)), "b2": jnp.zeros((E,), jnp.float32),
        "ln2_g": jnp.ones((E,), jnp.float32), "ln2_b": jnp.zeros((E,), jnp.float32),
    }


def init_decoder_layer(key, E, FF, nhead):
    ks = jax.random.split(key, 4)
    return {
        "self_attn": init_attn_params(ks[0], E, nhead),
        "cross_attn": init_attn_params(ks[1], E, nhead),
        "ln1_g": jnp.ones((E,), jnp.float32), "ln1_b": jnp.zeros((E,), jnp.float32),
        "ln2_g": jnp.ones((E,), jnp.float32), "ln2_b": jnp.zeros((E,), jnp.float32),
        "w1": _w(ks[2], (E, FF)), "b1": jnp.zeros((FF,), jnp.float32),
        "w2": _w(ks[3], (FF, E)), "b2": jnp.zeros((E,), jnp.float32),
        "ln3_g": jnp.ones((E,), jnp.float32), "ln3_b": jnp.zeros((E,), jnp.float32),
    }


def init_params(key, vocab_size, E, n_enc, n_dec, FF, max_len, nhead):
    ks = jax.random.split(key, 3 + n_enc + n_dec)
    # TODO(synk): real logits_mask comes from class_successors.json / token_to_class.json;
    # synthesized deterministically here as a 0/1 transition matrix.
    ii = jnp.arange(vocab_size)[:, None]
    jj = jnp.arange(vocab_size)[None, :]
    logits_mask = ((ii + jj) % 3 != 0).astype(jnp.float32)
    return {
        "embedding": _w(ks[0], (vocab_size, E), scale=1.0),
        "pos": positional_encodings(max_len, E),
        "enc_layers": [init_encoder_layer(ks[3 + i], E, FF, nhead) for i in range(n_enc)],
        "dec_layers": [init_decoder_layer(ks[3 + n_enc + i], E, FF, nhead) for i in range(n_dec)],
        "enc_norm_g": jnp.ones((E,), jnp.float32), "enc_norm_b": jnp.zeros((E,), jnp.float32),
        "dec_norm_g": jnp.ones((E,), jnp.float32), "dec_norm_b": jnp.zeros((E,), jnp.float32),
        "fc_w": _w(ks[1], (E, vocab_size)), "fc_b": jnp.zeros((vocab_size,), jnp.float32),
        "logits_mask": logits_mask,
    }


def transformer_forward(params, src_tokens, tgt_tokens, nhead):
    Ss = src_tokens.shape[1]
    St = tgt_tokens.shape[1]

    # TODO(synk): embedding gather stays in plain XLA (data-dependent gather; a Pallas
    # version would need manual DMA gather and buys nothing at this size).
    src = params["embedding"][src_tokens] + params["pos"][:, :Ss, :]
    tgt = params["embedding"][tgt_tokens] + params["pos"][:, :St, :]

    mem = src
    n_enc = len(params["enc_layers"])
    for i, lp in enumerate(params["enc_layers"]):
        if i == n_enc - 1:   # fold encoder final LayerNorm into the last layer's kernel
            mem = encoder_layer_pallas(mem, lp, nhead,
                                       final_g=params["enc_norm_g"],
                                       final_b=params["enc_norm_b"])
        else:
            mem = encoder_layer_pallas(mem, lp, nhead)

    out = tgt
    for lp in params["dec_layers"]:
        out = decoder_layer_pallas(out, mem, lp, nhead)

    # decoder final norm + fc_out + logit mask fused in one kernel
    return final_head_pallas(out, params["dec_norm_g"], params["dec_norm_b"],
                             params["fc_w"], params["fc_b"], params["logits_mask"])


# ----------------------------------------------------------------------------
# Main
# ----------------------------------------------------------------------------

if __name__ == "__main__":
    VOCAB = 32
    EMBED = 32
    NHEAD = 4
    N_ENC = 2
    N_DEC = 2
    DIM_FF = 64
    MAX_SEQ = 16
    B, S_SRC, S_TGT = 2, 8, 8

    root = jax.random.PRNGKey(0)
    kp, ksrc, ktgt = jax.random.split(root, 3)

    params = init_params(kp, VOCAB, EMBED, N_ENC, N_DEC, DIM_FF, MAX_SEQ, NHEAD)
    src = jax.random.randint(ksrc, (B, S_SRC), 0, VOCAB, dtype=jnp.int32)
    tgt = jax.random.randint(ktgt, (B, S_TGT), 0, VOCAB, dtype=jnp.int32)

    fwd = jax.jit(functools.partial(transformer_forward, nhead=NHEAD))
    out = fwd(params, src, tgt)
    out = jax.block_until_ready(out)

    assert out.shape == (B, S_TGT, VOCAB)
    assert out.dtype == jnp.float32
    print("KERNEL_OK")
</pallas_src>

<mosaic_0001>
module attributes {stable_mosaic.version = 11 : i64} {
  func.func @kernel(%arg0: i32, %arg1: memref<1x8x32xf32, #tpu.memory_space<vmem>>, %arg2: memref<32x32xf32, #tpu.memory_space<vmem>>, %arg3: memref<1x32xf32, #tpu.memory_space<vmem>>, %arg4: memref<32x32xf32, #tpu.memory_space<vmem>>, %arg5: memref<1x32xf32, #tpu.memory_space<vmem>>, %arg6: memref<32x32xf32, #tpu.memory_space<vmem>>, %arg7: memref<1x32xf32, #tpu.memory_space<vmem>>, %arg8: memref<32x32xf32, #tpu.memory_space<vmem>>, %arg9: memref<1x32xf32, #tpu.memory_space<vmem>>, %arg10: memref<1x32xf32, #tpu.memory_space<vmem>>, %arg11: memref<1x32xf32, #tpu.memory_space<vmem>>, %arg12: memref<32x64xf32, #tpu.memory_space<vmem>>, %arg13: memref<1x64xf32, #tpu.memory_space<vmem>>, %arg14: memref<64x32xf32, #tpu.memory_space<vmem>>, %arg15: memref<1x32xf32, #tpu.memory_space<vmem>>, %arg16: memref<1x32xf32, #tpu.memory_space<vmem>>, %arg17: memref<1x32xf32, #tpu.memory_space<vmem>>, %arg18: memref<1x8x32xf32, #tpu.memory_space<vmem>>) attributes {dimension_semantics = [#tpu.dimension_semantics<parallel>], iteration_bounds = array<i64: 2>, scalar_prefetch = 0 : i64, scratch_operands = 0 : i64, tpu.core_type = #tpu.core_type<tc>, window_params = [{transform_indices = @transform_0, window_bounds = array<i64: 1, 8, 32>}, {pipeline_mode = #tpu.pipeline_mode<synchronous>, transform_indices = @transform_1, window_bounds = array<i64: 32, 32>}, {pipeline_mode = #tpu.pipeline_mode<synchronous>, transform_indices = @transform_2, window_bounds = array<i64: 1, 32>}, {pipeline_mode = #tpu.pipeline_mode<synchronous>, transform_indices = @transform_3, window_bounds = array<i64: 32, 32>}, {pipeline_mode = #tpu.pipeline_mode<synchronous>, transform_indices = @transform_4, window_bounds = array<i64: 1, 32>}, {pipeline_mode = #tpu.pipeline_mode<synchronous>, transform_indices = @transform_5, window_bounds = array<i64: 32, 32>}, {pipeline_mode = #tpu.pipeline_mode<synchronous>, transform_indices = @transform_6, window_bounds = array<i64: 1, 32>}, {pipeline_mode = #tpu.pipeline_mode<synchronous>, transform_indices = @transform_7, window_bounds = array<i64: 32, 32>}, {pipeline_mode = #tpu.pipeline_mode<synchronous>, transform_indices = @transform_8, window_bounds = array<i64: 1, 32>}, {pipeline_mode = #tpu.pipeline_mode<synchronous>, transform_indices = @transform_9, window_bounds = array<i64: 1, 32>}, {pipeline_mode = #tpu.pipeline_mode<synchronous>, transform_indices = @transform_10, window_bounds = array<i64: 1, 32>}, {pipeline_mode = #tpu.pipeline_mode<synchronous>, transform_indices = @transform_11, window_bounds = array<i64: 32, 64>}, {pipeline_mode = #tpu.pipeline_mode<synchronous>, transform_indices = @transform_12, window_bounds = array<i64: 1, 64>}, {pipeline_mode = #tpu.pipeline_mode<synchronous>, transform_indices = @transform_13, window_bounds = array<i64: 64, 32>}, {pipeline_mode = #tpu.pipeline_mode<synchronous>, transform_indices = @transform_14, window_bounds = array<i64: 1, 32>}, {pipeline_mode = #tpu.pipeline_mode<synchronous>, transform_indices = @transform_15, window_bounds = array<i64: 1, 32>}, {pipeline_mode = #tpu.pipeline_mode<synchronous>, transform_indices = @transform_16, window_bounds = array<i64: 1, 32>}, {transform_indices = @transform_17, window_bounds = array<i64: 1, 8, 32>}]} {
    %c0 = arith.constant 0 : index
    %c0_0 = arith.constant 0 : index
    %c0_1 = arith.constant 0 : index
    %0 = vector.load %arg1[%c0, %c0_0, %c0_1] : memref<1x8x32xf32, #tpu.memory_space<vmem>>, vector<1x8x32xf32>
    %1 = vector.shape_cast %0 : vector<1x8x32xf32> to vector<8x32xf32>
    %c0_2 = arith.constant 0 : index
    %c0_3 = arith.constant 0 : index
    %2 = vector.load %arg2[%c0_2, %c0_3] : memref<32x32xf32, #tpu.memory_space<vmem>>, vector<32x32xf32>
    %c0_4 = arith.constant 0 : index
    %c0_5 = arith.constant 0 : index
    %3 = vector.load %arg3[%c0_4, %c0_5] : memref<1x32xf32, #tpu.memory_space<vmem>>, vector<1x32xf32>
    %c0_6 = arith.constant 0 : index
    %c0_7 = arith.constant 0 : index
    %4 = vector.load %arg4[%c0_6, %c0_7] : memref<32x32xf32, #tpu.memory_space<vmem>>, vector<32x32xf32>
    %c0_8 = arith.constant 0 : index
    %c0_9 = arith.constant 0 : index
    %5 = vector.load %arg5[%c0_8, %c0_9] : memref<1x32xf32, #tpu.memory_space<vmem>>, vector<1x32xf32>
    %c0_10 = arith.constant 0 : index
    %c0_11 = arith.constant 0 : index
    %6 = vector.load %arg6[%c0_10, %c0_11] : memref<32x32xf32, #tpu.memory_space<vmem>>, vector<32x32xf32>
    %c0_12 = arith.constant 0 : index
    %c0_13 = arith.constant 0 : index
    %7 = vector.load %arg7[%c0_12, %c0_13] : memref<1x32xf32, #tpu.memory_space<vmem>>, vector<1x32xf32>
    %c0_14 = arith.constant 0 : index
    %c0_15 = arith.constant 0 : index
    %8 = vector.load %arg8[%c0_14, %c0_15] : memref<32x32xf32, #tpu.memory_space<vmem>>, vector<32x32xf32>
    %c0_16 = arith.constant 0 : index
    %c0_17 = arith.constant 0 : index
    %9 = vector.load %arg9[%c0_16, %c0_17] : memref<1x32xf32, #tpu.memory_space<vmem>>, vector<1x32xf32>
    %cst = arith.constant dense<0.000000e+00> : vector<8x32xf32>
    %10 = tpu.matmul %1, %2, %cst {dimension_numbers = #tpu.dot_dimension_numbers<[1], [0], [0], [1], [0, 0, 1, 1], [], []>} : vector<8x32xf32>, vector<32x32xf32>, vector<8x32xf32> -> vector<8x32xf32>
    %11 = vector.broadcast %3 : vector<1x32xf32> to vector<8x32xf32>
    %12 = arith.addf %10, %11 : vector<8x32xf32>
    %cst_18 = arith.constant dense<0.000000e+00> : vector<8x32xf32>
    %13 = tpu.matmul %1, %4, %cst_18 {dimension_numbers = #tpu.dot_dimension_numbers<[1], [0], [0], [1], [0, 0, 1, 1], [], []>} : vector<8x32xf32>, vector<32x32xf32>, vector<8x32xf32> -> vector<8x32xf32>
    %14 = vector.broadcast %5 : vector<1x32xf32> to vector<8x32xf32>
    %15 = arith.addf %13, %14 : vector<8x32xf32>
    %cst_19 = arith.constant dense<0.000000e+00> : vector<8x32xf32>
    %16 = tpu.matmul %1, %6, %cst_19 {dimension_numbers = #tpu.dot_dimension_numbers<[1], [0], [0], [1], [0, 0, 1, 1], [], []>} : vector<8x32xf32>, vector<32x32xf32>, vector<8x32xf32> -> vector<8x32xf32>
    %17 = vector.broadcast %7 : vector<1x32xf32> to vector<8x32xf32>
    %18 = arith.addf %16, %17 : vector<8x32xf32>
    %19 = vector.extract_strided_slice %12 {offsets = [0, 0], sizes = [8, 8], strides = [1, 1]} : vector<8x32xf32> to vector<8x8xf32>
    %20 = vector.extract_strided_slice %15 {offsets = [0, 0], sizes = [8, 8], strides = [1, 1]} : vector<8x32xf32> to vector<8x8xf32>
    %21 = vector.extract_strided_slice %18 {offsets = [0, 0], sizes = [8, 8], strides = [1, 1]} : vector<8x32xf32> to vector<8x8xf32>
    %cst_20 = arith.constant dense<0.000000e+00> : vector<8x8xf32>
    %22 = tpu.matmul %19, %20, %cst_20 {dimension_numbers = #tpu.dot_dimension_numbers<[1], [1], [0], [0], [0, 0, 1, 0], [], []>} : vector<8x8xf32>, vector<8x8xf32>, vector<8x8xf32> -> vector<8x8xf32>
    %cst_21 = arith.constant dense<0xFF800000> : vector<8xf32>
    %23 = vector.multi_reduction <maximumf>, %22, %cst_21 [1] : vector<8x8xf32> to vector<8xf32>
    %24 = vector.shape_cast %23 : vector<8xf32> to vector<8x1xf32>
    %25 = vector.broadcast %24 : vector<8x1xf32> to vector<8x8xf32>
    %26 = arith.subf %22, %25 : vector<8x8xf32>
    %27 = math.exp %26 : vector<8x8xf32>
    %cst_22 = arith.constant dense<0.000000e+00> : vector<8xf32>
    %28 = vector.multi_reduction <add>, %27, %cst_22 [1] : vector<8x8xf32> to vector<8xf32>
    %29 = vector.shape_cast %28 : vector<8xf32> to vector<8x1xf32>
    %30 = tpu.reciprocal %29 {approx = true} : vector<8x1xf32> -> vector<8x1xf32>
    %31 = vector.broadcast %30 : vector<8x1xf32> to vector<8x8xf32>
    %32 = arith.mulf %27, %31 : vector<8x8xf32>
    %cst_23 = arith.constant dense<0.000000e+00> : vector<8x8xf32>
    %33 = tpu.matmul %32, %21, %cst_23 {dimension_numbers = #tpu.dot_dimension_numbers<[1], [0], [0], [1], [0, 0, 1, 1], [], []>} : vector<8x8xf32>, vector<8x8xf32>, vector<8x8xf32> -> vector<8x8xf32>
    %34 = vector.extract_strided_slice %8 {offsets = [0, 0], sizes = [8, 32], strides = [1, 1]} : vector<32x32xf32> to vector<8x32xf32>
    %cst_24 = arith.constant dense<0.000000e+00> : vector<8x32xf32>
    %35 = tpu.matmul %33, %34, %cst_24 {dimension_numbers = #tpu.dot_dimension_numbers<[1], [0], [0], [1], [0, 0, 1, 1], [], []>} : vector<8x8xf32>, vector<8x32xf32>, vector<8x32xf32> -> vector<8x32xf32>
    %36 = vector.extract_strided_slice %12 {offsets = [0, 8], sizes = [8, 8], strides = [1, 1]} : vector<8x32xf32> to vector<8x8xf32>
    %37 = vector.extract_strided_slice %15 {offsets = [0, 8], sizes = [8, 8], strides = [1, 1]} : vector<8x32xf32> to vector<8x8xf32>
    %38 = vector.extract_strided_slice %18 {offsets = [0, 8], sizes = [8, 8], strides = [1, 1]} : vector<8x32xf32> to vector<8x8xf32>
    %cst_25 = arith.constant dense<0.000000e+00> : vector<8x8xf32>
    %39 = tpu.matmul %36, %37, %cst_25 {dimension_numbers = #tpu.dot_dimension_numbers<[1], [1], [0], [0], [0, 0, 1, 0], [], []>} : vector<8x8xf32>, vector<8x8xf32>, vector<8x8xf32> -> vector<8x8xf32>
    %cst_26 = arith.constant dense<0xFF800000> : vector<8xf32>
    %40 = vector.multi_reduction <maximumf>, %39, %cst_26 [1] : vector<8x8xf32> to vector<8xf32>
    %41 = vector.shape_cast %40 : vector<8xf32> to vector<8x1xf32>
    %42 = vector.broadcast %41 : vector<8x1xf32> to vector<8x8xf32>
    %43 = arith.subf %39, %42 : vector<8x8xf32>
    %44 = math.exp %43 : vector<8x8xf32>
    %cst_27 = arith.constant dense<0.000000e+00> : vector<8xf32>
    %45 = vector.multi_reduction <add>, %44, %cst_27 [1] : vector<8x8xf32> to vector<8xf32>
    %46 = vector.shape_cast %45 : vector<8xf32> to vector<8x1xf32>
    %47 = tpu.reciprocal %46 {approx = true} : vector<8x1xf32> -> vector<8x1xf32>
    %48 = vector.broadcast %47 : vector<8x1xf32> to vector<8x8xf32>
    %49 = arith.mulf %44, %48 : vector<8x8xf32>
    %cst_28 = arith.constant dense<0.000000e+00> : vector<8x8xf32>
    %50 = tpu.matmul %49, %38, %cst_28 {dimension_numbers = #tpu.dot_dimension_numbers<[1], [0], [0], [1], [0, 0, 1, 1], [], []>} : vector<8x8xf32>, vector<8x8xf32>, vector<8x8xf32> -> vector<8x8xf32>
    %51 = vector.extract_strided_slice %8 {offsets = [8, 0], sizes = [8, 32], strides = [1, 1]} : vector<32x32xf32> to vector<8x32xf32>
    %cst_29 = arith.constant dense<0.000000e+00> : vector<8x32xf32>
    %52 = tpu.matmul %50, %51, %cst_29 {dimension_numbers = #tpu.dot_dimension_numbers<[1], [0], [0], [1], [0, 0, 1, 1], [], []>} : vector<8x8xf32>, vector<8x32xf32>, vector<8x32xf32> -> vector<8x32xf32>
    %53 = arith.addf %35, %52 : vector<8x32xf32>
    %54 = vector.extract_strided_slice %12 {offsets = [0, 16], sizes = [8, 8], strides = [1, 1]} : vector<8x32xf32> to vector<8x8xf32>
    %55 = vector.extract_strided_slice %15 {offsets = [0, 16], sizes = [8, 8], strides = [1, 1]} : vector<8x32xf32> to vector<8x8xf32>
    %56 = vector.extract_strided_slice %18 {offsets = [0, 16], sizes = [8, 8], strides = [1, 1]} : vector<8x32xf32> to vector<8x8xf32>
    %cst_30 = arith.constant dense<0.000000e+00> : vector<8x8xf32>
    %57 = tpu.matmul %54, %55, %cst_30 {dimension_numbers = #tpu.dot_dimension_numbers<[1], [1], [0], [0], [0, 0, 1, 0], [], []>} : vector<8x8xf32>, vector<8x8xf32>, vector<8x8xf32> -> vector<8x8xf32>
    %cst_31 = arith.constant dense<0xFF800000> : vector<8xf32>
    %58 = vector.multi_reduction <maximumf>, %57, %cst_31 [1] : vector<8x8xf32> to vector<8xf32>
    %59 = vector.shape_cast %58 : vector<8xf32> to vector<8x1xf32>
    %60 = vector.broadcast %59 : vector<8x1xf32> to vector<8x8xf32>
    %61 = arith.subf %57, %60 : vector<8x8xf32>
    %62 = math.exp %61 : vector<8x8xf32>
    %cst_32 = arith.constant dense<0.000000e+00> : vector<8xf32>
    %63 = vector.multi_reduction <add>, %62, %cst_32 [1] : vector<8x8xf32> to vector<8xf32>
    %64 = vector.shape_cast %63 : vector<8xf32> to vector<8x1xf32>
    %65 = tpu.reciprocal %64 {approx = true} : vector<8x1xf32> -> vector<8x1xf32>
    %66 = vector.broadcast %65 : vector<8x1xf32> to vector<8x8xf32>
    %67 = arith.mulf %62, %66 : vector<8x8xf32>
    %cst_33 = arith.constant dense<0.000000e+00> : vector<8x8xf32>
    %68 = tpu.matmul %67, %56, %cst_33 {dimension_numbers = #tpu.dot_dimension_numbers<[1], [0], [0], [1], [0, 0, 1, 1], [], []>} : vector<8x8xf32>, vector<8x8xf32>, vector<8x8xf32> -> vector<8x8xf32>
    %69 = vector.extract_strided_slice %8 {offsets = [16, 0], sizes = [8, 32], strides = [1, 1]} : vector<32x32xf32> to vector<8x32xf32>
    %cst_34 = arith.constant dense<0.000000e+00> : vector<8x32xf32>
    %70 = tpu.matmul %68, %69, %cst_34 {dimension_numbers = #tpu.dot_dimension_numbers<[1], [0], [0], [1], [0, 0, 1, 1], [], []>} : vector<8x8xf32>, vector<8x32xf32>, vector<8x32xf32> -> vector<8x32xf32>
    %71 = arith.addf %53, %70 : vector<8x32xf32>
    %72 = vector.extract_strided_slice %12 {offsets = [0, 24], sizes = [8, 8], strides = [1, 1]} : vector<8x32xf32> to vector<8x8xf32>
    %73 = vector.extract_strided_slice %15 {offsets = [0, 24], sizes = [8, 8], strides = [1, 1]} : vector<8x32xf32> to vector<8x8xf32>
    %74 = vector.extract_strided_slice %18 {offsets = [0, 24], sizes = [8, 8], strides = [1, 1]} : vector<8x32xf32> to vector<8x8xf32>
    %cst_35 = arith.constant dense<0.000000e+00> : vector<8x8xf32>
    %75 = tpu.matmul %72, %73, %cst_35 {dimension_numbers = #tpu.dot_dimension_numbers<[1], [1], [0], [0], [0, 0, 1, 0], [], []>} : vector<8x8xf32>, vector<8x8xf32>, vector<8x8xf32> -> vector<8x8xf32>
    %cst_36 = arith.constant dense<0xFF800000> : vector<8xf32>
    %76 = vector.multi_reduction <maximumf>, %75, %cst_36 [1] : vector<8x8xf32> to vector<8xf32>
    %77 = vector.shape_cast %76 : vector<8xf32> to vector<8x1xf32>
    %78 = vector.broadcast %77 : vector<8x1xf32> to vector<8x8xf32>
    %79 = arith.subf %75, %78 : vector<8x8xf32>
    %80 = math.exp %79 : vector<8x8xf32>
    %cst_37 = arith.constant dense<0.000000e+00> : vector<8xf32>
    %81 = vector.multi_reduction <add>, %80, %cst_37 [1] : vector<8x8xf32> to vector<8xf32>
    %82 = vector.shape_cast %81 : vector<8xf32> to vector<8x1xf32>
    %83 = tpu.reciprocal %82 {approx = true} : vector<8x1xf32> -> vector<8x1xf32>
    %84 = vector.broadcast %83 : vector<8x1xf32> to vector<8x8xf32>
    %85 = arith.mulf %80, %84 : vector<8x8xf32>
    %cst_38 = arith.constant dense<0.000000e+00> : vector<8x8xf32>
    %86 = tpu.matmul %85, %74, %cst_38 {dimension_numbers = #tpu.dot_dimension_numbers<[1], [0], [0], [1], [0, 0, 1, 1], [], []>} : vector<8x8xf32>, vector<8x8xf32>, vector<8x8xf32> -> vector<8x8xf32>
    %87 = vector.extract_strided_slice %8 {offsets = [24, 0], sizes = [8, 32], strides = [1, 1]} : vector<32x32xf32> to vector<8x32xf32>
    %cst_39 = arith.constant dense<0.000000e+00> : vector<8x32xf32>
    %88 = tpu.matmul %86, %87, %cst_39 {dimension_numbers = #tpu.dot_dimension_numbers<[1], [0], [0], [1], [0, 0, 1, 1], [], []>} : vector<8x8xf32>, vector<8x32xf32>, vector<8x32xf32> -> vector<8x32xf32>
    %89 = arith.addf %71, %88 : vector<8x32xf32>
    %90 = vector.broadcast %9 : vector<1x32xf32> to vector<8x32xf32>
    %91 = arith.addf %89, %90 : vector<8x32xf32>
    %92 = arith.addf %1, %91 : vector<8x32xf32>
    %c0_40 = arith.constant 0 : index
    %c0_41 = arith.constant 0 : index
    %93 = vector.load %arg10[%c0_40, %c0_41] : memref<1x32xf32, #tpu.memory_space<vmem>>, vector<1x32xf32>
    %c0_42 = arith.constant 0 : index
    %c0_43 = arith.constant 0 : index
    %94 = vector.load %arg11[%c0_42, %c0_43] : memref<1x32xf32, #tpu.memory_space<vmem>>, vector<1x32xf32>
    %cst_44 = arith.constant dense<0.000000e+00> : vector<8xf32>
    %95 = vector.multi_reduction <add>, %92, %cst_44 [1] : vector<8x32xf32> to vector<8xf32>
    %96 = vector.shape_cast %95 : vector<8xf32> to vector<8x1xf32>
    %cst_45 = arith.constant 3.200000e+01 : f32
    %97 = vector.broadcast %cst_45 : f32 to vector<8x1xf32>
    %98 = arith.divf %96, %97 : vector<8x1xf32>
    %99 = vector.broadcast %98 : vector<8x1xf32> to vector<8x32xf32>
    %100 = arith.subf %92, %99 : vector<8x32xf32>
    %101 = arith.mulf %100, %100 : vector<8x32xf32>
    %cst_46 = arith.constant dense<0.000000e+00> : vector<8xf32>
    %102 = vector.multi_reduction <add>, %101, %cst_46 [1] : vector<8x32xf32> to vector<8xf32>
    %103 = vector.shape_cast %102 : vector<8xf32> to vector<8x1xf32>
    %cst_47 = arith.constant 3.200000e+01 : f32
    %104 = vector.broadcast %cst_47 : f32 to vector<8x1xf32>
    %105 = arith.divf %103, %104 : vector<8x1xf32>
    %106 = vector.broadcast %98 : vector<8x1xf32> to vector<8x32xf32>
    %107 = arith.subf %92, %106 : vector<8x32xf32>
    %cst_48 = arith.constant 9.99999974E-6 : f32
    %108 = vector.broadcast %cst_48 : f32 to vector<8x1xf32>
    %109 = arith.addf %105, %108 : vector<8x1xf32>
    %110 = math.rsqrt %109 : vector<8x1xf32>
    %111 = vector.broadcast %110 : vector<8x1xf32> to vector<8x32xf32>
    %112 = arith.mulf %107, %111 : vector<8x32xf32>
    %113 = vector.broadcast %93 : vector<1x32xf32> to vector<8x32xf32>
    %114 = arith.mulf %112, %113 : vector<8x32xf32>
    %115 = vector.broadcast %94 : vector<1x32xf32> to vector<8x32xf32>
    %116 = arith.addf %114, %115 : vector<8x32xf32>
    %c0_49 = arith.constant 0 : index
    %c0_50 = arith.constant 0 : index
    %117 = vector.load %arg12[%c0_49, %c0_50] : memref<32x64xf32, #tpu.memory_space<vmem>>, vector<32x64xf32>
    %c0_51 = arith.constant 0 : index
    %c0_52 = arith.constant 0 : index
    %118 = vector.load %arg13[%c0_51, %c0_52] : memref<1x64xf32, #tpu.memory_space<vmem>>, vector<1x64xf32>
    %c0_53 = arith.constant 0 : index
    %c0_54 = arith.constant 0 : index
    %119 = vector.load %arg14[%c0_53, %c0_54] : memref<64x32xf32, #tpu.memory_space<vmem>>, vector<64x32xf32>
    %c0_55 = arith.constant 0 : index
    %c0_56 = arith.constant 0 : index
    %120 = vector.load %arg15[%c0_55, %c0_56] : memref<1x32xf32, #tpu.memory_space<vmem>>, vector<1x32xf32>
    %cst_57 = arith.constant dense<0.000000e+00> : vector<8x64xf32>
    %121 = tpu.matmul %116, %117, %cst_57 {dimension_numbers = #tpu.dot_dimension_numbers<[1], [0], [0], [1], [0, 0, 1, 1], [], []>} : vector<8x32xf32>, vector<32x64xf32>, vector<8x64xf32> -> vector<8x64xf32>
    %122 = vector.broadcast %118 : vector<1x64xf32> to vector<8x64xf32>
    %123 = arith.addf %121, %122 : vector<8x64xf32>
    %cst_58 = arith.constant 0.000000e+00 : f32
    %124 = vector.broadcast %cst_58 : f32 to vector<8x64xf32>
    %125 = arith.maximumf %123, %124 : vector<8x64xf32>
    %cst_59 = arith.constant dense<0.000000e+00> : vector<8x32xf32>
    %126 = tpu.matmul %125, %119, %cst_59 {dimension_numbers = #tpu.dot_dimension_numbers<[1], [0], [0], [1], [0, 0, 1, 1], [], []>} : vector<8x64xf32>, vector<64x32xf32>, vector<8x32xf32> -> vector<8x32xf32>
    %127 = vector.broadcast %120 : vector<1x32xf32> to vector<8x32xf32>
    %128 = arith.addf %126, %127 : vector<8x32xf32>
    %129 = arith.addf %116, %128 : vector<8x32xf32>
    %c0_60 = arith.constant 0 : index
    %c0_61 = arith.constant 0 : index
    %130 = vector.load %arg16[%c0_60, %c0_61] : memref<1x32xf32, #tpu.memory_space<vmem>>, vector<1x32xf32>
    %c0_62 = arith.constant 0 : index
    %c0_63 = arith.constant 0 : index
    %131 = vector.load %arg17[%c0_62, %c0_63] : memref<1x32xf32, #tpu.memory_space<vmem>>, vector<1x32xf32>
    %cst_64 = arith.constant dense<0.000000e+00> : vector<8xf32>
    %132 = vector.multi_reduction <add>, %129, %cst_64 [1] : vector<8x32xf32> to vector<8xf32>
    %133 = vector.shape_cast %132 : vector<8xf32> to vector<8x1xf32>
    %cst_65 = arith.constant 3.200000e+01 : f32
    %134 = vector.broadcast %cst_65 : f32 to vector<8x1xf32>
    %135 = arith.divf %133, %134 : vector<8x1xf32>
    %136 = vector.broadcast %135 : vector<8x1xf32> to vector<8x32xf32>
    %137 = arith.subf %129, %136 : vector<8x32xf32>
    %138 = arith.mulf %137, %137 : vector<8x32xf32>
    %cst_66 = arith.constant dense<0.000000e+00> : vector<8xf32>
    %139 = vector.multi_reduction <add>, %138, %cst_66 [1] : vector<8x32xf32> to vector<8xf32>
    %140 = vector.shape_cast %139 : vector<8xf32> to vector<8x1xf32>
    %cst_67 = arith.constant 3.200000e+01 : f32
    %141 = vector.broadcast %cst_67 : f32 to vector<8x1xf32>
    %142 = arith.divf %140, %141 : vector<8x1xf32>
    %143 = vector.broadcast %135 : vector<8x1xf32> to vector<8x32xf32>
    %144 = arith.subf %129, %143 : vector<8x32xf32>
    %cst_68 = arith.constant 9.99999974E-6 : f32
    %145 = vector.broadcast %cst_68 : f32 to vector<8x1xf32>
    %146 = arith.addf %142, %145 : vector<8x1xf32>
    %147 = math.rsqrt %146 : vector<8x1xf32>
    %148 = vector.broadcast %147 : vector<8x1xf32> to vector<8x32xf32>
    %149 = arith.mulf %144, %148 : vector<8x32xf32>
    %150 = vector.broadcast %130 : vector<1x32xf32> to vector<8x32xf32>
    %151 = arith.mulf %149, %150 : vector<8x32xf32>
    %152 = vector.broadcast %131 : vector<1x32xf32> to vector<8x32xf32>
    %153 = arith.addf %151, %152 : vector<8x32xf32>
    %c0_69 = arith.constant 0 : index
    %c0_70 = arith.constant 0 : index
    %c0_71 = arith.constant 0 : index
    %154 = vector.load %arg18[%c0_69, %c0_70, %c0_71] : memref<1x8x32xf32, #tpu.memory_space<vmem>>, vector<1x8x32xf32>
    %155 = vector.shape_cast %154 : vector<1x8x32xf32> to vector<8x32xf32>
    %156 = vector.shape_cast %153 : vector<8x32xf32> to vector<1x8x32xf32>
    tpu.vector_store %arg18[%c0_69, %c0_70, %c0_71], %156 {strides = array<i32>} : memref<1x8x32xf32, #tpu.memory_space<vmem>>, vector<1x8x32xf32>,
    return
  }
  func.func @transform_0(%arg0: i32) -> (i32, i32, i32) {
    %c0_i32 = arith.constant 0 : i32
    %c0_i32_0 = arith.constant 0 : i32
    %c0_i32_1 = arith.constant 0 : i32
    return %arg0, %c0_i32, %c0_i32_0 : i32, i32, i32
  }
  func.func @transform_1(%arg0: i32) -> (i32, i32) {
    %c0_i32 = arith.constant 0 : i32
    %c0_i32_0 = arith.constant 0 : i32
    %c0_i32_1 = arith.constant 0 : i32
    return %c0_i32, %c0_i32_0 : i32, i32
  }
  func.func @transform_2(%arg0: i32) -> (i32, i32) {
    %c0_i32 = arith.constant 0 : i32
    %c0_i32_0 = arith.constant 0 : i32
    %c0_i32_1 = arith.constant 0 : i32
    return %c0_i32, %c0_i32_0 : i32, i32
  }
  func.func @transform_3(%arg0: i32) -> (i32, i32) {
    %c0_i32 = arith.constant 0 : i32
    %c0_i32_0 = arith.constant 0 : i32
    %c0_i32_1 = arith.constant 0 : i32
    return %c0_i32, %c0_i32_0 : i32, i32
  }
  func.func @transform_4(%arg0: i32) -> (i32, i32) {
    %c0_i32 = arith.constant 0 : i32
    %c0_i32_0 = arith.constant 0 : i32
    %c0_i32_1 = arith.constant 0 : i32
    return %c0_i32, %c0_i32_0 : i32, i32
  }
  func.func @transform_5(%arg0: i32) -> (i32, i32) {
    %c0_i32 = arith.constant 0 : i32
    %c0_i32_0 = arith.constant 0 : i32
    %c0_i32_1 = arith.constant 0 : i32
    return %c0_i32, %c0_i32_0 : i32, i32
  }
  func.func @transform_6(%arg0: i32) -> (i32, i32) {
    %c0_i32 = arith.constant 0 : i32
    %c0_i32_0 = arith.constant 0 : i32
    %c0_i32_1 = arith.constant 0 : i32
    return %c0_i32, %c0_i32_0 : i32, i32
  }
  func.func @transform_7(%arg0: i32) -> (i32, i32) {
    %c0_i32 = arith.constant 0 : i32
    %c0_i32_0 = arith.constant 0 : i32
    %c0_i32_1 = arith.constant 0 : i32
    return %c0_i32, %c0_i32_0 : i32, i32
  }
  func.func @transform_8(%arg0: i32) -> (i32, i32) {
    %c0_i32 = arith.constant 0 : i32
    %c0_i32_0 = arith.constant 0 : i32
    %c0_i32_1 = arith.constant 0 : i32
    return %c0_i32, %c0_i32_0 : i32, i32
  }
  func.func @transform_9(%arg0: i32) -> (i32, i32) {
    %c0_i32 = arith.constant 0 : i32
    %c0_i32_0 = arith.constant 0 : i32
    %c0_i32_1 = arith.constant 0 : i32
    return %c0_i32, %c0_i32_0 : i32, i32
  }
  func.func @transform_10(%arg0: i32) -> (i32, i32) {
    %c0_i32 = arith.constant 0 : i32
    %c0_i32_0 = arith.constant 0 : i32
    %c0_i32_1 = arith.constant 0 : i32
    return %c0_i32, %c0_i32_0 : i32, i32
  }
  func.func @transform_11(%arg0: i32) -> (i32, i32) {
    %c0_i32 = arith.constant 0 : i32
    %c0_i32_0 = arith.constant 0 : i32
    %c0_i32_1 = arith.constant 0 : i32
    return %c0_i32, %c0_i32_0 : i32, i32
  }
  func.func @transform_12(%arg0: i32) -> (i32, i32) {
    %c0_i32 = arith.constant 0 : i32
    %c0_i32_0 = arith.constant 0 : i32
    %c0_i32_1 = arith.constant 0 : i32
    return %c0_i32, %c0_i32_0 : i32, i32
  }
  func.func @transform_13(%arg0: i32) -> (i32, i32) {
    %c0_i32 = arith.constant 0 : i32
    %c0_i32_0 = arith.constant 0 : i32
    %c0_i32_1 = arith.constant 0 : i32
    return %c0_i32, %c0_i32_0 : i32, i32
  }
  func.func @transform_14(%arg0: i32) -> (i32, i32) {
    %c0_i32 = arith.constant 0 : i32
    %c0_i32_0 = arith.constant 0 : i32
    %c0_i32_1 = arith.constant 0 : i32
    return %c0_i32, %c0_i32_0 : i32, i32
  }
  func.func @transform_15(%arg0: i32) -> (i32, i32) {
    %c0_i32 = arith.constant 0 : i32
    %c0_i32_0 = arith.constant 0 : i32
    %c0_i32_1 = arith.constant 0 : i32
    return %c0_i32, %c0_i32_0 : i32, i32
  }
  func.func @transform_16(%arg0: i32) -> (i32, i32) {
    %c0_i32 = arith.constant 0 : i32
    %c0_i32_0 = arith.constant 0 : i32
    %c0_i32_1 = arith.constant 0 : i32
    return %c0_i32, %c0_i32_0 : i32, i32
  }
  func.func @transform_17(%arg0: i32) -> (i32, i32, i32) {
    %c0_i32 = arith.constant 0 : i32
    %c0_i32_0 = arith.constant 0 : i32
    %c0_i32_1 = arith.constant 0 : i32
    return %arg0, %c0_i32, %c0_i32_0 : i32, i32, i32
  }
}

module attributes {stable_mosaic.version = 11 : i64} {
  func.func @kernel(%arg0: i32, %arg1: memref<1x8x32xf32, #tpu.memory_space<vmem>>, %arg2: memref<32x32xf32, #tpu.memory_space<vmem>>, %arg3: memref<1x32xf32, #tpu.memory_space<vmem>>, %arg4: memref<32x32xf32, #tpu.memory_space<vmem>>, %arg5: memref<1x32xf32, #tpu.memory_space<vmem>>, %arg6: memref<32x32xf32, #tpu.memory_space<vmem>>, %arg7: memref<1x32xf32, #tpu.memory_space<vmem>>, %arg8: memref<32x32xf32, #tpu.memory_space<vmem>>, %arg9: memref<1x32xf32, #tpu.memory_space<vmem>>, %arg10: memref<1x32xf32, #tpu.memory_space<vmem>>, %arg11: memref<1x32xf32, #tpu.memory_space<vmem>>, %arg12: memref<32x64xf32, #tpu.memory_space<vmem>>, %arg13: memref<1x64xf32, #tpu.memory_space<vmem>>, %arg14: memref<64x32xf32, #tpu.memory_space<vmem>>, %arg15: memref<1x32xf32, #tpu.memory_space<vmem>>, %arg16: memref<1x32xf32, #tpu.memory_space<vmem>>, %arg17: memref<1x32xf32, #tpu.memory_space<vmem>>, %arg18: memref<1x32xf32, #tpu.memory_space<vmem>>, %arg19: memref<1x32xf32, #tpu.memory_space<vmem>>, %arg20: memref<1x8x32xf32, #tpu.memory_space<vmem>>) attributes {dimension_semantics = [#tpu.dimension_semantics<parallel>], iteration_bounds = array<i64: 2>, scalar_prefetch = 0 : i64, scratch_operands = 0 : i64, tpu.core_type = #tpu.core_type<tc>, window_params = [{transform_indices = @transform_0, window_bounds = array<i64: 1, 8, 32>}, {pipeline_mode = #tpu.pipeline_mode<synchronous>, transform_indices = @transform_1, window_bounds = array<i64: 32, 32>}, {pipeline_mode = #tpu.pipeline_mode<synchronous>, transform_indices = @transform_2, window_bounds = array<i64: 1, 32>}, {pipeline_mode = #tpu.pipeline_mode<synchronous>, transform_indices = @transform_3, window_bounds = array<i64: 32, 32>}, {pipeline_mode = #tpu.pipeline_mode<synchronous>, transform_indices = @transform_4, window_bounds = array<i64: 1, 32>}, {pipeline_mode = #tpu.pipeline_mode<synchronous>, transform_indices = @transform_5, window_bounds = array<i64: 32, 32>}, {pipeline_mode = #tpu.pipeline_mode<synchronous>, transform_indices = @transform_6, window_bounds = array<i64: 1, 32>}, {pipeline_mode = #tpu.pipeline_mode<synchronous>, transform_indices = @transform_7, window_bounds = array<i64: 32, 32>}, {pipeline_mode = #tpu.pipeline_mode<synchronous>, transform_indices = @transform_8, window_bounds = array<i64: 1, 32>}, {pipeline_mode = #tpu.pipeline_mode<synchronous>, transform_indices = @transform_9, window_bounds = array<i64: 1, 32>}, {pipeline_mode = #tpu.pipeline_mode<synchronous>, transform_indices = @transform_10, window_bounds = array<i64: 1, 32>}, {pipeline_mode = #tpu.pipeline_mode<synchronous>, transform_indices = @transform_11, window_bounds = array<i64: 32, 64>}, {pipeline_mode = #tpu.pipeline_mode<synchronous>, transform_indices = @transform_12, window_bounds = array<i64: 1, 64>}, {pipeline_mode = #tpu.pipeline_mode<synchronous>, transform_indices = @transform_13, window_bounds = array<i64: 64, 32>}, {pipeline_mode = #tpu.pipeline_mode<synchronous>, transform_indices = @transform_14, window_bounds = array<i64: 1, 32>}, {pipeline_mode = #tpu.pipeline_mode<synchronous>, transform_indices = @transform_15, window_bounds = array<i64: 1, 32>}, {pipeline_mode = #tpu.pipeline_mode<synchronous>, transform_indices = @transform_16, window_bounds = array<i64: 1, 32>}, {pipeline_mode = #tpu.pipeline_mode<synchronous>, transform_indices = @transform_17, window_bounds = array<i64: 1, 32>}, {pipeline_mode = #tpu.pipeline_mode<synchronous>, transform_indices = @transform_18, window_bounds = array<i64: 1, 32>}, {transform_indices = @transform_19, window_bounds = array<i64: 1, 8, 32>}]} {
    %c0 = arith.constant 0 : index
    %c0_0 = arith.constant 0 : index
    %c0_1 = arith.constant 0 : index
    %0 = vector.load %arg1[%c0, %c0_0, %c0_1] : memref<1x8x32xf32, #tpu.memory_space<vmem>>, vector<1x8x32xf32>
    %1 = vector.shape_cast %0 : vector<1x8x32xf32> to vector<8x32xf32>
    %c0_2 = arith.constant 0 : index
    %c0_3 = arith.constant 0 : index
    %2 = vector.load %arg2[%c0_2, %c0_3] : memref<32x32xf32, #tpu.memory_space<vmem>>, vector<32x32xf32>
    %c0_4 = arith.constant 0 : index
    %c0_5 = arith.constant 0 : index
    %3 = vector.load %arg3[%c0_4, %c0_5] : memref<1x32xf32, #tpu.memory_space<vmem>>, vector<1x32xf32>
    %c0_6 = arith.constant 0 : index
    %c0_7 = arith.constant 0 : index
    %4 = vector.load %arg4[%c0_6, %c0_7] : memref<32x32xf32, #tpu.memory_space<vmem>>, vector<32x32xf32>
    %c0_8 = arith.constant 0 : index
    %c0_9 = arith.constant 0 : index
    %5 = vector.load %arg5[%c0_8, %c0_9] : memref<1x32xf32, #tpu.memory_space<vmem>>, vector<1x32xf32>
    %c0_10 = arith.constant 0 : index
    %c0_11 = arith.constant 0 : index
    %6 = vector.load %arg6[%c0_10, %c0_11] : memref<32x32xf32, #tpu.memory_space<vmem>>, vector<32x32xf32>
    %c0_12 = arith.constant 0 : index
    %c0_13 = arith.constant 0 : index
    %7 = vector.load %arg7[%c0_12, %c0_13] : memref<1x32xf32, #tpu.memory_space<vmem>>, vector<1x32xf32>
    %c0_14 = arith.constant 0 : index
    %c0_15 = arith.constant 0 : index
    %8 = vector.load %arg8[%c0_14, %c0_15] : memref<32x32xf32, #tpu.memory_space<vmem>>, vector<32x32xf32>
    %c0_16 = arith.constant 0 : index
    %c0_17 = arith.constant 0 : index
    %9 = vector.load %arg9[%c0_16, %c0_17] : memref<1x32xf32, #tpu.memory_space<vmem>>, vector<1x32xf32>
    %cst = arith.constant dense<0.000000e+00> : vector<8x32xf32>
    %10 = tpu.matmul %1, %2, %cst {dimension_numbers = #tpu.dot_dimension_numbers<[1], [0], [0], [1], [0, 0, 1, 1], [], []>} : vector<8x32xf32>, vector<32x32xf32>, vector<8x32xf32> -> vector<8x32xf32>
    %11 = vector.broadcast %3 : vector<1x32xf32> to vector<8x32xf32>
    %12 = arith.addf %10, %11 : vector<8x32xf32>
    %cst_18 = arith.constant dense<0.000000e+00> : vector<8x32xf32>
    %13 = tpu.matmul %1, %4, %cst_18 {dimension_numbers = #tpu.dot_dimension_numbers<[1], [0], [0], [1], [0, 0, 1, 1], [], []>} : vector<8x32xf32>, vector<32x32xf32>, vector<8x32xf32> -> vector<8x32xf32>
    %14 = vector.broadcast %5 : vector<1x32xf32> to vector<8x32xf32>
    %15 = arith.addf %13, %14 : vector<8x32xf32>
    %cst_19 = arith.constant dense<0.000000e+00> : vector<8x32xf32>
    %16 = tpu.matmul %1, %6, %cst_19 {dimension_numbers = #tpu.dot_dimension_numbers<[1], [0], [0], [1], [0, 0, 1, 1], [], []>} : vector<8x32xf32>, vector<32x32xf32>, vector<8x32xf32> -> vector<8x32xf32>
    %17 = vector.broadcast %7 : vector<1x32xf32> to vector<8x32xf32>
    %18 = arith.addf %16, %17 : vector<8x32xf32>
    %19 = vector.extract_strided_slice %12 {offsets = [0, 0], sizes = [8, 8], strides = [1, 1]} : vector<8x32xf32> to vector<8x8xf32>
    %20 = vector.extract_strided_slice %15 {offsets = [0, 0], sizes = [8, 8], strides = [1, 1]} : vector<8x32xf32> to vector<8x8xf32>
    %21 = vector.extract_strided_slice %18 {offsets = [0, 0], sizes = [8, 8], strides = [1, 1]} : vector<8x32xf32> to vector<8x8xf32>
    %cst_20 = arith.constant dense<0.000000e+00> : vector<8x8xf32>
    %22 = tpu.matmul %19, %20, %cst_20 {dimension_numbers = #tpu.dot_dimension_numbers<[1], [1], [0], [0], [0, 0, 1, 0], [], []>} : vector<8x8xf32>, vector<8x8xf32>, vector<8x8xf32> -> vector<8x8xf32>
    %cst_21 = arith.constant dense<0xFF800000> : vector<8xf32>
    %23 = vector.multi_reduction <maximumf>, %22, %cst_21 [1] : vector<8x8xf32> to vector<8xf32>
    %24 = vector.shape_cast %23 : vector<8xf32> to vector<8x1xf32>
    %25 = vector.broadcast %24 : vector<8x1xf32> to vector<8x8xf32>
    %26 = arith.subf %22, %25 : vector<8x8xf32>
    %27 = math.exp %26 : vector<8x8xf32>
    %cst_22 = arith.constant dense<0.000000e+00> : vector<8xf32>
    %28 = vector.multi_reduction <add>, %27, %cst_22 [1] : vector<8x8xf32> to vector<8xf32>
    %29 = vector.shape_cast %28 : vector<8xf32> to vector<8x1xf32>
    %30 = tpu.reciprocal %29 {approx = true} : vector<8x1xf32> -> vector<8x1xf32>
    %31 = vector.broadcast %30 : vector<8x1xf32> to vector<8x8xf32>
    %32 = arith.mulf %27, %31 : vector<8x8xf32>
    %cst_23 = arith.constant dense<0.000000e+00> : vector<8x8xf32>
    %33 = tpu.matmul %32, %21, %cst_23 {dimension_numbers = #tpu.dot_dimension_numbers<[1], [0], [0], [1], [0, 0, 1, 1], [], []>} : vector<8x8xf32>, vector<8x8xf32>, vector<8x8xf32> -> vector<8x8xf32>
    %34 = vector.extract_strided_slice %8 {offsets = [0, 0], sizes = [8, 32], strides = [1, 1]} : vector<32x32xf32> to vector<8x32xf32>
    %cst_24 = arith.constant dense<0.000000e+00> : vector<8x32xf32>
    %35 = tpu.matmul %33, %34, %cst_24 {dimension_numbers = #tpu.dot_dimension_numbers<[1], [0], [0], [1], [0, 0, 1, 1], [], []>} : vector<8x8xf32>, vector<8x32xf32>, vector<8x32xf32> -> vector<8x32xf32>
    %36 = vector.extract_strided_slice %12 {offsets = [0, 8], sizes = [8, 8], strides = [1, 1]} : vector<8x32xf32> to vector<8x8xf32>
    %37 = vector.extract_strided_slice %15 {offsets = [0, 8], sizes = [8, 8], strides = [1, 1]} : vector<8x32xf32> to vector<8x8xf32>
    %38 = vector.extract_strided_slice %18 {offsets = [0, 8], sizes = [8, 8], strides = [1, 1]} : vector<8x32xf32> to vector<8x8xf32>
    %cst_25 = arith.constant dense<0.000000e+00> : vector<8x8xf32>
    %39 = tpu.matmul %36, %37, %cst_25 {dimension_numbers = #tpu.dot_dimension_numbers<[1], [1], [0], [0], [0, 0, 1, 0], [], []>} : vector<8x8xf32>, vector<8x8xf32>, vector<8x8xf32> -> vector<8x8xf32>
    %cst_26 = arith.constant dense<0xFF800000> : vector<8xf32>
    %40 = vector.multi_reduction <maximumf>, %39, %cst_26 [1] : vector<8x8xf32> to vector<8xf32>
    %41 = vector.shape_cast %40 : vector<8xf32> to vector<8x1xf32>
    %42 = vector.broadcast %41 : vector<8x1xf32> to vector<8x8xf32>
    %43 = arith.subf %39, %42 : vector<8x8xf32>
    %44 = math.exp %43 : vector<8x8xf32>
    %cst_27 = arith.constant dense<0.000000e+00> : vector<8xf32>
    %45 = vector.multi_reduction <add>, %44, %cst_27 [1] : vector<8x8xf32> to vector<8xf32>
    %46 = vector.shape_cast %45 : vector<8xf32> to vector<8x1xf32>
    %47 = tpu.reciprocal %46 {approx = true} : vector<8x1xf32> -> vector<8x1xf32>
    %48 = vector.broadcast %47 : vector<8x1xf32> to vector<8x8xf32>
    %49 = arith.mulf %44, %48 : vector<8x8xf32>
    %cst_28 = arith.constant dense<0.000000e+00> : vector<8x8xf32>
    %50 = tpu.matmul %49, %38, %cst_28 {dimension_numbers = #tpu.dot_dimension_numbers<[1], [0], [0], [1], [0, 0, 1, 1], [], []>} : vector<8x8xf32>, vector<8x8xf32>, vector<8x8xf32> -> vector<8x8xf32>
    %51 = vector.extract_strided_slice %8 {offsets = [8, 0], sizes = [8, 32], strides = [1, 1]} : vector<32x32xf32> to vector<8x32xf32>
    %cst_29 = arith.constant dense<0.000000e+00> : vector<8x32xf32>
    %52 = tpu.matmul %50, %51, %cst_29 {dimension_numbers = #tpu.dot_dimension_numbers<[1], [0], [0], [1], [0, 0, 1, 1], [], []>} : vector<8x8xf32>, vector<8x32xf32>, vector<8x32xf32> -> vector<8x32xf32>
    %53 = arith.addf %35, %52 : vector<8x32xf32>
    %54 = vector.extract_strided_slice %12 {offsets = [0, 16], sizes = [8, 8], strides = [1, 1]} : vector<8x32xf32> to vector<8x8xf32>
    %55 = vector.extract_strided_slice %15 {offsets = [0, 16], sizes = [8, 8], strides = [1, 1]} : vector<8x32xf32> to vector<8x8xf32>
    %56 = vector.extract_strided_slice %18 {offsets = [0, 16], sizes = [8, 8], strides = [1, 1]} : vector<8x32xf32> to vector<8x8xf32>
    %cst_30 = arith.constant dense<0.000000e+00> : vector<8x8xf32>
    %57 = tpu.matmul %54, %55, %cst_30 {dimension_numbers = #tpu.dot_dimension_numbers<[1], [1], [0], [0], [0, 0, 1, 0], [], []>} : vector<8x8xf32>, vector<8x8xf32>, vector<8x8xf32> -> vector<8x8xf32>
    %cst_31 = arith.constant dense<0xFF800000> : vector<8xf32>
    %58 = vector.multi_reduction <maximumf>, %57, %cst_31 [1] : vector<8x8xf32> to vector<8xf32>
    %59 = vector.shape_cast %58 : vector<8xf32> to vector<8x1xf32>
    %60 = vector.broadcast %59 : vector<8x1xf32> to vector<8x8xf32>
    %61 = arith.subf %57, %60 : vector<8x8xf32>
    %62 = math.exp %61 : vector<8x8xf32>
    %cst_32 = arith.constant dense<0.000000e+00> : vector<8xf32>
    %63 = vector.multi_reduction <add>, %62, %cst_32 [1] : vector<8x8xf32> to vector<8xf32>
    %64 = vector.shape_cast %63 : vector<8xf32> to vector<8x1xf32>
    %65 = tpu.reciprocal %64 {approx = true} : vector<8x1xf32> -> vector<8x1xf32>
    %66 = vector.broadcast %65 : vector<8x1xf32> to vector<8x8xf32>
    %67 = arith.mulf %62, %66 : vector<8x8xf32>
    %cst_33 = arith.constant dense<0.000000e+00> : vector<8x8xf32>
    %68 = tpu.matmul %67, %56, %cst_33 {dimension_numbers = #tpu.dot_dimension_numbers<[1], [0], [0], [1], [0, 0, 1, 1], [], []>} : vector<8x8xf32>, vector<8x8xf32>, vector<8x8xf32> -> vector<8x8xf32>
    %69 = vector.extract_strided_slice %8 {offsets = [16, 0], sizes = [8, 32], strides = [1, 1]} : vector<32x32xf32> to vector<8x32xf32>
    %cst_34 = arith.constant dense<0.000000e+00> : vector<8x32xf32>
    %70 = tpu.matmul %68, %69, %cst_34 {dimension_numbers = #tpu.dot_dimension_numbers<[1], [0], [0], [1], [0, 0, 1, 1], [], []>} : vector<8x8xf32>, vector<8x32xf32>, vector<8x32xf32> -> vector<8x32xf32>
    %71 = arith.addf %53, %70 : vector<8x32xf32>
    %72 = vector.extract_strided_slice %12 {offsets = [0, 24], sizes = [8, 8], strides = [1, 1]} : vector<8x32xf32> to vector<8x8xf32>
    %73 = vector.extract_strided_slice %15 {offsets = [0, 24], sizes = [8, 8], strides = [1, 1]} : vector<8x32xf32> to vector<8x8xf32>
    %74 = vector.extract_strided_slice %18 {offsets = [0, 24], sizes = [8, 8], strides = [1, 1]} : vector<8x32xf32> to vector<8x8xf32>
    %cst_35 = arith.constant dense<0.000000e+00> : vector<8x8xf32>
    %75 = tpu.matmul %72, %73, %cst_35 {dimension_numbers = #tpu.dot_dimension_numbers<[1], [1], [0], [0], [0, 0, 1, 0], [], []>} : vector<8x8xf32>, vector<8x8xf32>, vector<8x8xf32> -> vector<8x8xf32>
    %cst_36 = arith.constant dense<0xFF800000> : vector<8xf32>
    %76 = vector.multi_reduction <maximumf>, %75, %cst_36 [1] : vector<8x8xf32> to vector<8xf32>
    %77 = vector.shape_cast %76 : vector<8xf32> to vector<8x1xf32>
    %78 = vector.broadcast %77 : vector<8x1xf32> to vector<8x8xf32>
    %79 = arith.subf %75, %78 : vector<8x8xf32>
    %80 = math.exp %79 : vector<8x8xf32>
    %cst_37 = arith.constant dense<0.000000e+00> : vector<8xf32>
    %81 = vector.multi_reduction <add>, %80, %cst_37 [1] : vector<8x8xf32> to vector<8xf32>
    %82 = vector.shape_cast %81 : vector<8xf32> to vector<8x1xf32>
    %83 = tpu.reciprocal %82 {approx = true} : vector<8x1xf32> -> vector<8x1xf32>
    %84 = vector.broadcast %83 : vector<8x1xf32> to vector<8x8xf32>
    %85 = arith.mulf %80, %84 : vector<8x8xf32>
    %cst_38 = arith.constant dense<0.000000e+00> : vector<8x8xf32>
    %86 = tpu.matmul %85, %74, %cst_38 {dimension_numbers = #tpu.dot_dimension_numbers<[1], [0], [0], [1], [0, 0, 1, 1], [], []>} : vector<8x8xf32>, vector<8x8xf32>, vector<8x8xf32> -> vector<8x8xf32>
    %87 = vector.extract_strided_slice %8 {offsets = [24, 0], sizes = [8, 32], strides = [1, 1]} : vector<32x32xf32> to vector<8x32xf32>
    %cst_39 = arith.constant dense<0.000000e+00> : vector<8x32xf32>
    %88 = tpu.matmul %86, %87, %cst_39 {dimension_numbers = #tpu.dot_dimension_numbers<[1], [0], [0], [1], [0, 0, 1, 1], [], []>} : vector<8x8xf32>, vector<8x32xf32>, vector<8x32xf32> -> vector<8x32xf32>
    %89 = arith.addf %71, %88 : vector<8x32xf32>
    %90 = vector.broadcast %9 : vector<1x32xf32> to vector<8x32xf32>
    %91 = arith.addf %89, %90 : vector<8x32xf32>
    %92 = arith.addf %1, %91 : vector<8x32xf32>
    %c0_40 = arith.constant 0 : index
    %c0_41 = arith.constant 0 : index
    %93 = vector.load %arg10[%c0_40, %c0_41] : memref<1x32xf32, #tpu.memory_space<vmem>>, vector<1x32xf32>
    %c0_42 = arith.constant 0 : index
    %c0_43 = arith.constant 0 : index
    %94 = vector.load %arg11[%c0_42, %c0_43] : memref<1x32xf32, #tpu.memory_space<vmem>>, vector<1x32xf32>
    %cst_44 = arith.constant dense<0.000000e+00> : vector<8xf32>
    %95 = vector.multi_reduction <add>, %92, %cst_44 [1] : vector<8x32xf32> to vector<8xf32>
    %96 = vector.shape_cast %95 : vector<8xf32> to vector<8x1xf32>
    %cst_45 = arith.constant 3.200000e+01 : f32
    %97 = vector.broadcast %cst_45 : f32 to vector<8x1xf32>
    %98 = arith.divf %96, %97 : vector<8x1xf32>
    %99 = vector.broadcast %98 : vector<8x1xf32> to vector<8x32xf32>
    %100 = arith.subf %92, %99 : vector<8x32xf32>
    %101 = arith.mulf %100, %100 : vector<8x32xf32>
    %cst_46 = arith.constant dense<0.000000e+00> : vector<8xf32>
    %102 = vector.multi_reduction <add>, %101, %cst_46 [1] : vector<8x32xf32> to vector<8xf32>
    %103 = vector.shape_cast %102 : vector<8xf32> to vector<8x1xf32>
    %cst_47 = arith.constant 3.200000e+01 : f32
    %104 = vector.broadcast %cst_47 : f32 to vector<8x1xf32>
    %105 = arith.divf %103, %104 : vector<8x1xf32>
    %106 = vector.broadcast %98 : vector<8x1xf32> to vector<8x32xf32>
    %107 = arith.subf %92, %106 : vector<8x32xf32>
    %cst_48 = arith.constant 9.99999974E-6 : f32
    %108 = vector.broadcast %cst_48 : f32 to vector<8x1xf32>
    %109 = arith.addf %105, %108 : vector<8x1xf32>
    %110 = math.rsqrt %109 : vector<8x1xf32>
    %111 = vector.broadcast %110 : vector<8x1xf32> to vector<8x32xf32>
    %112 = arith.mulf %107, %111 : vector<8x32xf32>
    %113 = vector.broadcast %93 : vector<1x32xf32> to vector<8x32xf32>
    %114 = arith.mulf %112, %113 : vector<8x32xf32>
    %115 = vector.broadcast %94 : vector<1x32xf32> to vector<8x32xf32>
    %116 = arith.addf %114, %115 : vector<8x32xf32>
    %c0_49 = arith.constant 0 : index
    %c0_50 = arith.constant 0 : index
    %117 = vector.load %arg12[%c0_49, %c0_50] : memref<32x64xf32, #tpu.memory_space<vmem>>, vector<32x64xf32>
    %c0_51 = arith.constant 0 : index
    %c0_52 = arith.constant 0 : index
    %118 = vector.load %arg13[%c0_51, %c0_52] : memref<1x64xf32, #tpu.memory_space<vmem>>, vector<1x64xf32>
    %c0_53 = arith.constant 0 : index
    %c0_54 = arith.constant 0 : index
    %119 = vector.load %arg14[%c0_53, %c0_54] : memref<64x32xf32, #tpu.memory_space<vmem>>, vector<64x32xf32>
    %c0_55 = arith.constant 0 : index
    %c0_56 = arith.constant 0 : index
    %120 = vector.load %arg15[%c0_55, %c0_56] : memref<1x32xf32, #tpu.memory_space<vmem>>, vector<1x32xf32>
    %cst_57 = arith.constant dense<0.000000e+00> : vector<8x64xf32>
    %121 = tpu.matmul %116, %117, %cst_57 {dimension_numbers = #tpu.dot_dimension_numbers<[1], [0], [0], [1], [0, 0, 1, 1], [], []>} : vector<8x32xf32>, vector<32x64xf32>, vector<8x64xf32> -> vector<8x64xf32>
    %122 = vector.broadcast %118 : vector<1x64xf32> to vector<8x64xf32>
    %123 = arith.addf %121, %122 : vector<8x64xf32>
    %cst_58 = arith.constant 0.000000e+00 : f32
    %124 = vector.broadcast %cst_58 : f32 to vector<8x64xf32>
    %125 = arith.maximumf %123, %124 : vector<8x64xf32>
    %cst_59 = arith.constant dense<0.000000e+00> : vector<8x32xf32>
    %126 = tpu.matmul %125, %119, %cst_59 {dimension_numbers = #tpu.dot_dimension_numbers<[1], [0], [0], [1], [0, 0, 1, 1], [], []>} : vector<8x64xf32>, vector<64x32xf32>, vector<8x32xf32> -> vector<8x32xf32>
    %127 = vector.broadcast %120 : vector<1x32xf32> to vector<8x32xf32>
    %128 = arith.addf %126, %127 : vector<8x32xf32>
    %129 = arith.addf %116, %128 : vector<8x32xf32>
    %c0_60 = arith.constant 0 : index
    %c0_61 = arith.constant 0 : index
    %130 = vector.load %arg16[%c0_60, %c0_61] : memref<1x32xf32, #tpu.memory_space<vmem>>, vector<1x32xf32>
    %c0_62 = arith.constant 0 : index
    %c0_63 = arith.constant 0 : index
    %131 = vector.load %arg17[%c0_62, %c0_63] : memref<1x32xf32, #tpu.memory_space<vmem>>, vector<1x32xf32>
    %cst_64 = arith.constant dense<0.000000e+00> : vector<8xf32>
    %132 = vector.multi_reduction <add>, %129, %cst_64 [1] : vector<8x32xf32> to vector<8xf32>
    %133 = vector.shape_cast %132 : vector<8xf32> to vector<8x1xf32>
    %cst_65 = arith.constant 3.200000e+01 : f32
    %134 = vector.broadcast %cst_65 : f32 to vector<8x1xf32>
    %135 = arith.divf %133, %134 : vector<8x1xf32>
    %136 = vector.broadcast %135 : vector<8x1xf32> to vector<8x32xf32>
    %137 = arith.subf %129, %136 : vector<8x32xf32>
    %138 = arith.mulf %137, %137 : vector<8x32xf32>
    %cst_66 = arith.constant dense<0.000000e+00> : vector<8xf32>
    %139 = vector.multi_reduction <add>, %138, %cst_66 [1] : vector<8x32xf32> to vector<8xf32>
    %140 = vector.shape_cast %139 : vector<8xf32> to vector<8x1xf32>
    %cst_67 = arith.constant 3.200000e+01 : f32
    %141 = vector.broadcast %cst_67 : f32 to vector<8x1xf32>
    %142 = arith.divf %140, %141 : vector<8x1xf32>
    %143 = vector.broadcast %135 : vector<8x1xf32> to vector<8x32xf32>
    %144 = arith.subf %129, %143 : vector<8x32xf32>
    %cst_68 = arith.constant 9.99999974E-6 : f32
    %145 = vector.broadcast %cst_68 : f32 to vector<8x1xf32>
    %146 = arith.addf %142, %145 : vector<8x1xf32>
    %147 = math.rsqrt %146 : vector<8x1xf32>
    %148 = vector.broadcast %147 : vector<8x1xf32> to vector<8x32xf32>
    %149 = arith.mulf %144, %148 : vector<8x32xf32>
    %150 = vector.broadcast %130 : vector<1x32xf32> to vector<8x32xf32>
    %151 = arith.mulf %149, %150 : vector<8x32xf32>
    %152 = vector.broadcast %131 : vector<1x32xf32> to vector<8x32xf32>
    %153 = arith.addf %151, %152 : vector<8x32xf32>
    %c0_69 = arith.constant 0 : index
    %c0_70 = arith.constant 0 : index
    %154 = vector.load %arg18[%c0_69, %c0_70] : memref<1x32xf32, #tpu.memory_space<vmem>>, vector<1x32xf32>
    %c0_71 = arith.constant 0 : index
    %c0_72 = arith.constant 0 : index
    %155 = vector.load %arg19[%c0_71, %c0_72] : memref<1x32xf32, #tpu.memory_space<vmem>>, vector<1x32xf32>
    %cst_73 = arith.constant dense<0.000000e+00> : vector<8xf32>
    %156 = vector.multi_reduction <add>, %153, %cst_73 [1] : vector<8x32xf32> to vector<8xf32>
    %157 = vector.shape_cast %156 : vector<8xf32> to vector<8x1xf32>
    %cst_74 = arith.constant 3.200000e+01 : f32
    %158 = vector.broadcast %cst_74 : f32 to vector<8x1xf32>
    %159 = arith.divf %157, %158 : vector<8x1xf32>
    %160 = vector.broadcast %159 : vector<8x1xf32> to vector<8x32xf32>
    %161 = arith.subf %153, %160 : vector<8x32xf32>
    %162 = arith.mulf %161, %161 : vector<8x32xf32>
    %cst_75 = arith.constant dense<0.000000e+00> : vector<8xf32>
    %163 = vector.multi_reduction <add>, %162, %cst_75 [1] : vector<8x32xf32> to vector<8xf32>
    %164 = vector.shape_cast %163 : vector<8xf32> to vector<8x1xf32>
    %cst_76 = arith.constant 3.200000e+01 : f32
    %165 = vector.broadcast %cst_76 : f32 to vector<8x1xf32>
    %166 = arith.divf %164, %165 : vector<8x1xf32>
    %167 = vector.broadcast %159 : vector<8x1xf32> to vector<8x32xf32>
    %168 = arith.subf %153, %167 : vector<8x32xf32>
    %cst_77 = arith.constant 9.99999974E-6 : f32
    %169 = vector.broadcast %cst_77 : f32 to vector<8x1xf32>
    %170 = arith.addf %166, %169 : vector<8x1xf32>
    %171 = math.rsqrt %170 : vector<8x1xf32>
    %172 = vector.broadcast %171 : vector<8x1xf32> to vector<8x32xf32>
    %173 = arith.mulf %168, %172 : vector<8x32xf32>
    %174 = vector.broadcast %154 : vector<1x32xf32> to vector<8x32xf32>
    %175 = arith.mulf %173, %174 : vector<8x32xf32>
    %176 = vector.broadcast %155 : vector<1x32xf32> to vector<8x32xf32>
    %177 = arith.addf %175, %176 : vector<8x32xf32>
    %c0_78 = arith.constant 0 : index
    %c0_79 = arith.constant 0 : index
    %c0_80 = arith.constant 0 : index
    %178 = vector.load %arg20[%c0_78, %c0_79, %c0_80] : memref<1x8x32xf32, #tpu.memory_space<vmem>>, vector<1x8x32xf32>
    %179 = vector.shape_cast %178 : vector<1x8x32xf32> to vector<8x32xf32>
    %180 = vector.shape_cast %177 : vector<8x32xf32> to vector<1x8x32xf32>
    tpu.vector_store %arg20[%c0_78, %c0_79, %c0_80], %180 {strides = array<i32>} : memref<1x8x32xf32, #tpu.memory_space<vmem>>, vector<1x8x32xf32>,
    return
  }
  func.func @transform_0(%arg0: i32) -> (i32, i32, i32) {
    %c0_i32 = arith.constant 0 : i32
    %c0_i32_0 = arith.constant 0 : i32
    %c0_i32_1 = arith.constant 0 : i32
    return %arg0, %c0_i32, %c0_i32_0 : i32, i32, i32
  }
  func.func @transform_1(%arg0: i32) -> (i32, i32) {
    %c0_i32 = arith.constant 0 : i32
    %c0_i32_0 = arith.constant 0 : i32
    %c0_i32_1 = arith.constant 0 : i32
    return %c0_i32, %c0_i32_0 : i32, i32
  }
  func.func @transform_2(%arg0: i32) -> (i32, i32) {
    %c0_i32 = arith.constant 0 : i32
    %c0_i32_0 = arith.constant 0 : i32
    %c0_i32_1 = arith.constant 0 : i32
    return %c0_i32, %c0_i32_0 : i32, i32
  }
  func.func @transform_3(%arg0: i32) -> (i32, i32) {
    %c0_i32 = arith.constant 0 : i32
    %c0_i32_0 = arith.constant 0 : i32
    %c0_i32_1 = arith.constant 0 : i32
    return %c0_i32, %c0_i32_0 : i32, i32
  }
  func.func @transform_4(%arg0: i32) -> (i32, i32) {
    %c0_i32 = arith.constant 0 : i32
    %c0_i32_0 = arith.constant 0 : i32
    %c0_i32_1 = arith.constant 0 : i32
    return %c0_i32, %c0_i32_0 : i32, i32
  }
  func.func @transform_5(%arg0: i32) -> (i32, i32) {
    %c0_i32 = arith.constant 0 : i32
    %c0_i32_0 = arith.constant 0 : i32
    %c0_i32_1 = arith.constant 0 : i32
    return %c0_i32, %c0_i32_0 : i32, i32
  }
  func.func @transform_6(%arg0: i32) -> (i32, i32) {
    %c0_i32 = arith.constant 0 : i32
    %c0_i32_0 = arith.constant 0 : i32
    %c0_i32_1 = arith.constant 0 : i32
    return %c0_i32, %c0_i32_0 : i32, i32
  }
  func.func @transform_7(%arg0: i32) -> (i32, i32) {
    %c0_i32 = arith.constant 0 : i32
    %c0_i32_0 = arith.constant 0 : i32
    %c0_i32_1 = arith.constant 0 : i32
    return %c0_i32, %c0_i32_0 : i32, i32
  }
  func.func @transform_8(%arg0: i32) -> (i32, i32) {
    %c0_i32 = arith.constant 0 : i32
    %c0_i32_0 = arith.constant 0 : i32
    %c0_i32_1 = arith.constant 0 : i32
    return %c0_i32, %c0_i32_0 : i32, i32
  }
  func.func @transform_9(%arg0: i32) -> (i32, i32) {
    %c0_i32 = arith.constant 0 : i32
    %c0_i32_0 = arith.constant 0 : i32
    %c0_i32_1 = arith.constant 0 : i32
    return %c0_i32, %c0_i32_0 : i32, i32
  }
  func.func @transform_10(%arg0: i32) -> (i32, i32) {
    %c0_i32 = arith.constant 0 : i32
    %c0_i32_0 = arith.constant 0 : i32
    %c0_i32_1 = arith.constant 0 : i32
    return %c0_i32, %c0_i32_0 : i32, i32
  }
  func.func @transform_11(%arg0: i32) -> (i32, i32) {
    %c0_i32 = arith.constant 0 : i32
    %c0_i32_0 = arith.constant 0 : i32
    %c0_i32_1 = arith.constant 0 : i32
    return %c0_i32, %c0_i32_0 : i32, i32
  }
  func.func @transform_12(%arg0: i32) -> (i32, i32) {
    %c0_i32 = arith.constant 0 : i32
    %c0_i32_0 = arith.constant 0 : i32
    %c0_i32_1 = arith.constant 0 : i32
    return %c0_i32, %c0_i32_0 : i32, i32
  }
  func.func @transform_13(%arg0: i32) -> (i32, i32) {
    %c0_i32 = arith.constant 0 : i32
    %c0_i32_0 = arith.constant 0 : i32
    %c0_i32_1 = arith.constant 0 : i32
    return %c0_i32, %c0_i32_0 : i32, i32
  }
  func.func @transform_14(%arg0: i32) -> (i32, i32) {
    %c0_i32 = arith.constant 0 : i32
    %c0_i32_0 = arith.constant 0 : i32
    %c0_i32_1 = arith.constant 0 : i32
    return %c0_i32, %c0_i32_0 : i32, i32
  }
  func.func @transform_15(%arg0: i32) -> (i32, i32) {
    %c0_i32 = arith.constant 0 : i32
    %c0_i32_0 = arith.constant 0 : i32
    %c0_i32_1 = arith.constant 0 : i32
    return %c0_i32, %c0_i32_0 : i32, i32
  }
  func.func @transform_16(%arg0: i32) -> (i32, i32) {
    %c0_i32 = arith.constant 0 : i32
    %c0_i32_0 = arith.constant 0 : i32
    %c0_i32_1 = arith.constant 0 : i32
    return %c0_i32, %c0_i32_0 : i32, i32
  }
  func.func @transform_17(%arg0: i32) -> (i32, i32) {
    %c0_i32 = arith.constant 0 : i32
    %c0_i32_0 = arith.constant 0 : i32
    %c0_i32_1 = arith.constant 0 : i32
    return %c0_i32, %c0_i32_0 : i32, i32
  }
  func.func @transform_18(%arg0: i32) -> (i32, i32) {
    %c0_i32 = arith.constant 0 : i32
    %c0_i32_0 = arith.constant 0 : i32
    %c0_i32_1 = arith.constant 0 : i32
    return %c0_i32, %c0_i32_0 : i32, i32
  }
  func.func @transform_19(%arg0: i32) -> (i32, i32, i32) {
    %c0_i32 = arith.constant 0 : i32
    %c0_i32_0 = arith.constant 0 : i32
    %c0_i32_1 = arith.constant 0 : i32
    return %arg0, %c0_i32, %c0_i32_0 : i32, i32, i32
  }
}

module attributes {stable_mosaic.version = 11 : i64} {
  func.func @kernel(%arg0: i32, %arg1: memref<1x8x32xf32, #tpu.memory_space<vmem>>, %arg2: memref<1x8x32xf32, #tpu.memory_space<vmem>>, %arg3: memref<32x32xf32, #tpu.memory_space<vmem>>, %arg4: memref<1x32xf32, #tpu.memory_space<vmem>>, %arg5: memref<32x32xf32, #tpu.memory_space<vmem>>, %arg6: memref<1x32xf32, #tpu.memory_space<vmem>>, %arg7: memref<32x32xf32, #tpu.memory_space<vmem>>, %arg8: memref<1x32xf32, #tpu.memory_space<vmem>>, %arg9: memref<32x32xf32, #tpu.memory_space<vmem>>, %arg10: memref<1x32xf32, #tpu.memory_space<vmem>>, %arg11: memref<1x32xf32, #tpu.memory_space<vmem>>, %arg12: memref<1x32xf32, #tpu.memory_space<vmem>>, %arg13: memref<32x32xf32, #tpu.memory_space<vmem>>, %arg14: memref<1x32xf32, #tpu.memory_space<vmem>>, %arg15: memref<32x32xf32, #tpu.memory_space<vmem>>, %arg16: memref<1x32xf32, #tpu.memory_space<vmem>>, %arg17: memref<32x32xf32, #tpu.memory_space<vmem>>, %arg18: memref<1x32xf32, #tpu.memory_space<vmem>>, %arg19: memref<32x32xf32, #tpu.memory_space<vmem>>, %arg20: memref<1x32xf32, #tpu.memory_space<vmem>>, %arg21: memref<1x32xf32, #tpu.memory_space<vmem>>, %arg22: memref<1x32xf32, #tpu.memory_space<vmem>>, %arg23: memref<32x64xf32, #tpu.memory_space<vmem>>, %arg24: memref<1x64xf32, #tpu.memory_space<vmem>>, %arg25: memref<64x32xf32, #tpu.memory_space<vmem>>, %arg26: memref<1x32xf32, #tpu.memory_space<vmem>>, %arg27: memref<1x32xf32, #tpu.memory_space<vmem>>, %arg28: memref<1x32xf32, #tpu.memory_space<vmem>>, %arg29: memref<1x8x32xf32, #tpu.memory_space<vmem>>) attributes {dimension_semantics = [#tpu.dimension_semantics<parallel>], iteration_bounds = array<i64: 2>, scalar_prefetch = 0 : i64, scratch_operands = 0 : i64, tpu.core_type = #tpu.core_type<tc>, window_params = [{transform_indices = @transform_0, window_bounds = array<i64: 1, 8, 32>}, {transform_indices = @transform_1, window_bounds = array<i64: 1, 8, 32>}, {pipeline_mode = #tpu.pipeline_mode<synchronous>, transform_indices = @transform_2, window_bounds = array<i64: 32, 32>}, {pipeline_mode = #tpu.pipeline_mode<synchronous>, transform_indices = @transform_3, window_bounds = array<i64: 1, 32>}, {pipeline_mode = #tpu.pipeline_mode<synchronous>, transform_indices = @transform_4, window_bounds = array<i64: 32, 32>}, {pipeline_mode = #tpu.pipeline_mode<synchronous>, transform_indices = @transform_5, window_bounds = array<i64: 1, 32>}, {pipeline_mode = #tpu.pipeline_mode<synchronous>, transform_indices = @transform_6, window_bounds = array<i64: 32, 32>}, {pipeline_mode = #tpu.pipeline_mode<synchronous>, transform_indices = @transform_7, window_bounds = array<i64: 1, 32>}, {pipeline_mode = #tpu.pipeline_mode<synchronous>, transform_indices = @transform_8, window_bounds = array<i64: 32, 32>}, {pipeline_mode = #tpu.pipeline_mode<synchronous>, transform_indices = @transform_9, window_bounds = array<i64: 1, 32>}, {pipeline_mode = #tpu.pipeline_mode<synchronous>, transform_indices = @transform_10, window_bounds = array<i64: 1, 32>}, {pipeline_mode = #tpu.pipeline_mode<synchronous>, transform_indices = @transform_11, window_bounds = array<i64: 1, 32>}, {pipeline_mode = #tpu.pipeline_mode<synchronous>, transform_indices = @transform_12, window_bounds = array<i64: 32, 32>}, {pipeline_mode = #tpu.pipeline_mode<synchronous>, transform_indices = @transform_13, window_bounds = array<i64: 1, 32>}, {pipeline_mode = #tpu.pipeline_mode<synchronous>, transform_indices = @transform_14, window_bounds = array<i64: 32, 32>}, {pipeline_mode = #tpu.pipeline_mode<synchronous>, transform_indices = @transform_15, window_bounds = array<i64: 1, 32>}, {pipeline_mode = #tpu.pipeline_mode<synchronous>, transform_indices = @transform_16, window_bounds = array<i64: 32, 32>}, {pipeline_mode = #tpu.pipeline_mode<synchronous>, transform_indices = @transform_17, window_bounds = array<i64: 1, 32>}, {pipeline_mode = #tpu.pipeline_mode<synchronous>, transform_indices = @transform_18, window_bounds = array<i64: 32, 32>}, {pipeline_mode = #tpu.pipeline_mode<synchronous>, transform_indices = @transform_19, window_bounds = array<i64: 1, 32>}, {pipeline_mode = #tpu.pipeline_mode<synchronous>, transform_indices = @transform_20, window_bounds = array<i64: 1, 32>}, {pipeline_mode = #tpu.pipeline_mode<synchronous>, transform_indices = @transform_21, window_bounds = array<i64: 1, 32>}, {pipeline_mode = #tpu.pipeline_mode<synchronous>, transform_indices = @transform_22, window_bounds = array<i64: 32, 64>}, {pipeline_mode = #tpu.pipeline_mode<synchronous>, transform_indices = @transform_23, window_bounds = array<i64: 1, 64>}, {pipeline_mode = #tpu.pipeline_mode<synchronous>, transform_indices = @transform_24, window_bounds = array<i64: 64, 32>}, {pipeline_mode = #tpu.pipeline_mode<synchronous>, transform_indices = @transform_25, window_bounds = array<i64: 1, 32>}, {pipeline_mode = #tpu.pipeline_mode<synchronous>, transform_indices = @transform_26, window_bounds = array<i64: 1, 32>}, {pipeline_mode = #tpu.pipeline_mode<synchronous>, transform_indices = @transform_27, window_bounds = array<i64: 1, 32>}, {transform_indices = @transform_28, window_bounds = array<i64: 1, 8, 32>}]} {
    %c0 = arith.constant 0 : index
    %c0_0 = arith.constant 0 : index
    %c0_1 = arith.constant 0 : index
    %0 = vector.load %arg1[%c0, %c0_0, %c0_1] : memref<1x8x32xf32, #tpu.memory_space<vmem>>, vector<1x8x32xf32>
    %1 = vector.shape_cast %0 : vector<1x8x32xf32> to vector<8x32xf32>
    %c0_2 = arith.constant 0 : index
    %c0_3 = arith.constant 0 : index
    %c0_4 = arith.constant 0 : index
    %2 = vector.load %arg2[%c0_2, %c0_3, %c0_4] : memref<1x8x32xf32, #tpu.memory_space<vmem>>, vector<1x8x32xf32>
    %3 = vector.shape_cast %2 : vector<1x8x32xf32> to vector<8x32xf32>
    %c0_5 = arith.constant 0 : index
    %c0_6 = arith.constant 0 : index
    %4 = vector.load %arg3[%c0_5, %c0_6] : memref<32x32xf32, #tpu.memory_space<vmem>>, vector<32x32xf32>
    %c0_7 = arith.constant 0 : index
    %c0_8 = arith.constant 0 : index
    %5 = vector.load %arg4[%c0_7, %c0_8] : memref<1x32xf32, #tpu.memory_space<vmem>>, vector<1x32xf32>
    %c0_9 = arith.constant 0 : index
    %c0_10 = arith.constant 0 : index
    %6 = vector.load %arg5[%c0_9, %c0_10] : memref<32x32xf32, #tpu.memory_space<vmem>>, vector<32x32xf32>
    %c0_11 = arith.constant 0 : index
    %c0_12 = arith.constant 0 : index
    %7 = vector.load %arg6[%c0_11, %c0_12] : memref<1x32xf32, #tpu.memory_space<vmem>>, vector<1x32xf32>
    %c0_13 = arith.constant 0 : index
    %c0_14 = arith.constant 0 : index
    %8 = vector.load %arg7[%c0_13, %c0_14] : memref<32x32xf32, #tpu.memory_space<vmem>>, vector<32x32xf32>
    %c0_15 = arith.constant 0 : index
    %c0_16 = arith.constant 0 : index
    %9 = vector.load %arg8[%c0_15, %c0_16] : memref<1x32xf32, #tpu.memory_space<vmem>>, vector<1x32xf32>
    %c0_17 = arith.constant 0 : index
    %c0_18 = arith.constant 0 : index
    %10 = vector.load %arg9[%c0_17, %c0_18] : memref<32x32xf32, #tpu.memory_space<vmem>>, vector<32x32xf32>
    %c0_19 = arith.constant 0 : index
    %c0_20 = arith.constant 0 : index
    %11 = vector.load %arg10[%c0_19, %c0_20] : memref<1x32xf32, #tpu.memory_space<vmem>>, vector<1x32xf32>
    %cst = arith.constant dense<0.000000e+00> : vector<8x32xf32>
    %12 = tpu.matmul %1, %4, %cst {dimension_numbers = #tpu.dot_dimension_numbers<[1], [0], [0], [1], [0, 0, 1, 1], [], []>} : vector<8x32xf32>, vector<32x32xf32>, vector<8x32xf32> -> vector<8x32xf32>
    %13 = vector.broadcast %5 : vector<1x32xf32> to vector<8x32xf32>
    %14 = arith.addf %12, %13 : vector<8x32xf32>
    %cst_21 = arith.constant dense<0.000000e+00> : vector<8x32xf32>
    %15 = tpu.matmul %1, %6, %cst_21 {dimension_numbers = #tpu.dot_dimension_numbers<[1], [0], [0], [1], [0, 0, 1, 1], [], []>} : vector<8x32xf32>, vector<32x32xf32>, vector<8x32xf32> -> vector<8x32xf32>
    %16 = vector.broadcast %7 : vector<1x32xf32> to vector<8x32xf32>
    %17 = arith.addf %15, %16 : vector<8x32xf32>
    %cst_22 = arith.constant dense<0.000000e+00> : vector<8x32xf32>
    %18 = tpu.matmul %1, %8, %cst_22 {dimension_numbers = #tpu.dot_dimension_numbers<[1], [0], [0], [1], [0, 0, 1, 1], [], []>} : vector<8x32xf32>, vector<32x32xf32>, vector<8x32xf32> -> vector<8x32xf32>
    %19 = vector.broadcast %9 : vector<1x32xf32> to vector<8x32xf32>
    %20 = arith.addf %18, %19 : vector<8x32xf32>
    %21 = vector.extract_strided_slice %14 {offsets = [0, 0], sizes = [8, 8], strides = [1, 1]} : vector<8x32xf32> to vector<8x8xf32>
    %22 = vector.extract_strided_slice %17 {offsets = [0, 0], sizes = [8, 8], strides = [1, 1]} : vector<8x32xf32> to vector<8x8xf32>
    %23 = vector.extract_strided_slice %20 {offsets = [0, 0], sizes = [8, 8], strides = [1, 1]} : vector<8x32xf32> to vector<8x8xf32>
    %cst_23 = arith.constant dense<0.000000e+00> : vector<8x8xf32>
    %24 = tpu.matmul %21, %22, %cst_23 {dimension_numbers = #tpu.dot_dimension_numbers<[1], [1], [0], [0], [0, 0, 1, 0], [], []>} : vector<8x8xf32>, vector<8x8xf32>, vector<8x8xf32> -> vector<8x8xf32>
    %cst_24 = arith.constant dense<0xFF800000> : vector<8xf32>
    %25 = vector.multi_reduction <maximumf>, %24, %cst_24 [1] : vector<8x8xf32> to vector<8xf32>
    %26 = vector.shape_cast %25 : vector<8xf32> to vector<8x1xf32>
    %27 = vector.broadcast %26 : vector<8x1xf32> to vector<8x8xf32>
    %28 = arith.subf %24, %27 : vector<8x8xf32>
    %29 = math.exp %28 : vector<8x8xf32>
    %cst_25 = arith.constant dense<0.000000e+00> : vector<8xf32>
    %30 = vector.multi_reduction <add>, %29, %cst_25 [1] : vector<8x8xf32> to vector<8xf32>
    %31 = vector.shape_cast %30 : vector<8xf32> to vector<8x1xf32>
    %32 = tpu.reciprocal %31 {approx = true} : vector<8x1xf32> -> vector<8x1xf32>
    %33 = vector.broadcast %32 : vector<8x1xf32> to vector<8x8xf32>
    %34 = arith.mulf %29, %33 : vector<8x8xf32>
    %cst_26 = arith.constant dense<0.000000e+00> : vector<8x8xf32>
    %35 = tpu.matmul %34, %23, %cst_26 {dimension_numbers = #tpu.dot_dimension_numbers<[1], [0], [0], [1], [0, 0, 1, 1], [], []>} : vector<8x8xf32>, vector<8x8xf32>, vector<8x8xf32> -> vector<8x8xf32>
    %36 = vector.extract_strided_slice %10 {offsets = [0, 0], sizes = [8, 32], strides = [1, 1]} : vector<32x32xf32> to vector<8x32xf32>
    %cst_27 = arith.constant dense<0.000000e+00> : vector<8x32xf32>
    %37 = tpu.matmul %35, %36, %cst_27 {dimension_numbers = #tpu.dot_dimension_numbers<[1], [0], [0], [1], [0, 0, 1, 1], [], []>} : vector<8x8xf32>, vector<8x32xf32>, vector<8x32xf32> -> vector<8x32xf32>
    %38 = vector.extract_strided_slice %14 {offsets = [0, 8], sizes = [8, 8], strides = [1, 1]} : vector<8x32xf32> to vector<8x8xf32>
    %39 = vector.extract_strided_slice %17 {offsets = [0, 8], sizes = [8, 8], strides = [1, 1]} : vector<8x32xf32> to vector<8x8xf32>
    %40 = vector.extract_strided_slice %20 {offsets = [0, 8], sizes = [8, 8], strides = [1, 1]} : vector<8x32xf32> to vector<8x8xf32>
    %cst_28 = arith.constant dense<0.000000e+00> : vector<8x8xf32>
    %41 = tpu.matmul %38, %39, %cst_28 {dimension_numbers = #tpu.dot_dimension_numbers<[1], [1], [0], [0], [0, 0, 1, 0], [], []>} : vector<8x8xf32>, vector<8x8xf32>, vector<8x8xf32> -> vector<8x8xf32>
    %cst_29 = arith.constant dense<0xFF800000> : vector<8xf32>
    %42 = vector.multi_reduction <maximumf>, %41, %cst_29 [1] : vector<8x8xf32> to vector<8xf32>
    %43 = vector.shape_cast %42 : vector<8xf32> to vector<8x1xf32>
    %44 = vector.broadcast %43 : vector<8x1xf32> to vector<8x8xf32>
    %45 = arith.subf %41, %44 : vector<8x8xf32>
    %46 = math.exp %45 : vector<8x8xf32>
    %cst_30 = arith.constant dense<0.000000e+00> : vector<8xf32>
    %47 = vector.multi_reduction <add>, %46, %cst_30 [1] : vector<8x8xf32> to vector<8xf32>
    %48 = vector.shape_cast %47 : vector<8xf32> to vector<8x1xf32>
    %49 = tpu.reciprocal %48 {approx = true} : vector<8x1xf32> -> vector<8x1xf32>
    %50 = vector.broadcast %49 : vector<8x1xf32> to vector<8x8xf32>
    %51 = arith.mulf %46, %50 : vector<8x8xf32>
    %cst_31 = arith.constant dense<0.000000e+00> : vector<8x8xf32>
    %52 = tpu.matmul %51, %40, %cst_31 {dimension_numbers = #tpu.dot_dimension_numbers<[1], [0], [0], [1], [0, 0, 1, 1], [], []>} : vector<8x8xf32>, vector<8x8xf32>, vector<8x8xf32> -> vector<8x8xf32>
    %53 = vector.extract_strided_slice %10 {offsets = [8, 0], sizes = [8, 32], strides = [1, 1]} : vector<32x32xf32> to vector<8x32xf32>
    %cst_32 = arith.constant dense<0.000000e+00> : vector<8x32xf32>
    %54 = tpu.matmul %52, %53, %cst_32 {dimension_numbers = #tpu.dot_dimension_numbers<[1], [0], [0], [1], [0, 0, 1, 1], [], []>} : vector<8x8xf32>, vector<8x32xf32>, vector<8x32xf32> -> vector<8x32xf32>
    %55 = arith.addf %37, %54 : vector<8x32xf32>
    %56 = vector.extract_strided_slice %14 {offsets = [0, 16], sizes = [8, 8], strides = [1, 1]} : vector<8x32xf32> to vector<8x8xf32>
    %57 = vector.extract_strided_slice %17 {offsets = [0, 16], sizes = [8, 8], strides = [1, 1]} : vector<8x32xf32> to vector<8x8xf32>
    %58 = vector.extract_strided_slice %20 {offsets = [0, 16], sizes = [8, 8], strides = [1, 1]} : vector<8x32xf32> to vector<8x8xf32>
    %cst_33 = arith.constant dense<0.000000e+00> : vector<8x8xf32>
    %59 = tpu.matmul %56, %57, %cst_33 {dimension_numbers = #tpu.dot_dimension_numbers<[1], [1], [0], [0], [0, 0, 1, 0], [], []>} : vector<8x8xf32>, vector<8x8xf32>, vector<8x8xf32> -> vector<8x8xf32>
    %cst_34 = arith.constant dense<0xFF800000> : vector<8xf32>
    %60 = vector.multi_reduction <maximumf>, %59, %cst_34 [1] : vector<8x8xf32> to vector<8xf32>
    %61 = vector.shape_cast %60 : vector<8xf32> to vector<8x1xf32>
    %62 = vector.broadcast %61 : vector<8x1xf32> to vector<8x8xf32>
    %63 = arith.subf %59, %62 : vector<8x8xf32>
    %64 = math.exp %63 : vector<8x8xf32>
    %cst_35 = arith.constant dense<0.000000e+00> : vector<8xf32>
    %65 = vector.multi_reduction <add>, %64, %cst_35 [1] : vector<8x8xf32> to vector<8xf32>
    %66 = vector.shape_cast %65 : vector<8xf32> to vector<8x1xf32>
    %67 = tpu.reciprocal %66 {approx = true} : vector<8x1xf32> -> vector<8x1xf32>
    %68 = vector.broadcast %67 : vector<8x1xf32> to vector<8x8xf32>
    %69 = arith.mulf %64, %68 : vector<8x8xf32>
    %cst_36 = arith.constant dense<0.000000e+00> : vector<8x8xf32>
    %70 = tpu.matmul %69, %58, %cst_36 {dimension_numbers = #tpu.dot_dimension_numbers<[1], [0], [0], [1], [0, 0, 1, 1], [], []>} : vector<8x8xf32>, vector<8x8xf32>, vector<8x8xf32> -> vector<8x8xf32>
    %71 = vector.extract_strided_slice %10 {offsets = [16, 0], sizes = [8, 32], strides = [1, 1]} : vector<32x32xf32> to vector<8x32xf32>
    %cst_37 = arith.constant dense<0.000000e+00> : vector<8x32xf32>
    %72 = tpu.matmul %70, %71, %cst_37 {dimension_numbers = #tpu.dot_dimension_numbers<[1], [0], [0], [1], [0, 0, 1, 1], [], []>} : vector<8x8xf32>, vector<8x32xf32>, vector<8x32xf32> -> vector<8x32xf32>
    %73 = arith.addf %55, %72 : vector<8x32xf32>
    %74 = vector.extract_strided_slice %14 {offsets = [0, 24], sizes = [8, 8], strides = [1, 1]} : vector<8x32xf32> to vector<8x8xf32>
    %75 = vector.extract_strided_slice %17 {offsets = [0, 24], sizes = [8, 8], strides = [1, 1]} : vector<8x32xf32> to vector<8x8xf32>
    %76 = vector.extract_strided_slice %20 {offsets = [0, 24], sizes = [8, 8], strides = [1, 1]} : vector<8x32xf32> to vector<8x8xf32>
    %cst_38 = arith.constant dense<0.000000e+00> : vector<8x8xf32>
    %77 = tpu.matmul %74, %75, %cst_38 {dimension_numbers = #tpu.dot_dimension_numbers<[1], [1], [0], [0], [0, 0, 1, 0], [], []>} : vector<8x8xf32>, vector<8x8xf32>, vector<8x8xf32> -> vector<8x8xf32>
    %cst_39 = arith.constant dense<0xFF800000> : vector<8xf32>
    %78 = vector.multi_reduction <maximumf>, %77, %cst_39 [1] : vector<8x8xf32> to vector<8xf32>
    %79 = vector.shape_cast %78 : vector<8xf32> to vector<8x1xf32>
    %80 = vector.broadcast %79 : vector<8x1xf32> to vector<8x8xf32>
    %81 = arith.subf %77, %80 : vector<8x8xf32>
    %82 = math.exp %81 : vector<8x8xf32>
    %cst_40 = arith.constant dense<0.000000e+00> : vector<8xf32>
    %83 = vector.multi_reduction <add>, %82, %cst_40 [1] : vector<8x8xf32> to vector<8xf32>
    %84 = vector.shape_cast %83 : vector<8xf32> to vector<8x1xf32>
    %85 = tpu.reciprocal %84 {approx = true} : vector<8x1xf32> -> vector<8x1xf32>
    %86 = vector.broadcast %85 : vector<8x1xf32> to vector<8x8xf32>
    %87 = arith.mulf %82, %86 : vector<8x8xf32>
    %cst_41 = arith.constant dense<0.000000e+00> : vector<8x8xf32>
    %88 = tpu.matmul %87, %76, %cst_41 {dimension_numbers = #tpu.dot_dimension_numbers<[1], [0], [0], [1], [0, 0, 1, 1], [], []>} : vector<8x8xf32>, vector<8x8xf32>, vector<8x8xf32> -> vector<8x8xf32>
    %89 = vector.extract_strided_slice %10 {offsets = [24, 0], sizes = [8, 32], strides = [1, 1]} : vector<32x32xf32> to vector<8x32xf32>
    %cst_42 = arith.constant dense<0.000000e+00> : vector<8x32xf32>
    %90 = tpu.matmul %88, %89, %cst_42 {dimension_numbers = #tpu.dot_dimension_numbers<[1], [0], [0], [1], [0, 0, 1, 1], [], []>} : vector<8x8xf32>, vector<8x32xf32>, vector<8x32xf32> -> vector<8x32xf32>
    %91 = arith.addf %73, %90 : vector<8x32xf32>
    %92 = vector.broadcast %11 : vector<1x32xf32> to vector<8x32xf32>
    %93 = arith.addf %91, %92 : vector<8x32xf32>
    %94 = arith.addf %1, %93 : vector<8x32xf32>
    %c0_43 = arith.constant 0 : index
    %c0_44 = arith.constant 0 : index
    %95 = vector.load %arg11[%c0_43, %c0_44] : memref<1x32xf32, #tpu.memory_space<vmem>>, vector<1x32xf32>
    %c0_45 = arith.constant 0 : index
    %c0_46 = arith.constant 0 : index
    %96 = vector.load %arg12[%c0_45, %c0_46] : memref<1x32xf32, #tpu.memory_space<vmem>>, vector<1x32xf32>
    %cst_47 = arith.constant dense<0.000000e+00> : vector<8xf32>
    %97 = vector.multi_reduction <add>, %94, %cst_47 [1] : vector<8x32xf32> to vector<8xf32>
    %98 = vector.shape_cast %97 : vector<8xf32> to vector<8x1xf32>
    %cst_48 = arith.constant 3.200000e+01 : f32
    %99 = vector.broadcast %cst_48 : f32 to vector<8x1xf32>
    %100 = arith.divf %98, %99 : vector<8x1xf32>
    %101 = vector.broadcast %100 : vector<8x1xf32> to vector<8x32xf32>
    %102 = arith.subf %94, %101 : vector<8x32xf32>
    %103 = arith.mulf %102, %102 : vector<8x32xf32>
    %cst_49 = arith.constant dense<0.000000e+00> : vector<8xf32>
    %104 = vector.multi_reduction <add>, %103, %cst_49 [1] : vector<8x32xf32> to vector<8xf32>
    %105 = vector.shape_cast %104 : vector<8xf32> to vector<8x1xf32>
    %cst_50 = arith.constant 3.200000e+01 : f32
    %106 = vector.broadcast %cst_50 : f32 to vector<8x1xf32>
    %107 = arith.divf %105, %106 : vector<8x1xf32>
    %108 = vector.broadcast %100 : vector<8x1xf32> to vector<8x32xf32>
    %109 = arith.subf %94, %108 : vector<8x32xf32>
    %cst_51 = arith.constant 9.99999974E-6 : f32
    %110 = vector.broadcast %cst_51 : f32 to vector<8x1xf32>
    %111 = arith.addf %107, %110 : vector<8x1xf32>
    %112 = math.rsqrt %111 : vector<8x1xf32>
    %113 = vector.broadcast %112 : vector<8x1xf32> to vector<8x32xf32>
    %114 = arith.mulf %109, %113 : vector<8x32xf32>
    %115 = vector.broadcast %95 : vector<1x32xf32> to vector<8x32xf32>
    %116 = arith.mulf %114, %115 : vector<8x32xf32>
    %117 = vector.broadcast %96 : vector<1x32xf32> to vector<8x32xf32>
    %118 = arith.addf %116, %117 : vector<8x32xf32>
    %c0_52 = arith.constant 0 : index
    %c0_53 = arith.constant 0 : index
    %119 = vector.load %arg13[%c0_52, %c0_53] : memref<32x32xf32, #tpu.memory_space<vmem>>, vector<32x32xf32>
    %c0_54 = arith.constant 0 : index
    %c0_55 = arith.constant 0 : index
    %120 = vector.load %arg14[%c0_54, %c0_55] : memref<1x32xf32, #tpu.memory_space<vmem>>, vector<1x32xf32>
    %c0_56 = arith.constant 0 : index
    %c0_57 = arith.constant 0 : index
    %121 = vector.load %arg15[%c0_56, %c0_57] : memref<32x32xf32, #tpu.memory_space<vmem>>, vector<32x32xf32>
    %c0_58 = arith.constant 0 : index
    %c0_59 = arith.constant 0 : index
    %122 = vector.load %arg16[%c0_58, %c0_59] : memref<1x32xf32, #tpu.memory_space<vmem>>, vector<1x32xf32>
    %c0_60 = arith.constant 0 : index
    %c0_61 = arith.constant 0 : index
    %123 = vector.load %arg17[%c0_60, %c0_61] : memref<32x32xf32, #tpu.memory_space<vmem>>, vector<32x32xf32>
    %c0_62 = arith.constant 0 : index
    %c0_63 = arith.constant 0 : index
    %124 = vector.load %arg18[%c0_62, %c0_63] : memref<1x32xf32, #tpu.memory_space<vmem>>, vector<1x32xf32>
    %c0_64 = arith.constant 0 : index
    %c0_65 = arith.constant 0 : index
    %125 = vector.load %arg19[%c0_64, %c0_65] : memref<32x32xf32, #tpu.memory_space<vmem>>, vector<32x32xf32>
    %c0_66 = arith.constant 0 : index
    %c0_67 = arith.constant 0 : index
    %126 = vector.load %arg20[%c0_66, %c0_67] : memref<1x32xf32, #tpu.memory_space<vmem>>, vector<1x32xf32>
    %cst_68 = arith.constant dense<0.000000e+00> : vector<8x32xf32>
    %127 = tpu.matmul %118, %119, %cst_68 {dimension_numbers = #tpu.dot_dimension_numbers<[1], [0], [0], [1], [0, 0, 1, 1], [], []>} : vector<8x32xf32>, vector<32x32xf32>, vector<8x32xf32> -> vector<8x32xf32>
    %128 = vector.broadcast %120 : vector<1x32xf32> to vector<8x32xf32>
    %129 = arith.addf %127, %128 : vector<8x32xf32>
    %cst_69 = arith.constant dense<0.000000e+00> : vector<8x32xf32>
    %130 = tpu.matmul %3, %121, %cst_69 {dimension_numbers = #tpu.dot_dimension_numbers<[1], [0], [0], [1], [0, 0, 1, 1], [], []>} : vector<8x32xf32>, vector<32x32xf32>, vector<8x32xf32> -> vector<8x32xf32>
    %131 = vector.broadcast %122 : vector<1x32xf32> to vector<8x32xf32>
    %132 = arith.addf %130, %131 : vector<8x32xf32>
    %cst_70 = arith.constant dense<0.000000e+00> : vector<8x32xf32>
    %133 = tpu.matmul %3, %123, %cst_70 {dimension_numbers = #tpu.dot_dimension_numbers<[1], [0], [0], [1], [0, 0, 1, 1], [], []>} : vector<8x32xf32>, vector<32x32xf32>, vector<8x32xf32> -> vector<8x32xf32>
    %134 = vector.broadcast %124 : vector<1x32xf32> to vector<8x32xf32>
    %135 = arith.addf %133, %134 : vector<8x32xf32>
    %136 = vector.extract_strided_slice %129 {offsets = [0, 0], sizes = [8, 8], strides = [1, 1]} : vector<8x32xf32> to vector<8x8xf32>
    %137 = vector.extract_strided_slice %132 {offsets = [0, 0], sizes = [8, 8], strides = [1, 1]} : vector<8x32xf32> to vector<8x8xf32>
    %138 = vector.extract_strided_slice %135 {offsets = [0, 0], sizes = [8, 8], strides = [1, 1]} : vector<8x32xf32> to vector<8x8xf32>
    %cst_71 = arith.constant dense<0.000000e+00> : vector<8x8xf32>
    %139 = tpu.matmul %136, %137, %cst_71 {dimension_numbers = #tpu.dot_dimension_numbers<[1], [1], [0], [0], [0, 0, 1, 0], [], []>} : vector<8x8xf32>, vector<8x8xf32>, vector<8x8xf32> -> vector<8x8xf32>
    %cst_72 = arith.constant dense<0xFF800000> : vector<8xf32>
    %140 = vector.multi_reduction <maximumf>, %139, %cst_72 [1] : vector<8x8xf32> to vector<8xf32>
    %141 = vector.shape_cast %140 : vector<8xf32> to vector<8x1xf32>
    %142 = vector.broadcast %141 : vector<8x1xf32> to vector<8x8xf32>
    %143 = arith.subf %139, %142 : vector<8x8xf32>
    %144 = math.exp %143 : vector<8x8xf32>
    %cst_73 = arith.constant dense<0.000000e+00> : vector<8xf32>
    %145 = vector.multi_reduction <add>, %144, %cst_73 [1] : vector<8x8xf32> to vector<8xf32>
    %146 = vector.shape_cast %145 : vector<8xf32> to vector<8x1xf32>
    %147 = tpu.reciprocal %146 {approx = true} : vector<8x1xf32> -> vector<8x1xf32>
    %148 = vector.broadcast %147 : vector<8x1xf32> to vector<8x8xf32>
    %149 = arith.mulf %144, %148 : vector<8x8xf32>
    %cst_74 = arith.constant dense<0.000000e+00> : vector<8x8xf32>
    %150 = tpu.matmul %149, %138, %cst_74 {dimension_numbers = #tpu.dot_dimension_numbers<[1], [0], [0], [1], [0, 0, 1, 1], [], []>} : vector<8x8xf32>, vector<8x8xf32>, vector<8x8xf32> -> vector<8x8xf32>
    %151 = vector.extract_strided_slice %125 {offsets = [0, 0], sizes = [8, 32], strides = [1, 1]} : vector<32x32xf32> to vector<8x32xf32>
    %cst_75 = arith.constant dense<0.000000e+00> : vector<8x32xf32>
    %152 = tpu.matmul %150, %151, %cst_75 {dimension_numbers = #tpu.dot_dimension_numbers<[1], [0], [0], [1], [0, 0, 1, 1], [], []>} : vector<8x8xf32>, vector<8x32xf32>, vector<8x32xf32> -> vector<8x32xf32>
    %153 = vector.extract_strided_slice %129 {offsets = [0, 8], sizes = [8, 8], strides = [1, 1]} : vector<8x32xf32> to vector<8x8xf32>
    %154 = vector.extract_strided_slice %132 {offsets = [0, 8], sizes = [8, 8], strides = [1, 1]} : vector<8x32xf32> to vector<8x8xf32>
    %155 = vector.extract_strided_slice %135 {offsets = [0, 8], sizes = [8, 8], strides = [1, 1]} : vector<8x32xf32> to vector<8x8xf32>
    %cst_76 = arith.constant dense<0.000000e+00> : vector<8x8xf32>
    %156 = tpu.matmul %153, %154, %cst_76 {dimension_numbers = #tpu.dot_dimension_numbers<[1], [1], [0], [0], [0, 0, 1, 0], [], []>} : vector<8x8xf32>, vector<8x8xf32>, vector<8x8xf32> -> vector<8x8xf32>
    %cst_77 = arith.constant dense<0xFF800000> : vector<8xf32>
    %157 = vector.multi_reduction <maximumf>, %156, %cst_77 [1] : vector<8x8xf32> to vector<8xf32>
    %158 = vector.shape_cast %157 : vector<8xf32> to vector<8x1xf32>
    %159 = vector.broadcast %158 : vector<8x1xf32> to vector<8x8xf32>
    %160 = arith.subf %156, %159 : vector<8x8xf32>
    %161 = math.exp %160 : vector<8x8xf32>
    %cst_78 = arith.constant dense<0.000000e+00> : vector<8xf32>
    %162 = vector.multi_reduction <add>, %161, %cst_78 [1] : vector<8x8xf32> to vector<8xf32>
    %163 = vector.shape_cast %162 : vector<8xf32> to vector<8x1xf32>
    %164 = tpu.reciprocal %163 {approx = true} : vector<8x1xf32> -> vector<8x1xf32>
    %165 = vector.broadcast %164 : vector<8x1xf32> to vector<8x8xf32>
    %166 = arith.mulf %161, %165 : vector<8x8xf32>
    %cst_79 = arith.constant dense<0.000000e+00> : vector<8x8xf32>
    %167 = tpu.matmul %166, %155, %cst_79 {dimension_numbers = #tpu.dot_dimension_numbers<[1], [0], [0], [1], [0, 0, 1, 1], [], []>} : vector<8x8xf32>, vector<8x8xf32>, vector<8x8xf32> -> vector<8x8xf32>
    %168 = vector.extract_strided_slice %125 {offsets = [8, 0], sizes = [8, 32], strides = [1, 1]} : vector<32x32xf32> to vector<8x32xf32>
    %cst_80 = arith.constant dense<0.000000e+00> : vector<8x32xf32>
    %169 = tpu.matmul %167, %168, %cst_80 {dimension_numbers = #tpu.dot_dimension_numbers<[1], [0], [0], [1], [0, 0, 1, 1], [], []>} : vector<8x8xf32>, vector<8x32xf32>, vector<8x32xf32> -> vector<8x32xf32>
    %170 = arith.addf %152, %169 : vector<8x32xf32>
    %171 = vector.extract_strided_slice %129 {offsets = [0, 16], sizes = [8, 8], strides = [1, 1]} : vector<8x32xf32> to vector<8x8xf32>
    %172 = vector.extract_strided_slice %132 {offsets = [0, 16], sizes = [8, 8], strides = [1, 1]} : vector<8x32xf32> to vector<8x8xf32>
    %173 = vector.extract_strided_slice %135 {offsets = [0, 16], sizes = [8, 8], strides = [1, 1]} : vector<8x32xf32> to vector<8x8xf32>
    %cst_81 = arith.constant dense<0.000000e+00> : vector<8x8xf32>
    %174 = tpu.matmul %171, %172, %cst_81 {dimension_numbers = #tpu.dot_dimension_numbers<[1], [1], [0], [0], [0, 0, 1, 0], [], []>} : vector<8x8xf32>, vector<8x8xf32>, vector<8x8xf32> -> vector<8x8xf32>
    %cst_82 = arith.constant dense<0xFF800000> : vector<8xf32>
    %175 = vector.multi_reduction <maximumf>, %174, %cst_82 [1] : vector<8x8xf32> to vector<8xf32>
    %176 = vector.shape_cast %175 : vector<8xf32> to vector<8x1xf32>
    %177 = vector.broadcast %176 : vector<8x1xf32> to vector<8x8xf32>
    %178 = arith.subf %174, %177 : vector<8x8xf32>
    %179 = math.exp %178 : vector<8x8xf32>
    %cst_83 = arith.constant dense<0.000000e+00> : vector<8xf32>
    %180 = vector.multi_reduction <add>, %179, %cst_83 [1] : vector<8x8xf32> to vector<8xf32>
    %181 = vector.shape_cast %180 : vector<8xf32> to vector<8x1xf32>
    %182 = tpu.reciprocal %181 {approx = true} : vector<8x1xf32> -> vector<8x1xf32>
    %183 = vector.broadcast %182 : vector<8x1xf32> to vector<8x8xf32>
    %184 = arith.mulf %179, %183 : vector<8x8xf32>
    %cst_84 = arith.constant dense<0.000000e+00> : vector<8x8xf32>
    %185 = tpu.matmul %184, %173, %cst_84 {dimension_numbers = #tpu.dot_dimension_numbers<[1], [0], [0], [1], [0, 0, 1, 1], [], []>} : vector<8x8xf32>, vector<8x8xf32>, vector<8x8xf32> -> vector<8x8xf32>
    %186 = vector.extract_strided_slice %125 {offsets = [16, 0], sizes = [8, 32], strides = [1, 1]} : vector<32x32xf32> to vector<8x32xf32>
    %cst_85 = arith.constant dense<0.000000e+00> : vector<8x32xf32>
    %187 = tpu.matmul %185, %186, %cst_85 {dimension_numbers = #tpu.dot_dimension_numbers<[1], [0], [0], [1], [0, 0, 1, 1], [], []>} : vector<8x8xf32>, vector<8x32xf32>, vector<8x32xf32> -> vector<8x32xf32>
    %188 = arith.addf %170, %187 : vector<8x32xf32>
    %189 = vector.extract_strided_slice %129 {offsets = [0, 24], sizes = [8, 8], strides = [1, 1]} : vector<8x32xf32> to vector<8x8xf32>
    %190 = vector.extract_strided_slice %132 {offsets = [0, 24], sizes = [8, 8], strides = [1, 1]} : vector<8x32xf32> to vector<8x8xf32>
    %191 = vector.extract_strided_slice %135 {offsets = [0, 24], sizes = [8, 8], strides = [1, 1]} : vector<8x32xf32> to vector<8x8xf32>
    %cst_86 = arith.constant dense<0.000000e+00> : vector<8x8xf32>
    %192 = tpu.matmul %189, %190, %cst_86 {dimension_numbers = #tpu.dot_dimension_numbers<[1], [1], [0], [0], [0, 0, 1, 0], [], []>} : vector<8x8xf32>, vector<8x8xf32>, vector<8x8xf32> -> vector<8x8xf32>
    %cst_87 = arith.constant dense<0xFF800000> : vector<8xf32>
    %193 = vector.multi_reduction <maximumf>, %192, %cst_87 [1] : vector<8x8xf32> to vector<8xf32>
    %194 = vector.shape_cast %193 : vector<8xf32> to vector<8x1xf32>
    %195 = vector.broadcast %194 : vector<8x1xf32> to vector<8x8xf32>
    %196 = arith.subf %192, %195 : vector<8x8xf32>
    %197 = math.exp %196 : vector<8x8xf32>
    %cst_88 = arith.constant dense<0.000000e+00> : vector<8xf32>
    %198 = vector.multi_reduction <add>, %197, %cst_88 [1] : vector<8x8xf32> to vector<8xf32>
    %199 = vector.shape_cast %198 : vector<8xf32> to vector<8x1xf32>
    %200 = tpu.reciprocal %199 {approx = true} : vector<8x1xf32> -> vector<8x1xf32>
    %201 = vector.broadcast %200 : vector<8x1xf32> to vector<8x8xf32>
    %202 = arith.mulf %197, %201 : vector<8x8xf32>
    %cst_89 = arith.constant dense<0.000000e+00> : vector<8x8xf32>
    %203 = tpu.matmul %202, %191, %cst_89 {dimension_numbers = #tpu.dot_dimension_numbers<[1], [0], [0], [1], [0, 0, 1, 1], [], []>} : vector<8x8xf32>, vector<8x8xf32>, vector<8x8xf32> -> vector<8x8xf32>
    %204 = vector.extract_strided_slice %125 {offsets = [24, 0], sizes = [8, 32], strides = [1, 1]} : vector<32x32xf32> to vector<8x32xf32>
    %cst_90 = arith.constant dense<0.000000e+00> : vector<8x32xf32>
    %205 = tpu.matmul %203, %204, %cst_90 {dimension_numbers = #tpu.dot_dimension_numbers<[1], [0], [0], [1], [0, 0, 1, 1], [], []>} : vector<8x8xf32>, vector<8x32xf32>, vector<8x32xf32> -> vector<8x32xf32>
    %206 = arith.addf %188, %205 : vector<8x32xf32>
    %207 = vector.broadcast %126 : vector<1x32xf32> to vector<8x32xf32>
    %208 = arith.addf %206, %207 : vector<8x32xf32>
    %209 = arith.addf %118, %208 : vector<8x32xf32>
    %c0_91 = arith.constant 0 : index
    %c0_92 = arith.constant 0 : index
    %210 = vector.load %arg21[%c0_91, %c0_92] : memref<1x32xf32, #tpu.memory_space<vmem>>, vector<1x32xf32>
    %c0_93 = arith.constant 0 : index
    %c0_94 = arith.constant 0 : index
    %211 = vector.load %arg22[%c0_93, %c0_94] : memref<1x32xf32, #tpu.memory_space<vmem>>, vector<1x32xf32>
    %cst_95 = arith.constant dense<0.000000e+00> : vector<8xf32>
    %212 = vector.multi_reduction <add>, %209, %cst_95 [1] : vector<8x32xf32> to vector<8xf32>
    %213 = vector.shape_cast %212 : vector<8xf32> to vector<8x1xf32>
    %cst_96 = arith.constant 3.200000e+01 : f32
    %214 = vector.broadcast %cst_96 : f32 to vector<8x1xf32>
    %215 = arith.divf %213, %214 : vector<8x1xf32>
    %216 = vector.broadcast %215 : vector<8x1xf32> to vector<8x32xf32>
    %217 = arith.subf %209, %216 : vector<8x32xf32>
    %218 = arith.mulf %217, %217 : vector<8x32xf32>
    %cst_97 = arith.constant dense<0.000000e+00> : vector<8xf32>
    %219 = vector.multi_reduction <add>, %218, %cst_97 [1] : vector<8x32xf32> to vector<8xf32>
    %220 = vector.shape_cast %219 : vector<8xf32> to vector<8x1xf32>
    %cst_98 = arith.constant 3.200000e+01 : f32
    %221 = vector.broadcast %cst_98 : f32 to vector<8x1xf32>
    %222 = arith.divf %220, %221 : vector<8x1xf32>
    %223 = vector.broadcast %215 : vector<8x1xf32> to vector<8x32xf32>
    %224 = arith.subf %209, %223 : vector<8x32xf32>
    %cst_99 = arith.constant 9.99999974E-6 : f32
    %225 = vector.broadcast %cst_99 : f32 to vector<8x1xf32>
    %226 = arith.addf %222, %225 : vector<8x1xf32>
    %227 = math.rsqrt %226 : vector<8x1xf32>
    %228 = vector.broadcast %227 : vector<8x1xf32> to vector<8x32xf32>
    %229 = arith.mulf %224, %228 : vector<8x32xf32>
    %230 = vector.broadcast %210 : vector<1x32xf32> to vector<8x32xf32>
    %231 = arith.mulf %229, %230 : vector<8x32xf32>
    %232 = vector.broadcast %211 : vector<1x32xf32> to vector<8x32xf32>
    %233 = arith.addf %231, %232 : vector<8x32xf32>
    %c0_100 = arith.constant 0 : index
    %c0_101 = arith.constant 0 : index
    %234 = vector.load %arg23[%c0_100, %c0_101] : memref<32x64xf32, #tpu.memory_space<vmem>>, vector<32x64xf32>
    %c0_102 = arith.constant 0 : index
    %c0_103 = arith.constant 0 : index
    %235 = vector.load %arg24[%c0_102, %c0_103] : memref<1x64xf32, #tpu.memory_space<vmem>>, vector<1x64xf32>
    %c0_104 = arith.constant 0 : index
    %c0_105 = arith.constant 0 : index
    %236 = vector.load %arg25[%c0_104, %c0_105] : memref<64x32xf32, #tpu.memory_space<vmem>>, vector<64x32xf32>
    %c0_106 = arith.constant 0 : index
    %c0_107 = arith.constant 0 : index
    %237 = vector.load %arg26[%c0_106, %c0_107] : memref<1x32xf32, #tpu.memory_space<vmem>>, vector<1x32xf32>
    %cst_108 = arith.constant dense<0.000000e+00> : vector<8x64xf32>
    %238 = tpu.matmul %233, %234, %cst_108 {dimension_numbers = #tpu.dot_dimension_numbers<[1], [0], [0], [1], [0, 0, 1, 1], [], []>} : vector<8x32xf32>, vector<32x64xf32>, vector<8x64xf32> -> vector<8x64xf32>
    %239 = vector.broadcast %235 : vector<1x64xf32> to vector<8x64xf32>
    %240 = arith.addf %238, %239 : vector<8x64xf32>
    %cst_109 = arith.constant 0.000000e+00 : f32
    %241 = vector.broadcast %cst_109 : f32 to vector<8x64xf32>
    %242 = arith.maximumf %240, %241 : vector<8x64xf32>
    %cst_110 = arith.constant dense<0.000000e+00> : vector<8x32xf32>
    %243 = tpu.matmul %242, %236, %cst_110 {dimension_numbers = #tpu.dot_dimension_numbers<[1], [0], [0], [1], [0, 0, 1, 1], [], []>} : vector<8x64xf32>, vector<64x32xf32>, vector<8x32xf32> -> vector<8x32xf32>
    %244 = vector.broadcast %237 : vector<1x32xf32> to vector<8x32xf32>
    %245 = arith.addf %243, %244 : vector<8x32xf32>
    %246 = arith.addf %233, %245 : vector<8x32xf32>
    %c0_111 = arith.constant 0 : index
    %c0_112 = arith.constant 0 : index
    %247 = vector.load %arg27[%c0_111, %c0_112] : memref<1x32xf32, #tpu.memory_space<vmem>>, vector<1x32xf32>
    %c0_113 = arith.constant 0 : index
    %c0_114 = arith.constant 0 : index
    %248 = vector.load %arg28[%c0_113, %c0_114] : memref<1x32xf32, #tpu.memory_space<vmem>>, vector<1x32xf32>
    %cst_115 = arith.constant dense<0.000000e+00> : vector<8xf32>
    %249 = vector.multi_reduction <add>, %246, %cst_115 [1] : vector<8x32xf32> to vector<8xf32>
    %250 = vector.shape_cast %249 : vector<8xf32> to vector<8x1xf32>
    %cst_116 = arith.constant 3.200000e+01 : f32
    %251 = vector.broadcast %cst_116 : f32 to vector<8x1xf32>
    %252 = arith.divf %250, %251 : vector<8x1xf32>
    %253 = vector.broadcast %252 : vector<8x1xf32> to vector<8x32xf32>
    %254 = arith.subf %246, %253 : vector<8x32xf32>
    %255 = arith.mulf %254, %254 : vector<8x32xf32>
    %cst_117 = arith.constant dense<0.000000e+00> : vector<8xf32>
    %256 = vector.multi_reduction <add>, %255, %cst_117 [1] : vector<8x32xf32> to vector<8xf32>
    %257 = vector.shape_cast %256 : vector<8xf32> to vector<8x1xf32>
    %cst_118 = arith.constant 3.200000e+01 : f32
    %258 = vector.broadcast %cst_118 : f32 to vector<8x1xf32>
    %259 = arith.divf %257, %258 : vector<8x1xf32>
    %260 = vector.broadcast %252 : vector<8x1xf32> to vector<8x32xf32>
    %261 = arith.subf %246, %260 : vector<8x32xf32>
    %cst_119 = arith.constant 9.99999974E-6 : f32
    %262 = vector.broadcast %cst_119 : f32 to vector<8x1xf32>
    %263 = arith.addf %259, %262 : vector<8x1xf32>
    %264 = math.rsqrt %263 : vector<8x1xf32>
    %265 = vector.broadcast %264 : vector<8x1xf32> to vector<8x32xf32>
    %266 = arith.mulf %261, %265 : vector<8x32xf32>
    %267 = vector.broadcast %247 : vector<1x32xf32> to vector<8x32xf32>
    %268 = arith.mulf %266, %267 : vector<8x32xf32>
    %269 = vector.broadcast %248 : vector<1x32xf32> to vector<8x32xf32>
    %270 = arith.addf %268, %269 : vector<8x32xf32>
    %c0_120 = arith.constant 0 : index
    %c0_121 = arith.constant 0 : index
    %c0_122 = arith.constant 0 : index
    %271 = vector.load %arg29[%c0_120, %c0_121, %c0_122] : memref<1x8x32xf32, #tpu.memory_space<vmem>>, vector<1x8x32xf32>
    %272 = vector.shape_cast %271 : vector<1x8x32xf32> to vector<8x32xf32>
    %273 = vector.shape_cast %270 : vector<8x32xf32> to vector<1x8x32xf32>
    tpu.vector_store %arg29[%c0_120, %c0_121, %c0_122], %273 {strides = array<i32>} : memref<1x8x32xf32, #tpu.memory_space<vmem>>, vector<1x8x32xf32>,
    return
  }
  func.func @transform_0(%arg0: i32) -> (i32, i32, i32) {
    %c0_i32 = arith.constant 0 : i32
    %c0_i32_0 = arith.constant 0 : i32
    %c0_i32_1 = arith.constant 0 : i32
    return %arg0, %c0_i32, %c0_i32_0 : i32, i32, i32
  }
  func.func @transform_1(%arg0: i32) -> (i32, i32, i32) {
    %c0_i32 = arith.constant 0 : i32
    %c0_i32_0 = arith.constant 0 : i32
    %c0_i32_1 = arith.constant 0 : i32
    return %arg0, %c0_i32, %c0_i32_0 : i32, i32, i32
  }
  func.func @transform_2(%arg0: i32) -> (i32, i32) {
    %c0_i32 = arith.constant 0 : i32
    %c0_i32_0 = arith.constant 0 : i32
    %c0_i32_1 = arith.constant 0 : i32
    return %c0_i32, %c0_i32_0 : i32, i32
  }
  func.func @transform_3(%arg0: i32) -> (i32, i32) {
    %c0_i32 = arith.constant 0 : i32
    %c0_i32_0 = arith.constant 0 : i32
    %c0_i32_1 = arith.constant 0 : i32
    return %c0_i32, %c0_i32_0 : i32, i32
  }
  func.func @transform_4(%arg0: i32) -> (i32, i32) {
    %c0_i32 = arith.constant 0 : i32
    %c0_i32_0 = arith.constant 0 : i32
    %c0_i32_1 = arith.constant 0 : i32
    return %c0_i32, %c0_i32_0 : i32, i32
  }
  func.func @transform_5(%arg0: i32) -> (i32, i32) {
    %c0_i32 = arith.constant 0 : i32
    %c0_i32_0 = arith.constant 0 : i32
    %c0_i32_1 = arith.constant 0 : i32
    return %c0_i32, %c0_i32_0 : i32, i32
  }
  func.func @transform_6(%arg0: i32) -> (i32, i32) {
    %c0_i32 = arith.constant 0 : i32
    %c0_i32_0 = arith.constant 0 : i32
    %c0_i32_1 = arith.constant 0 : i32
    return %c0_i32, %c0_i32_0 : i32, i32
  }
  func.func @transform_7(%arg0: i32) -> (i32, i32) {
    %c0_i32 = arith.constant 0 : i32
    %c0_i32_0 = arith.constant 0 : i32
    %c0_i32_1 = arith.constant 0 : i32
    return %c0_i32, %c0_i32_0 : i32, i32
  }
  func.func @transform_8(%arg0: i32) -> (i32, i32) {
    %c0_i32 = arith.constant 0 : i32
    %c0_i32_0 = arith.constant 0 : i32
    %c0_i32_1 = arith.constant 0 : i32
    return %c0_i32, %c0_i32_0 : i32, i32
  }
  func.func @transform_9(%arg0: i32) -> (i32, i32) {
    %c0_i32 = arith.constant 0 : i32
    %c0_i32_0 = arith.constant 0 : i32
    %c0_i32_1 = arith.constant 0 : i32
    return %c0_i32, %c0_i32_0 : i32, i32
  }
  func.func @transform_10(%arg0: i32) -> (i32, i32) {
    %c0_i32 = arith.constant 0 : i32
    %c0_i32_0 = arith.constant 0 : i32
    %c0_i32_1 = arith.constant 0 : i32
    return %c0_i32, %c0_i32_0 : i32, i32
  }
  func.func @transform_11(%arg0: i32) -> (i32, i32) {
    %c0_i32 = arith.constant 0 : i32
    %c0_i32_0 = arith.constant 0 : i32
    %c0_i32_1 = arith.constant 0 : i32
    return %c0_i32, %c0_i32_0 : i32, i32
  }
  func.func @transform_12(%arg0: i32) -> (i32, i32) {
    %c0_i32 = arith.constant 0 : i32
    %c0_i32_0 = arith.constant 0 : i32
    %c0_i32_1 = arith.constant 0 : i32
    return %c0_i32, %c0_i32_0 : i32, i32
  }
  func.func @transform_13(%arg0: i32) -> (i32, i32) {
    %c0_i32 = arith.constant 0 : i32
    %c0_i32_0 = arith.constant 0 : i32
    %c0_i32_1 = arith.constant 0 : i32
    return %c0_i32, %c0_i32_0 : i32, i32
  }
  func.func @transform_14(%arg0: i32) -> (i32, i32) {
    %c0_i32 = arith.constant 0 : i32
    %c0_i32_0 = arith.constant 0 : i32
    %c0_i32_1 = arith.constant 0 : i32
    return %c0_i32, %c0_i32_0 : i32, i32
  }
  func.func @transform_15(%arg0: i32) -> (i32, i32) {
    %c0_i32 = arith.constant 0 : i32
    %c0_i32_0 = arith.constant 0 : i32
    %c0_i32_1 = arith.constant 0 : i32
    return %c0_i32, %c0_i32_0 : i32, i32
  }
  func.func @transform_16(%arg0: i32) -> (i32, i32) {
    %c0_i32 = arith.constant 0 : i32
    %c0_i32_0 = arith.constant 0 : i32
    %c0_i32_1 = arith.constant 0 : i32
    return %c0_i32, %c0_i32_0 : i32, i32
  }
  func.func @transform_17(%arg0: i32) -> (i32, i32) {
    %c0_i32 = arith.constant 0 : i32
    %c0_i32_0 = arith.constant 0 : i32
    %c0_i32_1 = arith.constant 0 : i32
    return %c0_i32, %c0_i32_0 : i32, i32
  }
  func.func @transform_18(%arg0: i32) -> (i32, i32) {
    %c0_i32 = arith.constant 0 : i32
    %c0_i32_0 = arith.constant 0 : i32
    %c0_i32_1 = arith.constant 0 : i32
    return %c0_i32, %c0_i32_0 : i32, i32
  }
  func.func @transform_19(%arg0: i32) -> (i32, i32) {
    %c0_i32 = arith.constant 0 : i32
    %c0_i32_0 = arith.constant 0 : i32
    %c0_i32_1 = arith.constant 0 : i32
    return %c0_i32, %c0_i32_0 : i32, i32
  }
  func.func @transform_20(%arg0: i32) -> (i32, i32) {
    %c0_i32 = arith.constant 0 : i32
    %c0_i32_0 = arith.constant 0 : i32
    %c0_i32_1 = arith.constant 0 : i32
    return %c0_i32, %c0_i32_0 : i32, i32
  }
  func.func @transform_21(%arg0: i32) -> (i32, i32) {
    %c0_i32 = arith.constant 0 : i32
    %c0_i32_0 = arith.constant 0 : i32
    %c0_i32_1 = arith.constant 0 : i32
    return %c0_i32, %c0_i32_0 : i32, i32
  }
  func.func @transform_22(%arg0: i32) -> (i32, i32) {
    %c0_i32 = arith.constant 0 : i32
    %c0_i32_0 = arith.constant 0 : i32
    %c0_i32_1 = arith.constant 0 : i32
    return %c0_i32, %c0_i32_0 : i32, i32
  }
  func.func @transform_23(%arg0: i32) -> (i32, i32) {
    %c0_i32 = arith.constant 0 : i32
    %c0_i32_0 = arith.constant 0 : i32
    %c0_i32_1 = arith.constant 0 : i32
    return %c0_i32, %c0_i32_0 : i32, i32
  }
  func.func @transform_24(%arg0: i32) -> (i32, i32) {
    %c0_i32 = arith.constant 0 : i32
    %c0_i32_0 = arith.constant 0 : i32
    %c0_i32_1 = arith.constant 0 : i32
    return %c0_i32, %c0_i32_0 : i32, i32
  }
  func.func @transform_25(%arg0: i32) -> (i32, i32) {
    %c0_i32 = arith.constant 0 : i32
    %c0_i32_0 = arith.constant 0 : i32
    %c0_i32_1 = arith.constant 0 : i32
    return %c0_i32, %c0_i32_0 : i32, i32
  }
  func.func @transform_26(%arg0: i32) -> (i32, i32) {
    %c0_i32 = arith.constant 0 : i32
    %c0_i32_0 = arith.constant 0 : i32
    %c0_i32_1 = arith.constant 0 : i32
    return %c0_i32, %c0_i32_0 : i32, i32
  }
  func.func @transform_27(%arg0: i32) -> (i32, i32) {
    %c0_i32 = arith.constant 0 : i32
    %c0_i32_0 = arith.constant 0 : i32
    %c0_i32_1 = arith.constant 0 : i32
    return %c0_i32, %c0_i32_0 : i32, i32
  }
  func.func @transform_28(%arg0: i32) -> (i32, i32, i32) {
    %c0_i32 = arith.constant 0 : i32
    %c0_i32_0 = arith.constant 0 : i32
    %c0_i32_1 = arith.constant 0 : i32
    return %arg0, %c0_i32, %c0_i32_0 : i32, i32, i32
  }
}

module attributes {stable_mosaic.version = 11 : i64} {
  func.func @kernel(%arg0: i32, %arg1: memref<1x8x32xf32, #tpu.memory_space<vmem>>, %arg2: memref<1x8x32xf32, #tpu.memory_space<vmem>>, %arg3: memref<32x32xf32, #tpu.memory_space<vmem>>, %arg4: memref<1x32xf32, #tpu.memory_space<vmem>>, %arg5: memref<32x32xf32, #tpu.memory_space<vmem>>, %arg6: memref<1x32xf32, #tpu.memory_space<vmem>>, %arg7: memref<32x32xf32, #tpu.memory_space<vmem>>, %arg8: memref<1x32xf32, #tpu.memory_space<vmem>>, %arg9: memref<32x32xf32, #tpu.memory_space<vmem>>, %arg10: memref<1x32xf32, #tpu.memory_space<vmem>>, %arg11: memref<1x32xf32, #tpu.memory_space<vmem>>, %arg12: memref<1x32xf32, #tpu.memory_space<vmem>>, %arg13: memref<32x32xf32, #tpu.memory_space<vmem>>, %arg14: memref<1x32xf32, #tpu.memory_space<vmem>>, %arg15: memref<32x32xf32, #tpu.memory_space<vmem>>, %arg16: memref<1x32xf32, #tpu.memory_space<vmem>>, %arg17: memref<32x32xf32, #tpu.memory_space<vmem>>, %arg18: memref<1x32xf32, #tpu.memory_space<vmem>>, %arg19: memref<32x32xf32, #tpu.memory_space<vmem>>, %arg20: memref<1x32xf32, #tpu.memory_space<vmem>>, %arg21: memref<1x32xf32, #tpu.memory_space<vmem>>, %arg22: memref<1x32xf32, #tpu.memory_space<vmem>>, %arg23: memref<32x64xf32, #tpu.memory_space<vmem>>, %arg24: memref<1x64xf32, #tpu.memory_space<vmem>>, %arg25: memref<64x32xf32, #tpu.memory_space<vmem>>, %arg26: memref<1x32xf32, #tpu.memory_space<vmem>>, %arg27: memref<1x32xf32, #tpu.memory_space<vmem>>, %arg28: memref<1x32xf32, #tpu.memory_space<vmem>>, %arg29: memref<1x8x32xf32, #tpu.memory_space<vmem>>) attributes {dimension_semantics = [#tpu.dimension_semantics<parallel>], iteration_bounds = array<i64: 2>, scalar_prefetch = 0 : i64, scratch_operands = 0 : i64, tpu.core_type = #tpu.core_type<tc>, window_params = [{transform_indices = @transform_0, window_bounds = array<i64: 1, 8, 32>}, {transform_indices = @transform_1, window_bounds = array<i64: 1, 8, 32>}, {pipeline_mode = #tpu.pipeline_mode<synchronous>, transform_indices = @transform_2, window_bounds = array<i64: 32, 32>}, {pipeline_mode = #tpu.pipeline_mode<synchronous>, transform_indices = @transform_3, window_bounds = array<i64: 1, 32>}, {pipeline_mode = #tpu.pipeline_mode<synchronous>, transform_indices = @transform_4, window_bounds = array<i64: 32, 32>}, {pipeline_mode = #tpu.pipeline_mode<synchronous>, transform_indices = @transform_5, window_bounds = array<i64: 1, 32>}, {pipeline_mode = #tpu.pipeline_mode<synchronous>, transform_indices = @transform_6, window_bounds = array<i64: 32, 32>}, {pipeline_mode = #tpu.pipeline_mode<synchronous>, transform_indices = @transform_7, window_bounds = array<i64: 1, 32>}, {pipeline_mode = #tpu.pipeline_mode<synchronous>, transform_indices = @transform_8, window_bounds = array<i64: 32, 32>}, {pipeline_mode = #tpu.pipeline_mode<synchronous>, transform_indices = @transform_9, window_bounds = array<i64: 1, 32>}, {pipeline_mode = #tpu.pipeline_mode<synchronous>, transform_indices = @transform_10, window_bounds = array<i64: 1, 32>}, {pipeline_mode = #tpu.pipeline_mode<synchronous>, transform_indices = @transform_11, window_bounds = array<i64: 1, 32>}, {pipeline_mode = #tpu.pipeline_mode<synchronous>, transform_indices = @transform_12, window_bounds = array<i64: 32, 32>}, {pipeline_mode = #tpu.pipeline_mode<synchronous>, transform_indices = @transform_13, window_bounds = array<i64: 1, 32>}, {pipeline_mode = #tpu.pipeline_mode<synchronous>, transform_indices = @transform_14, window_bounds = array<i64: 32, 32>}, {pipeline_mode = #tpu.pipeline_mode<synchronous>, transform_indices = @transform_15, window_bounds = array<i64: 1, 32>}, {pipeline_mode = #tpu.pipeline_mode<synchronous>, transform_indices = @transform_16, window_bounds = array<i64: 32, 32>}, {pipeline_mode = #tpu.pipeline_mode<synchronous>, transform_indices = @transform_17, window_bounds = array<i64: 1, 32>}, {pipeline_mode = #tpu.pipeline_mode<synchronous>, transform_indices = @transform_18, window_bounds = array<i64: 32, 32>}, {pipeline_mode = #tpu.pipeline_mode<synchronous>, transform_indices = @transform_19, window_bounds = array<i64: 1, 32>}, {pipeline_mode = #tpu.pipeline_mode<synchronous>, transform_indices = @transform_20, window_bounds = array<i64: 1, 32>}, {pipeline_mode = #tpu.pipeline_mode<synchronous>, transform_indices = @transform_21, window_bounds = array<i64: 1, 32>}, {pipeline_mode = #tpu.pipeline_mode<synchronous>, transform_indices = @transform_22, window_bounds = array<i64: 32, 64>}, {pipeline_mode = #tpu.pipeline_mode<synchronous>, transform_indices = @transform_23, window_bounds = array<i64: 1, 64>}, {pipeline_mode = #tpu.pipeline_mode<synchronous>, transform_indices = @transform_24, window_bounds = array<i64: 64, 32>}, {pipeline_mode = #tpu.pipeline_mode<synchronous>, transform_indices = @transform_25, window_bounds = array<i64: 1, 32>}, {pipeline_mode = #tpu.pipeline_mode<synchronous>, transform_indices = @transform_26, window_bounds = array<i64: 1, 32>}, {pipeline_mode = #tpu.pipeline_mode<synchronous>, transform_indices = @transform_27, window_bounds = array<i64: 1, 32>}, {transform_indices = @transform_28, window_bounds = array<i64: 1, 8, 32>}]} {
    %c0 = arith.constant 0 : index
    %c0_0 = arith.constant 0 : index
    %c0_1 = arith.constant 0 : index
    %0 = vector.load %arg1[%c0, %c0_0, %c0_1] : memref<1x8x32xf32, #tpu.memory_space<vmem>>, vector<1x8x32xf32>
    %1 = vector.shape_cast %0 : vector<1x8x32xf32> to vector<8x32xf32>
    %c0_2 = arith.constant 0 : index
    %c0_3 = arith.constant 0 : index
    %c0_4 = arith.constant 0 : index
    %2 = vector.load %arg2[%c0_2, %c0_3, %c0_4] : memref<1x8x32xf32, #tpu.memory_space<vmem>>, vector<1x8x32xf32>
    %3 = vector.shape_cast %2 : vector<1x8x32xf32> to vector<8x32xf32>
    %c0_5 = arith.constant 0 : index
    %c0_6 = arith.constant 0 : index
    %4 = vector.load %arg3[%c0_5, %c0_6] : memref<32x32xf32, #tpu.memory_space<vmem>>, vector<32x32xf32>
    %c0_7 = arith.constant 0 : index
    %c0_8 = arith.constant 0 : index
    %5 = vector.load %arg4[%c0_7, %c0_8] : memref<1x32xf32, #tpu.memory_space<vmem>>, vector<1x32xf32>
    %c0_9 = arith.constant 0 : index
    %c0_10 = arith.constant 0 : index
    %6 = vector.load %arg5[%c0_9, %c0_10] : memref<32x32xf32, #tpu.memory_space<vmem>>, vector<32x32xf32>
    %c0_11 = arith.constant 0 : index
    %c0_12 = arith.constant 0 : index
    %7 = vector.load %arg6[%c0_11, %c0_12] : memref<1x32xf32, #tpu.memory_space<vmem>>, vector<1x32xf32>
    %c0_13 = arith.constant 0 : index
    %c0_14 = arith.constant 0 : index
    %8 = vector.load %arg7[%c0_13, %c0_14] : memref<32x32xf32, #tpu.memory_space<vmem>>, vector<32x32xf32>
    %c0_15 = arith.constant 0 : index
    %c0_16 = arith.constant 0 : index
    %9 = vector.load %arg8[%c0_15, %c0_16] : memref<1x32xf32, #tpu.memory_space<vmem>>, vector<1x32xf32>
    %c0_17 = arith.constant 0 : index
    %c0_18 = arith.constant 0 : index
    %10 = vector.load %arg9[%c0_17, %c0_18] : memref<32x32xf32, #tpu.memory_space<vmem>>, vector<32x32xf32>
    %c0_19 = arith.constant 0 : index
    %c0_20 = arith.constant 0 : index
    %11 = vector.load %arg10[%c0_19, %c0_20] : memref<1x32xf32, #tpu.memory_space<vmem>>, vector<1x32xf32>
    %cst = arith.constant dense<0.000000e+00> : vector<8x32xf32>
    %12 = tpu.matmul %1, %4, %cst {dimension_numbers = #tpu.dot_dimension_numbers<[1], [0], [0], [1], [0, 0, 1, 1], [], []>} : vector<8x32xf32>, vector<32x32xf32>, vector<8x32xf32> -> vector<8x32xf32>
    %13 = vector.broadcast %5 : vector<1x32xf32> to vector<8x32xf32>
    %14 = arith.addf %12, %13 : vector<8x32xf32>
    %cst_21 = arith.constant dense<0.000000e+00> : vector<8x32xf32>
    %15 = tpu.matmul %1, %6, %cst_21 {dimension_numbers = #tpu.dot_dimension_numbers<[1], [0], [0], [1], [0, 0, 1, 1], [], []>} : vector<8x32xf32>, vector<32x32xf32>, vector<8x32xf32> -> vector<8x32xf32>
    %16 = vector.broadcast %7 : vector<1x32xf32> to vector<8x32xf32>
    %17 = arith.addf %15, %16 : vector<8x32xf32>
    %cst_22 = arith.constant dense<0.000000e+00> : vector<8x32xf32>
    %18 = tpu.matmul %1, %8, %cst_22 {dimension_numbers = #tpu.dot_dimension_numbers<[1], [0], [0], [1], [0, 0, 1, 1], [], []>} : vector<8x32xf32>, vector<32x32xf32>, vector<8x32xf32> -> vector<8x32xf32>
    %19 = vector.broadcast %9 : vector<1x32xf32> to vector<8x32xf32>
    %20 = arith.addf %18, %19 : vector<8x32xf32>
    %21 = vector.extract_strided_slice %14 {offsets = [0, 0], sizes = [8, 8], strides = [1, 1]} : vector<8x32xf32> to vector<8x8xf32>
    %22 = vector.extract_strided_slice %17 {offsets = [0, 0], sizes = [8, 8], strides = [1, 1]} : vector<8x32xf32> to vector<8x8xf32>
    %23 = vector.extract_strided_slice %20 {offsets = [0, 0], sizes = [8, 8], strides = [1, 1]} : vector<8x32xf32> to vector<8x8xf32>
    %cst_23 = arith.constant dense<0.000000e+00> : vector<8x8xf32>
    %24 = tpu.matmul %21, %22, %cst_23 {dimension_numbers = #tpu.dot_dimension_numbers<[1], [1], [0], [0], [0, 0, 1, 0], [], []>} : vector<8x8xf32>, vector<8x8xf32>, vector<8x8xf32> -> vector<8x8xf32>
    %cst_24 = arith.constant dense<0xFF800000> : vector<8xf32>
    %25 = vector.multi_reduction <maximumf>, %24, %cst_24 [1] : vector<8x8xf32> to vector<8xf32>
    %26 = vector.shape_cast %25 : vector<8xf32> to vector<8x1xf32>
    %27 = vector.broadcast %26 : vector<8x1xf32> to vector<8x8xf32>
    %28 = arith.subf %24, %27 : vector<8x8xf32>
    %29 = math.exp %28 : vector<8x8xf32>
    %cst_25 = arith.constant dense<0.000000e+00> : vector<8xf32>
    %30 = vector.multi_reduction <add>, %29, %cst_25 [1] : vector<8x8xf32> to vector<8xf32>
    %31 = vector.shape_cast %30 : vector<8xf32> to vector<8x1xf32>
    %32 = tpu.reciprocal %31 {approx = true} : vector<8x1xf32> -> vector<8x1xf32>
    %33 = vector.broadcast %32 : vector<8x1xf32> to vector<8x8xf32>
    %34 = arith.mulf %29, %33 : vector<8x8xf32>
    %cst_26 = arith.constant dense<0.000000e+00> : vector<8x8xf32>
    %35 = tpu.matmul %34, %23, %cst_26 {dimension_numbers = #tpu.dot_dimension_numbers<[1], [0], [0], [1], [0, 0, 1, 1], [], []>} : vector<8x8xf32>, vector<8x8xf32>, vector<8x8xf32> -> vector<8x8xf32>
    %36 = vector.extract_strided_slice %10 {offsets = [0, 0], sizes = [8, 32], strides = [1, 1]} : vector<32x32xf32> to vector<8x32xf32>
    %cst_27 = arith.constant dense<0.000000e+00> : vector<8x32xf32>
    %37 = tpu.matmul %35, %36, %cst_27 {dimension_numbers = #tpu.dot_dimension_numbers<[1], [0], [0], [1], [0, 0, 1, 1], [], []>} : vector<8x8xf32>, vector<8x32xf32>, vector<8x32xf32> -> vector<8x32xf32>
    %38 = vector.extract_strided_slice %14 {offsets = [0, 8], sizes = [8, 8], strides = [1, 1]} : vector<8x32xf32> to vector<8x8xf32>
    %39 = vector.extract_strided_slice %17 {offsets = [0, 8], sizes = [8, 8], strides = [1, 1]} : vector<8x32xf32> to vector<8x8xf32>
    %40 = vector.extract_strided_slice %20 {offsets = [0, 8], sizes = [8, 8], strides = [1, 1]} : vector<8x32xf32> to vector<8x8xf32>
    %cst_28 = arith.constant dense<0.000000e+00> : vector<8x8xf32>
    %41 = tpu.matmul %38, %39, %cst_28 {dimension_numbers = #tpu.dot_dimension_numbers<[1], [1], [0], [0], [0, 0, 1, 0], [], []>} : vector<8x8xf32>, vector<8x8xf32>, vector<8x8xf32> -> vector<8x8xf32>
    %cst_29 = arith.constant dense<0xFF800000> : vector<8xf32>
    %42 = vector.multi_reduction <maximumf>, %41, %cst_29 [1] : vector<8x8xf32> to vector<8xf32>
    %43 = vector.shape_cast %42 : vector<8xf32> to vector<8x1xf32>
    %44 = vector.broadcast %43 : vector<8x1xf32> to vector<8x8xf32>
    %45 = arith.subf %41, %44 : vector<8x8xf32>
    %46 = math.exp %45 : vector<8x8xf32>
    %cst_30 = arith.constant dense<0.000000e+00> : vector<8xf32>
    %47 = vector.multi_reduction <add>, %46, %cst_30 [1] : vector<8x8xf32> to vector<8xf32>
    %48 = vector.shape_cast %47 : vector<8xf32> to vector<8x1xf32>
    %49 = tpu.reciprocal %48 {approx = true} : vector<8x1xf32> -> vector<8x1xf32>
    %50 = vector.broadcast %49 : vector<8x1xf32> to vector<8x8xf32>
    %51 = arith.mulf %46, %50 : vector<8x8xf32>
    %cst_31 = arith.constant dense<0.000000e+00> : vector<8x8xf32>
    %52 = tpu.matmul %51, %40, %cst_31 {dimension_numbers = #tpu.dot_dimension_numbers<[1], [0], [0], [1], [0, 0, 1, 1], [], []>} : vector<8x8xf32>, vector<8x8xf32>, vector<8x8xf32> -> vector<8x8xf32>
    %53 = vector.extract_strided_slice %10 {offsets = [8, 0], sizes = [8, 32], strides = [1, 1]} : vector<32x32xf32> to vector<8x32xf32>
    %cst_32 = arith.constant dense<0.000000e+00> : vector<8x32xf32>
    %54 = tpu.matmul %52, %53, %cst_32 {dimension_numbers = #tpu.dot_dimension_numbers<[1], [0], [0], [1], [0, 0, 1, 1], [], []>} : vector<8x8xf32>, vector<8x32xf32>, vector<8x32xf32> -> vector<8x32xf32>
    %55 = arith.addf %37, %54 : vector<8x32xf32>
    %56 = vector.extract_strided_slice %14 {offsets = [0, 16], sizes = [8, 8], strides = [1, 1]} : vector<8x32xf32> to vector<8x8xf32>
    %57 = vector.extract_strided_slice %17 {offsets = [0, 16], sizes = [8, 8], strides = [1, 1]} : vector<8x32xf32> to vector<8x8xf32>
    %58 = vector.extract_strided_slice %20 {offsets = [0, 16], sizes = [8, 8], strides = [1, 1]} : vector<8x32xf32> to vector<8x8xf32>
    %cst_33 = arith.constant dense<0.000000e+00> : vector<8x8xf32>
    %59 = tpu.matmul %56, %57, %cst_33 {dimension_numbers = #tpu.dot_dimension_numbers<[1], [1], [0], [0], [0, 0, 1, 0], [], []>} : vector<8x8xf32>, vector<8x8xf32>, vector<8x8xf32> -> vector<8x8xf32>
    %cst_34 = arith.constant dense<0xFF800000> : vector<8xf32>
    %60 = vector.multi_reduction <maximumf>, %59, %cst_34 [1] : vector<8x8xf32> to vector<8xf32>
    %61 = vector.shape_cast %60 : vector<8xf32> to vector<8x1xf32>
    %62 = vector.broadcast %61 : vector<8x1xf32> to vector<8x8xf32>
    %63 = arith.subf %59, %62 : vector<8x8xf32>
    %64 = math.exp %63 : vector<8x8xf32>
    %cst_35 = arith.constant dense<0.000000e+00> : vector<8xf32>
    %65 = vector.multi_reduction <add>, %64, %cst_35 [1] : vector<8x8xf32> to vector<8xf32>
    %66 = vector.shape_cast %65 : vector<8xf32> to vector<8x1xf32>
    %67 = tpu.reciprocal %66 {approx = true} : vector<8x1xf32> -> vector<8x1xf32>
    %68 = vector.broadcast %67 : vector<8x1xf32> to vector<8x8xf32>
    %69 = arith.mulf %64, %68 : vector<8x8xf32>
    %cst_36 = arith.constant dense<0.000000e+00> : vector<8x8xf32>
    %70 = tpu.matmul %69, %58, %cst_36 {dimension_numbers = #tpu.dot_dimension_numbers<[1], [0], [0], [1], [0, 0, 1, 1], [], []>} : vector<8x8xf32>, vector<8x8xf32>, vector<8x8xf32> -> vector<8x8xf32>
    %71 = vector.extract_strided_slice %10 {offsets = [16, 0], sizes = [8, 32], strides = [1, 1]} : vector<32x32xf32> to vector<8x32xf32>
    %cst_37 = arith.constant dense<0.000000e+00> : vector<8x32xf32>
    %72 = tpu.matmul %70, %71, %cst_37 {dimension_numbers = #tpu.dot_dimension_numbers<[1], [0], [0], [1], [0, 0, 1, 1], [], []>} : vector<8x8xf32>, vector<8x32xf32>, vector<8x32xf32> -> vector<8x32xf32>
    %73 = arith.addf %55, %72 : vector<8x32xf32>
    %74 = vector.extract_strided_slice %14 {offsets = [0, 24], sizes = [8, 8], strides = [1, 1]} : vector<8x32xf32> to vector<8x8xf32>
    %75 = vector.extract_strided_slice %17 {offsets = [0, 24], sizes = [8, 8], strides = [1, 1]} : vector<8x32xf32> to vector<8x8xf32>
    %76 = vector.extract_strided_slice %20 {offsets = [0, 24], sizes = [8, 8], strides = [1, 1]} : vector<8x32xf32> to vector<8x8xf32>
    %cst_38 = arith.constant dense<0.000000e+00> : vector<8x8xf32>
    %77 = tpu.matmul %74, %75, %cst_38 {dimension_numbers = #tpu.dot_dimension_numbers<[1], [1], [0], [0], [0, 0, 1, 0], [], []>} : vector<8x8xf32>, vector<8x8xf32>, vector<8x8xf32> -> vector<8x8xf32>
    %cst_39 = arith.constant dense<0xFF800000> : vector<8xf32>
    %78 = vector.multi_reduction <maximumf>, %77, %cst_39 [1] : vector<8x8xf32> to vector<8xf32>
    %79 = vector.shape_cast %78 : vector<8xf32> to vector<8x1xf32>
    %80 = vector.broadcast %79 : vector<8x1xf32> to vector<8x8xf32>
    %81 = arith.subf %77, %80 : vector<8x8xf32>
    %82 = math.exp %81 : vector<8x8xf32>
    %cst_40 = arith.constant dense<0.000000e+00> : vector<8xf32>
    %83 = vector.multi_reduction <add>, %82, %cst_40 [1] : vector<8x8xf32> to vector<8xf32>
    %84 = vector.shape_cast %83 : vector<8xf32> to vector<8x1xf32>
    %85 = tpu.reciprocal %84 {approx = true} : vector<8x1xf32> -> vector<8x1xf32>
    %86 = vector.broadcast %85 : vector<8x1xf32> to vector<8x8xf32>
    %87 = arith.mulf %82, %86 : vector<8x8xf32>
    %cst_41 = arith.constant dense<0.000000e+00> : vector<8x8xf32>
    %88 = tpu.matmul %87, %76, %cst_41 {dimension_numbers = #tpu.dot_dimension_numbers<[1], [0], [0], [1], [0, 0, 1, 1], [], []>} : vector<8x8xf32>, vector<8x8xf32>, vector<8x8xf32> -> vector<8x8xf32>
    %89 = vector.extract_strided_slice %10 {offsets = [24, 0], sizes = [8, 32], strides = [1, 1]} : vector<32x32xf32> to vector<8x32xf32>
    %cst_42 = arith.constant dense<0.000000e+00> : vector<8x32xf32>
    %90 = tpu.matmul %88, %89, %cst_42 {dimension_numbers = #tpu.dot_dimension_numbers<[1], [0], [0], [1], [0, 0, 1, 1], [], []>} : vector<8x8xf32>, vector<8x32xf32>, vector<8x32xf32> -> vector<8x32xf32>
    %91 = arith.addf %73, %90 : vector<8x32xf32>
    %92 = vector.broadcast %11 : vector<1x32xf32> to vector<8x32xf32>
    %93 = arith.addf %91, %92 : vector<8x32xf32>
    %94 = arith.addf %1, %93 : vector<8x32xf32>
    %c0_43 = arith.constant 0 : index
    %c0_44 = arith.constant 0 : index
    %95 = vector.load %arg11[%c0_43, %c0_44] : memref<1x32xf32, #tpu.memory_space<vmem>>, vector<1x32xf32>
    %c0_45 = arith.constant 0 : index
    %c0_46 = arith.constant 0 : index
    %96 = vector.load %arg12[%c0_45, %c0_46] : memref<1x32xf32, #tpu.memory_space<vmem>>, vector<1x32xf32>
    %cst_47 = arith.constant dense<0.000000e+00> : vector<8xf32>
    %97 = vector.multi_reduction <add>, %94, %cst_47 [1] : vector<8x32xf32> to vector<8xf32>
    %98 = vector.shape_cast %97 : vector<8xf32> to vector<8x1xf32>
    %cst_48 = arith.constant 3.200000e+01 : f32
    %99 = vector.broadcast %cst_48 : f32 to vector<8x1xf32>
    %100 = arith.divf %98, %99 : vector<8x1xf32>
    %101 = vector.broadcast %100 : vector<8x1xf32> to vector<8x32xf32>
    %102 = arith.subf %94, %101 : vector<8x32xf32>
    %103 = arith.mulf %102, %102 : vector<8x32xf32>
    %cst_49 = arith.constant dense<0.000000e+00> : vector<8xf32>
    %104 = vector.multi_reduction <add>, %103, %cst_49 [1] : vector<8x32xf32> to vector<8xf32>
    %105 = vector.shape_cast %104 : vector<8xf32> to vector<8x1xf32>
    %cst_50 = arith.constant 3.200000e+01 : f32
    %106 = vector.broadcast %cst_50 : f32 to vector<8x1xf32>
    %107 = arith.divf %105, %106 : vector<8x1xf32>
    %108 = vector.broadcast %100 : vector<8x1xf32> to vector<8x32xf32>
    %109 = arith.subf %94, %108 : vector<8x32xf32>
    %cst_51 = arith.constant 9.99999974E-6 : f32
    %110 = vector.broadcast %cst_51 : f32 to vector<8x1xf32>
    %111 = arith.addf %107, %110 : vector<8x1xf32>
    %112 = math.rsqrt %111 : vector<8x1xf32>
    %113 = vector.broadcast %112 : vector<8x1xf32> to vector<8x32xf32>
    %114 = arith.mulf %109, %113 : vector<8x32xf32>
    %115 = vector.broadcast %95 : vector<1x32xf32> to vector<8x32xf32>
    %116 = arith.mulf %114, %115 : vector<8x32xf32>
    %117 = vector.broadcast %96 : vector<1x32xf32> to vector<8x32xf32>
    %118 = arith.addf %116, %117 : vector<8x32xf32>
    %c0_52 = arith.constant 0 : index
    %c0_53 = arith.constant 0 : index
    %119 = vector.load %arg13[%c0_52, %c0_53] : memref<32x32xf32, #tpu.memory_space<vmem>>, vector<32x32xf32>
    %c0_54 = arith.constant 0 : index
    %c0_55 = arith.constant 0 : index
    %120 = vector.load %arg14[%c0_54, %c0_55] : memref<1x32xf32, #tpu.memory_space<vmem>>, vector<1x32xf32>
    %c0_56 = arith.constant 0 : index
    %c0_57 = arith.constant 0 : index
    %121 = vector.load %arg15[%c0_56, %c0_57] : memref<32x32xf32, #tpu.memory_space<vmem>>, vector<32x32xf32>
    %c0_58 = arith.constant 0 : index
    %c0_59 = arith.constant 0 : index
    %122 = vector.load %arg16[%c0_58, %c0_59] : memref<1x32xf32, #tpu.memory_space<vmem>>, vector<1x32xf32>
    %c0_60 = arith.constant 0 : index
    %c0_61 = arith.constant 0 : index
    %123 = vector.load %arg17[%c0_60, %c0_61] : memref<32x32xf32, #tpu.memory_space<vmem>>, vector<32x32xf32>
    %c0_62 = arith.constant 0 : index
    %c0_63 = arith.constant 0 : index
    %124 = vector.load %arg18[%c0_62, %c0_63] : memref<1x32xf32, #tpu.memory_space<vmem>>, vector<1x32xf32>
    %c0_64 = arith.constant 0 : index
    %c0_65 = arith.constant 0 : index
    %125 = vector.load %arg19[%c0_64, %c0_65] : memref<32x32xf32, #tpu.memory_space<vmem>>, vector<32x32xf32>
    %c0_66 = arith.constant 0 : index
    %c0_67 = arith.constant 0 : index
    %126 = vector.load %arg20[%c0_66, %c0_67] : memref<1x32xf32, #tpu.memory_space<vmem>>, vector<1x32xf32>
    %cst_68 = arith.constant dense<0.000000e+00> : vector<8x32xf32>
    %127 = tpu.matmul %118, %119, %cst_68 {dimension_numbers = #tpu.dot_dimension_numbers<[1], [0], [0], [1], [0, 0, 1, 1], [], []>} : vector<8x32xf32>, vector<32x32xf32>, vector<8x32xf32> -> vector<8x32xf32>
    %128 = vector.broadcast %120 : vector<1x32xf32> to vector<8x32xf32>
    %129 = arith.addf %127, %128 : vector<8x32xf32>
    %cst_69 = arith.constant dense<0.000000e+00> : vector<8x32xf32>
    %130 = tpu.matmul %3, %121, %cst_69 {dimension_numbers = #tpu.dot_dimension_numbers<[1], [0], [0], [1], [0, 0, 1, 1], [], []>} : vector<8x32xf32>, vector<32x32xf32>, vector<8x32xf32> -> vector<8x32xf32>
    %131 = vector.broadcast %122 : vector<1x32xf32> to vector<8x32xf32>
    %132 = arith.addf %130, %131 : vector<8x32xf32>
    %cst_70 = arith.constant dense<0.000000e+00> : vector<8x32xf32>
    %133 = tpu.matmul %3, %123, %cst_70 {dimension_numbers = #tpu.dot_dimension_numbers<[1], [0], [0], [1], [0, 0, 1, 1], [], []>} : vector<8x32xf32>, vector<32x32xf32>, vector<8x32xf32> -> vector<8x32xf32>
    %134 = vector.broadcast %124 : vector<1x32xf32> to vector<8x32xf32>
    %135 = arith.addf %133, %134 : vector<8x32xf32>
    %136 = vector.extract_strided_slice %129 {offsets = [0, 0], sizes = [8, 8], strides = [1, 1]} : vector<8x32xf32> to vector<8x8xf32>
    %137 = vector.extract_strided_slice %132 {offsets = [0, 0], sizes = [8, 8], strides = [1, 1]} : vector<8x32xf32> to vector<8x8xf32>
    %138 = vector.extract_strided_slice %135 {offsets = [0, 0], sizes = [8, 8], strides = [1, 1]} : vector<8x32xf32> to vector<8x8xf32>
    %cst_71 = arith.constant dense<0.000000e+00> : vector<8x8xf32>
    %139 = tpu.matmul %136, %137, %cst_71 {dimension_numbers = #tpu.dot_dimension_numbers<[1], [1], [0], [0], [0, 0, 1, 0], [], []>} : vector<8x8xf32>, vector<8x8xf32>, vector<8x8xf32> -> vector<8x8xf32>
    %cst_72 = arith.constant dense<0xFF800000> : vector<8xf32>
    %140 = vector.multi_reduction <maximumf>, %139, %cst_72 [1] : vector<8x8xf32> to vector<8xf32>
    %141 = vector.shape_cast %140 : vector<8xf32> to vector<8x1xf32>
    %142 = vector.broadcast %141 : vector<8x1xf32> to vector<8x8xf32>
    %143 = arith.subf %139, %142 : vector<8x8xf32>
    %144 = math.exp %143 : vector<8x8xf32>
    %cst_73 = arith.constant dense<0.000000e+00> : vector<8xf32>
    %145 = vector.multi_reduction <add>, %144, %cst_73 [1] : vector<8x8xf32> to vector<8xf32>
    %146 = vector.shape_cast %145 : vector<8xf32> to vector<8x1xf32>
    %147 = tpu.reciprocal %146 {approx = true} : vector<8x1xf32> -> vector<8x1xf32>
    %148 = vector.broadcast %147 : vector<8x1xf32> to vector<8x8xf32>
    %149 = arith.mulf %144, %148 : vector<8x8xf32>
    %cst_74 = arith.constant dense<0.000000e+00> : vector<8x8xf32>
    %150 = tpu.matmul %149, %138, %cst_74 {dimension_numbers = #tpu.dot_dimension_numbers<[1], [0], [0], [1], [0, 0, 1, 1], [], []>} : vector<8x8xf32>, vector<8x8xf32>, vector<8x8xf32> -> vector<8x8xf32>
    %151 = vector.extract_strided_slice %125 {offsets = [0, 0], sizes = [8, 32], strides = [1, 1]} : vector<32x32xf32> to vector<8x32xf32>
    %cst_75 = arith.constant dense<0.000000e+00> : vector<8x32xf32>
    %152 = tpu.matmul %150, %151, %cst_75 {dimension_numbers = #tpu.dot_dimension_numbers<[1], [0], [0], [1], [0, 0, 1, 1], [], []>} : vector<8x8xf32>, vector<8x32xf32>, vector<8x32xf32> -> vector<8x32xf32>
    %153 = vector.extract_strided_slice %129 {offsets = [0, 8], sizes = [8, 8], strides = [1, 1]} : vector<8x32xf32> to vector<8x8xf32>
    %154 = vector.extract_strided_slice %132 {offsets = [0, 8], sizes = [8, 8], strides = [1, 1]} : vector<8x32xf32> to vector<8x8xf32>
    %155 = vector.extract_strided_slice %135 {offsets = [0, 8], sizes = [8, 8], strides = [1, 1]} : vector<8x32xf32> to vector<8x8xf32>
    %cst_76 = arith.constant dense<0.000000e+00> : vector<8x8xf32>
    %156 = tpu.matmul %153, %154, %cst_76 {dimension_numbers = #tpu.dot_dimension_numbers<[1], [1], [0], [0], [0, 0, 1, 0], [], []>} : vector<8x8xf32>, vector<8x8xf32>, vector<8x8xf32> -> vector<8x8xf32>
    %cst_77 = arith.constant dense<0xFF800000> : vector<8xf32>
    %157 = vector.multi_reduction <maximumf>, %156, %cst_77 [1] : vector<8x8xf32> to vector<8xf32>
    %158 = vector.shape_cast %157 : vector<8xf32> to vector<8x1xf32>
    %159 = vector.broadcast %158 : vector<8x1xf32> to vector<8x8xf32>
    %160 = arith.subf %156, %159 : vector<8x8xf32>
    %161 = math.exp %160 : vector<8x8xf32>
    %cst_78 = arith.constant dense<0.000000e+00> : vector<8xf32>
    %162 = vector.multi_reduction <add>, %161, %cst_78 [1] : vector<8x8xf32> to vector<8xf32>
    %163 = vector.shape_cast %162 : vector<8xf32> to vector<8x1xf32>
    %164 = tpu.reciprocal %163 {approx = true} : vector<8x1xf32> -> vector<8x1xf32>
    %165 = vector.broadcast %164 : vector<8x1xf32> to vector<8x8xf32>
    %166 = arith.mulf %161, %165 : vector<8x8xf32>
    %cst_79 = arith.constant dense<0.000000e+00> : vector<8x8xf32>
    %167 = tpu.matmul %166, %155, %cst_79 {dimension_numbers = #tpu.dot_dimension_numbers<[1], [0], [0], [1], [0, 0, 1, 1], [], []>} : vector<8x8xf32>, vector<8x8xf32>, vector<8x8xf32> -> vector<8x8xf32>
    %168 = vector.extract_strided_slice %125 {offsets = [8, 0], sizes = [8, 32], strides = [1, 1]} : vector<32x32xf32> to vector<8x32xf32>
    %cst_80 = arith.constant dense<0.000000e+00> : vector<8x32xf32>
    %169 = tpu.matmul %167, %168, %cst_80 {dimension_numbers = #tpu.dot_dimension_numbers<[1], [0], [0], [1], [0, 0, 1, 1], [], []>} : vector<8x8xf32>, vector<8x32xf32>, vector<8x32xf32> -> vector<8x32xf32>
    %170 = arith.addf %152, %169 : vector<8x32xf32>
    %171 = vector.extract_strided_slice %129 {offsets = [0, 16], sizes = [8, 8], strides = [1, 1]} : vector<8x32xf32> to vector<8x8xf32>
    %172 = vector.extract_strided_slice %132 {offsets = [0, 16], sizes = [8, 8], strides = [1, 1]} : vector<8x32xf32> to vector<8x8xf32>
    %173 = vector.extract_strided_slice %135 {offsets = [0, 16], sizes = [8, 8], strides = [1, 1]} : vector<8x32xf32> to vector<8x8xf32>
    %cst_81 = arith.constant dense<0.000000e+00> : vector<8x8xf32>
    %174 = tpu.matmul %171, %172, %cst_81 {dimension_numbers = #tpu.dot_dimension_numbers<[1], [1], [0], [0], [0, 0, 1, 0], [], []>} : vector<8x8xf32>, vector<8x8xf32>, vector<8x8xf32> -> vector<8x8xf32>
    %cst_82 = arith.constant dense<0xFF800000> : vector<8xf32>
    %175 = vector.multi_reduction <maximumf>, %174, %cst_82 [1] : vector<8x8xf32> to vector<8xf32>
    %176 = vector.shape_cast %175 : vector<8xf32> to vector<8x1xf32>
    %177 = vector.broadcast %176 : vector<8x1xf32> to vector<8x8xf32>
    %178 = arith.subf %174, %177 : vector<8x8xf32>
    %179 = math.exp %178 : vector<8x8xf32>
    %cst_83 = arith.constant dense<0.000000e+00> : vector<8xf32>
    %180 = vector.multi_reduction <add>, %179, %cst_83 [1] : vector<8x8xf32> to vector<8xf32>
    %181 = vector.shape_cast %180 : vector<8xf32> to vector<8x1xf32>
    %182 = tpu.reciprocal %181 {approx = true} : vector<8x1xf32> -> vector<8x1xf32>
    %183 = vector.broadcast %182 : vector<8x1xf32> to vector<8x8xf32>
    %184 = arith.mulf %179, %183 : vector<8x8xf32>
    %cst_84 = arith.constant dense<0.000000e+00> : vector<8x8xf32>
    %185 = tpu.matmul %184, %173, %cst_84 {dimension_numbers = #tpu.dot_dimension_numbers<[1], [0], [0], [1], [0, 0, 1, 1], [], []>} : vector<8x8xf32>, vector<8x8xf32>, vector<8x8xf32> -> vector<8x8xf32>
    %186 = vector.extract_strided_slice %125 {offsets = [16, 0], sizes = [8, 32], strides = [1, 1]} : vector<32x32xf32> to vector<8x32xf32>
    %cst_85 = arith.constant dense<0.000000e+00> : vector<8x32xf32>
    %187 = tpu.matmul %185, %186, %cst_85 {dimension_numbers = #tpu.dot_dimension_numbers<[1], [0], [0], [1], [0, 0, 1, 1], [], []>} : vector<8x8xf32>, vector<8x32xf32>, vector<8x32xf32> -> vector<8x32xf32>
    %188 = arith.addf %170, %187 : vector<8x32xf32>
    %189 = vector.extract_strided_slice %129 {offsets = [0, 24], sizes = [8, 8], strides = [1, 1]} : vector<8x32xf32> to vector<8x8xf32>
    %190 = vector.extract_strided_slice %132 {offsets = [0, 24], sizes = [8, 8], strides = [1, 1]} : vector<8x32xf32> to vector<8x8xf32>
    %191 = vector.extract_strided_slice %135 {offsets = [0, 24], sizes = [8, 8], strides = [1, 1]} : vector<8x32xf32> to vector<8x8xf32>
    %cst_86 = arith.constant dense<0.000000e+00> : vector<8x8xf32>
    %192 = tpu.matmul %189, %190, %cst_86 {dimension_numbers = #tpu.dot_dimension_numbers<[1], [1], [0], [0], [0, 0, 1, 0], [], []>} : vector<8x8xf32>, vector<8x8xf32>, vector<8x8xf32> -> vector<8x8xf32>
    %cst_87 = arith.constant dense<0xFF800000> : vector<8xf32>
    %193 = vector.multi_reduction <maximumf>, %192, %cst_87 [1] : vector<8x8xf32> to vector<8xf32>
    %194 = vector.shape_cast %193 : vector<8xf32> to vector<8x1xf32>
    %195 = vector.broadcast %194 : vector<8x1xf32> to vector<8x8xf32>
    %196 = arith.subf %192, %195 : vector<8x8xf32>
    %197 = math.exp %196 : vector<8x8xf32>
    %cst_88 = arith.constant dense<0.000000e+00> : vector<8xf32>
    %198 = vector.multi_reduction <add>, %197, %cst_88 [1] : vector<8x8xf32> to vector<8xf32>
    %199 = vector.shape_cast %198 : vector<8xf32> to vector<8x1xf32>
    %200 = tpu.reciprocal %199 {approx = true} : vector<8x1xf32> -> vector<8x1xf32>
    %201 = vector.broadcast %200 : vector<8x1xf32> to vector<8x8xf32>
    %202 = arith.mulf %197, %201 : vector<8x8xf32>
    %cst_89 = arith.constant dense<0.000000e+00> : vector<8x8xf32>
    %203 = tpu.matmul %202, %191, %cst_89 {dimension_numbers = #tpu.dot_dimension_numbers<[1], [0], [0], [1], [0, 0, 1, 1], [], []>} : vector<8x8xf32>, vector<8x8xf32>, vector<8x8xf32> -> vector<8x8xf32>
    %204 = vector.extract_strided_slice %125 {offsets = [24, 0], sizes = [8, 32], strides = [1, 1]} : vector<32x32xf32> to vector<8x32xf32>
    %cst_90 = arith.constant dense<0.000000e+00> : vector<8x32xf32>
    %205 = tpu.matmul %203, %204, %cst_90 {dimension_numbers = #tpu.dot_dimension_numbers<[1], [0], [0], [1], [0, 0, 1, 1], [], []>} : vector<8x8xf32>, vector<8x32xf32>, vector<8x32xf32> -> vector<8x32xf32>
    %206 = arith.addf %188, %205 : vector<8x32xf32>
    %207 = vector.broadcast %126 : vector<1x32xf32> to vector<8x32xf32>
    %208 = arith.addf %206, %207 : vector<8x32xf32>
    %209 = arith.addf %118, %208 : vector<8x32xf32>
    %c0_91 = arith.constant 0 : index
    %c0_92 = arith.constant 0 : index
    %210 = vector.load %arg21[%c0_91, %c0_92] : memref<1x32xf32, #tpu.memory_space<vmem>>, vector<1x32xf32>
    %c0_93 = arith.constant 0 : index
    %c0_94 = arith.constant 0 : index
    %211 = vector.load %arg22[%c0_93, %c0_94] : memref<1x32xf32, #tpu.memory_space<vmem>>, vector<1x32xf32>
    %cst_95 = arith.constant dense<0.000000e+00> : vector<8xf32>
    %212 = vector.multi_reduction <add>, %209, %cst_95 [1] : vector<8x32xf32> to vector<8xf32>
    %213 = vector.shape_cast %212 : vector<8xf32> to vector<8x1xf32>
    %cst_96 = arith.constant 3.200000e+01 : f32
    %214 = vector.broadcast %cst_96 : f32 to vector<8x1xf32>
    %215 = arith.divf %213, %214 : vector<8x1xf32>
    %216 = vector.broadcast %215 : vector<8x1xf32> to vector<8x32xf32>
    %217 = arith.subf %209, %216 : vector<8x32xf32>
    %218 = arith.mulf %217, %217 : vector<8x32xf32>
    %cst_97 = arith.constant dense<0.000000e+00> : vector<8xf32>
    %219 = vector.multi_reduction <add>, %218, %cst_97 [1] : vector<8x32xf32> to vector<8xf32>
    %220 = vector.shape_cast %219 : vector<8xf32> to vector<8x1xf32>
    %cst_98 = arith.constant 3.200000e+01 : f32
    %221 = vector.broadcast %cst_98 : f32 to vector<8x1xf32>
    %222 = arith.divf %220, %221 : vector<8x1xf32>
    %223 = vector.broadcast %215 : vector<8x1xf32> to vector<8x32xf32>
    %224 = arith.subf %209, %223 : vector<8x32xf32>
    %cst_99 = arith.constant 9.99999974E-6 : f32
    %225 = vector.broadcast %cst_99 : f32 to vector<8x1xf32>
    %226 = arith.addf %222, %225 : vector<8x1xf32>
    %227 = math.rsqrt %226 : vector<8x1xf32>
    %228 = vector.broadcast %227 : vector<8x1xf32> to vector<8x32xf32>
    %229 = arith.mulf %224, %228 : vector<8x32xf32>
    %230 = vector.broadcast %210 : vector<1x32xf32> to vector<8x32xf32>
    %231 = arith.mulf %229, %230 : vector<8x32xf32>
    %232 = vector.broadcast %211 : vector<1x32xf32> to vector<8x32xf32>
    %233 = arith.addf %231, %232 : vector<8x32xf32>
    %c0_100 = arith.constant 0 : index
    %c0_101 = arith.constant 0 : index
    %234 = vector.load %arg23[%c0_100, %c0_101] : memref<32x64xf32, #tpu.memory_space<vmem>>, vector<32x64xf32>
    %c0_102 = arith.constant 0 : index
    %c0_103 = arith.constant 0 : index
    %235 = vector.load %arg24[%c0_102, %c0_103] : memref<1x64xf32, #tpu.memory_space<vmem>>, vector<1x64xf32>
    %c0_104 = arith.constant 0 : index
    %c0_105 = arith.constant 0 : index
    %236 = vector.load %arg25[%c0_104, %c0_105] : memref<64x32xf32, #tpu.memory_space<vmem>>, vector<64x32xf32>
    %c0_106 = arith.constant 0 : index
    %c0_107 = arith.constant 0 : index
    %237 = vector.load %arg26[%c0_106, %c0_107] : memref<1x32xf32, #tpu.memory_space<vmem>>, vector<1x32xf32>
    %cst_108 = arith.constant dense<0.000000e+00> : vector<8x64xf32>
    %238 = tpu.matmul %233, %234, %cst_108 {dimension_numbers = #tpu.dot_dimension_numbers<[1], [0], [0], [1], [0, 0, 1, 1], [], []>} : vector<8x32xf32>, vector<32x64xf32>, vector<8x64xf32> -> vector<8x64xf32>
    %239 = vector.broadcast %235 : vector<1x64xf32> to vector<8x64xf32>
    %240 = arith.addf %238, %239 : vector<8x64xf32>
    %cst_109 = arith.constant 0.000000e+00 : f32
    %241 = vector.broadcast %cst_109 : f32 to vector<8x64xf32>
    %242 = arith.maximumf %240, %241 : vector<8x64xf32>
    %cst_110 = arith.constant dense<0.000000e+00> : vector<8x32xf32>
    %243 = tpu.matmul %242, %236, %cst_110 {dimension_numbers = #tpu.dot_dimension_numbers<[1], [0], [0], [1], [0, 0, 1, 1], [], []>} : vector<8x64xf32>, vector<64x32xf32>, vector<8x32xf32> -> vector<8x32xf32>
    %244 = vector.broadcast %237 : vector<1x32xf32> to vector<8x32xf32>
    %245 = arith.addf %243, %244 : vector<8x32xf32>
    %246 = arith.addf %233, %245 : vector<8x32xf32>
    %c0_111 = arith.constant 0 : index
    %c0_112 = arith.constant 0 : index
    %247 = vector.load %arg27[%c0_111, %c0_112] : memref<1x32xf32, #tpu.memory_space<vmem>>, vector<1x32xf32>
    %c0_113 = arith.constant 0 : index
    %c0_114 = arith.constant 0 : index
    %248 = vector.load %arg28[%c0_113, %c0_114] : memref<1x32xf32, #tpu.memory_space<vmem>>, vector<1x32xf32>
    %cst_115 = arith.constant dense<0.000000e+00> : vector<8xf32>
    %249 = vector.multi_reduction <add>, %246, %cst_115 [1] : vector<8x32xf32> to vector<8xf32>
    %250 = vector.shape_cast %249 : vector<8xf32> to vector<8x1xf32>
    %cst_116 = arith.constant 3.200000e+01 : f32
    %251 = vector.broadcast %cst_116 : f32 to vector<8x1xf32>
    %252 = arith.divf %250, %251 : vector<8x1xf32>
    %253 = vector.broadcast %252 : vector<8x1xf32> to vector<8x32xf32>
    %254 = arith.subf %246, %253 : vector<8x32xf32>
    %255 = arith.mulf %254, %254 : vector<8x32xf32>
    %cst_117 = arith.constant dense<0.000000e+00> : vector<8xf32>
    %256 = vector.multi_reduction <add>, %255, %cst_117 [1] : vector<8x32xf32> to vector<8xf32>
    %257 = vector.shape_cast %256 : vector<8xf32> to vector<8x1xf32>
    %cst_118 = arith.constant 3.200000e+01 : f32
    %258 = vector.broadcast %cst_118 : f32 to vector<8x1xf32>
    %259 = arith.divf %257, %258 : vector<8x1xf32>
    %260 = vector.broadcast %252 : vector<8x1xf32> to vector<8x32xf32>
    %261 = arith.subf %246, %260 : vector<8x32xf32>
    %cst_119 = arith.constant 9.99999974E-6 : f32
    %262 = vector.broadcast %cst_119 : f32 to vector<8x1xf32>
    %263 = arith.addf %259, %262 : vector<8x1xf32>
    %264 = math.rsqrt %263 : vector<8x1xf32>
    %265 = vector.broadcast %264 : vector<8x1xf32> to vector<8x32xf32>
    %266 = arith.mulf %261, %265 : vector<8x32xf32>
    %267 = vector.broadcast %247 : vector<1x32xf32> to vector<8x32xf32>
    %268 = arith.mulf %266, %267 : vector<8x32xf32>
    %269 = vector.broadcast %248 : vector<1x32xf32> to vector<8x32xf32>
    %270 = arith.addf %268, %269 : vector<8x32xf32>
    %c0_120 = arith.constant 0 : index
    %c0_121 = arith.constant 0 : index
    %c0_122 = arith.constant 0 : index
    %271 = vector.load %arg29[%c0_120, %c0_121, %c0_122] : memref<1x8x32xf32, #tpu.memory_space<vmem>>, vector<1x8x32xf32>
    %272 = vector.shape_cast %271 : vector<1x8x32xf32> to vector<8x32xf32>
    %273 = vector.shape_cast %270 : vector<8x32xf32> to vector<1x8x32xf32>
    tpu.vector_store %arg29[%c0_120, %c0_121, %c0_122], %273 {strides = array<i32>} : memref<1x8x32xf32, #tpu.memory_space<vmem>>, vector<1x8x32xf32>,
    return
  }
  func.func @transform_0(%arg0: i32) -> (i32, i32, i32) {
    %c0_i32 = arith.constant 0 : i32
    %c0_i32_0 = arith.constant 0 : i32
    %c0_i32_1 = arith.constant 0 : i32
    return %arg0, %c0_i32, %c0_i32_0 : i32, i32, i32
  }
  func.func @transform_1(%arg0: i32) -> (i32, i32, i32) {
    %c0_i32 = arith.constant 0 : i32
    %c0_i32_0 = arith.constant 0 : i32
    %c0_i32_1 = arith.constant 0 : i32
    return %arg0, %c0_i32, %c0_i32_0 : i32, i32, i32
  }
  func.func @transform_2(%arg0: i32) -> (i32, i32) {
    %c0_i32 = arith.constant 0 : i32
    %c0_i32_0 = arith.constant 0 : i32
    %c0_i32_1 = arith.constant 0 : i32
    return %c0_i32, %c0_i32_0 : i32, i32
  }
  func.func @transform_3(%arg0: i32) -> (i32, i32) {
    %c0_i32 = arith.constant 0 : i32
    %c0_i32_0 = arith.constant 0 : i32
    %c0_i32_1 = arith.constant 0 : i32
    return %c0_i32, %c0_i32_0 : i32, i32
  }
  func.func @transform_4(%arg0: i32) -> (i32, i32) {
    %c0_i32 = arith.constant 0 : i32
    %c0_i32_0 = arith.constant 0 : i32
    %c0_i32_1 = arith.constant 0 : i32
    return %c0_i32, %c0_i32_0 : i32, i32
  }
  func.func @transform_5(%arg0: i32) -> (i32, i32) {
    %c0_i32 = arith.constant 0 : i32
    %c0_i32_0 = arith.constant 0 : i32
    %c0_i32_1 = arith.constant 0 : i32
    return %c0_i32, %c0_i32_0 : i32, i32
  }
  func.func @transform_6(%arg0: i32) -> (i32, i32) {
    %c0_i32 = arith.constant 0 : i32
    %c0_i32_0 = arith.constant 0 : i32
    %c0_i32_1 = arith.constant 0 : i32
    return %c0_i32, %c0_i32_0 : i32, i32
  }
  func.func @transform_7(%arg0: i32) -> (i32, i32) {
    %c0_i32 = arith.constant 0 : i32
    %c0_i32_0 = arith.constant 0 : i32
    %c0_i32_1 = arith.constant 0 : i32
    return %c0_i32, %c0_i32_0 : i32, i32
  }
  func.func @transform_8(%arg0: i32) -> (i32, i32) {
    %c0_i32 = arith.constant 0 : i32
    %c0_i32_0 = arith.constant 0 : i32
    %c0_i32_1 = arith.constant 0 : i32
    return %c0_i32, %c0_i32_0 : i32, i32
  }
  func.func @transform_9(%arg0: i32) -> (i32, i32) {
    %c0_i32 = arith.constant 0 : i32
    %c0_i32_0 = arith.constant 0 : i32
    %c0_i32_1 = arith.constant 0 : i32
    return %c0_i32, %c0_i32_0 : i32, i32
  }
  func.func @transform_10(%arg0: i32) -> (i32, i32) {
    %c0_i32 = arith.constant 0 : i32
    %c0_i32_0 = arith.constant 0 : i32
    %c0_i32_1 = arith.constant 0 : i32
    return %c0_i32, %c0_i32_0 : i32, i32
  }
  func.func @transform_11(%arg0: i32) -> (i32, i32) {
    %c0_i32 = arith.constant 0 : i32
    %c0_i32_0 = arith.constant 0 : i32
    %c0_i32_1 = arith.constant 0 : i32
    return %c0_i32, %c0_i32_0 : i32, i32
  }
  func.func @transform_12(%arg0: i32) -> (i32, i32) {
    %c0_i32 = arith.constant 0 : i32
    %c0_i32_0 = arith.constant 0 : i32
    %c0_i32_1 = arith.constant 0 : i32
    return %c0_i32, %c0_i32_0 : i32, i32
  }
  func.func @transform_13(%arg0: i32) -> (i32, i32) {
    %c0_i32 = arith.constant 0 : i32
    %c0_i32_0 = arith.constant 0 : i32
    %c0_i32_1 = arith.constant 0 : i32
    return %c0_i32, %c0_i32_0 : i32, i32
  }
  func.func @transform_14(%arg0: i32) -> (i32, i32) {
    %c0_i32 = arith.constant 0 : i32
    %c0_i32_0 = arith.constant 0 : i32
    %c0_i32_1 = arith.constant 0 : i32
    return %c0_i32, %c0_i32_0 : i32, i32
  }
  func.func @transform_15(%arg0: i32) -> (i32, i32) {
    %c0_i32 = arith.constant 0 : i32
    %c0_i32_0 = arith.constant 0 : i32
    %c0_i32_1 = arith.constant 0 : i32
    return %c0_i32, %c0_i32_0 : i32, i32
  }
  func.func @transform_16(%arg0: i32) -> (i32, i32) {
    %c0_i32 = arith.constant 0 : i32
    %c0_i32_0 = arith.constant 0 : i32
    %c0_i32_1 = arith.constant 0 : i32
    return %c0_i32, %c0_i32_0 : i32, i32
  }
  func.func @transform_17(%arg0: i32) -> (i32, i32) {
    %c0_i32 = arith.constant 0 : i32
    %c0_i32_0 = arith.constant 0 : i32
    %c0_i32_1 = arith.constant 0 : i32
    return %c0_i32, %c0_i32_0 : i32, i32
  }
  func.func @transform_18(%arg0: i32) -> (i32, i32) {
    %c0_i32 = arith.constant 0 : i32
    %c0_i32_0 = arith.constant 0 : i32
    %c0_i32_1 = arith.constant 0 : i32
    return %c0_i32, %c0_i32_0 : i32, i32
  }
  func.func @transform_19(%arg0: i32) -> (i32, i32) {
    %c0_i32 = arith.constant 0 : i32
    %c0_i32_0 = arith.constant 0 : i32
    %c0_i32_1 = arith.constant 0 : i32
    return %c0_i32, %c0_i32_0 : i32, i32
  }
  func.func @transform_20(%arg0: i32) -> (i32, i32) {
    %c0_i32 = arith.constant 0 : i32
    %c0_i32_0 = arith.constant 0 : i32
    %c0_i32_1 = arith.constant 0 : i32
    return %c0_i32, %c0_i32_0 : i32, i32
  }
  func.func @transform_21(%arg0: i32) -> (i32, i32) {
    %c0_i32 = arith.constant 0 : i32
    %c0_i32_0 = arith.constant 0 : i32
    %c0_i32_1 = arith.constant 0 : i32
    return %c0_i32, %c0_i32_0 : i32, i32
  }
  func.func @transform_22(%arg0: i32) -> (i32, i32) {
    %c0_i32 = arith.constant 0 : i32
    %c0_i32_0 = arith.constant 0 : i32
    %c0_i32_1 = arith.constant 0 : i32
    return %c0_i32, %c0_i32_0 : i32, i32
  }
  func.func @transform_23(%arg0: i32) -> (i32, i32) {
    %c0_i32 = arith.constant 0 : i32
    %c0_i32_0 = arith.constant 0 : i32
    %c0_i32_1 = arith.constant 0 : i32
    return %c0_i32, %c0_i32_0 : i32, i32
  }
  func.func @transform_24(%arg0: i32) -> (i32, i32) {
    %c0_i32 = arith.constant 0 : i32
    %c0_i32_0 = arith.constant 0 : i32
    %c0_i32_1 = arith.constant 0 : i32
    return %c0_i32, %c0_i32_0 : i32, i32
  }
  func.func @transform_25(%arg0: i32) -> (i32, i32) {
    %c0_i32 = arith.constant 0 : i32
    %c0_i32_0 = arith.constant 0 : i32
    %c0_i32_1 = arith.constant 0 : i32
    return %c0_i32, %c0_i32_0 : i32, i32
  }
  func.func @transform_26(%arg0: i32) -> (i32, i32) {
    %c0_i32 = arith.constant 0 : i32
    %c0_i32_0 = arith.constant 0 : i32
    %c0_i32_1 = arith.constant 0 : i32
    return %c0_i32, %c0_i32_0 : i32, i32
  }
  func.func @transform_27(%arg0: i32) -> (i32, i32) {
    %c0_i32 = arith.constant 0 : i32
    %c0_i32_0 = arith.constant 0 : i32
    %c0_i32_1 = arith.constant 0 : i32
    return %c0_i32, %c0_i32_0 : i32, i32
  }
  func.func @transform_28(%arg0: i32) -> (i32, i32, i32) {
    %c0_i32 = arith.constant 0 : i32
    %c0_i32_0 = arith.constant 0 : i32
    %c0_i32_1 = arith.constant 0 : i32
    return %arg0, %c0_i32, %c0_i32_0 : i32, i32, i32
  }
}

module attributes {stable_mosaic.version = 11 : i64} {
  func.func @kernel(%arg0: i32, %arg1: memref<1x8x32xf32, #tpu.memory_space<vmem>>, %arg2: memref<1x32xf32, #tpu.memory_space<vmem>>, %arg3: memref<1x32xf32, #tpu.memory_space<vmem>>, %arg4: memref<32x32xf32, #tpu.memory_space<vmem>>, %arg5: memref<1x32xf32, #tpu.memory_space<vmem>>, %arg6: memref<32x32xf32, #tpu.memory_space<vmem>>, %arg7: memref<1x8x32xf32, #tpu.memory_space<vmem>>) attributes {dimension_semantics = [#tpu.dimension_semantics<parallel>], iteration_bounds = array<i64: 2>, scalar_prefetch = 0 : i64, scratch_operands = 0 : i64, tpu.core_type = #tpu.core_type<tc>, window_params = [{transform_indices = @transform_0, window_bounds = array<i64: 1, 8, 32>}, {pipeline_mode = #tpu.pipeline_mode<synchronous>, transform_indices = @transform_1, window_bounds = array<i64: 1, 32>}, {pipeline_mode = #tpu.pipeline_mode<synchronous>, transform_indices = @transform_2, window_bounds = array<i64: 1, 32>}, {pipeline_mode = #tpu.pipeline_mode<synchronous>, transform_indices = @transform_3, window_bounds = array<i64: 32, 32>}, {pipeline_mode = #tpu.pipeline_mode<synchronous>, transform_indices = @transform_4, window_bounds = array<i64: 1, 32>}, {pipeline_mode = #tpu.pipeline_mode<synchronous>, transform_indices = @transform_5, window_bounds = array<i64: 32, 32>}, {transform_indices = @transform_6, window_bounds = array<i64: 1, 8, 32>}]} {
    %c0 = arith.constant 0 : index
    %c0_0 = arith.constant 0 : index
    %c0_1 = arith.constant 0 : index
    %0 = vector.load %arg1[%c0, %c0_0, %c0_1] : memref<1x8x32xf32, #tpu.memory_space<vmem>>, vector<1x8x32xf32>
    %1 = vector.shape_cast %0 : vector<1x8x32xf32> to vector<8x32xf32>
    %c0_2 = arith.constant 0 : index
    %c0_3 = arith.constant 0 : index
    %2 = vector.load %arg2[%c0_2, %c0_3] : memref<1x32xf32, #tpu.memory_space<vmem>>, vector<1x32xf32>
    %c0_4 = arith.constant 0 : index
    %c0_5 = arith.constant 0 : index
    %3 = vector.load %arg3[%c0_4, %c0_5] : memref<1x32xf32, #tpu.memory_space<vmem>>, vector<1x32xf32>
    %cst = arith.constant dense<0.000000e+00> : vector<8xf32>
    %4 = vector.multi_reduction <add>, %1, %cst [1] : vector<8x32xf32> to vector<8xf32>
    %5 = vector.shape_cast %4 : vector<8xf32> to vector<8x1xf32>
    %cst_6 = arith.constant 3.200000e+01 : f32
    %6 = vector.broadcast %cst_6 : f32 to vector<8x1xf32>
    %7 = arith.divf %5, %6 : vector<8x1xf32>
    %8 = vector.broadcast %7 : vector<8x1xf32> to vector<8x32xf32>
    %9 = arith.subf %1, %8 : vector<8x32xf32>
    %10 = arith.mulf %9, %9 : vector<8x32xf32>
    %cst_7 = arith.constant dense<0.000000e+00> : vector<8xf32>
    %11 = vector.multi_reduction <add>, %10, %cst_7 [1] : vector<8x32xf32> to vector<8xf32>
    %12 = vector.shape_cast %11 : vector<8xf32> to vector<8x1xf32>
    %cst_8 = arith.constant 3.200000e+01 : f32
    %13 = vector.broadcast %cst_8 : f32 to vector<8x1xf32>
    %14 = arith.divf %12, %13 : vector<8x1xf32>
    %15 = vector.broadcast %7 : vector<8x1xf32> to vector<8x32xf32>
    %16 = arith.subf %1, %15 : vector<8x32xf32>
    %cst_9 = arith.constant 9.99999974E-6 : f32
    %17 = vector.broadcast %cst_9 : f32 to vector<8x1xf32>
    %18 = arith.addf %14, %17 : vector<8x1xf32>
    %19 = math.rsqrt %18 : vector<8x1xf32>
    %20 = vector.broadcast %19 : vector<8x1xf32> to vector<8x32xf32>
    %21 = arith.mulf %16, %20 : vector<8x32xf32>
    %22 = vector.broadcast %2 : vector<1x32xf32> to vector<8x32xf32>
    %23 = arith.mulf %21, %22 : vector<8x32xf32>
    %24 = vector.broadcast %3 : vector<1x32xf32> to vector<8x32xf32>
    %25 = arith.addf %23, %24 : vector<8x32xf32>
    %c0_10 = arith.constant 0 : index
    %c0_11 = arith.constant 0 : index
    %26 = vector.load %arg4[%c0_10, %c0_11] : memref<32x32xf32, #tpu.memory_space<vmem>>, vector<32x32xf32>
    %cst_12 = arith.constant dense<0.000000e+00> : vector<8x32xf32>
    %27 = tpu.matmul %25, %26, %cst_12 {dimension_numbers = #tpu.dot_dimension_numbers<[1], [0], [0], [1], [0, 0, 1, 1], [], []>} : vector<8x32xf32>, vector<32x32xf32>, vector<8x32xf32> -> vector<8x32xf32>
    %c0_13 = arith.constant 0 : index
    %c0_14 = arith.constant 0 : index
    %28 = vector.load %arg5[%c0_13, %c0_14] : memref<1x32xf32, #tpu.memory_space<vmem>>, vector<1x32xf32>
    %29 = vector.broadcast %28 : vector<1x32xf32> to vector<8x32xf32>
    %30 = arith.addf %27, %29 : vector<8x32xf32>
    %c0_15 = arith.constant 0 : index
    %c0_16 = arith.constant 0 : index
    %31 = vector.load %arg6[%c0_15, %c0_16] : memref<32x32xf32, #tpu.memory_space<vmem>>, vector<32x32xf32>
    %cst_17 = arith.constant dense<0.000000e+00> : vector<8x32xf32>
    %32 = tpu.matmul %30, %31, %cst_17 {dimension_numbers = #tpu.dot_dimension_numbers<[1], [1], [0], [0], [0, 0, 1, 0], [], []>} : vector<8x32xf32>, vector<32x32xf32>, vector<8x32xf32> -> vector<8x32xf32>
    %cst_18 = arith.constant 0.000000e+00 : f32
    %33 = vector.broadcast %cst_18 : f32 to vector<8x32xf32>
    %34 = arith.cmpf one, %32, %33 : vector<8x32xf32>
    %cst_19 = arith.constant -1.000000e+10 : f32
    %35 = vector.broadcast %cst_19 : f32 to vector<8x32xf32>
    %36 = arith.select %34, %30, %35 : vector<8x32xi1>, vector<8x32xf32>
    %c0_20 = arith.constant 0 : index
    %c0_21 = arith.constant 0 : index
    %c0_22 = arith.constant 0 : index
    %37 = vector.load %arg7[%c0_20, %c0_21, %c0_22] : memref<1x8x32xf32, #tpu.memory_space<vmem>>, vector<1x8x32xf32>
    %38 = vector.shape_cast %37 : vector<1x8x32xf32> to vector<8x32xf32>
    %39 = vector.shape_cast %36 : vector<8x32xf32> to vector<1x8x32xf32>
    tpu.vector_store %arg7[%c0_20, %c0_21, %c0_22], %39 {strides = array<i32>} : memref<1x8x32xf32, #tpu.memory_space<vmem>>, vector<1x8x32xf32>,
    return
  }
  func.func @transform_0(%arg0: i32) -> (i32, i32, i32) {
    %c0_i32 = arith.constant 0 : i32
    %c0_i32_0 = arith.constant 0 : i32
    %c0_i32_1 = arith.constant 0 : i32
    return %arg0, %c0_i32, %c0_i32_0 : i32, i32, i32
  }
  func.func @transform_1(%arg0: i32) -> (i32, i32) {
    %c0_i32 = arith.constant 0 : i32
    %c0_i32_0 = arith.constant 0 : i32
    %c0_i32_1 = arith.constant 0 : i32
    return %c0_i32, %c0_i32_0 : i32, i32
  }
  func.func @transform_2(%arg0: i32) -> (i32, i32) {
    %c0_i32 = arith.constant 0 : i32
    %c0_i32_0 = arith.constant 0 : i32
    %c0_i32_1 = arith.constant 0 : i32
    return %c0_i32, %c0_i32_0 : i32, i32
  }
  func.func @transform_3(%arg0: i32) -> (i32, i32) {
    %c0_i32 = arith.constant 0 : i32
    %c0_i32_0 = arith.constant 0 : i32
    %c0_i32_1 = arith.constant 0 : i32
    return %c0_i32, %c0_i32_0 : i32, i32
  }
  func.func @transform_4(%arg0: i32) -> (i32, i32) {
    %c0_i32 = arith.constant 0 : i32
    %c0_i32_0 = arith.constant 0 : i32
    %c0_i32_1 = arith.constant 0 : i32
    return %c0_i32, %c0_i32_0 : i32, i32
  }
  func.func @transform_5(%arg0: i32) -> (i32, i32) {
    %c0_i32 = arith.constant 0 : i32
    %c0_i32_0 = arith.constant 0 : i32
    %c0_i32_1 = arith.constant 0 : i32
    return %c0_i32, %c0_i32_0 : i32, i32
  }
  func.func @transform_6(%arg0: i32) -> (i32, i32, i32) {
    %c0_i32 = arith.constant 0 : i32
    %c0_i32_0 = arith.constant 0 : i32
    %c0_i32_1 = arith.constant 0 : i32
    return %arg0, %c0_i32, %c0_i32_0 : i32, i32, i32
  }
}

</mosaic_0001>

<bundles_post_ra>
// kernel: transformer_forward.6
= control target key start
LH: loop header
LB: loop body
LE: loop exit
PB: predicated region body
PF: predicated region fallthrough
CT: control target
= control target key end

     0   :  { %s1672_s0 = inlined_call_operand.vmem [shape: f32[2,8,32], index: 0, kind: input, shape index: {}]   ;;  %s1673_s1 = inlined_call_operand.vmem [shape: f32[32,32], index: 1, kind: input, shape index: {}]   ;;  %s1674_s2 = inlined_call_operand.vmem [shape: f32[1,32], index: 2, kind: input, shape index: {}]   ;;  %s1675_s3 = inlined_call_operand.vmem [shape: f32[32,32], index: 3, kind: input, shape index: {}]   ;;  %s1676_s4 = inlined_call_operand.vmem [shape: f32[1,32], index: 4, kind: input, shape index: {}]   ;;  %s1677_s5 = inlined_call_operand.vmem [shape: f32[32,32], index: 5, kind: input, shape index: {}]   ;;  %s1678_s6 = inlined_call_operand.vmem [shape: f32[1,32], index: 6, kind: input, shape index: {}]   ;;  %s1679_s7 = inlined_call_operand.vmem [shape: f32[32,32], index: 7, kind: input, shape index: {}]   ;;  %s1680_s8 = inlined_call_operand.vmem [shape: f32[1,32], index: 8, kind: input, shape index: {}]   ;;  %s1681_s9 = inlined_call_operand.vmem [shape: f32[1,32], index: 9, kind: input, shape index: {}]   ;;  %s1682_s10 = inlined_call_operand.vmem [shape: f32[1,32], index: 10, kind: input, shape index: {}]   ;;  %s1683_s11 = inlined_call_operand.vmem [shape: f32[32,64], index: 11, kind: input, shape index: {}]   ;;  %s1684_s12 = inlined_call_operand.vmem [shape: f32[1,64], index: 12, kind: input, shape index: {}]   ;;  %s1685_s13 = inlined_call_operand.vmem [shape: f32[64,32], index: 13, kind: input, shape index: {}]   ;;  %s1686_s14 = inlined_call_operand.vmem [shape: f32[1,32], index: 14, kind: input, shape index: {}]   ;;  %s1687_s15 = inlined_call_operand.vmem [shape: f32[1,32], index: 15, kind: input, shape index: {}]   ;;  %s1688_s16 = inlined_call_operand.vmem [shape: f32[1,32], index: 16, kind: input, shape index: {}]   ;;  %s1689_s17 = inlined_call_operand.vmem [shape: f32[1,32], index: 17, kind: input, shape index: {}]   ;;  %s1690_s18 = inlined_call_operand.vmem [shape: f32[1,32], index: 18, kind: input, shape index: {}]   ;;  %s1691_s19 = inlined_call_operand.vmem [shape: f32[2,8,32], index: 19, kind: output, shape index: {}]  }
   0x1   :  { %1694 = sst [smem:[#allocation2_spill]] %s1672_s0  ;;  %s1464_s0 = smov 0  }
   0x2   :  { %1695 = sst [smem:[#allocation3_spill]] %s1673_s1 }
   0x3   :  { %1696 = sst [smem:[#allocation4_spill]] %s1674_s2 }
   0x4   :  { %1697 = sst [smem:[#allocation5_spill]] %s1675_s3 }
   0x5 LB: > { %s1274_s30 = sadd.s32 4294967295, %s1358_s0   ;;  %p1278_p0 = scmp.ge.s32.totalorder %s1358_s0, 1  ;;  %s1358_s0 = sphi %s1464_s0, %s29_s0  }
   0x6   : > { %p536_p1 = scmp.lt.s32.totalorder %s1358_s0, 3 }
   0x8   : > { %p537_p2 = pnand %p1278_p0, %p536_p1 }
   0x9   : > { %s1698_s1 = sld [smem:[#allocation5_spill]] (!%p537_p2)  ;;  %p590_p3 = scmp.lt.s32.totalorder (!%p537_p2), %s1274_s30, 1 }
   0xa   : > { %540 = sbr.rel (%p537_p2) target bundleno = 2396 (0x95c), region = 96  ;;  %s1699_s25 = sld [smem:[#allocation3_spill]] (!%p537_p2) }
   0xb   : > { %s1700_s27 = sld [smem:[#allocation2_spill]] (!%p537_p2)  ;;  %s1360_s24 = smov (!%p537_p2), 112  }
   0xc   : > { %s1701_s23 = sld [smem:[#allocation4_spill]] (!%p537_p2)  ;;  %s1361_s3 = smov (!%p537_p2), 120  }
   0xd   : > { %s1362_s26 = smov (!%p537_p2), 104  }
   0xf   : > { %v607_v0 = vld [vmem:[%s1698_s1 + $0x18] sm:$0xff]  ;;  %v606_v1 = vld [vmem:[%s1698_s1 + $0x10] sm:$0xff]  ;;  %v605_v4 = vld [vmem:[%s1698_s1 + $0x8] sm:$0xff]  ;;  %s1703_s30 = smov (!%p590_p3, %s1274_s30), 1  ;;  %vm622_vm0 = vcmask 261120   ;;  %vm692_vm1 = vcmask 64512  }
  0x10   : > { %v602_v2 = vld [vmem:[%s1699_s25 + $0x18] sm:$0xff]  ;;  %661 = vmatpush.msra.mxu1 %v607_v0  ;;  %v601_v3 = vld [vmem:[%s1699_s25 + $0x10] sm:$0xff]  ;;  %v600_v5 = vld [vmem:[%s1699_s25 + $0x8] sm:$0xff]  ;;  %s1279_s2 = sshll.u32 %s1703_s30, 3  ;;  %vm1131_vm6 = vcmask 523264  }
  0x11   : > { %638 = vmatpush.msra.mxu0 %v602_v2  ;;  %v604_v6 = vld [vmem:[%s1698_s1] sm:$0xff]  ;;  %s593_s28 = scalar_lea.vmem %s1700_s27, %s1279_s2  ;;  %v612_v15 = vld [vmem:[%s1677_s5 + $0x18] sm:$0xff]  ;;  %v611_v16 = vld [vmem:[%s1677_s5 + $0x10] sm:$0xff] }
  0x12   : > { %662 = vmatpush.msra.mxu1 %v606_v1  ;;  %v599_v7 = vld [vmem:[%s1699_s25] sm:$0xff]  ;;  %684 = vmatpush.msra.mxu2 %v612_v15  ;;  %v610_v17 = vld [vmem:[%s1677_s5 + $0x8] sm:$0xff]  ;;  %v617_v15 = vld [vmem:[%s1679_s7 + $0x18] sm:$0xff] }
  0x13   : > { %639 = vmatpush.msra.mxu0 %v601_v3  ;;  %v1504_v8 = vld [vmem:[%s593_s28] sm:$0xff]  ;;  %v615_v61 = vld [vmem:[%s1679_s7 + $0x8] sm:$0xff] }
  0x14   : > { %663 = vmatpush.msra.mxu1 %v605_v4  ;;  %v1316_v9 = vld [vmem:[%s1676_s4] ss:$0 sm:$0xff]  ;;  %685 = vmatpush.msra.mxu2 %v611_v16 }
  0x15   : > { %640 = vmatpush.msra.mxu0 %v600_v5  ;;  %v1317_v10 = vld [vmem:[%s1701_s23] ss:$0 sm:$0xff] }
  0x16   : > { %664 = vmatpush.msra.mxu1 %v604_v6  ;;  %686 = vmatpush.msra.mxu2 %v610_v17  ;;  %v609_v23 = vld [vmem:[%s1677_s5] sm:$0xff] }
  0x17   : > { %641 = vmatpush.msra.mxu0 %v599_v7  ;;  %1282 = vmatmul.msk.f32.vlgmr.msra.gmra.mxu1 %vm622_vm0, %v1504_v8  ;;  %v1318_v31 = vld [vmem:[%s1678_s6] ss:$0 sm:$0xff] }
  0x18   : > { %1281 = vmatmul.msk.f32.vlgmr.msra.gmra.mxu0 %vm622_vm0, %v1504_v8  ;;  %687 = vmatpush.msra.mxu2 %v609_v23  ;;  %v614_v34 = vld [vmem:[%s1679_s7] sm:$0xff] }
  0x19   : > { %1283 = vmatmul.msk.f32.vlgmr.msra.gmra.mxu2 %vm622_vm0, %v1504_v8 }
  0x1a   : > { %837 = vmatpush.msrb.mxu2 %v615_v61 }
  0x94   : > { %v666_v11 = vpop.f32.mrf.mxu1 }
  0x95   : > { %v643_v12 = vpop.f32.mrf.mxu0  ;;  %v667_v13 = vadd.f32 %v1316_v9, %v666_v11  ;;  %v616_v9 = vld [vmem:[%s1679_s7 + $0x10] sm:$0xff] }
  0x96   : > { %v644_v14 = vadd.f32 %v1317_v10, %v643_v12  ;;  %948 = vmatpush.msra.mxu2 %v616_v9 }
  0x97   : > { %867 = vrot.lane.b32.xlu2 %v667_v13, %s1360_s24  ;;  %755 = vrot.lane.b32.xlu1 %v667_v13, %s1361_s3 }
  0x98   : > { %1284 = vmatpush.xpose.msk.msrb.mxu0 %vm692_vm1, %v667_v13 }
  0x9b   : > { %1285 = vmatmul.msk.f32.vlgmr.msrb.gmra.mxu0 %vm692_vm1, %v644_v14 }
  0x9c   : > { %v689_v32 = vpop.f32.mrf.mxu2 }
  0x9d   : > { %v1547_v33 = vadd.f32 %v1318_v31, %v689_v32 }
  0x9f   : > { %956 = vrot.lane.b32.xlu2 %v667_v13, %s1362_s26  ;;  %753 = vrot.lane.b32.xlu1 %v644_v14, %s1361_s3 }
  0xa0   : > { %748 = vmatpush.msra.mxu3 %v1547_v33 }
  0xa2   : > { %860 = vmatpush.msrb.mxu3 %v614_v34 }
  0xa7   : > { %954 = vrot.lane.b32.xlu1 %v644_v14, %s1362_s26 }
  0xf1   : > { %v868_v19 = vpop.permute.xlu2 %867 }
  0xf9   : > { %v957_v35 = vpop.permute.xlu2 %956 }
 0x109   : > { %v756_v18 = vpop.permute.xlu1 %755 }
 0x10a   : > { %1287 = vmatpush.xpose.msk.msra.mxu0 %vm692_vm1, %v756_v18 }
 0x10e   : > { %1292 = vmatpush.xpose.msk.msrb.mxu0 %vm692_vm1, %v868_v19 }
 0x111   : > { %v754_v20 = vpop.permute.xlu1 %753 }
 0x112   : > { %1288 = vmatmul.msk.f32.vlgmr.msra.gmra.mxu0 %vm692_vm1, %v754_v20 }
 0x118   : > { %v716_v21 = vpop.f32.mrf.mxu0 }
 0x119   : > { %v719_v22 = vsel %vm692_vm1, %v716_v21, -inf  ;;  %v955_v48 = vpop.permute.xlu1 %954 }
 0x11a   : > { %720 = vmax.xlane.f32.xlu0 %v719_v22 }
 0x18d   : > { %v721_v24 = vpop.xlane.xlu0 %720 }
 0x18e   : > { %v722_v25 = vsub.f32 %v716_v21, %v721_v24  ;;  %v1319_v21 = vld [vmem:[%s1680_s8] ss:$0 sm:$0xff] }
 0x18f   : > { %v778_v26 = vpop.f32.mrf.mxu0 }
 0x190   : > { %v723_v27 = vmul.f32 1.442695, %v722_v25  ;;  %v781_v28 = vsel %vm692_vm1, %v778_v26, -inf }
 0x191   : > { %782 = vmax.xlane.f32.xlu2 %v781_v28 }
 0x192   : > { %1328 = vpow2.f32 %v723_v27  ;;  %v1363_v27 = vmov 32.0  }
 0x198   : > { %v1329_v29 = vpop.eup %1328 }
 0x199   : > { %v725_v30 = vsel %vm692_vm1, %v1329_v29, 0.0 }
 0x19a   : > { %726 = vadd.xlane.f32.xlu0 %v725_v30 }
 0x1ae   : > { %865 = vrot.lane.b32.xlu0 %v644_v14, %s1360_s24 }
 0x204   : > { %v783_v36 = vpop.xlane.xlu2 %782 }
 0x205   : > { %v784_v37 = vsub.f32 %v778_v26, %v783_v36 }
 0x207   : > { %v785_v38 = vmul.f32 1.442695, %v784_v37 }
 0x209   : > { %1330 = vpow2.f32 %v785_v38  ;;  %v1090_v38 = vld [vmem:[%s1683_s11 + $0x18] sm:$0xff] }
 0x20d   : > { %v727_v39 = vpop.xlane.xlu0 %726 }
 0x20e   : > { %1332 = vrcp.f32 %v727_v39  ;;  %v1089_v39 = vld [vmem:[%s1683_s11 + $0x10] sm:$0xff] }
 0x20f   : > { %v1331_v40 = vpop.eup %1330 }
 0x210   : > { %v787_v41 = vsel %vm692_vm1, %v1331_v40, 0.0 }
 0x211   : > { %788 = vadd.xlane.f32.xlu2 %v787_v41  ;;  %v1087_v41 = vld [vmem:[%s1683_s11] sm:$0xff] }
 0x214   : > { %v1333_v42 = vpop.eup %1332 }
 0x215   : > { %v729_v43 = vmul.f32 %v1333_v42, %v1329_v29  ;;  %v1099_v42 = vld [vmem:[%s1685_s13 + $0x38] sm:$0xff] }
 0x217   : > { %1286 = vmatmul.msk.f32.vlgmr.msra.gmra.mxu3 %vm692_vm1, %v729_v43  ;;  %v1098_v43 = vld [vmem:[%s1685_s13 + $0x30] sm:$0xff] }
 0x218   : > { %1296 = vmatpush.xpose.msk.msra.mxu3 %vm692_vm1, %v957_v35 }
 0x220   : > { %v866_v44 = vpop.permute.xlu0 %865 }
 0x221   : > { %1293 = vmatmul.msk.f32.vlgmr.msrb.gmra.mxu0 %vm692_vm1, %v866_v44  ;;  %v1097_v44 = vld [vmem:[%s1685_s13 + $0x28] sm:$0xff] }
 0x284   : > { %v789_v54 = vpop.xlane.xlu2 %788 }
 0x29a   : > { %v750_v45 = vpop.f32.mrf.mxu3 }
 0x29b   : > { %1291 = vmatmul.msk.f32.vlgmr.msrb.gmra.mxu3 %vm692_vm1, %v750_v45 }
 0x29c   : > { %1143 = vmatpush.msrb.mxu3 %v1099_v42 }
 0x29e   : > { %v890_v46 = vpop.f32.mrf.mxu0  ;;  %1144 = vmatpush.msrb.mxu3 %v1098_v43 }
 0x29f   : > { %v893_v47 = vsel %vm692_vm1, %v890_v46, -inf }
 0x2a0   : > { %894 = vmax.xlane.f32.xlu1 %v893_v47  ;;  %v1096_v47 = vld [vmem:[%s1685_s13 + $0x20] sm:$0xff]  ;;  %1145 = vmatpush.msrb.mxu3 %v1097_v44 }
 0x2a2   : > { %1146 = vmatpush.msrb.mxu3 %v1096_v47 }
 0x2a3   : > { %1297 = vmatmul.msk.f32.vlgmr.msra.gmra.mxu3 %vm692_vm1, %v955_v48 }
 0x2b9   : > { %793 = vrot.lane.b32.xlu1 %v1547_v33, %s1361_s3  ;;  %s597_s3 = scalar_lea.vmem %s1691_s19, %s1279_s2 }
 0x313   : > { %v895_v49 = vpop.xlane.xlu1 %894 }
 0x314   : > { %v896_v50 = vsub.f32 %v890_v46, %v895_v49  ;;  %v1095_v49 = vld [vmem:[%s1685_s13 + $0x18] sm:$0xff] }
 0x315   : > { %1147 = vmatpush.msrb.mxu3 %v1095_v49 }
 0x316   : > { %v897_v51 = vmul.f32 1.442695, %v896_v50 }
 0x318   : > { %1334 = vpow2.f32 %v897_v51 }
 0x319   : > { %1336 = vrcp.f32 %v789_v54 }
 0x31e   : > { %v1335_v52 = vpop.eup %1334  ;;  %v862_v53 = vpop.f32.mrf.mxu3 }
 0x31f   : > { %v899_v55 = vsel %vm692_vm1, %v1335_v52, 0.0  ;;  %v1337_v58 = vpop.eup %1336 }
 0x320   : > { %900 = vadd.xlane.f32.xlu2 %v899_v55  ;;  %v791_v60 = vmul.f32 %v1337_v58, %v1331_v40  ;;  %v1088_v40 = vld [vmem:[%s1683_s11 + $0x8] sm:$0xff] }
 0x326   : > { %v979_v56 = vpop.f32.mrf.mxu3 }
 0x327   : > { %v982_v57 = vsel %vm692_vm1, %v979_v56, -inf }
 0x328   : > { %983 = vmax.xlane.f32.xlu0 %v982_v57 }
 0x32b   : > { %v794_v59 = vpop.permute.xlu1 %793 }
 0x32c   : > { %814 = vmatpush.msrb.mxu1 %v794_v59  ;;  %v1321_v59 = vld [vmem:[%s1682_s10] ss:$0 sm:$0xff] }
 0x32d   : > { %1289 = vmatmul.msk.f32.vlgmr.msrb.gmra.mxu1 %vm692_vm1, %v791_v60 }
 0x33c   : > { %904 = vrot.lane.b32.xlu0 %v1547_v33, %s1360_s24 }
 0x393   : > { %v901_v1 = vpop.xlane.xlu2 %900 }
 0x39b   : > { %v984_v62 = vpop.xlane.xlu0 %983 }
 0x39c   : > { %v985_v63 = vsub.f32 %v979_v56, %v984_v62  ;;  %v1320_v56 = vld [vmem:[%s1681_s9] ss:$0 sm:$0xff]  ;;  %v1094_v62 = vld [vmem:[%s1685_s13 + $0x10] sm:$0xff] }
 0x39d   : > { %1148 = vmatpush.msrb.mxu3 %v1094_v62 }
 0x39e   : > { %v986_v0 = vmul.f32 1.442695, %v985_v63  ;;  %v1093_v63 = vld [vmem:[%s1685_s13 + $0x8] sm:$0xff] }
 0x39f   : > { %1149 = vmatpush.msrb.mxu3 %v1093_v63 }
 0x3a0   : > { %1338 = vpow2.f32 %v986_v0  ;;  %v1092_v0 = vld [vmem:[%s1685_s13] sm:$0xff] }
 0x3a1   : > { %1340 = vrcp.f32 %v901_v1  ;;  %1150 = vmatpush.msrb.mxu3 %v1092_v0  ;;  %v1322_v1 = vld [vmem:[%s1684_s12] ss:$0 sm:$0xff] }
 0x3a6   : > { %v1339_v2 = vpop.eup %1338 }
 0x3a7   : > { %v988_v3 = vsel %vm692_vm1, %v1339_v2, 0.0  ;;  %v1341_v5 = vpop.eup %1340 }
 0x3a8   : > { %989 = vadd.xlane.f32.xlu2 %v988_v3  ;;  %v903_v6 = vmul.f32 %v1341_v5, %v1335_v52  ;;  %v1323_v5 = vld [vmem:[%s1686_s14] ss:$0 sm:$0xff] }
 0x3aa   : > { %v816_v4 = vpop.f32.mrf.mxu1 }
 0x3ab   : > { %1290 = vmatmul.msk.f32.vlgmr.msrb.gmra.mxu2 %vm692_vm1, %v816_v4 }
 0x3ac   : > { %1119 = vmatpush.msrb.mxu2 %v1090_v38 }
 0x3ae   : > { %v905_v7 = vpop.permute.xlu0 %904  ;;  %1120 = vmatpush.msrb.mxu2 %v1089_v39 }
 0x3af   : > { %925 = vmatpush.msra.mxu1 %v905_v7 }
 0x3b0   : > { %1294 = vmatmul.msk.f32.vlgmr.msra.gmra.mxu1 %vm692_vm1, %v903_v6  ;;  %1121 = vmatpush.msrb.mxu2 %v1088_v40 }
 0x3b1   : > { %1037 = vmatpush.msrb.mxu1 %v617_v15 }
 0x3b2   : > { %1122 = vmatpush.msrb.mxu2 %v1087_v41 }
 0x3c0   : > { %993 = vrot.lane.b32.xlu2 %v1547_v33, %s1362_s26 }
 0x41b   : > { %v990_v10 = vpop.xlane.xlu2 %989 }
 0x41c   : > { %1342 = vrcp.f32 %v990_v10 }
 0x41d   : > { %1344 = vrcp.f32 %v1363_v27 }
 0x422   : > { %v1343_v11 = vpop.eup %1342 }
 0x423   : > { %v992_v12 = vmul.f32 %v1343_v11, %v1339_v2  ;;  %v994_v13 = vpop.permute.xlu2 %993  ;;  %v1345_v28 = vpop.eup %1344 }
 0x424   : > { %1014 = vmatpush.msra.mxu0 %v994_v13  ;;  %v1054_v29 = vmul.f32 32.0, %v1345_v28  ;;  %vm1058_vm2 = vweird.f32 %v1345_v28 }
 0x425   : > { %1298 = vmatmul.msk.f32.vlgmr.msra.gmra.mxu0 %vm692_vm1, %v992_v12 }
 0x426   : > { %v1055_v30 = vsub.f32 1.0, %v1054_v29 }
 0x428   : > { %v1056_v31 = vmul.f32 %v1345_v28, %v1055_v30 }
 0x42a   : > { %v1057_v32 = vadd.f32 %v1345_v28, %v1056_v31 }
 0x42c   : > { %v1589_v33 = vsel %vm1058_vm2, %v1345_v28, %v1057_v32  ;;  %v1325_v28 = vld [vmem:[%s1688_s16] ss:$0 sm:$0xff] }
 0x42d   : > { %v927_v14 = vpop.f32.mrf.mxu1 }
 0x42e   : > { %1295 = vmatmul.msk.f32.vlgmr.msra.gmra.mxu2 %vm692_vm1, %v927_v14  ;;  %v839_v17 = vpop.f32.mrf.mxu2 }
 0x42f   : > { %v863_v19 = vadd.f32 %v862_v53, %v839_v17 }
 0x4a2   : > { %v1016_v16 = vpop.f32.mrf.mxu0 }
 0x4a3   : > { %1299 = vmatmul.msk.f32.vlgmr.msrb.gmra.mxu1 %vm692_vm1, %v1016_v16 }
 0x4b1   : > { %v950_v18 = vpop.f32.mrf.mxu2 }
 0x4b2   : > { %v953_v20 = vadd.f32 %v950_v18, %v863_v19 }
 0x520   : > { %v1039_v22 = vpop.f32.mrf.mxu1 }
 0x521   : > { %v1042_v23 = vadd.f32 %v1039_v22, %v953_v20 }
 0x523   : > { %v1046_v24 = vadd.f32 %v1319_v21, %v1042_v23 }
 0x525   : > { %v1047_v25 = vadd.f32 %v1046_v24, %v1504_v8 }
 0x527   : > { %v1050_v26 = vsel %vm622_vm0, %v1047_v25, 0.0 }
 0x528   : > { %1051 = vadd.xlane.f32.xlu1 %v1050_v26 }
 0x59b   : > { %v1052_v34 = vpop.xlane.xlu1 %1051 }
 0x59c   : > { %v1060_v35 = vmul.f32 %v1589_v33, %v1052_v34 }
 0x59e   : > { %v1061_v36 = vsub.f32 %v1047_v25, %v1060_v35  ;;  %v1324_v25 = vld [vmem:[%s1687_s15] ss:$0 sm:$0xff] }
 0x5a0   : > { %v1062_v37 = vmul.f32 %v1061_v36, %v1061_v36 }
 0x5a2   : > { %v1063_v8 = vsel %vm622_vm0, %v1062_v37, 0.0 }
 0x5a3   : > { %1064 = vadd.xlane.f32.xlu0 %v1063_v8 }
 0x616   : > { %v1065_v45 = vpop.xlane.xlu0 %1064 }
 0x617   : > { %v1066_v46 = vmul.f32 %v1065_v45, %v1589_v33 }
 0x619   : > { %v1067_v48 = vadd.f32 1e-05, %v1066_v46  ;;  %v1326_v46 = vld [vmem:[%s1689_s17] ss:$0 sm:$0xff] }
 0x61b   : > { %1346 = vrsqrt.f32 %v1067_v48  ;;  %vm1074_vm4 = vweird.f32 %v1067_v48 }
 0x621   : > { %v1347_v50 = vpop.eup %1346 }
 0x622   : > { %v1069_v51 = vmul.f32 %v1347_v50, %v1067_v48  ;;  %vm1075_vm3 = vweird.f32 %v1347_v50 }
 0x623   : > { %vm1076_vm5 = vmor %vm1074_vm4, %vm1075_vm3 }
 0x624   : > { %v1070_v52 = vmul.f32 %v1347_v50, %v1069_v51 }
 0x626   : > { %v1071_v53 = vmul.f32 0.5, %v1070_v52 }
 0x628   : > { %v1072_v54 = vsub.f32 1.5, %v1071_v53 }
 0x62a   : > { %v1073_v55 = vmul.f32 %v1347_v50, %v1072_v54 }
 0x62c   : > { %v1077_v57 = vsel %vm1076_vm5, %v1347_v50, %v1073_v55 }
 0x62d   : > { %v1078_v58 = vmul.f32 %v1077_v57, %v1061_v36 }
 0x62f   : > { %v1082_v60 = vmul.f32 %v1320_v56, %v1078_v58 }
 0x631   : > { %v1086_v61 = vadd.f32 %v1321_v59, %v1082_v60 }
 0x633   : > { %1300 = vmatmul.msk.f32.vlgmr.msrb.gmra.mxu2 %vm622_vm0, %v1086_v61 }
 0x6b6   : > { %v1124_v2 = vpop.f32.mrf.mxu2 }
 0x6b7   : > { %v1125_v3 = vadd.f32 %v1322_v1, %v1124_v2 }
 0x6b9   : > { %v1127_v4 = vmax.f32 %v1125_v3, 0.0 }
 0x6bb   : > { %1301 = vmatmul.msk.f32.vlgmr.msrb.gmra.mxu3 %vm1131_vm6, %v1127_v4 }
 0x73e   : > { %v1152_v6 = vpop.f32.mrf.mxu3 }
 0x73f   : > { %v1153_v7 = vadd.f32 %v1323_v5, %v1152_v6 }
 0x741   : > { %v1155_v9 = vadd.f32 %v1153_v7, %v1086_v61 }
 0x743   : > { %v1158_v10 = vsel %vm622_vm0, %v1155_v9, 0.0 }
 0x744   : > { %1159 = vadd.xlane.f32.xlu2 %v1158_v10 }
 0x7b7   : > { %v1160_v11 = vpop.xlane.xlu2 %1159 }
 0x7b8   : > { %v1161_v12 = vmul.f32 %v1160_v11, %v1589_v33 }
 0x7ba   : > { %v1162_v13 = vsub.f32 %v1155_v9, %v1161_v12 }
 0x7bc   : > { %v1163_v14 = vmul.f32 %v1162_v13, %v1162_v13 }
 0x7be   : > { %v1164_v15 = vsel %vm622_vm0, %v1163_v14, 0.0 }
 0x7bf   : > { %1165 = vadd.xlane.f32.xlu1 %v1164_v15 }
 0x832   : > { %v1166_v16 = vpop.xlane.xlu1 %1165 }
 0x833   : > { %v1167_v17 = vmul.f32 %v1166_v16, %v1589_v33 }
 0x835   : > { %v1168_v18 = vadd.f32 1e-05, %v1167_v17 }
 0x837   : > { %1348 = vrsqrt.f32 %v1168_v18  ;;  %vm1175_vm8 = vweird.f32 %v1168_v18 }
 0x83d   : > { %v1349_v19 = vpop.eup %1348 }
 0x83e   : > { %v1170_v20 = vmul.f32 %v1349_v19, %v1168_v18  ;;  %vm1176_vm7 = vweird.f32 %v1349_v19 }
 0x83f   : > { %vm1177_vm9 = vmor %vm1175_vm8, %vm1176_vm7 }
 0x840   : > { %v1171_v21 = vmul.f32 %v1349_v19, %v1170_v20 }
 0x842   : > { %v1172_v22 = vmul.f32 0.5, %v1171_v21 }
 0x844   : > { %v1173_v23 = vsub.f32 1.5, %v1172_v22 }
 0x846   : > { %v1174_v24 = vmul.f32 %v1349_v19, %v1173_v23 }
 0x848   : > { %v1178_v26 = vsel %vm1177_vm9, %v1349_v19, %v1174_v24 }
 0x849   : > { %v1179_v27 = vmul.f32 %v1178_v26, %v1162_v13 }
 0x84b   : > { %v1183_v29 = vmul.f32 %v1324_v25, %v1179_v27 }
 0x84d   : > { %v1187_v30 = vadd.f32 %v1325_v28, %v1183_v29 }
 0x84f   : > { %v1190_v31 = vsel %vm622_vm0, %v1187_v30, 0.0 }
 0x850   : > { %1191 = vadd.xlane.f32.xlu0 %v1190_v31 }
 0x8c3   : > { %v1192_v32 = vpop.xlane.xlu0 %1191 }
 0x8c4   : > { %v1193_v34 = vmul.f32 %v1192_v32, %v1589_v33 }
 0x8c6   : > { %v1194_v35 = vsub.f32 %v1187_v30, %v1193_v34 }
 0x8c8   : > { %v1195_v36 = vmul.f32 %v1194_v35, %v1194_v35 }
 0x8ca   : > { %v1196_v37 = vsel %vm622_vm0, %v1195_v36, 0.0 }
 0x8cb   : > { %1197 = vadd.xlane.f32.xlu1 %v1196_v37 }
 0x93e   : > { %v1198_v8 = vpop.xlane.xlu1 %1197 }
 0x93f   : > { %v1199_v38 = vmul.f32 %v1198_v8, %v1589_v33  ;;  %v1327_v33 = vld [vmem:[%s1690_s18] ss:$0 sm:$0xff] }
 0x941   : > { %v1200_v39 = vadd.f32 1e-05, %v1199_v38 }
 0x943   : > { %1350 = vrsqrt.f32 %v1200_v39  ;;  %vm1207_vm11 = vweird.f32 %v1200_v39 }
 0x949   : > { %v1351_v40 = vpop.eup %1350 }
 0x94a   : > { %v1202_v41 = vmul.f32 %v1351_v40, %v1200_v39  ;;  %vm1208_vm10 = vweird.f32 %v1351_v40 }
 0x94b   : > { %vm1209_vm12 = vmor %vm1207_vm11, %vm1208_vm10 }
 0x94c   : > { %v1203_v42 = vmul.f32 %v1351_v40, %v1202_v41 }
 0x94e   : > { %v1204_v43 = vmul.f32 0.5, %v1203_v42 }
 0x950   : > { %v1205_v44 = vsub.f32 1.5, %v1204_v43 }
 0x952   : > { %v1206_v45 = vmul.f32 %v1351_v40, %v1205_v44 }
 0x954   : > { %v1210_v47 = vsel %vm1209_vm12, %v1351_v40, %v1206_v45 }
 0x955   : > { %v1211_v48 = vmul.f32 %v1210_v47, %v1194_v35 }
 0x957   : > { %v1215_v49 = vmul.f32 %v1326_v46, %v1211_v48 }
 0x959   : > { %v1219_v50 = vadd.f32 %v1327_v33, %v1215_v49 }
 0x95b   : > { %1220 = vst.msk [vmem:[%s597_s3] sm:$0xff] %vm622_vm0, %v1219_v50 }
 0x95c PF: > { %s29_s0 = sadd.s32 1, %s1358_s0  }
 0x95d   : > { %p26_p4 = scmp.ge.s32.totalorder %s29_s0, 4  }
 0x95f   :  { %28 = sbr.rel (!%p26_p4) target bundleno = 5 (0x5), region = 126 }

// kernel: transformer_forward.5
= control target key start
LH: loop header
LB: loop body
LE: loop exit
PB: predicated region body
PF: predicated region fallthrough
CT: control target
= control target key end

     0   :  { %s1364_s24 = smov 0   ;;  %s1562_s0 = inlined_call_operand.vmem [shape: f32[2,8,32], index: 0, kind: input, shape index: {}]   ;;  %s1563_s1 = inlined_call_operand.vmem [shape: f32[32,32], index: 1, kind: input, shape index: {}]   ;;  %s1564_s2 = inlined_call_operand.vmem [shape: f32[1,32], index: 2, kind: input, shape index: {}]   ;;  %s1565_s3 = inlined_call_operand.vmem [shape: f32[32,32], index: 3, kind: input, shape index: {}]   ;;  %s1566_s4 = inlined_call_operand.vmem [shape: f32[1,32], index: 4, kind: input, shape index: {}]   ;;  %s1567_s5 = inlined_call_operand.vmem [shape: f32[32,32], index: 5, kind: input, shape index: {}]   ;;  %s1568_s6 = inlined_call_operand.vmem [shape: f32[1,32], index: 6, kind: input, shape index: {}]   ;;  %s1569_s7 = inlined_call_operand.vmem [shape: f32[32,32], index: 7, kind: input, shape index: {}]   ;;  %s1570_s8 = inlined_call_operand.vmem [shape: f32[1,32], index: 8, kind: input, shape index: {}]   ;;  %s1571_s9 = inlined_call_operand.vmem [shape: f32[1,32], index: 9, kind: input, shape index: {}]   ;;  %s1572_s10 = inlined_call_operand.vmem [shape: f32[1,32], index: 10, kind: input, shape index: {}]   ;;  %s1573_s11 = inlined_call_operand.vmem [shape: f32[32,64], index: 11, kind: input, shape index: {}]   ;;  %s1574_s12 = inlined_call_operand.vmem [shape: f32[1,64], index: 12, kind: input, shape index: {}]   ;;  %s1575_s13 = inlined_call_operand.vmem [shape: f32[64,32], index: 13, kind: input, shape index: {}]   ;;  %s1576_s14 = inlined_call_operand.vmem [shape: f32[1,32], index: 14, kind: input, shape index: {}]   ;;  %s1577_s15 = inlined_call_operand.vmem [shape: f32[1,32], index: 15, kind: input, shape index: {}]   ;;  %s1578_s16 = inlined_call_operand.vmem [shape: f32[1,32], index: 16, kind: input, shape index: {}]   ;;  %s1579_s17 = inlined_call_operand.vmem [shape: f32[2,8,32], index: 17, kind: output, shape index: {}]  }
   0x1   :  { %1581 = sst [smem:[#allocation2_spill]] %s1562_s0 }
   0x2   :  { %1582 = sst [smem:[#allocation3_spill]] %s1563_s1 }
   0x3 LB: > { %s1188_s25 = sadd.s32 4294967295, %s1268_s24   ;;  %p1192_p0 = scmp.ge.s32.totalorder %s1268_s24, 1  ;;  %s1268_s24 = sphi %s1364_s24, %s27_s24  }
   0x4   : > { %p486_p1 = scmp.lt.s32.totalorder %s1268_s24, 3 }
   0x6   : > { %p487_p2 = pnand %p1192_p0, %p486_p1 }
   0x7   : > { %s1583_s18 = sld [smem:[#allocation3_spill]] (!%p487_p2)  ;;  %p536_p3 = scmp.lt.s32.totalorder (!%p487_p2), %s1188_s25, 1 }
   0x8   : > { %490 = sbr.rel (%p487_p2) target bundleno = 2126 (0x84e), region = 88  ;;  %s1584_s1 = sld [smem:[#allocation2_spill]] (!%p487_p2) }
   0x9   : > { %s1270_s27 = smov (!%p487_p2), 112   ;;  %s1271_s29 = smov (!%p487_p2), 120  }
   0xa   : > { %s1272_s0 = smov (!%p487_p2), 104  }
   0xd   : > { %v553_v0 = vld [vmem:[%s1565_s3 + $0x18] sm:$0xff]  ;;  %v552_v1 = vld [vmem:[%s1565_s3 + $0x10] sm:$0xff]  ;;  %v551_v4 = vld [vmem:[%s1565_s3 + $0x8] sm:$0xff]  ;;  %s1586_s25 = smov (!%p536_p3, %s1188_s25), 1  ;;  %vm568_vm0 = vcmask 261120   ;;  %vm638_vm1 = vcmask 64512  }
   0xe   : > { %v548_v2 = vld [vmem:[%s1583_s18 + $0x18] sm:$0xff]  ;;  %607 = vmatpush.msra.mxu1 %v553_v0  ;;  %v547_v3 = vld [vmem:[%s1583_s18 + $0x10] sm:$0xff]  ;;  %v546_v5 = vld [vmem:[%s1583_s18 + $0x8] sm:$0xff]  ;;  %s1193_s28 = sshll.u32 %s1586_s25, 3  ;;  %vm1077_vm6 = vcmask 523264  }
   0xf   : > { %584 = vmatpush.msra.mxu0 %v548_v2  ;;  %v550_v6 = vld [vmem:[%s1565_s3] sm:$0xff]  ;;  %s539_s20 = scalar_lea.vmem %s1584_s1, %s1193_s28  ;;  %v558_v15 = vld [vmem:[%s1567_s5 + $0x18] sm:$0xff]  ;;  %v557_v16 = vld [vmem:[%s1567_s5 + $0x10] sm:$0xff] }
  0x10   : > { %608 = vmatpush.msra.mxu1 %v552_v1  ;;  %v545_v7 = vld [vmem:[%s1583_s18] sm:$0xff]  ;;  %630 = vmatpush.msra.mxu2 %v558_v15  ;;  %v556_v17 = vld [vmem:[%s1567_s5 + $0x8] sm:$0xff]  ;;  %v563_v15 = vld [vmem:[%s1569_s7 + $0x18] sm:$0xff] }
  0x11   : > { %585 = vmatpush.msra.mxu0 %v547_v3  ;;  %v1404_v8 = vld [vmem:[%s539_s20] sm:$0xff]  ;;  %v561_v61 = vld [vmem:[%s1569_s7 + $0x8] sm:$0xff] }
  0x12   : > { %609 = vmatpush.msra.mxu1 %v551_v4  ;;  %v1230_v9 = vld [vmem:[%s1566_s4] ss:$0 sm:$0xff]  ;;  %631 = vmatpush.msra.mxu2 %v557_v16 }
  0x13   : > { %586 = vmatpush.msra.mxu0 %v546_v5  ;;  %v1231_v10 = vld [vmem:[%s1564_s2] ss:$0 sm:$0xff] }
  0x14   : > { %610 = vmatpush.msra.mxu1 %v550_v6  ;;  %632 = vmatpush.msra.mxu2 %v556_v17  ;;  %v555_v23 = vld [vmem:[%s1567_s5] sm:$0xff] }
  0x15   : > { %587 = vmatpush.msra.mxu0 %v545_v7  ;;  %1196 = vmatmul.msk.f32.vlgmr.msra.gmra.mxu1 %vm568_vm0, %v1404_v8  ;;  %v1232_v31 = vld [vmem:[%s1568_s6] ss:$0 sm:$0xff] }
  0x16   : > { %1195 = vmatmul.msk.f32.vlgmr.msra.gmra.mxu0 %vm568_vm0, %v1404_v8  ;;  %633 = vmatpush.msra.mxu2 %v555_v23  ;;  %v560_v34 = vld [vmem:[%s1569_s7] sm:$0xff] }
  0x17   : > { %1197 = vmatmul.msk.f32.vlgmr.msra.gmra.mxu2 %vm568_vm0, %v1404_v8 }
  0x18   : > { %783 = vmatpush.msrb.mxu2 %v561_v61 }
  0x92   : > { %v612_v11 = vpop.f32.mrf.mxu1 }
  0x93   : > { %v589_v12 = vpop.f32.mrf.mxu0  ;;  %v613_v13 = vadd.f32 %v1230_v9, %v612_v11  ;;  %v562_v9 = vld [vmem:[%s1569_s7 + $0x10] sm:$0xff] }
  0x94   : > { %v590_v14 = vadd.f32 %v1231_v10, %v589_v12  ;;  %894 = vmatpush.msra.mxu2 %v562_v9 }
  0x95   : > { %813 = vrot.lane.b32.xlu2 %v613_v13, %s1270_s27  ;;  %701 = vrot.lane.b32.xlu1 %v613_v13, %s1271_s29 }
  0x96   : > { %1198 = vmatpush.xpose.msk.msrb.mxu0 %vm638_vm1, %v613_v13 }
  0x99   : > { %1199 = vmatmul.msk.f32.vlgmr.msrb.gmra.mxu0 %vm638_vm1, %v590_v14 }
  0x9a   : > { %v635_v32 = vpop.f32.mrf.mxu2 }
  0x9b   : > { %v1447_v33 = vadd.f32 %v1232_v31, %v635_v32 }
  0x9d   : > { %902 = vrot.lane.b32.xlu2 %v613_v13, %s1272_s0  ;;  %699 = vrot.lane.b32.xlu1 %v590_v14, %s1271_s29 }
  0x9e   : > { %694 = vmatpush.msra.mxu3 %v1447_v33 }
  0xa0   : > { %806 = vmatpush.msrb.mxu3 %v560_v34 }
  0xa5   : > { %900 = vrot.lane.b32.xlu1 %v590_v14, %s1272_s0 }
  0xef   : > { %v814_v19 = vpop.permute.xlu2 %813 }
  0xf7   : > { %v903_v35 = vpop.permute.xlu2 %902 }
 0x107   : > { %v702_v18 = vpop.permute.xlu1 %701 }
 0x108   : > { %1201 = vmatpush.xpose.msk.msra.mxu0 %vm638_vm1, %v702_v18 }
 0x10c   : > { %1206 = vmatpush.xpose.msk.msrb.mxu0 %vm638_vm1, %v814_v19 }
 0x10f   : > { %v700_v20 = vpop.permute.xlu1 %699 }
 0x110   : > { %1202 = vmatmul.msk.f32.vlgmr.msra.gmra.mxu0 %vm638_vm1, %v700_v20 }
 0x116   : > { %v662_v21 = vpop.f32.mrf.mxu0 }
 0x117   : > { %v665_v22 = vsel %vm638_vm1, %v662_v21, -inf  ;;  %v901_v48 = vpop.permute.xlu1 %900 }
 0x118   : > { %666 = vmax.xlane.f32.xlu0 %v665_v22 }
 0x18b   : > { %v667_v24 = vpop.xlane.xlu0 %666 }
 0x18c   : > { %v668_v25 = vsub.f32 %v662_v21, %v667_v24  ;;  %v1233_v21 = vld [vmem:[%s1570_s8] ss:$0 sm:$0xff] }
 0x18d   : > { %v724_v26 = vpop.f32.mrf.mxu0 }
 0x18e   : > { %v669_v27 = vmul.f32 1.442695, %v668_v25  ;;  %v727_v28 = vsel %vm638_vm1, %v724_v26, -inf }
 0x18f   : > { %728 = vmax.xlane.f32.xlu2 %v727_v28 }
 0x190   : > { %1240 = vpow2.f32 %v669_v27  ;;  %v1273_v27 = vmov 32.0  }
 0x196   : > { %v1241_v29 = vpop.eup %1240 }
 0x197   : > { %v671_v30 = vsel %vm638_vm1, %v1241_v29, 0.0 }
 0x198   : > { %672 = vadd.xlane.f32.xlu0 %v671_v30 }
 0x1ac   : > { %811 = vrot.lane.b32.xlu0 %v590_v14, %s1270_s27 }
 0x202   : > { %v729_v36 = vpop.xlane.xlu2 %728 }
 0x203   : > { %v730_v37 = vsub.f32 %v724_v26, %v729_v36 }
 0x205   : > { %v731_v38 = vmul.f32 1.442695, %v730_v37 }
 0x207   : > { %1242 = vpow2.f32 %v731_v38  ;;  %v1036_v38 = vld [vmem:[%s1573_s11 + $0x18] sm:$0xff] }
 0x20b   : > { %v673_v39 = vpop.xlane.xlu0 %672 }
 0x20c   : > { %1244 = vrcp.f32 %v673_v39  ;;  %v1035_v39 = vld [vmem:[%s1573_s11 + $0x10] sm:$0xff] }
 0x20d   : > { %v1243_v40 = vpop.eup %1242 }
 0x20e   : > { %v733_v41 = vsel %vm638_vm1, %v1243_v40, 0.0 }
 0x20f   : > { %734 = vadd.xlane.f32.xlu2 %v733_v41  ;;  %v1033_v41 = vld [vmem:[%s1573_s11] sm:$0xff] }
 0x212   : > { %v1245_v42 = vpop.eup %1244 }
 0x213   : > { %v675_v43 = vmul.f32 %v1245_v42, %v1241_v29  ;;  %v1045_v42 = vld [vmem:[%s1575_s13 + $0x38] sm:$0xff] }
 0x215   : > { %1200 = vmatmul.msk.f32.vlgmr.msra.gmra.mxu3 %vm638_vm1, %v675_v43  ;;  %v1044_v43 = vld [vmem:[%s1575_s13 + $0x30] sm:$0xff] }
 0x216   : > { %1210 = vmatpush.xpose.msk.msra.mxu3 %vm638_vm1, %v903_v35 }
 0x21e   : > { %v812_v44 = vpop.permute.xlu0 %811 }
 0x21f   : > { %1207 = vmatmul.msk.f32.vlgmr.msrb.gmra.mxu0 %vm638_vm1, %v812_v44  ;;  %v1043_v44 = vld [vmem:[%s1575_s13 + $0x28] sm:$0xff] }
 0x282   : > { %v735_v54 = vpop.xlane.xlu2 %734 }
 0x298   : > { %v696_v45 = vpop.f32.mrf.mxu3 }
 0x299   : > { %1205 = vmatmul.msk.f32.vlgmr.msrb.gmra.mxu3 %vm638_vm1, %v696_v45 }
 0x29a   : > { %1089 = vmatpush.msrb.mxu3 %v1045_v42 }
 0x29c   : > { %v836_v46 = vpop.f32.mrf.mxu0  ;;  %1090 = vmatpush.msrb.mxu3 %v1044_v43 }
 0x29d   : > { %v839_v47 = vsel %vm638_vm1, %v836_v46, -inf }
 0x29e   : > { %840 = vmax.xlane.f32.xlu1 %v839_v47  ;;  %v1042_v47 = vld [vmem:[%s1575_s13 + $0x20] sm:$0xff]  ;;  %1091 = vmatpush.msrb.mxu3 %v1043_v44 }
 0x2a0   : > { %1092 = vmatpush.msrb.mxu3 %v1042_v47 }
 0x2a1   : > { %1211 = vmatmul.msk.f32.vlgmr.msra.gmra.mxu3 %vm638_vm1, %v901_v48 }
 0x2b7   : > { %739 = vrot.lane.b32.xlu1 %v1447_v33, %s1271_s29 }
 0x311   : > { %v841_v49 = vpop.xlane.xlu1 %840 }
 0x312   : > { %v842_v50 = vsub.f32 %v836_v46, %v841_v49  ;;  %v1041_v49 = vld [vmem:[%s1575_s13 + $0x18] sm:$0xff] }
 0x313   : > { %1093 = vmatpush.msrb.mxu3 %v1041_v49 }
 0x314   : > { %v843_v51 = vmul.f32 1.442695, %v842_v50 }
 0x316   : > { %1246 = vpow2.f32 %v843_v51 }
 0x317   : > { %1248 = vrcp.f32 %v735_v54 }
 0x31c   : > { %v1247_v52 = vpop.eup %1246  ;;  %v808_v53 = vpop.f32.mrf.mxu3 }
 0x31d   : > { %v845_v55 = vsel %vm638_vm1, %v1247_v52, 0.0  ;;  %v1249_v58 = vpop.eup %1248 }
 0x31e   : > { %846 = vadd.xlane.f32.xlu2 %v845_v55  ;;  %v737_v60 = vmul.f32 %v1249_v58, %v1243_v40  ;;  %v1034_v40 = vld [vmem:[%s1573_s11 + $0x8] sm:$0xff] }
 0x324   : > { %v925_v56 = vpop.f32.mrf.mxu3 }
 0x325   : > { %v928_v57 = vsel %vm638_vm1, %v925_v56, -inf }
 0x326   : > { %929 = vmax.xlane.f32.xlu0 %v928_v57 }
 0x329   : > { %v740_v59 = vpop.permute.xlu1 %739 }
 0x32a   : > { %760 = vmatpush.msrb.mxu1 %v740_v59  ;;  %v1235_v59 = vld [vmem:[%s1572_s10] ss:$0 sm:$0xff] }
 0x32b   : > { %1203 = vmatmul.msk.f32.vlgmr.msrb.gmra.mxu1 %vm638_vm1, %v737_v60 }
 0x33a   : > { %850 = vrot.lane.b32.xlu0 %v1447_v33, %s1270_s27  ;;  %s543_s27 = scalar_lea.vmem %s1579_s17, %s1193_s28 }
 0x391   : > { %v847_v1 = vpop.xlane.xlu2 %846 }
 0x399   : > { %v930_v62 = vpop.xlane.xlu0 %929 }
 0x39a   : > { %v931_v63 = vsub.f32 %v925_v56, %v930_v62  ;;  %v1234_v56 = vld [vmem:[%s1571_s9] ss:$0 sm:$0xff]  ;;  %v1040_v62 = vld [vmem:[%s1575_s13 + $0x10] sm:$0xff] }
 0x39b   : > { %1094 = vmatpush.msrb.mxu3 %v1040_v62 }
 0x39c   : > { %v932_v0 = vmul.f32 1.442695, %v931_v63  ;;  %v1039_v63 = vld [vmem:[%s1575_s13 + $0x8] sm:$0xff] }
 0x39d   : > { %1095 = vmatpush.msrb.mxu3 %v1039_v63 }
 0x39e   : > { %1250 = vpow2.f32 %v932_v0  ;;  %v1038_v0 = vld [vmem:[%s1575_s13] sm:$0xff] }
 0x39f   : > { %1252 = vrcp.f32 %v847_v1  ;;  %1096 = vmatpush.msrb.mxu3 %v1038_v0  ;;  %v1236_v1 = vld [vmem:[%s1574_s12] ss:$0 sm:$0xff] }
 0x3a4   : > { %v1251_v2 = vpop.eup %1250 }
 0x3a5   : > { %v934_v3 = vsel %vm638_vm1, %v1251_v2, 0.0  ;;  %v1253_v5 = vpop.eup %1252 }
 0x3a6   : > { %935 = vadd.xlane.f32.xlu2 %v934_v3  ;;  %v849_v6 = vmul.f32 %v1253_v5, %v1247_v52  ;;  %v1237_v5 = vld [vmem:[%s1576_s14] ss:$0 sm:$0xff] }
 0x3a8   : > { %v762_v4 = vpop.f32.mrf.mxu1 }
 0x3a9   : > { %1204 = vmatmul.msk.f32.vlgmr.msrb.gmra.mxu2 %vm638_vm1, %v762_v4 }
 0x3aa   : > { %1065 = vmatpush.msrb.mxu2 %v1036_v38 }
 0x3ac   : > { %v851_v7 = vpop.permute.xlu0 %850  ;;  %1066 = vmatpush.msrb.mxu2 %v1035_v39 }
 0x3ad   : > { %871 = vmatpush.msra.mxu1 %v851_v7 }
 0x3ae   : > { %1208 = vmatmul.msk.f32.vlgmr.msra.gmra.mxu1 %vm638_vm1, %v849_v6  ;;  %1067 = vmatpush.msrb.mxu2 %v1034_v40 }
 0x3af   : > { %983 = vmatpush.msrb.mxu1 %v563_v15 }
 0x3b0   : > { %1068 = vmatpush.msrb.mxu2 %v1033_v41 }
 0x3be   : > { %939 = vrot.lane.b32.xlu2 %v1447_v33, %s1272_s0 }
 0x419   : > { %v936_v10 = vpop.xlane.xlu2 %935 }
 0x41a   : > { %1254 = vrcp.f32 %v936_v10 }
 0x41b   : > { %1256 = vrcp.f32 %v1273_v27  ;;  %v1239_v27 = vld [vmem:[%s1578_s16] ss:$0 sm:$0xff] }
 0x420   : > { %v1255_v11 = vpop.eup %1254 }
 0x421   : > { %v938_v12 = vmul.f32 %v1255_v11, %v1251_v2  ;;  %v940_v13 = vpop.permute.xlu2 %939  ;;  %v1257_v28 = vpop.eup %1256 }
 0x422   : > { %960 = vmatpush.msra.mxu0 %v940_v13  ;;  %v1000_v29 = vmul.f32 32.0, %v1257_v28  ;;  %vm1004_vm2 = vweird.f32 %v1257_v28 }
 0x423   : > { %1212 = vmatmul.msk.f32.vlgmr.msra.gmra.mxu0 %vm638_vm1, %v938_v12 }
 0x424   : > { %v1001_v30 = vsub.f32 1.0, %v1000_v29 }
 0x426   : > { %v1002_v31 = vmul.f32 %v1257_v28, %v1001_v30 }
 0x428   : > { %v1003_v32 = vadd.f32 %v1257_v28, %v1002_v31 }
 0x42a   : > { %v1489_v33 = vsel %vm1004_vm2, %v1257_v28, %v1003_v32 }
 0x42b   : > { %v873_v14 = vpop.f32.mrf.mxu1 }
 0x42c   : > { %1209 = vmatmul.msk.f32.vlgmr.msra.gmra.mxu2 %vm638_vm1, %v873_v14  ;;  %v785_v17 = vpop.f32.mrf.mxu2 }
 0x42d   : > { %v809_v19 = vadd.f32 %v808_v53, %v785_v17 }
 0x4a0   : > { %v962_v16 = vpop.f32.mrf.mxu0 }
 0x4a1   : > { %1213 = vmatmul.msk.f32.vlgmr.msrb.gmra.mxu1 %vm638_vm1, %v962_v16 }
 0x4af   : > { %v896_v18 = vpop.f32.mrf.mxu2 }
 0x4b0   : > { %v899_v20 = vadd.f32 %v896_v18, %v809_v19 }
 0x51e   : > { %v985_v22 = vpop.f32.mrf.mxu1 }
 0x51f   : > { %v988_v23 = vadd.f32 %v985_v22, %v899_v20 }
 0x521   : > { %v992_v24 = vadd.f32 %v1233_v21, %v988_v23 }
 0x523   : > { %v993_v25 = vadd.f32 %v992_v24, %v1404_v8 }
 0x525   : > { %v996_v26 = vsel %vm568_vm0, %v993_v25, 0.0 }
 0x526   : > { %997 = vadd.xlane.f32.xlu1 %v996_v26 }
 0x599   : > { %v998_v34 = vpop.xlane.xlu1 %997 }
 0x59a   : > { %v1006_v35 = vmul.f32 %v1489_v33, %v998_v34 }
 0x59c   : > { %v1007_v36 = vsub.f32 %v993_v25, %v1006_v35  ;;  %v1238_v25 = vld [vmem:[%s1577_s15] ss:$0 sm:$0xff] }
 0x59e   : > { %v1008_v37 = vmul.f32 %v1007_v36, %v1007_v36 }
 0x5a0   : > { %v1009_v8 = vsel %vm568_vm0, %v1008_v37, 0.0 }
 0x5a1   : > { %1010 = vadd.xlane.f32.xlu0 %v1009_v8 }
 0x614   : > { %v1011_v45 = vpop.xlane.xlu0 %1010 }
 0x615   : > { %v1012_v46 = vmul.f32 %v1011_v45, %v1489_v33 }
 0x617   : > { %v1013_v48 = vadd.f32 1e-05, %v1012_v46 }
 0x619   : > { %1258 = vrsqrt.f32 %v1013_v48  ;;  %vm1020_vm4 = vweird.f32 %v1013_v48 }
 0x61f   : > { %v1259_v50 = vpop.eup %1258 }
 0x620   : > { %v1015_v51 = vmul.f32 %v1259_v50, %v1013_v48  ;;  %vm1021_vm3 = vweird.f32 %v1259_v50 }
 0x621   : > { %vm1022_vm5 = vmor %vm1020_vm4, %vm1021_vm3 }
 0x622   : > { %v1016_v52 = vmul.f32 %v1259_v50, %v1015_v51 }
 0x624   : > { %v1017_v53 = vmul.f32 0.5, %v1016_v52 }
 0x626   : > { %v1018_v54 = vsub.f32 1.5, %v1017_v53 }
 0x628   : > { %v1019_v55 = vmul.f32 %v1259_v50, %v1018_v54 }
 0x62a   : > { %v1023_v57 = vsel %vm1022_vm5, %v1259_v50, %v1019_v55 }
 0x62b   : > { %v1024_v58 = vmul.f32 %v1023_v57, %v1007_v36 }
 0x62d   : > { %v1028_v60 = vmul.f32 %v1234_v56, %v1024_v58 }
 0x62f   : > { %v1032_v61 = vadd.f32 %v1235_v59, %v1028_v60 }
 0x631   : > { %1214 = vmatmul.msk.f32.vlgmr.msrb.gmra.mxu2 %vm568_vm0, %v1032_v61 }
 0x6b4   : > { %v1070_v2 = vpop.f32.mrf.mxu2 }
 0x6b5   : > { %v1071_v3 = vadd.f32 %v1236_v1, %v1070_v2 }
 0x6b7   : > { %v1073_v4 = vmax.f32 %v1071_v3, 0.0 }
 0x6b9   : > { %1215 = vmatmul.msk.f32.vlgmr.msrb.gmra.mxu3 %vm1077_vm6, %v1073_v4 }
 0x73c   : > { %v1098_v6 = vpop.f32.mrf.mxu3 }
 0x73d   : > { %v1099_v7 = vadd.f32 %v1237_v5, %v1098_v6 }
 0x73f   : > { %v1101_v9 = vadd.f32 %v1099_v7, %v1032_v61 }
 0x741   : > { %v1104_v10 = vsel %vm568_vm0, %v1101_v9, 0.0 }
 0x742   : > { %1105 = vadd.xlane.f32.xlu2 %v1104_v10 }
 0x7b5   : > { %v1106_v11 = vpop.xlane.xlu2 %1105 }
 0x7b6   : > { %v1107_v12 = vmul.f32 %v1106_v11, %v1489_v33 }
 0x7b8   : > { %v1108_v13 = vsub.f32 %v1101_v9, %v1107_v12 }
 0x7ba   : > { %v1109_v14 = vmul.f32 %v1108_v13, %v1108_v13 }
 0x7bc   : > { %v1110_v15 = vsel %vm568_vm0, %v1109_v14, 0.0 }
 0x7bd   : > { %1111 = vadd.xlane.f32.xlu1 %v1110_v15 }
 0x830   : > { %v1112_v16 = vpop.xlane.xlu1 %1111 }
 0x831   : > { %v1113_v17 = vmul.f32 %v1112_v16, %v1489_v33 }
 0x833   : > { %v1114_v18 = vadd.f32 1e-05, %v1113_v17 }
 0x835   : > { %1260 = vrsqrt.f32 %v1114_v18  ;;  %vm1121_vm8 = vweird.f32 %v1114_v18 }
 0x83b   : > { %v1261_v19 = vpop.eup %1260 }
 0x83c   : > { %v1116_v20 = vmul.f32 %v1261_v19, %v1114_v18  ;;  %vm1122_vm7 = vweird.f32 %v1261_v19 }
 0x83d   : > { %vm1123_vm9 = vmor %vm1121_vm8, %vm1122_vm7 }
 0x83e   : > { %v1117_v21 = vmul.f32 %v1261_v19, %v1116_v20 }
 0x840   : > { %v1118_v22 = vmul.f32 0.5, %v1117_v21 }
 0x842   : > { %v1119_v23 = vsub.f32 1.5, %v1118_v22 }
 0x844   : > { %v1120_v24 = vmul.f32 %v1261_v19, %v1119_v23 }
 0x846   : > { %v1124_v26 = vsel %vm1123_vm9, %v1261_v19, %v1120_v24 }
 0x847   : > { %v1125_v28 = vmul.f32 %v1124_v26, %v1108_v13 }
 0x849   : > { %v1129_v29 = vmul.f32 %v1238_v25, %v1125_v28 }
 0x84b   : > { %v1133_v30 = vadd.f32 %v1239_v27, %v1129_v29 }
 0x84d   : > { %1134 = vst.msk [vmem:[%s543_s27] sm:$0xff] %vm568_vm0, %v1133_v30 }
 0x84e PF: > { %s27_s24 = sadd.s32 1, %s1268_s24  }
 0x84f   : > { %p24_p4 = scmp.ge.s32.totalorder %s27_s24, 4  }
 0x851   :  { %26 = sbr.rel (!%p24_p4) target bundleno = 3 (0x3), region = 118 }

// kernel: transformer_forward.7
= control target key start
LH: loop header
LB: loop body
LE: loop exit
PB: predicated region body
PF: predicated region fallthrough
CT: control target
= control target key end

     0   :  { %s3048_s0 = inlined_call_operand.vmem [shape: f32[2,8,32], index: 0, kind: input, shape index: {}]   ;;  %s3049_s1 = inlined_call_operand.vmem [shape: f32[2,8,32], index: 1, kind: input, shape index: {}]   ;;  %s3050_s2 = inlined_call_operand.vmem [shape: f32[32,32], index: 2, kind: input, shape index: {}]   ;;  %s3051_s3 = inlined_call_operand.vmem [shape: f32[1,32], index: 3, kind: input, shape index: {}]   ;;  %s3052_s4 = inlined_call_operand.vmem [shape: f32[32,32], index: 4, kind: input, shape index: {}]   ;;  %s3053_s5 = inlined_call_operand.vmem [shape: f32[1,32], index: 5, kind: input, shape index: {}]   ;;  %s3054_s6 = inlined_call_operand.vmem [shape: f32[32,32], index: 6, kind: input, shape index: {}]   ;;  %s3055_s7 = inlined_call_operand.vmem [shape: f32[1,32], index: 7, kind: input, shape index: {}]   ;;  %s3056_s8 = inlined_call_operand.vmem [shape: f32[32,32], index: 8, kind: input, shape index: {}]   ;;  %s3057_s9 = inlined_call_operand.vmem [shape: f32[1,32], index: 9, kind: input, shape index: {}]   ;;  %s3058_s10 = inlined_call_operand.vmem [shape: f32[1,32], index: 10, kind: input, shape index: {}]   ;;  %s3059_s11 = inlined_call_operand.vmem [shape: f32[1,32], index: 11, kind: input, shape index: {}]   ;;  %s3060_s12 = inlined_call_operand.vmem [shape: f32[32,32], index: 12, kind: input, shape index: {}]   ;;  %s3061_s13 = inlined_call_operand.vmem [shape: f32[1,32], index: 13, kind: input, shape index: {}]   ;;  %s3062_s14 = inlined_call_operand.vmem [shape: f32[32,32], index: 14, kind: input, shape index: {}]   ;;  %s3063_s15 = inlined_call_operand.vmem [shape: f32[1,32], index: 15, kind: input, shape index: {}]   ;;  %s3064_s16 = inlined_call_operand.vmem [shape: f32[32,32], index: 16, kind: input, shape index: {}]   ;;  %s3065_s17 = inlined_call_operand.vmem [shape: f32[1,32], index: 17, kind: input, shape index: {}]   ;;  %s3066_s18 = inlined_call_operand.vmem [shape: f32[32,32], index: 18, kind: input, shape index: {}]   ;;  %s3067_s19 = inlined_call_operand.vmem [shape: f32[1,32], index: 19, kind: input, shape index: {}]   ;;  %s3068_s20 = inlined_call_operand.vmem [shape: f32[1,32], index: 20, kind: input, shape index: {}]   ;;  %s3069_s21 = inlined_call_operand.hbm [shape: f32[1,32], index: 21, kind: input, shape index: {}]   ;;  %s3070_s22 = inlined_call_operand.hbm [shape: f32[32,64], index: 22, kind: input, shape index: {}]   ;;  %s3071_s23 = inlined_call_operand.hbm [shape: f32[1,64], index: 23, kind: input, shape index: {}]   ;;  %s3072_s24 = inlined_call_operand.vmem [shape: f32[64,32], index: 24, kind: input, shape index: {}]   ;;  %s3073_s25 = inlined_call_operand.hbm [shape: f32[1,32], index: 25, kind: input, shape index: {}]   ;;  %s3074_s26 = inlined_call_operand.hbm [shape: f32[1,32], index: 26, kind: input, shape index: {}]   ;;  %s3075_s27 = inlined_call_operand.hbm [shape: f32[1,32], index: 27, kind: input, shape index: {}]   ;;  %s3076_s28 = inlined_call_operand.vmem [shape: f32[2,8,32], index: 28, kind: output, shape index: {}]  }
   0x1   :  { %3087 = sst [smem:[#allocation17_spill]] %s3048_s0 }
   0x2   :  { %3088 = sst [smem:[#allocation18_spill]] %s3049_s1 }
   0x3   :  { %3089 = sst [smem:[#allocation19_spill]] %s3050_s2 }
   0x4   :  { %3090 = sst [smem:[#allocation20_spill]] %s3051_s3 }
   0x5   :  { %3091 = sst [smem:[#allocation21_spill]] %s3052_s4 }
   0x6   :  { %3092 = sst [smem:[#allocation22_spill]] %s3053_s5 }
   0x7   :  { %3093 = sst [smem:[#allocation23_spill]] %s3054_s6 }
   0x8   :  { %3094 = sst [smem:[#allocation24_spill]] %s3055_s7 }
   0x9   :  { %3095 = sst [smem:[#allocation25_spill]] %s3056_s8 }
   0xa   :  { %3096 = sst [smem:[#allocation26_spill]] %s3057_s9 }
   0xb   :  { %3097 = sst [smem:[#allocation27_spill]] %s3058_s10 }
   0xc   :  { %3098 = sst [smem:[#allocation28_spill]] %s3059_s11 }
   0xd   :  { %3099 = sst [smem:[#allocation29_spill]] %s3060_s12 }
   0xe   :  { %3100 = sst [smem:[#allocation30_spill]] %s3069_s21 }
   0xf   :  { %3101 = sst [smem:[#allocation31_spill]] %s3070_s22 }
  0x10   :  { %3102 = sst [smem:[#allocation32_spill]] %s3073_s25 }
  0x11   :  { %33 = vsyncpa [#allocation3], 0 }
  0x12   :  { %34 = vsyncpa [#allocation5], 0 }
  0x13   :  { %35 = vsyncpa [#allocation8], 0 }
  0x14   :  { %36 = vsyncpa [#allocation11], 0  ;;  %s2701_s8 = smov 0  }
  0x15 LB: > { %3103 = sst [smem:[#allocation16_spill]] %s2542_s8  ;;  %s2710_s3 = sadd.s32 4294967295, %s2542_s8   ;;  %s2542_s8 = sphi %s2701_s8, %s42_s8  }
  0x16   : > { %s3104_s22 = sld [smem:[#allocation31_spill]]  ;;  %p2149_p0 = scmp.ge.s32.totalorder %s2542_s8, 1 }
  0x17   : > { %p671_p1 = scmp.lt.s32.totalorder %s2542_s8, 3  ;;  %p2252_p2 = scmp.eq.s32.totalorder %s2710_s3, 0 }
  0x18   : > { %s2544_s10 = smov [#allocation4]   ;;  %s3106_s25 = sld [smem:[#allocation32_spill]] }
  0x19   : > { %p2715_p3 = pnand %p2149_p0, %p671_p1  ;;  %s753_s0 = sshll.u32 %s2544_s10, 4  ;;  %s754_s0 = int_to_ptr.vmem [resolvable:$true] %s753_s0 }
  0x1a   : > { %s2545_s12 = smov [#allocation7]   ;;  %s3108_s21 = sld [smem:[#allocation30_spill]] }
  0x1b   : > { %p2233_p4 = pneg %p2715_p3  ;;  %s783_s1 = sshll.u32 %s2545_s12, 4  ;;  %s784_s1 = int_to_ptr.vmem [resolvable:$true] %s783_s1 }
  0x1c   : > { %s751_s30 = sshll.u32 %s3104_s22, 4  ;;  %s2546_s10 = smov 128   ;;  %s752_s30 = int_to_ptr.hbm [resolvable:$true] %s751_s30 }
  0x1d   : > { %p2726_p5 = pnand %p2252_p2, %p2233_p4  ;;  %s2547_s11 = smov 8  }
  0x1e   : > { %s781_s2 = sshll.u32 %s3106_s25, 4  ;;  %s2548_s29 = smov [#allocation2]   ;;  %s782_s2 = int_to_ptr.hbm [resolvable:$true] %s781_s2 }
  0x1f   : > { %2239 = dma.hbm_to_vmem [thread:$0]  (!%p2726_p5), %s752_s30, 512, %s754_s0, [#allocation5], %s2546_s10, %s2546_s10, %s2547_s11  }
  0x20   : > { %s740_s9 = sshll.u32 %s3108_s21, 4  ;;  %s742_s22 = sshll.u32 %s2548_s29, 4  ;;  %s741_s9 = int_to_ptr.hbm [resolvable:$true] %s740_s9  ;;  %s743_s22 = int_to_ptr.vmem [resolvable:$true] %s742_s22 }
  0x21   : > { %2245 = dma.hbm_to_vmem [thread:$0]  (!%p2726_p5), %s782_s2, 16, %s784_s1, [#allocation8]  }
  0x22   : > { %s766_s12 = sshll.u32 %s3071_s23, 4  ;;  %s793_s21 = sshll.u32 %s3074_s26, 4  ;;  %s767_s12 = int_to_ptr.hbm [resolvable:$true] %s766_s12  ;;  %s794_s21 = int_to_ptr.hbm [resolvable:$true] %s793_s21 }
  0x23   : > { %2236 = dma.hbm_to_vmem [thread:$0]  (!%p2726_p5), %s741_s9, 16, %s743_s22, [#allocation3]  }
  0x24   : > { %s2549_s30 = smov [#allocation6]   ;;  %s2550_s2 = smov [#allocation9]  }
  0x25   : > { %s768_s0 = sshll.u32 %s2549_s30, 4  ;;  %s795_s1 = sshll.u32 %s2550_s2, 4  ;;  %s769_s0 = int_to_ptr.vmem [resolvable:$true] %s768_s0  ;;  %s796_s1 = int_to_ptr.vmem [resolvable:$true] %s795_s1 }
  0x26   : > { %2242 = dma.hbm_to_vmem [thread:$0]  (!%p2726_p5), %s767_s12, 16, %s769_s0, [#allocation5]  }
  0x27   : > { %s805_s8 = sshll.u32 %s3075_s27, 4  ;;  %s2551_s22 = smov [#allocation10]   ;;  %s806_s8 = int_to_ptr.hbm [resolvable:$true] %s805_s8 }
  0x28   : > { %2248 = dma.hbm_to_vmem [thread:$0]  (!%p2726_p5), %s794_s21, 16, %s796_s1, [#allocation8]  }
  0x29   : > { %s807_s9 = sshll.u32 %s2551_s22, 4  ;;  %834 = sbr.rel (%p2715_p3) target bundleno = 3880 (0xf28), region = 132  ;;  %s808_s9 = int_to_ptr.vmem [resolvable:$true] %s807_s9 }
  0x2a   : > { %2251 = dma.hbm_to_vmem [thread:$0]  (!%p2726_p5), %s806_s8, 16, %s808_s9, [#allocation11]  }
  0x2e   : > { %2525 = dma.done.wait (%p2252_p2), [#allocation3], 16  }
  0x2f   : > { %2527 = vsyncadd (%p2252_p2), [#allocation3], 4294967280 }
  0x30   : > { %2529 = dma.done.wait (%p2252_p2), [#allocation5], 528  }
  0x31   : > { %2531 = vsyncadd (%p2252_p2), [#allocation5], 4294966768 }
  0x32   : > { %2533 = dma.done.wait (%p2252_p2), [#allocation8], 32  }
  0x33   : > { %2535 = vsyncadd (%p2252_p2), [#allocation8], 4294967264 }
  0x34   : > { %2537 = dma.done.wait (%p2252_p2), [#allocation11], 16  }
  0x35   : > { %2539 = vsyncadd (%p2252_p2), [#allocation11], 4294967280  ;;  %p936_p6 = scmp.lt.s32.totalorder %s2710_s3, 1  ;;  %s3109_s11 = sld [smem:[#allocation21_spill]]  ;;  %vm973_vm0 = vcmask 261120   ;;  %vm1043_vm1 = vcmask 64512  }
  0x36   : > { %s3110_s30 = sld [smem:[#allocation17_spill]]  ;;  %s3083_s10 = smov 112   ;;  %vm1964_vm9 = vcmask 523264  }
  0x37   : > { %s3126_s3 = smov (!%p936_p6, %s2710_s3), 1  ;;  %s3111_s25 = sld [smem:[#allocation19_spill]] }
  0x38   : > { %s2774_s21 = sshll.u32 %s3126_s3, 3  ;;  %s3112_s12 = sld [smem:[#allocation23_spill]] }
  0x39   : > { %s3113_s7 = sld [smem:[#allocation22_spill]]  ;;  %s3085_s8 = smov 104  }
  0x3a   : > { %s3114_s5 = sld [smem:[#allocation20_spill]]  ;;  %s3122_s2 = smov 104  }
  0x3b   : > { %v958_v0 = vld [vmem:[%s3109_s11 + $0x18] sm:$0xff]  ;;  %v957_v1 = vld [vmem:[%s3109_s11 + $0x10] sm:$0xff]  ;;  %v956_v2 = vld [vmem:[%s3109_s11 + $0x8] sm:$0xff]  ;;  %s3115_s3 = sld [smem:[#allocation24_spill]]  ;;  %s3123_s1 = smov 112  }
  0x3c   : > { %s939_s0 = scalar_lea.vmem %s3110_s30, %s2774_s21  ;;  %1012 = vmatpush.msra.mxu1 %v958_v0  ;;  %v955_v4 = vld [vmem:[%s3109_s11] sm:$0xff]  ;;  %s2552_s30 = smov 120  }
  0x3d   : > { %v953_v3 = vld [vmem:[%s3111_s25 + $0x18] sm:$0xff]  ;;  %v952_v5 = vld [vmem:[%s3111_s25 + $0x10] sm:$0xff]  ;;  %v2801_v7 = vld [vmem:[%s939_s0] sm:$0xff]  ;;  %s3116_s9 = sld [smem:[#allocation25_spill]] }
  0x3e   : > { %989 = vmatpush.msra.mxu0 %v953_v3  ;;  %v963_v6 = vld [vmem:[%s3112_s12 + $0x18] sm:$0xff]  ;;  %1013 = vmatpush.msra.mxu1 %v957_v1  ;;  %v951_v8 = vld [vmem:[%s3111_s25 + $0x8] sm:$0xff]  ;;  %v962_v9 = vld [vmem:[%s3112_s12 + $0x10] sm:$0xff]  ;;  %s3117_s0 = sld [smem:[#allocation26_spill]] }
  0x3f   : > { %1035 = vmatpush.msra.mxu2 %v963_v6  ;;  %v950_v10 = vld [vmem:[%s3111_s25] sm:$0xff]  ;;  %v961_v11 = vld [vmem:[%s3112_s12 + $0x8] sm:$0xff]  ;;  %s3121_s29 = sld [smem:[#allocation28_spill]] }
  0x40   : > { %990 = vmatpush.msra.mxu0 %v952_v5  ;;  %1014 = vmatpush.msra.mxu1 %v956_v2  ;;  %v960_v12 = vld [vmem:[%s3112_s12] sm:$0xff] }
  0x41   : > { %1036 = vmatpush.msra.mxu2 %v962_v9  ;;  %v2284_v13 = vld [vmem:[%s3113_s7] ss:$0 sm:$0xff]  ;;  %s3119_s7 = sld [smem:[#allocation29_spill]] }
  0x42   : > { %991 = vmatpush.msra.mxu0 %v951_v8  ;;  %1015 = vmatpush.msra.mxu1 %v955_v4  ;;  %v2285_v14 = vld [vmem:[%s3114_s5] ss:$0 sm:$0xff] }
  0x43   : > { %1037 = vmatpush.msra.mxu2 %v961_v11  ;;  %2168 = vmatmul.msk.f32.vlgmr.msra.gmra.mxu1 %vm973_vm0, %v2801_v7  ;;  %v2286_v19 = vld [vmem:[%s3115_s3] ss:$0 sm:$0xff]  ;;  %v966_v47 = vld [vmem:[%s3116_s9 + $0x8] sm:$0xff]  ;;  %v967_v6 = vld [vmem:[%s3116_s9 + $0x10] sm:$0xff]  ;;  %s3118_s3 = sld [smem:[#allocation18_spill]] }
  0x44   : > { %992 = vmatpush.msra.mxu0 %v950_v10  ;;  %v965_v50 = vld [vmem:[%s3116_s9] sm:$0xff] }
  0x45   : > { %2167 = vmatmul.msk.f32.vlgmr.msra.gmra.mxu0 %vm973_vm0, %v2801_v7  ;;  %1038 = vmatpush.msra.mxu2 %v960_v12 }
  0x46   : > { %2169 = vmatmul.msk.f32.vlgmr.msra.gmra.mxu2 %vm973_vm0, %v2801_v7 }
  0x47   : > { %1299 = vmatpush.msrb.mxu2 %v967_v6 }
  0xc0   : > { %v1017_v15 = vpop.f32.mrf.mxu1 }
  0xc1   : > { %v1018_v16 = vadd.f32 %v2284_v13, %v1017_v15 }
  0xc2   : > { %v994_v17 = vpop.f32.mrf.mxu0 }
  0xc3   : > { %v995_v18 = vadd.f32 %v2285_v14, %v994_v17  ;;  %1106 = vrot.lane.b32.xlu0 %v1018_v16, %s2552_s30  ;;  %2170 = vmatpush.xpose.msk.msra.mxu3 %vm1043_vm1, %v1018_v16  ;;  %v968_v17 = vld [vmem:[%s3116_s9 + $0x18] sm:$0xff] }
  0xc6   : > { %2171 = vmatmul.msk.f32.vlgmr.msra.gmra.mxu3 %vm1043_vm1, %v995_v18 }
  0xc9   : > { %v1040_v20 = vpop.f32.mrf.mxu2 }
  0xca   : > { %v2836_v21 = vadd.f32 %v2286_v19, %v1040_v20 }
  0xcb   : > { %1104 = vrot.lane.b32.xlu0 %v995_v18, %s2552_s30 }
  0xcc   : > { %1099 = vmatpush.msrb.mxu3 %v2836_v21 }
  0xce   : > { %1188 = vmatpush.msra.mxu3 %v966_v47 }
  0xd3   : > { %1144 = vrot.lane.b32.xlu0 %v2836_v21, %s2552_s30 }
  0xdb   : > { %1216 = vrot.lane.b32.xlu0 %v995_v18, %s3083_s10 }
  0xe3   : > { %1305 = vrot.lane.b32.xlu0 %v995_v18, %s3085_s8 }
 0x135   : > { %v1107_v22 = vpop.permute.xlu0 %1106 }
 0x136   : > { %2173 = vmatpush.xpose.msk.msrb.mxu0 %vm1043_vm1, %v1107_v22 }
 0x13d   : > { %v1105_v23 = vpop.permute.xlu0 %1104 }
 0x13e   : > { %2174 = vmatmul.msk.f32.vlgmr.msrb.gmra.mxu0 %vm1043_vm1, %v1105_v23 }
 0x145   : > { %v1145_v24 = vpop.permute.xlu0 %1144 }
 0x146   : > { %1165 = vmatpush.msrb.mxu1 %v1145_v24 }
 0x149   : > { %v1067_v27 = vpop.f32.mrf.mxu3 }
 0x14a   : > { %v1070_v28 = vsel %vm1043_vm1, %v1067_v27, -inf }
 0x14d   : > { %v1217_v40 = vpop.permute.xlu0 %1216 }
 0x155   : > { %v1306_v53 = vpop.permute.xlu0 %1305 }
 0x1bb   : > { %v1129_v25 = vpop.f32.mrf.mxu0 }
 0x1bc   : > { %v1132_v26 = vsel %vm1043_vm1, %v1129_v25, -inf }
 0x1bd   : > { %1133 = vmax.xlane.f32.xlu1 %v1132_v26 }
 0x1c5   : > { %1071 = vmax.xlane.f32.xlu1 %v1070_v28 }
 0x1de   : > { %1218 = vrot.lane.b32.xlu1 %v1018_v16, %s3083_s10 }
 0x230   : > { %v1134_v29 = vpop.xlane.xlu1 %1133 }
 0x231   : > { %v1135_v30 = vsub.f32 %v1129_v25, %v1134_v29 }
 0x233   : > { %v1136_v31 = vmul.f32 1.442695, %v1135_v30 }
 0x235   : > { %2300 = vpow2.f32 %v1136_v31 }
 0x238   : > { %v1072_v32 = vpop.xlane.xlu1 %1071 }
 0x239   : > { %v1073_v33 = vsub.f32 %v1067_v27, %v1072_v32  ;;  %v2555_v27 = vmov 32.0  }
 0x23b   : > { %v2301_v34 = vpop.eup %2300  ;;  %v1074_v35 = vmul.f32 1.442695, %v1073_v33 }
 0x23c   : > { %v1138_v36 = vsel %vm1043_vm1, %v2301_v34, 0.0 }
 0x23d   : > { %2302 = vpow2.f32 %v1074_v35  ;;  %1139 = vadd.xlane.f32.xlu2 %v1138_v36 }
 0x243   : > { %v2303_v37 = vpop.eup %2302 }
 0x244   : > { %v1076_v38 = vsel %vm1043_vm1, %v2303_v37, 0.0 }
 0x245   : > { %1077 = vadd.xlane.f32.xlu2 %v1076_v38  ;;  %v1446_v38 = vld [vmem:[%s3062_s14 + $0x18] sm:$0xff] }
 0x250   : > { %v1219_v39 = vpop.permute.xlu1 %1218 }
 0x251   : > { %2178 = vmatpush.xpose.msk.msra.mxu0 %vm1043_vm1, %v1219_v39  ;;  %v1445_v39 = vld [vmem:[%s3062_s14 + $0x10] sm:$0xff] }
 0x254   : > { %2179 = vmatmul.msk.f32.vlgmr.msra.gmra.mxu0 %vm1043_vm1, %v1217_v40  ;;  %v1444_v40 = vld [vmem:[%s3062_s14 + $0x8] sm:$0xff] }
 0x25d   : > { %1307 = vrot.lane.b32.xlu2 %v1018_v16, %s3085_s8 }
 0x2b0   : > { %v1140_v41 = vpop.xlane.xlu2 %1139 }
 0x2b1   : > { %2304 = vrcp.f32 %v1140_v41  ;;  %v1443_v41 = vld [vmem:[%s3062_s14] sm:$0xff] }
 0x2b7   : > { %v2305_v42 = vpop.eup %2304 }
 0x2b8   : > { %v1078_v43 = vpop.xlane.xlu2 %1077  ;;  %v1142_v44 = vmul.f32 %v2305_v42, %v2301_v34 }
 0x2b9   : > { %2306 = vrcp.f32 %v1078_v43  ;;  %v1441_v43 = vld [vmem:[%s3119_s7 + $0x18] sm:$0xff] }
 0x2ba   : > { %2175 = vmatmul.msk.f32.vlgmr.msrb.gmra.mxu1 %vm1043_vm1, %v1142_v44  ;;  %1476 = vmatpush.msra.mxu2 %v1441_v43  ;;  %v1440_v44 = vld [vmem:[%s3119_s7 + $0x10] sm:$0xff] }
 0x2bc   : > { %1477 = vmatpush.msra.mxu2 %v1440_v44 }
 0x2bf   : > { %v2307_v45 = vpop.eup %2306 }
 0x2c0   : > { %v1080_v46 = vmul.f32 %v2307_v45, %v2303_v37  ;;  %v1308_v52 = vpop.permute.xlu2 %1307  ;;  %v1439_v45 = vld [vmem:[%s3119_s7 + $0x8] sm:$0xff] }
 0x2c1   : > { %1478 = vmatpush.msra.mxu2 %v1439_v45 }
 0x2c2   : > { %2172 = vmatmul.msk.f32.vlgmr.msrb.gmra.mxu3 %vm1043_vm1, %v1080_v46  ;;  %v1438_v46 = vld [vmem:[%s3119_s7] sm:$0xff] }
 0x2c3   : > { %1211 = vmatpush.msrb.mxu3 %v965_v50  ;;  %1479 = vmatpush.msra.mxu2 %v1438_v46 }
 0x2d1   : > { %v1241_v48 = vpop.f32.mrf.mxu0 }
 0x2d2   : > { %v1244_v49 = vsel %vm1043_vm1, %v1241_v48, -inf }
 0x2d3   : > { %1245 = vmax.xlane.f32.xlu0 %v1244_v49 }
 0x2e7   : > { %1255 = vrot.lane.b32.xlu0 %v2836_v21, %s3083_s10 }
 0x337   : > { %v1167_v51 = vpop.f32.mrf.mxu1 }
 0x338   : > { %2176 = vmatmul.msk.f32.vlgmr.msra.gmra.mxu3 %vm1043_vm1, %v1167_v51 }
 0x339   : > { %2182 = vmatpush.xpose.msk.msra.mxu3 %vm1043_vm1, %v1308_v52 }
 0x345   : > { %v1101_v54 = vpop.f32.mrf.mxu3 }
 0x346   : > { %2177 = vmatmul.msk.f32.vlgmr.msrb.gmra.mxu3 %vm1043_vm1, %v1101_v54  ;;  %v1246_v55 = vpop.xlane.xlu0 %1245 }
 0x347   : > { %v1247_v56 = vsub.f32 %v1241_v48, %v1246_v55  ;;  %1502 = vmatpush.msrb.mxu3 %v1446_v38 }
 0x349   : > { %v1248_v57 = vmul.f32 1.442695, %v1247_v56  ;;  %1503 = vmatpush.msrb.mxu3 %v1445_v39 }
 0x34b   : > { %2308 = vpow2.f32 %v1248_v57  ;;  %1504 = vmatpush.msrb.mxu3 %v1444_v40 }
 0x34d   : > { %1505 = vmatpush.msrb.mxu3 %v1443_v41 }
 0x34e   : > { %2183 = vmatmul.msk.f32.vlgmr.msra.gmra.mxu3 %vm1043_vm1, %v1306_v53 }
 0x351   : > { %v2309_v58 = vpop.eup %2308 }
 0x352   : > { %v1250_v59 = vsel %vm1043_vm1, %v2309_v58, 0.0 }
 0x353   : > { %1251 = vadd.xlane.f32.xlu1 %v1250_v59  ;;  %v2289_v59 = vld [vmem:[%s3121_s29] ss:$0 sm:$0xff]  ;;  %s947_s29 = scalar_lea.vmem %s3076_s28, %s2774_s21 }
 0x359   : > { %v1256_v60 = vpop.permute.xlu0 %1255 }
 0x35a   : > { %1276 = vmatpush.msra.mxu1 %v1256_v60 }
 0x35c   : > { %1388 = vmatpush.msrb.mxu1 %v968_v17 }
 0x36c   : > { %1344 = vrot.lane.b32.xlu1 %v2836_v21, %s3085_s8  ;;  %v2287_v21 = vld [vmem:[%s3117_s0] ss:$0 sm:$0xff]  ;;  %s943_s0 = scalar_lea.vmem %s3118_s3, %s2774_s21 }
 0x36d   : > { %v949_v42 = vld [vmem:[%s943_s0] sm:$0xff]  ;;  %s3120_s0 = sld [smem:[#allocation27_spill]] }
 0x36e   : > { %2187 = vmatmul.msk.f32.vlgmr.msrb.gmra.mxu3 %vm973_vm0, %v949_v42 }
 0x373   : > { %v2288_v56 = vld [vmem:[%s3120_s0] ss:$0 sm:$0xff] }
 0x3bb   : > { %v1190_v61 = vpop.f32.mrf.mxu3 }
 0x3c6   : > { %v1252_v62 = vpop.xlane.xlu1 %1251 }
 0x3c7   : > { %2310 = vrcp.f32 %v1252_v62  ;;  %v2290_v62 = vld [vmem:[%s3063_s15] ss:$0 sm:$0xff] }
 0x3c9   : > { %v1213_v63 = vpop.f32.mrf.mxu3 }
 0x3ca   : > { %v1214_v0 = vadd.f32 %v1213_v63, %v1190_v61 }
 0x3cd   : > { %v2311_v1 = vpop.eup %2310 }
 0x3ce   : > { %v1254_v2 = vmul.f32 %v2311_v1, %v2309_v58  ;;  %v2291_v1 = vld [vmem:[%s3061_s13] ss:$0 sm:$0xff] }
 0x3d0   : > { %2180 = vmatmul.msk.f32.vlgmr.msra.gmra.mxu1 %vm1043_vm1, %v1254_v2 }
 0x3d1   : > { %v1330_v3 = vpop.f32.mrf.mxu3 }
 0x3d2   : > { %v1333_v4 = vsel %vm1043_vm1, %v1330_v3, -inf }
 0x3d3   : > { %1334 = vmax.xlane.f32.xlu2 %v1333_v4 }
 0x3de   : > { %v1345_v5 = vpop.permute.xlu1 %1344 }
 0x3df   : > { %1365 = vmatpush.msrb.mxu0 %v1345_v5 }
 0x3f1   : > { %v1507_v63 = vpop.f32.mrf.mxu3 }
 0x446   : > { %v1335_v8 = vpop.xlane.xlu2 %1334 }
 0x447   : > { %v1336_v9 = vsub.f32 %v1330_v3, %v1335_v8 }
 0x449   : > { %v1337_v10 = vmul.f32 1.442695, %v1336_v9 }
 0x44b   : > { %2312 = vpow2.f32 %v1337_v10 }
 0x44d   : > { %v1278_v11 = vpop.f32.mrf.mxu1 }
 0x44e   : > { %2181 = vmatmul.msk.f32.vlgmr.msrb.gmra.mxu2 %vm1043_vm1, %v1278_v11  ;;  %v1451_v11 = vld [vmem:[%s3064_s16 + $0x18] sm:$0xff] }
 0x44f   : > { %1525 = vmatpush.msra.mxu0 %v1451_v11 }
 0x451   : > { %v2313_v12 = vpop.eup %2312 }
 0x452   : > { %v1339_v13 = vsel %vm1043_vm1, %v2313_v12, 0.0 }
 0x453   : > { %1340 = vadd.xlane.f32.xlu2 %v1339_v13  ;;  %v1449_v13 = vld [vmem:[%s3064_s16 + $0x8] sm:$0xff] }
 0x4c6   : > { %v1341_v14 = vpop.xlane.xlu2 %1340 }
 0x4c7   : > { %2314 = vrcp.f32 %v1341_v14  ;;  %v1448_v14 = vld [vmem:[%s3064_s16] sm:$0xff] }
 0x4c8   : > { %2316 = vrcp.f32 %v2555_v27 }
 0x4cd   : > { %v2315_v15 = vpop.eup %2314 }
 0x4ce   : > { %v1343_v16 = vmul.f32 %v2315_v15, %v2313_v12  ;;  %v2317_v28 = vpop.eup %2316  ;;  %v1450_v12 = vld [vmem:[%s3064_s16 + $0x10] sm:$0xff] }
 0x4cf   : > { %v1405_v29 = vmul.f32 32.0, %v2317_v28  ;;  %vm1409_vm2 = vweird.f32 %v2317_v28  ;;  %1526 = vmatpush.msra.mxu0 %v1450_v12  ;;  %v2293_v12 = vld [vmem:[%s3067_s19] ss:$0 sm:$0xff] }
 0x4d0   : > { %2184 = vmatmul.msk.f32.vlgmr.msrb.gmra.mxu0 %vm1043_vm1, %v1343_v16 }
 0x4d1   : > { %v1301_v19 = vpop.f32.mrf.mxu2  ;;  %v1406_v30 = vsub.f32 1.0, %v1405_v29  ;;  %1527 = vmatpush.msra.mxu0 %v1449_v13 }
 0x4d2   : > { %v1304_v20 = vadd.f32 %v1301_v19, %v1214_v0  ;;  %v1508_v0 = vadd.f32 %v2290_v62, %v1507_v63 }
 0x4d3   : > { %v1407_v31 = vmul.f32 %v2317_v28, %v1406_v30  ;;  %1528 = vmatpush.msra.mxu0 %v1448_v14 }
 0x4d4   : > { %1595 = vrot.lane.b32.xlu1 %v1508_v0, %s2552_s30  ;;  %2189 = vmatpush.xpose.msk.msra.mxu1 %vm1043_vm1, %v1508_v0 }
 0x4d5   : > { %v1408_v32 = vadd.f32 %v2317_v28, %v1407_v31 }
 0x4d7   : > { %v2889_v33 = vsel %vm1409_vm2, %v2317_v28, %v1408_v32 }
 0x4d8   : > { %2188 = vmatmul.msk.f32.vlgmr.msra.gmra.mxu0 %vm973_vm0, %v949_v42 }
 0x4dc   : > { %1796 = vrot.lane.b32.xlu1 %v1508_v0, %s3122_s2 }
 0x546   : > { %v1596_v4 = vpop.permute.xlu1 %1595 }
 0x547   : > { %2192 = vmatpush.xpose.msk.msra.mxu3 %vm1043_vm1, %v1596_v4 }
 0x54d   : > { %v1367_v18 = vpop.f32.mrf.mxu0 }
 0x54e   : > { %2185 = vmatmul.msk.f32.vlgmr.msrb.gmra.mxu1 %vm1043_vm1, %v1367_v18  ;;  %v1797_v5 = vpop.permute.xlu1 %1796 }
 0x5cb   : > { %v1390_v22 = vpop.f32.mrf.mxu1 }
 0x5cc   : > { %v1393_v23 = vadd.f32 %v1390_v22, %v1304_v20  ;;  %v2292_v20 = vld [vmem:[%s3065_s17] ss:$0 sm:$0xff] }
 0x5ce   : > { %v1397_v24 = vadd.f32 %v2287_v21, %v1393_v23  ;;  %v1530_v21 = vpop.f32.mrf.mxu0  ;;  %v1453_v23 = vld [vmem:[%s3066_s18] sm:$0xff] }
 0x5cf   : > { %v1531_v22 = vadd.f32 %v2292_v20, %v1530_v21 }
 0x5d0   : > { %v1398_v25 = vadd.f32 %v1397_v24, %v2801_v7 }
 0x5d1   : > { %1588 = vmatpush.msrb.mxu2 %v1531_v22 }
 0x5d2   : > { %v1401_v26 = vsel %vm973_vm0, %v1398_v25, 0.0 }
 0x5d3   : > { %1402 = vadd.xlane.f32.xlu2 %v1401_v26 }
 0x646   : > { %v1403_v34 = vpop.xlane.xlu2 %1402 }
 0x647   : > { %v1411_v35 = vmul.f32 %v2889_v33, %v1403_v34 }
 0x649   : > { %v1412_v36 = vsub.f32 %v1398_v25, %v1411_v35 }
 0x64b   : > { %v1413_v37 = vmul.f32 %v1412_v36, %v1412_v36 }
 0x64d   : > { %v1414_v7 = vsel %vm973_vm0, %v1413_v37, 0.0 }
 0x64e   : > { %1415 = vadd.xlane.f32.xlu2 %v1414_v7 }
 0x6c1   : > { %v1416_v47 = vpop.xlane.xlu2 %1415 }
 0x6c2   : > { %v1417_v48 = vmul.f32 %v1416_v47, %v2889_v33 }
 0x6c4   : > { %v1418_v49 = vadd.f32 1e-05, %v1417_v48 }
 0x6c6   : > { %2318 = vrsqrt.f32 %v1418_v49  ;;  %vm1425_vm4 = vweird.f32 %v1418_v49 }
 0x6cc   : > { %v2319_v50 = vpop.eup %2318 }
 0x6cd   : > { %v1420_v51 = vmul.f32 %v2319_v50, %v1418_v49  ;;  %vm1426_vm3 = vweird.f32 %v2319_v50 }
 0x6ce   : > { %vm1427_vm5 = vmor %vm1425_vm4, %vm1426_vm3 }
 0x6cf   : > { %v1421_v52 = vmul.f32 %v2319_v50, %v1420_v51 }
 0x6d1   : > { %v1422_v53 = vmul.f32 0.5, %v1421_v52 }
 0x6d3   : > { %v1423_v54 = vsub.f32 1.5, %v1422_v53 }
 0x6d5   : > { %v1424_v55 = vmul.f32 %v2319_v50, %v1423_v54 }
 0x6d7   : > { %v1428_v57 = vsel %vm1427_vm5, %v2319_v50, %v1424_v55 }
 0x6d8   : > { %v1429_v58 = vmul.f32 %v1428_v57, %v1412_v36 }
 0x6da   : > { %v1433_v60 = vmul.f32 %v2288_v56, %v1429_v58 }
 0x6dc   : > { %v2929_v61 = vadd.f32 %v2289_v59, %v1433_v60 }
 0x6de   : > { %2186 = vmatmul.msk.f32.vlgmr.msra.gmra.mxu2 %vm973_vm0, %v2929_v61 }
 0x6df   : > { %1700 = vmatpush.msra.mxu2 %v1453_v23  ;;  %v1923_v23 = vld [vmem:[#allocation4 + $0x18] sm:$0xff] }
 0x761   : > { %v1481_v2 = vpop.f32.mrf.mxu2 }
 0x762   : > { %v1482_v3 = vadd.f32 %v2291_v1, %v1481_v2  ;;  %v1456_v1 = vld [vmem:[%s3066_s18 + $0x18] sm:$0xff]  ;;  %v1454_v2 = vld [vmem:[%s3066_s18 + $0x8] sm:$0xff] }
 0x763   : > { %1677 = vmatpush.msrb.mxu1 %v1454_v2 }
 0x764   : > { %1794 = vrot.lane.b32.xlu1 %v1482_v3, %s3122_s2  ;;  %2190 = vmatmul.msk.f32.vlgmr.msra.gmra.mxu1 %vm1043_vm1, %v1482_v3 }
 0x76c   : > { %1707 = vrot.lane.b32.xlu1 %v1508_v0, %s3123_s1 }
 0x7d6   : > { %v1795_v6 = vpop.permute.xlu1 %1794 }
 0x7de   : > { %v1708_v8 = vpop.permute.xlu1 %1707 }
 0x7df   : > { %2197 = vmatpush.xpose.msk.msrb.mxu3 %vm1043_vm1, %v1708_v8 }
 0x7e1   : > { %v1556_v9 = vpop.f32.mrf.mxu1 }
 0x7e2   : > { %v1559_v10 = vsel %vm1043_vm1, %v1556_v9, -inf }
 0x7e3   : > { %1560 = vmax.xlane.f32.xlu0 %v1559_v10 }
 0x856   : > { %v1561_v15 = vpop.xlane.xlu0 %1560 }
 0x857   : > { %v1562_v16 = vsub.f32 %v1556_v9, %v1561_v15 }
 0x859   : > { %v1563_v17 = vmul.f32 1.442695, %v1562_v16 }
 0x85b   : > { %2320 = vpow2.f32 %v1563_v17 }
 0x861   : > { %v2321_v18 = vpop.eup %2320 }
 0x862   : > { %v1565_v19 = vsel %vm1043_vm1, %v2321_v18, 0.0 }
 0x863   : > { %1566 = vadd.xlane.f32.xlu2 %v1565_v19 }
 0x87b   : > { %1593 = vrot.lane.b32.xlu2 %v1482_v3, %s2552_s30 }
 0x883   : > { %1705 = vrot.lane.b32.xlu2 %v1482_v3, %s3123_s1  ;;  %v1455_v3 = vld [vmem:[%s3066_s18 + $0x10] sm:$0xff] }
 0x884   : > { %1788 = vmatpush.msra.mxu1 %v1455_v3 }
 0x8d6   : > { %v1567_v24 = vpop.xlane.xlu2 %1566 }
 0x8d7   : > { %2322 = vrcp.f32 %v1567_v24  ;;  %v1922_v24 = vld [vmem:[#allocation4 + $0x10] sm:$0xff] }
 0x8dd   : > { %v2323_v25 = vpop.eup %2322 }
 0x8de   : > { %v1569_v26 = vmul.f32 %v2323_v25, %v2321_v18  ;;  %v1594_v27 = vpop.permute.xlu2 %1593  ;;  %v1921_v25 = vld [vmem:[#allocation4 + $0x8] sm:$0xff] }
 0x8df   : > { %2193 = vmatmul.msk.f32.vlgmr.msra.gmra.mxu3 %vm1043_vm1, %v1594_v27  ;;  %v1931_v27 = vld [vmem:[%s3072_s24 + $0x30] sm:$0xff] }
 0x8e0   : > { %2191 = vmatmul.msk.f32.vlgmr.msrb.gmra.mxu2 %vm1043_vm1, %v1569_v26  ;;  %v1920_v26 = vld [vmem:[#allocation4] sm:$0xff] }
 0x8e1   : > { %2201 = vmatpush.xpose.msk.msrb.mxu2 %vm1043_vm1, %v1797_v5 }
 0x8e6   : > { %v1706_v28 = vpop.permute.xlu2 %1705 }
 0x8e7   : > { %2198 = vmatmul.msk.f32.vlgmr.msrb.gmra.mxu3 %vm1043_vm1, %v1706_v28  ;;  %v1930_v28 = vld [vmem:[%s3072_s24 + $0x28] sm:$0xff] }
 0x962   : > { %v1618_v29 = vpop.f32.mrf.mxu3 }
 0x963   : > { %v1590_v30 = vpop.f32.mrf.mxu2  ;;  %v1621_v31 = vsel %vm1043_vm1, %v1618_v29, -inf }
 0x964   : > { %2196 = vmatmul.msk.f32.vlgmr.msra.gmra.mxu2 %vm1043_vm1, %v1590_v30  ;;  %1622 = vmax.xlane.f32.xlu1 %v1621_v31  ;;  %v1929_v31 = vld [vmem:[%s3072_s24 + $0x20] sm:$0xff] }
 0x96a   : > { %v1730_v32 = vpop.f32.mrf.mxu3 }
 0x96b   : > { %v1733_v34 = vsel %vm1043_vm1, %v1730_v32, -inf }
 0x96c   : > { %2202 = vmatmul.msk.f32.vlgmr.msrb.gmra.mxu2 %vm1043_vm1, %v1795_v6  ;;  %1734 = vmax.xlane.f32.xlu2 %v1733_v34  ;;  %v1928_v34 = vld [vmem:[%s3072_s24 + $0x18] sm:$0xff] }
 0x97d   : > { %1833 = vrot.lane.b32.xlu1 %v1531_v22, %s3122_s2 }
 0x984   : > { %1744 = vrot.lane.b32.xlu2 %v1531_v22, %s3123_s1 }
 0x9d7   : > { %v1623_v35 = vpop.xlane.xlu1 %1622 }
 0x9d8   : > { %v1624_v36 = vsub.f32 %v1618_v29, %v1623_v35 }
 0x9da   : > { %v1625_v37 = vmul.f32 1.442695, %v1624_v36 }
 0x9dc   : > { %2324 = vpow2.f32 %v1625_v37 }
 0x9df   : > { %v1735_v39 = vpop.xlane.xlu2 %1734 }
 0x9e0   : > { %v1736_v40 = vsub.f32 %v1730_v32, %v1735_v39 }
 0x9e2   : > { %v2325_v7 = vpop.eup %2324  ;;  %v1737_v42 = vmul.f32 1.442695, %v1736_v40  ;;  %v2294_v40 = vld [vmem:[%s3068_s20] ss:$0 sm:$0xff] }
 0x9e3   : > { %v1627_v38 = vsel %vm1043_vm1, %v2325_v7, 0.0 }
 0x9e4   : > { %1628 = vadd.xlane.f32.xlu0 %v1627_v38  ;;  %2326 = vpow2.f32 %v1737_v42 }
 0x9e7   : > { %v1702_v41 = vpop.f32.mrf.mxu2  ;;  %v1745_v62 = vpop.permute.xlu2 %1744 }
 0x9ea   : > { %v2327_v46 = vpop.eup %2326 }
 0x9eb   : > { %v1739_v47 = vsel %vm1043_vm1, %v2327_v46, 0.0 }
 0x9ef   : > { %v1819_v43 = vpop.f32.mrf.mxu2  ;;  %v1834_v44 = vpop.permute.xlu1 %1833 }
 0x9f0   : > { %1854 = vmatpush.msra.mxu3 %v1834_v44  ;;  %v1822_v45 = vsel %vm1043_vm1, %v1819_v43, -inf }
 0x9f1   : > { %1823 = vmax.xlane.f32.xlu0 %v1822_v45 }
 0x9f9   : > { %1740 = vadd.xlane.f32.xlu0 %v1739_v47  ;;  %v1926_v47 = vld [vmem:[%s3072_s24 + $0x8] sm:$0xff] }
 0xa57   : > { %v1629_v48 = vpop.xlane.xlu0 %1628 }
 0xa64   : > { %v1824_v49 = vpop.xlane.xlu0 %1823 }
 0xa65   : > { %v1825_v50 = vsub.f32 %v1819_v43, %v1824_v49  ;;  %v2295_v43 = vld [vmem:[#allocation2] ss:$0 sm:$0xff]  ;;  %v2296_v49 = vld [vmem:[#allocation6] ss:$0 sm:$0xff] }
 0xa67   : > { %v1826_v51 = vmul.f32 1.442695, %v1825_v50 }
 0xa69   : > { %2328 = vpow2.f32 %v1826_v51 }
 0xa6c   : > { %v1741_v54 = vpop.xlane.xlu0 %1740 }
 0xa6f   : > { %v2329_v52 = vpop.eup %2328 }
 0xa70   : > { %v1828_v53 = vsel %vm1043_vm1, %v2329_v52, 0.0 }
 0xa71   : > { %1829 = vadd.xlane.f32.xlu0 %v1828_v53  ;;  %v2297_v53 = vld [vmem:[#allocation7] ss:$0 sm:$0xff] }
 0xa85   : > { %1633 = vrot.lane.b32.xlu0 %v1531_v22, %s2552_s30 }
 0xae4   : > { %v1830_v55 = vpop.xlane.xlu0 %1829 }
 0xae5   : > { %2330 = vrcp.f32 %v1830_v55 }
 0xae6   : > { %2332 = vrcp.f32 %v1629_v48  ;;  %v1925_v48 = vld [vmem:[%s3072_s24] sm:$0xff] }
 0xae7   : > { %2334 = vrcp.f32 %v1741_v54 }
 0xaeb   : > { %v2331_v56 = vpop.eup %2330 }
 0xaec   : > { %v1832_v57 = vmul.f32 %v2331_v56, %v2329_v52  ;;  %v2333_v58 = vpop.eup %2332 }
 0xaed   : > { %v1631_v59 = vmul.f32 %v2333_v58, %v2325_v7  ;;  %v2335_v63 = vpop.eup %2334 }
 0xaee   : > { %2203 = vmatmul.msk.f32.vlgmr.msra.gmra.mxu3 %vm1043_vm1, %v1832_v57  ;;  %v1743_v0 = vmul.f32 %v2335_v63, %v2327_v46  ;;  %v1927_v46 = vld [vmem:[%s3072_s24 + $0x10] sm:$0xff] }
 0xaf7   : > { %v1634_v60 = vpop.permute.xlu0 %1633 }
 0xaf8   : > { %1654 = vmatpush.msrb.mxu0 %v1634_v60 }
 0xaf9   : > { %2194 = vmatmul.msk.f32.vlgmr.msrb.gmra.mxu0 %vm1043_vm1, %v1631_v59 }
 0xafa   : > { %1765 = vmatpush.msra.mxu0 %v1745_v62 }
 0xafc   : > { %1877 = vmatpush.msrb.mxu0 %v1456_v1 }
 0xb01   : > { %2199 = vmatmul.msk.f32.vlgmr.msra.gmra.mxu0 %vm1043_vm1, %v1743_v0 }
 0xb71   : > { %v1856_v4 = vpop.f32.mrf.mxu3 }
 0xb72   : > { %2204 = vmatmul.msk.f32.vlgmr.msrb.gmra.mxu0 %vm1043_vm1, %v1856_v4 }
 0xb76   : > { %v1656_v5 = vpop.f32.mrf.mxu0 }
 0xb77   : > { %2195 = vmatmul.msk.f32.vlgmr.msrb.gmra.mxu1 %vm1043_vm1, %v1656_v5 }
 0xb78   : > { %1952 = vmatpush.msrb.mxu1 %v1923_v23 }
 0xb7a   : > { %1953 = vmatpush.msrb.mxu1 %v1922_v24 }
 0xb7c   : > { %1954 = vmatpush.msrb.mxu1 %v1921_v25 }
 0xb7e   : > { %v1767_v6 = vpop.f32.mrf.mxu0  ;;  %1955 = vmatpush.msrb.mxu1 %v1920_v26 }
 0xb7f   : > { %2200 = vmatmul.msk.f32.vlgmr.msra.gmra.mxu1 %vm1043_vm1, %v1767_v6 }
 0xbef   : > { %v1879_v13 = vpop.f32.mrf.mxu0 }
 0xbf4   : > { %v1679_v8 = vpop.f32.mrf.mxu1 }
 0xbf5   : > { %v1703_v9 = vadd.f32 %v1702_v41, %v1679_v8 }
 0xbfc   : > { %v1790_v10 = vpop.f32.mrf.mxu1 }
 0xbfd   : > { %v1793_v11 = vadd.f32 %v1790_v10, %v1703_v9  ;;  %v2298_v10 = vld [vmem:[#allocation9] ss:$0 sm:$0xff] }
 0xbff   : > { %v1882_v14 = vadd.f32 %v1879_v13, %v1793_v11 }
 0xc01   : > { %v1886_v15 = vadd.f32 %v2293_v12, %v1882_v14  ;;  %v2299_v12 = vld [vmem:[#allocation10] ss:$0 sm:$0xff] }
 0xc03   : > { %v1887_v16 = vadd.f32 %v1886_v15, %v2929_v61  ;;  %v1932_v61 = vld [vmem:[%s3072_s24 + $0x38] sm:$0xff] }
 0xc04   : > { %1976 = vmatpush.msra.mxu2 %v1932_v61 }
 0xc05   : > { %v1890_v17 = vsel %vm973_vm0, %v1887_v16, 0.0 }
 0xc06   : > { %1891 = vadd.xlane.f32.xlu0 %v1890_v17  ;;  %1977 = vmatpush.msra.mxu2 %v1931_v27 }
 0xc08   : > { %1978 = vmatpush.msra.mxu2 %v1930_v28 }
 0xc0a   : > { %1979 = vmatpush.msra.mxu2 %v1929_v31 }
 0xc0c   : > { %1980 = vmatpush.msra.mxu2 %v1928_v34 }
 0xc0e   : > { %1981 = vmatpush.msra.mxu2 %v1927_v46 }
 0xc10   : > { %1982 = vmatpush.msra.mxu2 %v1926_v47 }
 0xc12   : > { %1983 = vmatpush.msra.mxu2 %v1925_v48 }
 0xc79   : > { %v1892_v18 = vpop.xlane.xlu0 %1891 }
 0xc7a   : > { %v1893_v19 = vmul.f32 %v1892_v18, %v2889_v33 }
 0xc7c   : > { %v1894_v20 = vsub.f32 %v1887_v16, %v1893_v19 }
 0xc7e   : > { %v1895_v21 = vmul.f32 %v1894_v20, %v1894_v20 }
 0xc80   : > { %v1896_v22 = vsel %vm973_vm0, %v1895_v21, 0.0 }
 0xc81   : > { %1897 = vadd.xlane.f32.xlu1 %v1896_v22 }
 0xcf4   : > { %v1898_v29 = vpop.xlane.xlu1 %1897 }
 0xcf5   : > { %v1899_v30 = vmul.f32 %v1898_v29, %v2889_v33 }
 0xcf7   : > { %v1900_v32 = vadd.f32 1e-05, %v1899_v30 }
 0xcf9   : > { %2336 = vrsqrt.f32 %v1900_v32  ;;  %vm1907_vm7 = vweird.f32 %v1900_v32 }
 0xcff   : > { %v2337_v35 = vpop.eup %2336 }
 0xd00   : > { %v1902_v36 = vmul.f32 %v2337_v35, %v1900_v32  ;;  %vm1908_vm6 = vweird.f32 %v2337_v35 }
 0xd01   : > { %vm1909_vm8 = vmor %vm1907_vm7, %vm1908_vm6 }
 0xd02   : > { %v1903_v37 = vmul.f32 %v2337_v35, %v1902_v36 }
 0xd04   : > { %v1904_v7 = vmul.f32 0.5, %v1903_v37 }
 0xd06   : > { %v1905_v38 = vsub.f32 1.5, %v1904_v7 }
 0xd08   : > { %v1906_v39 = vmul.f32 %v2337_v35, %v1905_v38 }
 0xd0a   : > { %v1910_v41 = vsel %vm1909_vm8, %v2337_v35, %v1906_v39 }
 0xd0b   : > { %v1911_v42 = vmul.f32 %v1910_v41, %v1894_v20 }
 0xd0d   : > { %v1915_v44 = vmul.f32 %v2294_v40, %v1911_v42 }
 0xd0f   : > { %v1919_v45 = vadd.f32 %v2295_v43, %v1915_v44 }
 0xd11   : > { %2205 = vmatmul.msk.f32.vlgmr.msrb.gmra.mxu1 %vm973_vm0, %v1919_v45 }
 0xd8e   : > { %v1957_v50 = vpop.f32.mrf.mxu1 }
 0xd8f   : > { %v1958_v51 = vadd.f32 %v2296_v49, %v1957_v50 }
 0xd91   : > { %v1960_v52 = vmax.f32 %v1958_v51, 0.0 }
 0xd93   : > { %2206 = vmatmul.msk.f32.vlgmr.msra.gmra.mxu2 %vm1964_vm9, %v1960_v52 }
 0xe16   : > { %v1985_v54 = vpop.f32.mrf.mxu2 }
 0xe17   : > { %v1986_v55 = vadd.f32 %v2297_v53, %v1985_v54 }
 0xe19   : > { %v1988_v56 = vadd.f32 %v1986_v55, %v1919_v45 }
 0xe1b   : > { %v1991_v57 = vsel %vm973_vm0, %v1988_v56, 0.0 }
 0xe1c   : > { %1992 = vadd.xlane.f32.xlu2 %v1991_v57 }
 0xe8f   : > { %v1993_v58 = vpop.xlane.xlu2 %1992 }
 0xe90   : > { %v1994_v59 = vmul.f32 %v1993_v58, %v2889_v33 }
 0xe92   : > { %v1995_v60 = vsub.f32 %v1988_v56, %v1994_v59 }
 0xe94   : > { %v1996_v62 = vmul.f32 %v1995_v60, %v1995_v60 }
 0xe96   : > { %v1997_v63 = vsel %vm973_vm0, %v1996_v62, 0.0 }
 0xe97   : > { %1998 = vadd.xlane.f32.xlu0 %v1997_v63 }
 0xf0a   : > { %v1999_v0 = vpop.xlane.xlu0 %1998 }
 0xf0b   : > { %v2000_v1 = vmul.f32 %v1999_v0, %v2889_v33 }
 0xf0d   : > { %v2001_v2 = vadd.f32 1e-05, %v2000_v1 }
 0xf0f   : > { %2338 = vrsqrt.f32 %v2001_v2  ;;  %vm2008_vm11 = vweird.f32 %v2001_v2 }
 0xf15   : > { %v2339_v3 = vpop.eup %2338 }
 0xf16   : > { %v2003_v4 = vmul.f32 %v2339_v3, %v2001_v2  ;;  %vm2009_vm10 = vweird.f32 %v2339_v3 }
 0xf17   : > { %vm2010_vm12 = vmor %vm2008_vm11, %vm2009_vm10 }
 0xf18   : > { %v2004_v5 = vmul.f32 %v2339_v3, %v2003_v4 }
 0xf1a   : > { %v2005_v6 = vmul.f32 0.5, %v2004_v5 }
 0xf1c   : > { %v2006_v8 = vsub.f32 1.5, %v2005_v6 }
 0xf1e   : > { %v2007_v9 = vmul.f32 %v2339_v3, %v2006_v8 }
 0xf20   : > { %v2011_v11 = vsel %vm2010_vm12, %v2339_v3, %v2007_v9 }
 0xf21   : > { %v2012_v13 = vmul.f32 %v2011_v11, %v1995_v60 }
 0xf23   : > { %v2016_v14 = vmul.f32 %v2298_v10, %v2012_v13 }
 0xf25   : > { %v2020_v33 = vadd.f32 %v2299_v12, %v2016_v14 }
 0xf27   : > { %2021 = vst.msk [vmem:[%s947_s29] sm:$0xff] %vm973_vm0, %v2020_v33 }
 0xf28 PF: > { %s3124_s4 = sld [smem:[#allocation16_spill]] }
 0xf2e   : > { %s42_s8 = sadd.s32 1, %s3124_s4  }
 0xf2f   : > { %p39_p7 = scmp.ge.s32.totalorder %s42_s8, 4  }
 0xf31   :  { %41 = sbr.rel (!%p39_p7) target bundleno = 21 (0x15), region = 190 }
 0xf36   :  { %2041 = vsyncpa [#allocation3], 1 }
 0xf37   :  { %2043 = vsyncpa [#allocation3 + $0x1], 1 }
 0xf38   :  { %2044 = vsyncpa [#allocation5], 1 }
 0xf39   :  { %2045 = vsyncpa [#allocation8], 1 }
 0xf3a   :  { %2046 = vsyncpa [#allocation11], 1 }

// kernel: transformer_forward.8
= control target key start
LH: loop header
LB: loop body
LE: loop exit
PB: predicated region body
PF: predicated region fallthrough
CT: control target
= control target key end

     0   :  { %s3323_s0 = inlined_call_operand.vmem [shape: f32[2,8,32], index: 0, kind: input, shape index: {}]   ;;  %s3324_s1 = inlined_call_operand.vmem [shape: f32[2,8,32], index: 1, kind: input, shape index: {}]   ;;  %s3325_s2 = inlined_call_operand.vmem [shape: f32[32,32], index: 2, kind: input, shape index: {}]   ;;  %s3326_s3 = inlined_call_operand.vmem [shape: f32[1,32], index: 3, kind: input, shape index: {}]   ;;  %s3327_s4 = inlined_call_operand.vmem [shape: f32[32,32], index: 4, kind: input, shape index: {}]   ;;  %s3328_s5 = inlined_call_operand.vmem [shape: f32[1,32], index: 5, kind: input, shape index: {}]   ;;  %s3329_s6 = inlined_call_operand.vmem [shape: f32[32,32], index: 6, kind: input, shape index: {}]   ;;  %s3330_s7 = inlined_call_operand.vmem [shape: f32[1,32], index: 7, kind: input, shape index: {}]   ;;  %s3331_s8 = inlined_call_operand.hbm [shape: f32[32,32], index: 8, kind: input, shape index: {}]   ;;  %s3332_s9 = inlined_call_operand.vmem [shape: f32[1,32], index: 9, kind: input, shape index: {}]   ;;  %s3333_s10 = inlined_call_operand.vmem [shape: f32[1,32], index: 10, kind: input, shape index: {}]   ;;  %s3334_s11 = inlined_call_operand.vmem [shape: f32[1,32], index: 11, kind: input, shape index: {}]   ;;  %s3335_s12 = inlined_call_operand.hbm [shape: f32[32,32], index: 12, kind: input, shape index: {}]   ;;  %s3336_s13 = inlined_call_operand.vmem [shape: f32[1,32], index: 13, kind: input, shape index: {}]   ;;  %s3337_s14 = inlined_call_operand.hbm [shape: f32[32,32], index: 14, kind: input, shape index: {}]   ;;  %s3338_s15 = inlined_call_operand.vmem [shape: f32[1,32], index: 15, kind: input, shape index: {}]   ;;  %s3339_s16 = inlined_call_operand.hbm [shape: f32[32,32], index: 16, kind: input, shape index: {}]   ;;  %s3340_s17 = inlined_call_operand.vmem [shape: f32[1,32], index: 17, kind: input, shape index: {}]   ;;  %s3341_s18 = inlined_call_operand.hbm [shape: f32[32,32], index: 18, kind: input, shape index: {}]   ;;  %s3342_s19 = inlined_call_operand.vmem [shape: f32[1,32], index: 19, kind: input, shape index: {}]   ;;  %s3343_s20 = inlined_call_operand.vmem [shape: f32[1,32], index: 20, kind: input, shape index: {}]   ;;  %s3344_s21 = inlined_call_operand.vmem [shape: f32[1,32], index: 21, kind: input, shape index: {}]   ;;  %s3345_s22 = inlined_call_operand.hbm [shape: f32[32,64], index: 22, kind: input, shape index: {}]   ;;  %s3346_s23 = inlined_call_operand.hbm [shape: f32[1,64], index: 23, kind: input, shape index: {}]   ;;  %s3347_s24 = inlined_call_operand.vmem [shape: f32[64,32], index: 24, kind: input, shape index: {}]   ;;  %s3348_s25 = inlined_call_operand.hbm [shape: f32[1,32], index: 25, kind: input, shape index: {}]   ;;  %s3349_s26 = inlined_call_operand.hbm [shape: f32[1,32], index: 26, kind: input, shape index: {}]   ;;  %s3350_s27 = inlined_call_operand.hbm [shape: f32[1,32], index: 27, kind: input, shape index: {}]   ;;  %s3351_s28 = inlined_call_operand.vmem [shape: f32[2,8,32], index: 28, kind: output, shape index: {}]  }
   0x1   :  { %3356 = sst [smem:[#allocation25_spill]] %s3323_s0 }
   0x2   :  { %3357 = sst [smem:[#allocation26_spill]] %s3324_s1 }
   0x3   :  { %3358 = sst [smem:[#allocation27_spill]] %s3325_s2 }
   0x4   :  { %3359 = sst [smem:[#allocation28_spill]] %s3326_s3 }
   0x5   :  { %3360 = sst [smem:[#allocation29_spill]] %s3327_s4 }
   0x6   :  { %3361 = sst [smem:[#allocation30_spill]] %s3328_s5 }
   0x7   :  { %3362 = sst [smem:[#allocation31_spill]] %s3329_s6 }
   0x8   :  { %3363 = sst [smem:[#allocation32_spill]] %s3330_s7 }
   0x9   :  { %3364 = sst [smem:[#allocation33_spill]] %s3331_s8 }
   0xa   :  { %3365 = sst [smem:[#allocation34_spill]] %s3332_s9 }
   0xb   :  { %3366 = sst [smem:[#allocation35_spill]] %s3333_s10 }
   0xc   :  { %3367 = sst [smem:[#allocation36_spill]] %s3334_s11 }
   0xd   :  { %3368 = sst [smem:[#allocation37_spill]] %s3335_s12 }
   0xe   :  { %3369 = sst [smem:[#allocation38_spill]] %s3339_s16 }
   0xf   :  { %3370 = sst [smem:[#allocation39_spill]] %s3345_s22 }
  0x10   :  { %3371 = sst [smem:[#allocation40_spill]] %s3348_s25 }
  0x11   :  { %3372 = sst [smem:[#allocation41_spill]] %s3351_s28 }
  0x12   :  { %33 = vsyncpa [#allocation3], 0 }
  0x13   :  { %34 = vsyncpa [#allocation5], 0 }
  0x14   :  { %35 = vsyncpa [#allocation8], 0 }
  0x15   :  { %36 = vsyncpa [#allocation11], 0 }
  0x16   :  { %37 = vsyncpa [#allocation14], 0 }
  0x17   :  { %38 = vsyncpa [#allocation17], 0  ;;  %s2987_s8 = smov 0  }
  0x18 LB: > { %3373 = sst [smem:[#allocation24_spill]] %s2824_s8  ;;  %s2993_s5 = sadd.s32 4294967295, %s2824_s8   ;;  %s2824_s8 = sphi %s2987_s8, %s44_s8  }
  0x19   : > { %p2255_p0 = scmp.ge.s32.totalorder %s2824_s8, 1  ;;  %p673_p1 = scmp.lt.s32.totalorder %s2824_s8, 3 }
  0x1a   : > { %p2394_p2 = scmp.eq.s32.totalorder %s2993_s5, 0  ;;  %s3374_s3 = sld [smem:[#allocation37_spill]] }
  0x1b   : > { %p3001_p3 = pnand %p2255_p0, %p673_p1  ;;  %s3376_s16 = sld [smem:[#allocation38_spill]] }
  0x1c   : > { %s2826_s2 = smov [#allocation4]   ;;  %s2827_s1 = smov [#allocation7]  }
  0x1d   : > { %p2363_p4 = pneg %p3001_p3  ;;  %s727_s7 = sshll.u32 %s2826_s2, 4  ;;  %s728_s7 = int_to_ptr.vmem [resolvable:$true] %s727_s7 }
  0x1e   : > { %s761_s4 = sshll.u32 %s2827_s1, 4  ;;  %s3378_s22 = sld [smem:[#allocation39_spill]]  ;;  %s762_s4 = int_to_ptr.vmem [resolvable:$true] %s761_s4 }
  0x1f   : > { %p3012_p5 = pnand %p2394_p2, %p2363_p4  ;;  %s2828_s0 = smov 128  }
  0x20   : > { %s725_s6 = sshll.u32 %s3374_s3, 4  ;;  %s2829_s11 = smov 8   ;;  %s726_s6 = int_to_ptr.hbm [resolvable:$true] %s725_s6 }
  0x21   : > { %s759_s29 = sshll.u32 %s3376_s16, 4  ;;  %s2830_s2 = smov [#allocation10]   ;;  %s760_s29 = int_to_ptr.hbm [resolvable:$true] %s759_s29 }
  0x22   : > { %2369 = dma.hbm_to_vmem [thread:$0]  (!%p3012_p5), %s726_s6, 512, %s728_s7, [#allocation5], %s2828_s0, %s2828_s0, %s2829_s11  }
  0x23   : > { %2375 = dma.hbm_to_vmem [thread:$0]  (!%p3012_p5), %s760_s29, 512, %s762_s4, [#allocation8], %s2828_s0, %s2828_s0, %s2829_s11  }
  0x24   : > { %s799_s3 = sshll.u32 %s3378_s22, 4  ;;  %s801_s1 = sshll.u32 %s2830_s2, 4  ;;  %s800_s3 = int_to_ptr.hbm [resolvable:$true] %s799_s3  ;;  %s802_s1 = int_to_ptr.vmem [resolvable:$true] %s801_s1 }
  0x25   : > { %s3379_s25 = sld [smem:[#allocation40_spill]]  ;;  %s2831_s29 = smov [#allocation13]  }
  0x26   : > { %2381 = dma.hbm_to_vmem [thread:$0]  (!%p3012_p5), %s800_s3, 512, %s802_s1, [#allocation11], %s2828_s0, %s2828_s0, %s2829_s11  }
  0x27   : > { %s3380_s22 = sld [smem:[#allocation33_spill]]  ;;  %s831_s4 = sshll.u32 %s2831_s29, 4  ;;  %s832_s4 = int_to_ptr.vmem [resolvable:$true] %s831_s4 }
  0x28   : > { %s2832_s16 = smov [#allocation2]   ;;  %s742_s28 = sshll.u32 %s3337_s14, 4  ;;  %s743_s28 = int_to_ptr.hbm [resolvable:$true] %s742_s28 }
  0x29   : > { %s704_s2 = sshll.u32 %s2832_s16, 4  ;;  %s776_s1 = sshll.u32 %s3341_s18, 4  ;;  %s705_s2 = int_to_ptr.vmem [resolvable:$true] %s704_s2  ;;  %s777_s1 = int_to_ptr.hbm [resolvable:$true] %s776_s1 }
  0x2a   : > { %s2833_s6 = smov [#allocation6]   ;;  %s841_s9 = sshll.u32 %s3349_s26, 4  ;;  %s842_s9 = int_to_ptr.hbm [resolvable:$true] %s841_s9 }
  0x2b   : > { %s829_s30 = sshll.u32 %s3379_s25, 4  ;;  %s2834_s25 = smov [#allocation9]   ;;  %s830_s30 = int_to_ptr.hbm [resolvable:$true] %s829_s30 }
  0x2c   : > { %2387 = dma.hbm_to_vmem [thread:$0]  (!%p3012_p5), %s830_s30, 16, %s832_s4, [#allocation14]  }
  0x2d   : > { %s702_s8 = sshll.u32 %s3380_s22, 4  ;;  %s744_s30 = sshll.u32 %s2833_s6, 4  ;;  %s703_s8 = int_to_ptr.hbm [resolvable:$true] %s702_s8  ;;  %s745_s30 = int_to_ptr.vmem [resolvable:$true] %s744_s30 }
  0x2e   : > { %2366 = dma.hbm_to_vmem [thread:$0]  (!%p3012_p5), %s703_s8, 512, %s705_s2, [#allocation3], %s2828_s0, %s2828_s0, %s2829_s11  }
  0x2f   : > { %2372 = dma.hbm_to_vmem [thread:$0]  (!%p3012_p5), %s743_s28, 512, %s745_s30, [#allocation5], %s2828_s0, %s2828_s0, %s2829_s11  }
  0x30   : > { %s778_s7 = sshll.u32 %s2834_s25, 4  ;;  %s814_s8 = sshll.u32 %s3346_s23, 4  ;;  %s779_s7 = int_to_ptr.vmem [resolvable:$true] %s778_s7  ;;  %s815_s8 = int_to_ptr.hbm [resolvable:$true] %s814_s8 }
  0x31   : > { %2378 = dma.hbm_to_vmem [thread:$0]  (!%p3012_p5), %s777_s1, 512, %s779_s7, [#allocation8], %s2828_s0, %s2828_s0, %s2829_s11  }
  0x32   : > { %s2835_s28 = smov [#allocation12]   ;;  %s2836_s3 = smov [#allocation15]  }
  0x33   : > { %s816_s22 = sshll.u32 %s2835_s28, 4  ;;  %s843_s6 = sshll.u32 %s2836_s3, 4  ;;  %s817_s22 = int_to_ptr.vmem [resolvable:$true] %s816_s22  ;;  %s844_s6 = int_to_ptr.vmem [resolvable:$true] %s843_s6 }
  0x34   : > { %2384 = dma.hbm_to_vmem [thread:$0]  (!%p3012_p5), %s815_s8, 16, %s817_s22, [#allocation11]  }
  0x35   : > { %s853_s29 = sshll.u32 %s3350_s27, 4  ;;  %s2837_s0 = smov [#allocation16]   ;;  %s854_s29 = int_to_ptr.hbm [resolvable:$true] %s853_s29 }
  0x36   : > { %2390 = dma.hbm_to_vmem [thread:$0]  (!%p3012_p5), %s842_s9, 16, %s844_s6, [#allocation14]  }
  0x37   : > { %s855_s11 = sshll.u32 %s2837_s0, 4  ;;  %882 = sbr.rel (%p3001_p3) target bundleno = 3898 (0xf3a), region = 132  ;;  %s856_s11 = int_to_ptr.vmem [resolvable:$true] %s855_s11 }
  0x38   : > { %2393 = dma.hbm_to_vmem [thread:$0]  (!%p3012_p5), %s854_s29, 16, %s856_s11, [#allocation17]  }
  0x3c   : > { %2799 = dma.done.wait (%p2394_p2), [#allocation3], 512  }
  0x3d   : > { %2801 = vsyncadd (%p2394_p2), [#allocation3], 4294966784 }
  0x3e   : > { %2803 = dma.done.wait (%p2394_p2), [#allocation5], 1024  }
  0x3f   : > { %2805 = vsyncadd (%p2394_p2), [#allocation5], 4294966272 }
  0x40   : > { %2807 = dma.done.wait (%p2394_p2), [#allocation8], 1024  }
  0x41   : > { %2809 = vsyncadd (%p2394_p2), [#allocation8], 4294966272 }
  0x42   : > { %2811 = dma.done.wait (%p2394_p2), [#allocation11], 528  }
  0x43   : > { %2813 = vsyncadd (%p2394_p2), [#allocation11], 4294966768 }
  0x44   : > { %2815 = dma.done.wait (%p2394_p2), [#allocation14], 32  }
  0x45   : > { %2817 = vsyncadd (%p2394_p2), [#allocation14], 4294967264 }
  0x46   : > { %2819 = dma.done.wait (%p2394_p2), [#allocation17], 16  }
  0x47   : > { %2821 = vsyncadd (%p2394_p2), [#allocation17], 4294967280  ;;  %p1004_p6 = scmp.lt.s32.totalorder %s2993_s5, 1  ;;  %s3381_s7 = sld [smem:[#allocation29_spill]]  ;;  %vm1041_vm0 = vcmask 261120   ;;  %vm1111_vm1 = vcmask 64512  }
  0x48   : > { %s3382_s9 = sld [smem:[#allocation25_spill]]  ;;  %s2838_s16 = smov 120   ;;  %v1034_v47 = vld [vmem:[#allocation2 + $0x8] sm:$0xff]  ;;  %v1033_v50 = vld [vmem:[#allocation2] sm:$0xff]  ;;  %vm2032_vm9 = vcmask 523264  }
  0x49   : > { %s3395_s5 = smov (!%p1004_p6, %s2993_s5), 1  ;;  %s3383_s30 = sld [smem:[#allocation27_spill]] }
  0x4a   : > { %s3106_s10 = sshll.u32 %s3395_s5, 3  ;;  %s3384_s4 = sld [smem:[#allocation31_spill]] }
  0x4b   : > { %s3385_s11 = sld [smem:[#allocation30_spill]]  ;;  %s2839_s3 = smov 112  }
  0x4c   : > { %s3386_s8 = sld [smem:[#allocation28_spill]]  ;;  %s2840_s5 = smov 104  }
  0x4d   : > { %v1026_v0 = vld [vmem:[%s3381_s7 + $0x18] sm:$0xff]  ;;  %v1025_v1 = vld [vmem:[%s3381_s7 + $0x10] sm:$0xff]  ;;  %v1024_v2 = vld [vmem:[%s3381_s7 + $0x8] sm:$0xff]  ;;  %s3387_s22 = sld [smem:[#allocation32_spill]] }
  0x4e   : > { %s1007_s28 = scalar_lea.vmem %s3382_s9, %s3106_s10  ;;  %1080 = vmatpush.msra.mxu1 %v1026_v0  ;;  %v1023_v4 = vld [vmem:[%s3381_s7] sm:$0xff]  ;;  %s3388_s25 = sld [smem:[#allocation34_spill]] }
  0x4f   : > { %v1021_v3 = vld [vmem:[%s3383_s30 + $0x18] sm:$0xff]  ;;  %v1020_v5 = vld [vmem:[%s3383_s30 + $0x10] sm:$0xff]  ;;  %v3133_v7 = vld [vmem:[%s1007_s28] sm:$0xff]  ;;  %s3390_s2 = sld [smem:[#allocation35_spill]] }
  0x50   : > { %1057 = vmatpush.msra.mxu0 %v1021_v3  ;;  %v1031_v6 = vld [vmem:[%s3384_s4 + $0x18] sm:$0xff]  ;;  %1081 = vmatpush.msra.mxu1 %v1025_v1  ;;  %v1019_v8 = vld [vmem:[%s3383_s30 + $0x8] sm:$0xff]  ;;  %v1030_v9 = vld [vmem:[%s3384_s4 + $0x10] sm:$0xff]  ;;  %s3391_s6 = sld [smem:[#allocation36_spill]] }
  0x51   : > { %1103 = vmatpush.msra.mxu2 %v1031_v6  ;;  %v1018_v10 = vld [vmem:[%s3383_s30] sm:$0xff]  ;;  %v1029_v11 = vld [vmem:[%s3384_s4 + $0x8] sm:$0xff]  ;;  %v1035_v6 = vld [vmem:[#allocation2 + $0x10] sm:$0xff]  ;;  %s3392_s28 = sld [smem:[#allocation41_spill]] }
  0x52   : > { %1058 = vmatpush.msra.mxu0 %v1020_v5  ;;  %1082 = vmatpush.msra.mxu1 %v1024_v2  ;;  %v1028_v12 = vld [vmem:[%s3384_s4] sm:$0xff] }
  0x53   : > { %1104 = vmatpush.msra.mxu2 %v1030_v9  ;;  %v2438_v13 = vld [vmem:[%s3385_s11] ss:$0 sm:$0xff]  ;;  %s3389_s11 = sld [smem:[#allocation26_spill]] }
  0x54   : > { %1059 = vmatpush.msra.mxu0 %v1019_v8  ;;  %1083 = vmatpush.msra.mxu1 %v1023_v4  ;;  %v2439_v14 = vld [vmem:[%s3386_s8] ss:$0 sm:$0xff] }
  0x55   : > { %1105 = vmatpush.msra.mxu2 %v1029_v11  ;;  %2282 = vmatmul.msk.f32.vlgmr.msra.gmra.mxu1 %vm1041_vm0, %v3133_v7  ;;  %v2440_v19 = vld [vmem:[%s3387_s22] ss:$0 sm:$0xff] }
  0x56   : > { %1060 = vmatpush.msra.mxu0 %v1018_v10 }
  0x57   : > { %2281 = vmatmul.msk.f32.vlgmr.msra.gmra.mxu0 %vm1041_vm0, %v3133_v7  ;;  %1106 = vmatpush.msra.mxu2 %v1028_v12 }
  0x58   : > { %2283 = vmatmul.msk.f32.vlgmr.msra.gmra.mxu2 %vm1041_vm0, %v3133_v7 }
  0x59   : > { %1367 = vmatpush.msrb.mxu2 %v1035_v6  ;;  %s1011_s12 = scalar_lea.vmem %s3389_s11, %s3106_s10 }
  0xd2   : > { %v1085_v15 = vpop.f32.mrf.mxu1 }
  0xd3   : > { %v1086_v16 = vadd.f32 %v2438_v13, %v1085_v15 }
  0xd4   : > { %v1062_v17 = vpop.f32.mrf.mxu0 }
  0xd5   : > { %v1063_v18 = vadd.f32 %v2439_v14, %v1062_v17  ;;  %1174 = vrot.lane.b32.xlu0 %v1086_v16, %s2838_s16  ;;  %2284 = vmatpush.xpose.msk.msra.mxu3 %vm1111_vm1, %v1086_v16  ;;  %v1036_v17 = vld [vmem:[#allocation2 + $0x18] sm:$0xff] }
  0xd8   : > { %2285 = vmatmul.msk.f32.vlgmr.msra.gmra.mxu3 %vm1111_vm1, %v1063_v18 }
  0xdb   : > { %v1108_v20 = vpop.f32.mrf.mxu2 }
  0xdc   : > { %v3168_v21 = vadd.f32 %v2440_v19, %v1108_v20 }
  0xdd   : > { %1172 = vrot.lane.b32.xlu0 %v1063_v18, %s2838_s16 }
  0xde   : > { %1167 = vmatpush.msrb.mxu3 %v3168_v21 }
  0xe0   : > { %1256 = vmatpush.msra.mxu3 %v1034_v47 }
  0xe5   : > { %1212 = vrot.lane.b32.xlu0 %v3168_v21, %s2838_s16 }
  0xed   : > { %1284 = vrot.lane.b32.xlu0 %v1063_v18, %s2839_s3 }
  0xf5   : > { %1373 = vrot.lane.b32.xlu0 %v1063_v18, %s2840_s5 }
 0x147   : > { %v1175_v22 = vpop.permute.xlu0 %1174 }
 0x148   : > { %2287 = vmatpush.xpose.msk.msrb.mxu0 %vm1111_vm1, %v1175_v22 }
 0x14f   : > { %v1173_v23 = vpop.permute.xlu0 %1172 }
 0x150   : > { %2288 = vmatmul.msk.f32.vlgmr.msrb.gmra.mxu0 %vm1111_vm1, %v1173_v23 }
 0x157   : > { %v1213_v24 = vpop.permute.xlu0 %1212 }
 0x158   : > { %1233 = vmatpush.msrb.mxu1 %v1213_v24 }
 0x15b   : > { %v1135_v27 = vpop.f32.mrf.mxu3 }
 0x15c   : > { %v1138_v28 = vsel %vm1111_vm1, %v1135_v27, -inf }
 0x15f   : > { %v1285_v40 = vpop.permute.xlu0 %1284 }
 0x167   : > { %v1374_v53 = vpop.permute.xlu0 %1373 }
 0x1cd   : > { %v1197_v25 = vpop.f32.mrf.mxu0 }
 0x1ce   : > { %v1200_v26 = vsel %vm1111_vm1, %v1197_v25, -inf }
 0x1cf   : > { %1201 = vmax.xlane.f32.xlu1 %v1200_v26 }
 0x1d7   : > { %1139 = vmax.xlane.f32.xlu1 %v1138_v28 }
 0x1f0   : > { %1286 = vrot.lane.b32.xlu1 %v1086_v16, %s2839_s3 }
 0x242   : > { %v1202_v29 = vpop.xlane.xlu1 %1201 }
 0x243   : > { %v1203_v30 = vsub.f32 %v1197_v25, %v1202_v29 }
 0x245   : > { %v1204_v31 = vmul.f32 1.442695, %v1203_v30 }
 0x247   : > { %2454 = vpow2.f32 %v1204_v31 }
 0x24a   : > { %v1140_v32 = vpop.xlane.xlu1 %1139 }
 0x24b   : > { %v1141_v33 = vsub.f32 %v1135_v27, %v1140_v32  ;;  %v2841_v27 = vmov 32.0  }
 0x24d   : > { %v2455_v34 = vpop.eup %2454  ;;  %v1142_v35 = vmul.f32 1.442695, %v1141_v33 }
 0x24e   : > { %v1206_v36 = vsel %vm1111_vm1, %v2455_v34, 0.0 }
 0x24f   : > { %2456 = vpow2.f32 %v1142_v35  ;;  %1207 = vadd.xlane.f32.xlu2 %v1206_v36 }
 0x255   : > { %v2457_v37 = vpop.eup %2456 }
 0x256   : > { %v1144_v38 = vsel %vm1111_vm1, %v2457_v37, 0.0 }
 0x257   : > { %1145 = vadd.xlane.f32.xlu2 %v1144_v38  ;;  %v1514_v38 = vld [vmem:[#allocation6 + $0x18] sm:$0xff] }
 0x262   : > { %v1287_v39 = vpop.permute.xlu1 %1286 }
 0x263   : > { %2292 = vmatpush.xpose.msk.msra.mxu0 %vm1111_vm1, %v1287_v39  ;;  %v1513_v39 = vld [vmem:[#allocation6 + $0x10] sm:$0xff] }
 0x266   : > { %2293 = vmatmul.msk.f32.vlgmr.msra.gmra.mxu0 %vm1111_vm1, %v1285_v40  ;;  %v1512_v40 = vld [vmem:[#allocation6 + $0x8] sm:$0xff] }
 0x26f   : > { %1375 = vrot.lane.b32.xlu2 %v1086_v16, %s2840_s5 }
 0x2c2   : > { %v1208_v41 = vpop.xlane.xlu2 %1207 }
 0x2c3   : > { %2458 = vrcp.f32 %v1208_v41  ;;  %v1511_v41 = vld [vmem:[#allocation6] sm:$0xff] }
 0x2c9   : > { %v2459_v42 = vpop.eup %2458 }
 0x2ca   : > { %v1146_v43 = vpop.xlane.xlu2 %1145  ;;  %v1210_v44 = vmul.f32 %v2459_v42, %v2455_v34  ;;  %v1017_v42 = vld [vmem:[%s1011_s12] sm:$0xff] }
 0x2cb   : > { %2460 = vrcp.f32 %v1146_v43  ;;  %v1509_v43 = vld [vmem:[#allocation4 + $0x18] sm:$0xff] }
 0x2cc   : > { %2289 = vmatmul.msk.f32.vlgmr.msrb.gmra.mxu1 %vm1111_vm1, %v1210_v44  ;;  %1544 = vmatpush.msra.mxu2 %v1509_v43  ;;  %v1508_v44 = vld [vmem:[#allocation4 + $0x10] sm:$0xff] }
 0x2ce   : > { %1545 = vmatpush.msra.mxu2 %v1508_v44 }
 0x2d1   : > { %v2461_v45 = vpop.eup %2460 }
 0x2d2   : > { %v1148_v46 = vmul.f32 %v2461_v45, %v2457_v37  ;;  %v1376_v52 = vpop.permute.xlu2 %1375  ;;  %v1507_v45 = vld [vmem:[#allocation4 + $0x8] sm:$0xff] }
 0x2d3   : > { %1546 = vmatpush.msra.mxu2 %v1507_v45 }
 0x2d4   : > { %2286 = vmatmul.msk.f32.vlgmr.msrb.gmra.mxu3 %vm1111_vm1, %v1148_v46  ;;  %v1506_v46 = vld [vmem:[#allocation4] sm:$0xff] }
 0x2d5   : > { %1279 = vmatpush.msrb.mxu3 %v1033_v50  ;;  %1547 = vmatpush.msra.mxu2 %v1506_v46 }
 0x2e3   : > { %v1309_v48 = vpop.f32.mrf.mxu0 }
 0x2e4   : > { %v1312_v49 = vsel %vm1111_vm1, %v1309_v48, -inf }
 0x2e5   : > { %1313 = vmax.xlane.f32.xlu0 %v1312_v49 }
 0x2f9   : > { %1323 = vrot.lane.b32.xlu0 %v3168_v21, %s2839_s3 }
 0x349   : > { %v1235_v51 = vpop.f32.mrf.mxu1 }
 0x34a   : > { %2290 = vmatmul.msk.f32.vlgmr.msra.gmra.mxu3 %vm1111_vm1, %v1235_v51 }
 0x34b   : > { %2296 = vmatpush.xpose.msk.msra.mxu3 %vm1111_vm1, %v1376_v52 }
 0x357   : > { %v1169_v54 = vpop.f32.mrf.mxu3 }
 0x358   : > { %2291 = vmatmul.msk.f32.vlgmr.msrb.gmra.mxu3 %vm1111_vm1, %v1169_v54  ;;  %v1314_v55 = vpop.xlane.xlu0 %1313 }
 0x359   : > { %v1315_v56 = vsub.f32 %v1309_v48, %v1314_v55  ;;  %1570 = vmatpush.msrb.mxu3 %v1514_v38 }
 0x35b   : > { %v1316_v57 = vmul.f32 1.442695, %v1315_v56  ;;  %1571 = vmatpush.msrb.mxu3 %v1513_v39  ;;  %v2442_v56 = vld [vmem:[%s3390_s2] ss:$0 sm:$0xff] }
 0x35d   : > { %2462 = vpow2.f32 %v1316_v57  ;;  %1572 = vmatpush.msrb.mxu3 %v1512_v40 }
 0x35f   : > { %1573 = vmatpush.msrb.mxu3 %v1511_v41 }
 0x360   : > { %2297 = vmatmul.msk.f32.vlgmr.msra.gmra.mxu3 %vm1111_vm1, %v1374_v53 }
 0x363   : > { %v2463_v58 = vpop.eup %2462 }
 0x364   : > { %v1318_v59 = vsel %vm1111_vm1, %v2463_v58, 0.0 }
 0x365   : > { %1319 = vadd.xlane.f32.xlu1 %v1318_v59  ;;  %v2443_v59 = vld [vmem:[%s3391_s6] ss:$0 sm:$0xff] }
 0x368   : > { %2301 = vmatmul.msk.f32.vlgmr.msrb.gmra.mxu3 %vm1041_vm0, %v1017_v42 }
 0x36b   : > { %v1324_v60 = vpop.permute.xlu0 %1323 }
 0x36c   : > { %1344 = vmatpush.msra.mxu1 %v1324_v60 }
 0x36e   : > { %1456 = vmatpush.msrb.mxu1 %v1036_v17 }
 0x37e   : > { %1412 = vrot.lane.b32.xlu1 %v3168_v21, %s2840_s5  ;;  %v2441_v21 = vld [vmem:[%s3388_s25] ss:$0 sm:$0xff]  ;;  %s1015_s25 = scalar_lea.vmem %s3392_s28, %s3106_s10 }
 0x3cd   : > { %v1258_v61 = vpop.f32.mrf.mxu3 }
 0x3d8   : > { %v1320_v62 = vpop.xlane.xlu1 %1319 }
 0x3d9   : > { %2464 = vrcp.f32 %v1320_v62  ;;  %v2444_v62 = vld [vmem:[%s3338_s15] ss:$0 sm:$0xff] }
 0x3db   : > { %v1281_v63 = vpop.f32.mrf.mxu3 }
 0x3dc   : > { %v1282_v0 = vadd.f32 %v1281_v63, %v1258_v61 }
 0x3df   : > { %v2465_v1 = vpop.eup %2464 }
 0x3e0   : > { %v1322_v2 = vmul.f32 %v2465_v1, %v2463_v58  ;;  %v2445_v1 = vld [vmem:[%s3336_s13] ss:$0 sm:$0xff] }
 0x3e2   : > { %2294 = vmatmul.msk.f32.vlgmr.msra.gmra.mxu1 %vm1111_vm1, %v1322_v2 }
 0x3e3   : > { %v1398_v3 = vpop.f32.mrf.mxu3 }
 0x3e4   : > { %v1401_v4 = vsel %vm1111_vm1, %v1398_v3, -inf }
 0x3e5   : > { %1402 = vmax.xlane.f32.xlu2 %v1401_v4 }
 0x3eb   : > { %v1575_v63 = vpop.f32.mrf.mxu3 }
 0x3f0   : > { %v1413_v5 = vpop.permute.xlu1 %1412 }
 0x3f1   : > { %1433 = vmatpush.msrb.mxu0 %v1413_v5 }
 0x458   : > { %v1403_v8 = vpop.xlane.xlu2 %1402 }
 0x459   : > { %v1404_v9 = vsub.f32 %v1398_v3, %v1403_v8 }
 0x45b   : > { %v1405_v10 = vmul.f32 1.442695, %v1404_v9 }
 0x45d   : > { %2466 = vpow2.f32 %v1405_v10 }
 0x45f   : > { %v1346_v11 = vpop.f32.mrf.mxu1 }
 0x460   : > { %2295 = vmatmul.msk.f32.vlgmr.msrb.gmra.mxu2 %vm1111_vm1, %v1346_v11  ;;  %v1519_v11 = vld [vmem:[#allocation7 + $0x18] sm:$0xff] }
 0x461   : > { %1593 = vmatpush.msra.mxu0 %v1519_v11 }
 0x463   : > { %v2467_v12 = vpop.eup %2466 }
 0x464   : > { %v1407_v13 = vsel %vm1111_vm1, %v2467_v12, 0.0 }
 0x465   : > { %1408 = vadd.xlane.f32.xlu2 %v1407_v13  ;;  %v1517_v13 = vld [vmem:[#allocation7 + $0x8] sm:$0xff] }
 0x4d8   : > { %v1409_v14 = vpop.xlane.xlu2 %1408 }
 0x4d9   : > { %2468 = vrcp.f32 %v1409_v14  ;;  %v1516_v14 = vld [vmem:[#allocation7] sm:$0xff] }
 0x4da   : > { %2470 = vrcp.f32 %v2841_v27 }
 0x4df   : > { %v2469_v15 = vpop.eup %2468 }
 0x4e0   : > { %v1411_v16 = vmul.f32 %v2469_v15, %v2467_v12  ;;  %v2471_v28 = vpop.eup %2470  ;;  %v1518_v12 = vld [vmem:[#allocation7 + $0x10] sm:$0xff] }
 0x4e1   : > { %v1473_v29 = vmul.f32 32.0, %v2471_v28  ;;  %vm1477_vm2 = vweird.f32 %v2471_v28  ;;  %1594 = vmatpush.msra.mxu0 %v1518_v12  ;;  %v2447_v12 = vld [vmem:[%s3342_s19] ss:$0 sm:$0xff] }
 0x4e2   : > { %2298 = vmatmul.msk.f32.vlgmr.msrb.gmra.mxu0 %vm1111_vm1, %v1411_v16 }
 0x4e3   : > { %v1369_v19 = vpop.f32.mrf.mxu2  ;;  %v1474_v30 = vsub.f32 1.0, %v1473_v29  ;;  %1595 = vmatpush.msra.mxu0 %v1517_v13 }
 0x4e4   : > { %v1372_v20 = vadd.f32 %v1369_v19, %v1282_v0  ;;  %v1576_v0 = vadd.f32 %v2444_v62, %v1575_v63 }
 0x4e5   : > { %v1475_v31 = vmul.f32 %v2471_v28, %v1474_v30  ;;  %1596 = vmatpush.msra.mxu0 %v1516_v14 }
 0x4e6   : > { %1663 = vrot.lane.b32.xlu1 %v1576_v0, %s2838_s16  ;;  %2303 = vmatpush.xpose.msk.msra.mxu1 %vm1111_vm1, %v1576_v0 }
 0x4e7   : > { %v1476_v32 = vadd.f32 %v2471_v28, %v1475_v31 }
 0x4e9   : > { %v3209_v33 = vsel %vm1477_vm2, %v2471_v28, %v1476_v32 }
 0x4ea   : > { %2302 = vmatmul.msk.f32.vlgmr.msra.gmra.mxu0 %vm1041_vm0, %v1017_v42 }
 0x4ee   : > { %1864 = vrot.lane.b32.xlu1 %v1576_v0, %s2840_s5 }
 0x558   : > { %v1664_v4 = vpop.permute.xlu1 %1663 }
 0x559   : > { %2306 = vmatpush.xpose.msk.msra.mxu3 %vm1111_vm1, %v1664_v4 }
 0x55f   : > { %v1435_v18 = vpop.f32.mrf.mxu0 }
 0x560   : > { %2299 = vmatmul.msk.f32.vlgmr.msrb.gmra.mxu1 %vm1111_vm1, %v1435_v18  ;;  %v1865_v5 = vpop.permute.xlu1 %1864 }
 0x5dd   : > { %v1458_v22 = vpop.f32.mrf.mxu1 }
 0x5de   : > { %v1461_v23 = vadd.f32 %v1458_v22, %v1372_v20  ;;  %v2446_v20 = vld [vmem:[%s3340_s17] ss:$0 sm:$0xff] }
 0x5e0   : > { %v1465_v24 = vadd.f32 %v2441_v21, %v1461_v23  ;;  %v1598_v21 = vpop.f32.mrf.mxu0  ;;  %v1521_v23 = vld [vmem:[#allocation9] sm:$0xff] }
 0x5e1   : > { %v1599_v22 = vadd.f32 %v2446_v20, %v1598_v21 }
 0x5e2   : > { %v1466_v25 = vadd.f32 %v1465_v24, %v3133_v7 }
 0x5e3   : > { %1656 = vmatpush.msrb.mxu2 %v1599_v22 }
 0x5e4   : > { %v1469_v26 = vsel %vm1041_vm0, %v1466_v25, 0.0 }
 0x5e5   : > { %1470 = vadd.xlane.f32.xlu2 %v1469_v26 }
 0x658   : > { %v1471_v34 = vpop.xlane.xlu2 %1470 }
 0x659   : > { %v1479_v35 = vmul.f32 %v3209_v33, %v1471_v34 }
 0x65b   : > { %v1480_v36 = vsub.f32 %v1466_v25, %v1479_v35 }
 0x65d   : > { %v1481_v37 = vmul.f32 %v1480_v36, %v1480_v36 }
 0x65f   : > { %v1482_v7 = vsel %vm1041_vm0, %v1481_v37, 0.0 }
 0x660   : > { %1483 = vadd.xlane.f32.xlu2 %v1482_v7 }
 0x6d3   : > { %v1484_v47 = vpop.xlane.xlu2 %1483 }
 0x6d4   : > { %v1485_v48 = vmul.f32 %v1484_v47, %v3209_v33 }
 0x6d6   : > { %v1486_v49 = vadd.f32 1e-05, %v1485_v48 }
 0x6d8   : > { %2472 = vrsqrt.f32 %v1486_v49  ;;  %vm1493_vm4 = vweird.f32 %v1486_v49 }
 0x6de   : > { %v2473_v50 = vpop.eup %2472 }
 0x6df   : > { %v1488_v51 = vmul.f32 %v2473_v50, %v1486_v49  ;;  %vm1494_vm3 = vweird.f32 %v2473_v50 }
 0x6e0   : > { %vm1495_vm5 = vmor %vm1493_vm4, %vm1494_vm3 }
 0x6e1   : > { %v1489_v52 = vmul.f32 %v2473_v50, %v1488_v51 }
 0x6e3   : > { %v1490_v53 = vmul.f32 0.5, %v1489_v52 }
 0x6e5   : > { %v1491_v54 = vsub.f32 1.5, %v1490_v53 }
 0x6e7   : > { %v1492_v55 = vmul.f32 %v2473_v50, %v1491_v54 }
 0x6e9   : > { %v1496_v57 = vsel %vm1495_vm5, %v2473_v50, %v1492_v55 }
 0x6ea   : > { %v1497_v58 = vmul.f32 %v1496_v57, %v1480_v36 }
 0x6ec   : > { %v1501_v60 = vmul.f32 %v2442_v56, %v1497_v58 }
 0x6ee   : > { %v3225_v61 = vadd.f32 %v2443_v59, %v1501_v60 }
 0x6f0   : > { %2300 = vmatmul.msk.f32.vlgmr.msra.gmra.mxu2 %vm1041_vm0, %v3225_v61 }
 0x6f1   : > { %1768 = vmatpush.msra.mxu2 %v1521_v23  ;;  %v1991_v23 = vld [vmem:[#allocation10 + $0x18] sm:$0xff] }
 0x773   : > { %v1549_v2 = vpop.f32.mrf.mxu2 }
 0x774   : > { %v1550_v3 = vadd.f32 %v2445_v1, %v1549_v2  ;;  %v1524_v1 = vld [vmem:[#allocation9 + $0x18] sm:$0xff]  ;;  %v1522_v2 = vld [vmem:[#allocation9 + $0x8] sm:$0xff] }
 0x775   : > { %1745 = vmatpush.msrb.mxu1 %v1522_v2 }
 0x776   : > { %1862 = vrot.lane.b32.xlu1 %v1550_v3, %s2840_s5  ;;  %2304 = vmatmul.msk.f32.vlgmr.msra.gmra.mxu1 %vm1111_vm1, %v1550_v3 }
 0x77e   : > { %1775 = vrot.lane.b32.xlu1 %v1576_v0, %s2839_s3 }
 0x7e8   : > { %v1863_v6 = vpop.permute.xlu1 %1862 }
 0x7f0   : > { %v1776_v8 = vpop.permute.xlu1 %1775 }
 0x7f1   : > { %2311 = vmatpush.xpose.msk.msrb.mxu3 %vm1111_vm1, %v1776_v8 }
 0x7f3   : > { %v1624_v9 = vpop.f32.mrf.mxu1 }
 0x7f4   : > { %v1627_v10 = vsel %vm1111_vm1, %v1624_v9, -inf }
 0x7f5   : > { %1628 = vmax.xlane.f32.xlu0 %v1627_v10 }
 0x868   : > { %v1629_v15 = vpop.xlane.xlu0 %1628 }
 0x869   : > { %v1630_v16 = vsub.f32 %v1624_v9, %v1629_v15 }
 0x86b   : > { %v1631_v17 = vmul.f32 1.442695, %v1630_v16 }
 0x86d   : > { %2474 = vpow2.f32 %v1631_v17 }
 0x873   : > { %v2475_v18 = vpop.eup %2474 }
 0x874   : > { %v1633_v19 = vsel %vm1111_vm1, %v2475_v18, 0.0 }
 0x875   : > { %1634 = vadd.xlane.f32.xlu2 %v1633_v19 }
 0x88d   : > { %1661 = vrot.lane.b32.xlu2 %v1550_v3, %s2838_s16 }
 0x895   : > { %1773 = vrot.lane.b32.xlu2 %v1550_v3, %s2839_s3  ;;  %v1523_v3 = vld [vmem:[#allocation9 + $0x10] sm:$0xff] }
 0x896   : > { %1856 = vmatpush.msra.mxu1 %v1523_v3 }
 0x8e8   : > { %v1635_v24 = vpop.xlane.xlu2 %1634 }
 0x8e9   : > { %2476 = vrcp.f32 %v1635_v24  ;;  %v1990_v24 = vld [vmem:[#allocation10 + $0x10] sm:$0xff] }
 0x8ef   : > { %v2477_v25 = vpop.eup %2476 }
 0x8f0   : > { %v1637_v26 = vmul.f32 %v2477_v25, %v2475_v18  ;;  %v1662_v27 = vpop.permute.xlu2 %1661  ;;  %v1989_v25 = vld [vmem:[#allocation10 + $0x8] sm:$0xff] }
 0x8f1   : > { %2307 = vmatmul.msk.f32.vlgmr.msra.gmra.mxu3 %vm1111_vm1, %v1662_v27  ;;  %v1999_v27 = vld [vmem:[%s3347_s24 + $0x30] sm:$0xff] }
 0x8f2   : > { %2305 = vmatmul.msk.f32.vlgmr.msrb.gmra.mxu2 %vm1111_vm1, %v1637_v26  ;;  %v1988_v26 = vld [vmem:[#allocation10] sm:$0xff] }
 0x8f3   : > { %2315 = vmatpush.xpose.msk.msrb.mxu2 %vm1111_vm1, %v1865_v5 }
 0x8f8   : > { %v1774_v28 = vpop.permute.xlu2 %1773 }
 0x8f9   : > { %2312 = vmatmul.msk.f32.vlgmr.msrb.gmra.mxu3 %vm1111_vm1, %v1774_v28  ;;  %v1998_v28 = vld [vmem:[%s3347_s24 + $0x28] sm:$0xff] }
 0x974   : > { %v1686_v29 = vpop.f32.mrf.mxu3 }
 0x975   : > { %v1658_v30 = vpop.f32.mrf.mxu2  ;;  %v1689_v31 = vsel %vm1111_vm1, %v1686_v29, -inf }
 0x976   : > { %2310 = vmatmul.msk.f32.vlgmr.msra.gmra.mxu2 %vm1111_vm1, %v1658_v30  ;;  %1690 = vmax.xlane.f32.xlu1 %v1689_v31  ;;  %v1997_v31 = vld [vmem:[%s3347_s24 + $0x20] sm:$0xff] }
 0x97c   : > { %v1798_v32 = vpop.f32.mrf.mxu3 }
 0x97d   : > { %v1801_v34 = vsel %vm1111_vm1, %v1798_v32, -inf }
 0x97e   : > { %2316 = vmatmul.msk.f32.vlgmr.msrb.gmra.mxu2 %vm1111_vm1, %v1863_v6  ;;  %1802 = vmax.xlane.f32.xlu2 %v1801_v34  ;;  %v1996_v34 = vld [vmem:[%s3347_s24 + $0x18] sm:$0xff] }
 0x98f   : > { %1901 = vrot.lane.b32.xlu1 %v1599_v22, %s2840_s5 }
 0x996   : > { %1812 = vrot.lane.b32.xlu2 %v1599_v22, %s2839_s3 }
 0x9e9   : > { %v1691_v35 = vpop.xlane.xlu1 %1690 }
 0x9ea   : > { %v1692_v36 = vsub.f32 %v1686_v29, %v1691_v35 }
 0x9ec   : > { %v1693_v37 = vmul.f32 1.442695, %v1692_v36 }
 0x9ee   : > { %2478 = vpow2.f32 %v1693_v37 }
 0x9f1   : > { %v1803_v39 = vpop.xlane.xlu2 %1802 }
 0x9f2   : > { %v1804_v40 = vsub.f32 %v1798_v32, %v1803_v39 }
 0x9f4   : > { %v2479_v7 = vpop.eup %2478  ;;  %v1805_v42 = vmul.f32 1.442695, %v1804_v40  ;;  %v2448_v40 = vld [vmem:[%s3343_s20] ss:$0 sm:$0xff] }
 0x9f5   : > { %v1695_v38 = vsel %vm1111_vm1, %v2479_v7, 0.0 }
 0x9f6   : > { %1696 = vadd.xlane.f32.xlu0 %v1695_v38  ;;  %2480 = vpow2.f32 %v1805_v42 }
 0x9f9   : > { %v1770_v41 = vpop.f32.mrf.mxu2  ;;  %v1813_v62 = vpop.permute.xlu2 %1812 }
 0x9fc   : > { %v2481_v46 = vpop.eup %2480 }
 0x9fd   : > { %v1807_v47 = vsel %vm1111_vm1, %v2481_v46, 0.0 }
 0xa01   : > { %v1887_v43 = vpop.f32.mrf.mxu2  ;;  %v1902_v44 = vpop.permute.xlu1 %1901 }
 0xa02   : > { %1922 = vmatpush.msra.mxu3 %v1902_v44  ;;  %v1890_v45 = vsel %vm1111_vm1, %v1887_v43, -inf }
 0xa03   : > { %1891 = vmax.xlane.f32.xlu0 %v1890_v45 }
 0xa0b   : > { %1808 = vadd.xlane.f32.xlu0 %v1807_v47  ;;  %v1994_v47 = vld [vmem:[%s3347_s24 + $0x8] sm:$0xff] }
 0xa69   : > { %v1697_v48 = vpop.xlane.xlu0 %1696 }
 0xa76   : > { %v1892_v49 = vpop.xlane.xlu0 %1891 }
 0xa77   : > { %v1893_v50 = vsub.f32 %v1887_v43, %v1892_v49  ;;  %v2449_v43 = vld [vmem:[%s3344_s21] ss:$0 sm:$0xff] }
 0xa78   : > { %v2450_v49 = vld [vmem:[#allocation12] ss:$0 sm:$0xff] }
 0xa79   : > { %v1894_v51 = vmul.f32 1.442695, %v1893_v50 }
 0xa7b   : > { %2482 = vpow2.f32 %v1894_v51 }
 0xa7e   : > { %v1809_v54 = vpop.xlane.xlu0 %1808 }
 0xa81   : > { %v2483_v52 = vpop.eup %2482 }
 0xa82   : > { %v1896_v53 = vsel %vm1111_vm1, %v2483_v52, 0.0 }
 0xa83   : > { %1897 = vadd.xlane.f32.xlu0 %v1896_v53  ;;  %v2451_v53 = vld [vmem:[#allocation13] ss:$0 sm:$0xff] }
 0xa97   : > { %1701 = vrot.lane.b32.xlu0 %v1599_v22, %s2838_s16 }
 0xaf6   : > { %v1898_v55 = vpop.xlane.xlu0 %1897 }
 0xaf7   : > { %2484 = vrcp.f32 %v1898_v55 }
 0xaf8   : > { %2486 = vrcp.f32 %v1697_v48  ;;  %v1993_v48 = vld [vmem:[%s3347_s24] sm:$0xff] }
 0xaf9   : > { %2488 = vrcp.f32 %v1809_v54 }
 0xafd   : > { %v2485_v56 = vpop.eup %2484 }
 0xafe   : > { %v1900_v57 = vmul.f32 %v2485_v56, %v2483_v52  ;;  %v2487_v58 = vpop.eup %2486 }
 0xaff   : > { %v1699_v59 = vmul.f32 %v2487_v58, %v2479_v7  ;;  %v2489_v63 = vpop.eup %2488 }
 0xb00   : > { %2317 = vmatmul.msk.f32.vlgmr.msra.gmra.mxu3 %vm1111_vm1, %v1900_v57  ;;  %v1811_v0 = vmul.f32 %v2489_v63, %v2481_v46  ;;  %v1995_v46 = vld [vmem:[%s3347_s24 + $0x10] sm:$0xff] }
 0xb09   : > { %v1702_v60 = vpop.permute.xlu0 %1701 }
 0xb0a   : > { %1722 = vmatpush.msrb.mxu0 %v1702_v60 }
 0xb0b   : > { %2308 = vmatmul.msk.f32.vlgmr.msrb.gmra.mxu0 %vm1111_vm1, %v1699_v59 }
 0xb0c   : > { %1833 = vmatpush.msra.mxu0 %v1813_v62 }
 0xb0e   : > { %1945 = vmatpush.msrb.mxu0 %v1524_v1 }
 0xb13   : > { %2313 = vmatmul.msk.f32.vlgmr.msra.gmra.mxu0 %vm1111_vm1, %v1811_v0 }
 0xb83   : > { %v1924_v4 = vpop.f32.mrf.mxu3 }
 0xb84   : > { %2318 = vmatmul.msk.f32.vlgmr.msrb.gmra.mxu0 %vm1111_vm1, %v1924_v4 }
 0xb88   : > { %v1724_v5 = vpop.f32.mrf.mxu0 }
 0xb89   : > { %2309 = vmatmul.msk.f32.vlgmr.msrb.gmra.mxu1 %vm1111_vm1, %v1724_v5 }
 0xb8a   : > { %2020 = vmatpush.msrb.mxu1 %v1991_v23 }
 0xb8c   : > { %2021 = vmatpush.msrb.mxu1 %v1990_v24 }
 0xb8e   : > { %2022 = vmatpush.msrb.mxu1 %v1989_v25 }
 0xb90   : > { %v1835_v6 = vpop.f32.mrf.mxu0  ;;  %2023 = vmatpush.msrb.mxu1 %v1988_v26 }
 0xb91   : > { %2314 = vmatmul.msk.f32.vlgmr.msra.gmra.mxu1 %vm1111_vm1, %v1835_v6 }
 0xc01   : > { %v1947_v13 = vpop.f32.mrf.mxu0 }
 0xc06   : > { %v1747_v8 = vpop.f32.mrf.mxu1 }
 0xc07   : > { %v1771_v9 = vadd.f32 %v1770_v41, %v1747_v8 }
 0xc0e   : > { %v1858_v10 = vpop.f32.mrf.mxu1 }
 0xc0f   : > { %v1861_v11 = vadd.f32 %v1858_v10, %v1771_v9  ;;  %v2452_v10 = vld [vmem:[#allocation15] ss:$0 sm:$0xff] }
 0xc11   : > { %v1950_v14 = vadd.f32 %v1947_v13, %v1861_v11 }
 0xc13   : > { %v1954_v15 = vadd.f32 %v2447_v12, %v1950_v14  ;;  %v2453_v12 = vld [vmem:[#allocation16] ss:$0 sm:$0xff] }
 0xc15   : > { %v1955_v16 = vadd.f32 %v1954_v15, %v3225_v61  ;;  %v2000_v61 = vld [vmem:[%s3347_s24 + $0x38] sm:$0xff] }
 0xc16   : > { %2044 = vmatpush.msra.mxu2 %v2000_v61 }
 0xc17   : > { %v1958_v17 = vsel %vm1041_vm0, %v1955_v16, 0.0 }
 0xc18   : > { %1959 = vadd.xlane.f32.xlu0 %v1958_v17  ;;  %2045 = vmatpush.msra.mxu2 %v1999_v27 }
 0xc1a   : > { %2046 = vmatpush.msra.mxu2 %v1998_v28 }
 0xc1c   : > { %2047 = vmatpush.msra.mxu2 %v1997_v31 }
 0xc1e   : > { %2048 = vmatpush.msra.mxu2 %v1996_v34 }
 0xc20   : > { %2049 = vmatpush.msra.mxu2 %v1995_v46 }
 0xc22   : > { %2050 = vmatpush.msra.mxu2 %v1994_v47 }
 0xc24   : > { %2051 = vmatpush.msra.mxu2 %v1993_v48 }
 0xc8b   : > { %v1960_v18 = vpop.xlane.xlu0 %1959 }
 0xc8c   : > { %v1961_v19 = vmul.f32 %v1960_v18, %v3209_v33 }
 0xc8e   : > { %v1962_v20 = vsub.f32 %v1955_v16, %v1961_v19 }
 0xc90   : > { %v1963_v21 = vmul.f32 %v1962_v20, %v1962_v20 }
 0xc92   : > { %v1964_v22 = vsel %vm1041_vm0, %v1963_v21, 0.0 }
 0xc93   : > { %1965 = vadd.xlane.f32.xlu1 %v1964_v22 }
 0xd06   : > { %v1966_v29 = vpop.xlane.xlu1 %1965 }
 0xd07   : > { %v1967_v30 = vmul.f32 %v1966_v29, %v3209_v33 }
 0xd09   : > { %v1968_v32 = vadd.f32 1e-05, %v1967_v30 }
 0xd0b   : > { %2490 = vrsqrt.f32 %v1968_v32  ;;  %vm1975_vm7 = vweird.f32 %v1968_v32 }
 0xd11   : > { %v2491_v35 = vpop.eup %2490 }
 0xd12   : > { %v1970_v36 = vmul.f32 %v2491_v35, %v1968_v32  ;;  %vm1976_vm6 = vweird.f32 %v2491_v35 }
 0xd13   : > { %vm1977_vm8 = vmor %vm1975_vm7, %vm1976_vm6 }
 0xd14   : > { %v1971_v37 = vmul.f32 %v2491_v35, %v1970_v36 }
 0xd16   : > { %v1972_v7 = vmul.f32 0.5, %v1971_v37 }
 0xd18   : > { %v1973_v38 = vsub.f32 1.5, %v1972_v7 }
 0xd1a   : > { %v1974_v39 = vmul.f32 %v2491_v35, %v1973_v38 }
 0xd1c   : > { %v1978_v41 = vsel %vm1977_vm8, %v2491_v35, %v1974_v39 }
 0xd1d   : > { %v1979_v42 = vmul.f32 %v1978_v41, %v1962_v20 }
 0xd1f   : > { %v1983_v44 = vmul.f32 %v2448_v40, %v1979_v42 }
 0xd21   : > { %v1987_v45 = vadd.f32 %v2449_v43, %v1983_v44 }
 0xd23   : > { %2319 = vmatmul.msk.f32.vlgmr.msrb.gmra.mxu1 %vm1041_vm0, %v1987_v45 }
 0xda0   : > { %v2025_v50 = vpop.f32.mrf.mxu1 }
 0xda1   : > { %v2026_v51 = vadd.f32 %v2450_v49, %v2025_v50 }
 0xda3   : > { %v2028_v52 = vmax.f32 %v2026_v51, 0.0 }
 0xda5   : > { %2320 = vmatmul.msk.f32.vlgmr.msra.gmra.mxu2 %vm2032_vm9, %v2028_v52 }
 0xe28   : > { %v2053_v54 = vpop.f32.mrf.mxu2 }
 0xe29   : > { %v2054_v55 = vadd.f32 %v2451_v53, %v2053_v54 }
 0xe2b   : > { %v2056_v56 = vadd.f32 %v2054_v55, %v1987_v45 }
 0xe2d   : > { %v2059_v57 = vsel %vm1041_vm0, %v2056_v56, 0.0 }
 0xe2e   : > { %2060 = vadd.xlane.f32.xlu2 %v2059_v57 }
 0xea1   : > { %v2061_v58 = vpop.xlane.xlu2 %2060 }
 0xea2   : > { %v2062_v59 = vmul.f32 %v2061_v58, %v3209_v33 }
 0xea4   : > { %v2063_v60 = vsub.f32 %v2056_v56, %v2062_v59 }
 0xea6   : > { %v2064_v62 = vmul.f32 %v2063_v60, %v2063_v60 }
 0xea8   : > { %v2065_v63 = vsel %vm1041_vm0, %v2064_v62, 0.0 }
 0xea9   : > { %2066 = vadd.xlane.f32.xlu0 %v2065_v63 }
 0xf1c   : > { %v2067_v0 = vpop.xlane.xlu0 %2066 }
 0xf1d   : > { %v2068_v1 = vmul.f32 %v2067_v0, %v3209_v33 }
 0xf1f   : > { %v2069_v2 = vadd.f32 1e-05, %v2068_v1 }
 0xf21   : > { %2492 = vrsqrt.f32 %v2069_v2  ;;  %vm2076_vm11 = vweird.f32 %v2069_v2 }
 0xf27   : > { %v2493_v3 = vpop.eup %2492 }
 0xf28   : > { %v2071_v4 = vmul.f32 %v2493_v3, %v2069_v2  ;;  %vm2077_vm10 = vweird.f32 %v2493_v3 }
 0xf29   : > { %vm2078_vm12 = vmor %vm2076_vm11, %vm2077_vm10 }
 0xf2a   : > { %v2072_v5 = vmul.f32 %v2493_v3, %v2071_v4 }
 0xf2c   : > { %v2073_v6 = vmul.f32 0.5, %v2072_v5 }
 0xf2e   : > { %v2074_v8 = vsub.f32 1.5, %v2073_v6 }
 0xf30   : > { %v2075_v9 = vmul.f32 %v2493_v3, %v2074_v8 }
 0xf32   : > { %v2079_v11 = vsel %vm2078_vm12, %v2493_v3, %v2075_v9 }
 0xf33   : > { %v2080_v13 = vmul.f32 %v2079_v11, %v2063_v60 }
 0xf35   : > { %v2084_v14 = vmul.f32 %v2452_v10, %v2080_v13 }
 0xf37   : > { %v2088_v33 = vadd.f32 %v2453_v12, %v2084_v14 }
 0xf39   : > { %2089 = vst.msk [vmem:[%s1015_s25] sm:$0xff] %vm1041_vm0, %v2088_v33 }
 0xf3a PF: > { %s3393_s29 = sld [smem:[#allocation24_spill]] }
 0xf40   : > { %s44_s8 = sadd.s32 1, %s3393_s29  }
 0xf41   : > { %p41_p7 = scmp.ge.s32.totalorder %s44_s8, 4  }
 0xf43   :  { %43 = sbr.rel (!%p41_p7) target bundleno = 24 (0x18), region = 206 }
 0xf48   :  { %2109 = vsyncpa [#allocation3], 1 }
 0xf49   :  { %2111 = vsyncpa [#allocation3 + $0x1], 1 }
 0xf4a   :  { %2112 = vsyncpa [#allocation5], 1 }
 0xf4b   :  { %2113 = vsyncpa [#allocation8], 1 }
 0xf4c   :  { %2114 = vsyncpa [#allocation11], 1 }
 0xf4d   :  { %2115 = vsyncpa [#allocation14], 1 }
 0xf4e   :  { %2116 = vsyncpa [#allocation17], 1 }

// kernel: transformer_forward.9
= control target key start
LH: loop header
LB: loop body
LE: loop exit
PB: predicated region body
PF: predicated region fallthrough
CT: control target
= control target key end

     0   :  { %s1036_s0 = inlined_call_operand.vmem [shape: f32[2,8,32], index: 0, kind: input, shape index: {}]   ;;  %s1037_s1 = inlined_call_operand.vmem [shape: f32[1,32], index: 1, kind: input, shape index: {}]   ;;  %s1038_s2 = inlined_call_operand.hbm [shape: f32[1,32], index: 2, kind: input, shape index: {}]   ;;  %s1039_s3 = inlined_call_operand.hbm [shape: f32[32,32], index: 3, kind: input, shape index: {}]   ;;  %s1040_s4 = inlined_call_operand.hbm [shape: f32[1,32], index: 4, kind: input, shape index: {}]   ;;  %s1041_s5 = inlined_call_operand.hbm [shape: f32[32,32], index: 5, kind: input, shape index: {}]   ;;  %s1042_s6 = inlined_call_operand.hbm [shape: f32[2,8,32], index: 6, kind: output, shape index: {}]  }
   0x1   :  { %1043 = sst [smem:[#allocation15_spill]] %s1038_s2 }
   0x2   :  { %1044 = sst [smem:[#allocation16_spill]] %s1039_s3 }
   0x3   :  { %11 = vsyncpa [#allocation3], 0 }
   0x4   :  { %12 = vsyncpa [#allocation6], 0 }
   0x5   :  { %13 = vsyncpa [#allocation9], 0 }
   0x6   :  { %14 = vsyncpa [#allocation4], 0 }
   0x7   :  { %16 = vsyncpa [#allocation4 + $0x1], 0  ;;  %s892_s21 = smov 0   ;;  %s894_s22 = smov 0  }
   0x8   :  { %s896_s23 = smov 0   ;;  %s898_s24 = smov 0  }
   0x9 LB: > { %s913_s25 = sadd.s32 4294967295, %s848_s24   ;;  %s540_s26 = sadd.s32 4294967294, %s848_s24   ;;  %s848_s24 = sphi %s898_s24, %s1054_s24   ;;  %s844_s23 = sphi %s896_s23, %s1053_s23   ;;  %s840_s22 = sphi %s894_s22, %s1052_s22   ;;  %s836_s21 = sphi %s892_s21, %s1051_s21  }
   0xa   : > { %s917_s27 = sadd.s32 1, %s848_s24   ;;  %s160_s28 = sadd.s32 1, %s844_s23 }
   0xb   : > { %s157_s29 = ssub.s32 %s848_s24, %s917_s27  ;;  %p170_p0 = scmp.ne.s32.totalorder %s844_s23, %s840_s22 }
   0xc   : > { %p158_p1 = scmp.eq.s32.totalorder %s157_s29, 0  ;;  %p171_p2 = scmp.eq.s32.totalorder %s913_s25, 1 }
   0xd   : > { %p176_p3 = scmp.ne.s32.totalorder %s840_s22, %s836_s21  ;;  %p177_p4 = scmp.eq.s32.totalorder %s540_s26, 1 }
   0xe   : > { %s928_s30 = scalar_select %p158_p1, %s844_s23, %s160_s28  }
   0xf   : > { %p930_p5 = por %p171_p2, %p170_p0  ;;  %p934_p6 = por %p177_p4, %p176_p3 }
  0x10   : > { %p541_p7 = scmp.ge.s32.totalorder %s848_s24, 1  ;;  %p184_p8 = scmp.lt.s32.totalorder %s848_s24, 3 }
  0x11   : > { %p599_p9 = scmp.eq.s32.totalorder %s913_s25, 0  ;;  %s1048_s3 = sld [smem:[#allocation16_spill]] }
  0x12   : > { %p941_p10 = pnand %p541_p7, %p184_p8  ;;  %s850_s13 = smov [#allocation5]  }
  0x13   : > { %s212_s14 = sshll.u32 %s850_s13, 4  ;;  %s1050_s2 = sld [smem:[#allocation15_spill]]  ;;  %s213_s14 = int_to_ptr.vmem [resolvable:$true] %s212_s14 }
  0x14   : > { %p582_p11 = pneg %p941_p10  ;;  %s851_s19 = smov 128  }
  0x15   : > { %s852_s20 = smov 8   ;;  %s853_s26 = smov [#allocation2]  }
  0x16   : > { %p952_p12 = pnand %p599_p9, %p582_p11  ;;  %s201_s28 = sshll.u32 %s853_s26, 4  ;;  %s202_s28 = int_to_ptr.vmem [resolvable:$true] %s201_s28 }
  0x17   : > { %s210_s12 = sshll.u32 %s1048_s3, 4  ;;  %s225_s11 = sshll.u32 %s1040_s4, 4  ;;  %s211_s12 = int_to_ptr.hbm [resolvable:$true] %s210_s12  ;;  %s226_s11 = int_to_ptr.hbm [resolvable:$true] %s225_s11 }
  0x18   : > { %588 = dma.hbm_to_vmem [thread:$0]  (!%p952_p12), %s211_s12, 512, %s213_s14, [#allocation6], %s851_s19, %s851_s19, %s852_s20  }
  0x19   : > { %s199_s18 = sshll.u32 %s1050_s2, 4  ;;  %s236_s17 = sshll.u32 %s1041_s5, 4  ;;  %s200_s18 = int_to_ptr.hbm [resolvable:$true] %s199_s18  ;;  %s237_s17 = int_to_ptr.hbm [resolvable:$true] %s236_s17 }
  0x1a   : > { %585 = dma.hbm_to_vmem [thread:$0]  (!%p952_p12), %s200_s18, 16, %s202_s28, [#allocation3]  }
  0x1b   : > { %s854_s2 = smov [#allocation7]   ;;  %s855_s12 = smov [#allocation8]  }
  0x1c   : > { %s227_s3 = sshll.u32 %s854_s2, 4  ;;  %s238_s14 = sshll.u32 %s855_s12, 4  ;;  %s228_s3 = int_to_ptr.vmem [resolvable:$true] %s227_s3  ;;  %s239_s14 = int_to_ptr.vmem [resolvable:$true] %s238_s14 }
  0x1d   : > { %591 = dma.hbm_to_vmem [thread:$0]  (!%p952_p12), %s226_s11, 16, %s228_s3, [#allocation6]  }
  0x1e   : > { %594 = dma.hbm_to_vmem [thread:$0]  (!%p952_p12), %s237_s17, 512, %s239_s14, [#allocation9], %s851_s19, %s851_s19, %s852_s20  }
  0x1f   : > { %261 = sbr.rel (%p941_p10) target bundleno = 575 (0x23f), region = 44 }
  0x24   : > { %819 = dma.done.wait (%p599_p9), [#allocation3], 16  }
  0x25   : > { %821 = vsyncadd (%p599_p9), [#allocation3], 4294967280 }
  0x26   : > { %823 = dma.done.wait (%p599_p9), [#allocation6], 528  }
  0x27   : > { %825 = vsyncadd (%p599_p9), [#allocation6], 4294966768 }
  0x28   : > { %827 = dma.done.wait (%p599_p9), [#allocation9], 512  }
  0x29   : > { %829 = vsyncadd (%p599_p9), [#allocation9], 4294966784  ;;  %p306_p13 = scmp.lt.s32.totalorder %s913_s25, 1  ;;  %vm313_vm0 = vcmask 261120   ;;  %v856_v2 = vmov 32.0   ;;  %v354_v14 = vld [vmem:[#allocation5 + $0x18] sm:$0xff] }
  0x2a   : > { %650 = vrcp.f32 %v856_v2  ;;  %374 = vmatpush.msra.mxu0 %v354_v14  ;;  %v353_v15 = vld [vmem:[#allocation5 + $0x10] sm:$0xff]  ;;  %v352_v16 = vld [vmem:[#allocation5 + $0x8] sm:$0xff]  ;;  %v351_v17 = vld [vmem:[#allocation5] sm:$0xff]  ;;  %s303_s26 = sand.u32 1, %s840_s22   ;;  %s561_s29 = sshll.u32 %s913_s25, 3 }
  0x2b   : > { %s307_s2 = scalar_select %p306_p13, %s913_s25, 1  ;;  %v385_v18 = vld [vmem:[#allocation8 + $0x18] sm:$0xff]  ;;  %v384_v19 = vld [vmem:[#allocation8 + $0x10] sm:$0xff]  ;;  %v383_v23 = vld [vmem:[#allocation8 + $0x8] sm:$0xff] }
  0x2c   : > { %375 = vmatpush.msra.mxu0 %v353_v15  ;;  %555 = vmatpush.xpose.msk.msra.mxu1 %vm313_vm0, %v385_v18  ;;  %v647_v30 = vld [vmem:[%s1037_s1] ss:$0 sm:$0xff]  ;;  %v382_v36 = vld [vmem:[#allocation8] sm:$0xff]  ;;  %v649_v37 = vld [vmem:[#allocation7] ss:$0 sm:$0xff]  ;;  %s552_s28 = sshll.u32 %s303_s26, 3  ;;  %s435_s13 = scalar_lea.hbm %s1042_s6, %s561_s29 }
  0x2d   : > { %s553_s3 = sshll.u32 %s307_s2, 3  ;;  %v648_v33 = vld [vmem:[#allocation2] ss:$0 sm:$0xff]  ;;  %s305_s16 = scalar_lea.vmem [#allocation10], %s552_s28 }
  0x2e   : > { %s309_s18 = scalar_lea.vmem %s1036_s0, %s553_s3  ;;  %376 = vmatpush.msra.mxu0 %v352_v16  ;;  %s437_s17 = sshll.u32 %s305_s16, 4  ;;  %s438_s17 = int_to_ptr.vmem [resolvable:$true] %s437_s17 }
  0x2f   : > { %v310_v0 = vld [vmem:[%s309_s18] sm:$0xff]  ;;  %s439_s12 = sshll.u32 %s435_s13, 4  ;;  %s425_s14 = scalar_lea.sflag [#allocation4], %s303_s26  ;;  %s440_s12 = int_to_ptr.hbm [resolvable:$true] %s439_s12 }
  0x30   : > { %v314_v1 = vsel %vm313_vm0, %v310_v0, 0.0  ;;  %v651_v3 = vpop.eup %650  ;;  %377 = vmatpush.msra.mxu0 %v351_v17  ;;  %556 = vmatpush.xpose.msk.msra.mxu1 %vm313_vm0, %v384_v19  ;;  %s788_s2 = sshra.s32 %s440_s12, 4  ;;  %s794_s15 = scalar_lea.hbm %s1042_s6, 16  ;;  %s789_s2 = int_to_ptr.hbm [resolvable:$true] %s788_s2 }
  0x31   : > { %315 = vadd.xlane.f32.xlu0 %v314_v1  ;;  %v318_v4 = vmul.f32 32.0, %v651_v3  ;;  %vm322_vm1 = vweird.f32 %v651_v3  ;;  %s790_s3 = scalar_lea.hbm %s789_s2, 8  ;;  %p795_p3 = scmp.lt.s32.totalorder %s789_s2, %s1042_s6 }
  0x32   : > { %p791_p0 = scmp.ne.s32.totalorder %s789_s2, %s790_s3  ;;  %p796_p4 = scmp.lt.s32.totalorder %s794_s15, %s790_s3 }
  0x33   : > { %v319_v5 = vsub.f32 1.0, %v318_v4 }
  0x34   : > { %557 = vmatpush.xpose.msk.msra.mxu1 %vm313_vm0, %v383_v23  ;;  %p792_p1 = pnand %p791_p0, %p930_p5  ;;  %p797_p7 = por %p796_p4, %p795_p3 }
  0x35   : > { %v320_v6 = vmul.f32 %v651_v3, %v319_v5 }
  0x36   : > { %p793_p2 = pneg %p792_p1 }
  0x37   : > { %v321_v7 = vadd.f32 %v651_v3, %v320_v6 }
  0x38   : > { %558 = vmatpush.xpose.msk.msra.mxu1 %vm313_vm0, %v382_v36  ;;  %p798_p8 = pnand %p797_p7, %p793_p2 }
  0x39   : > { %v323_v8 = vsel %vm322_vm1, %v651_v3, %v321_v7 }
  0xa4   : > { %v316_v9 = vpop.xlane.xlu0 %315 }
  0xa5   : > { %v324_v10 = vmul.f32 %v323_v8, %v316_v9 }
  0xa7   : > { %v325_v11 = vsub.f32 %v310_v0, %v324_v10 }
  0xa9   : > { %v326_v12 = vmul.f32 %v325_v11, %v325_v11 }
  0xab   : > { %v327_v13 = vsel %vm313_vm0, %v326_v12, 0.0 }
  0xac   : > { %328 = vadd.xlane.f32.xlu0 %v327_v13 }
 0x11f   : > { %v329_v20 = vpop.xlane.xlu0 %328 }
 0x120   : > { %v330_v21 = vmul.f32 %v329_v20, %v323_v8 }
 0x122   : > { %v331_v22 = vadd.f32 1e-05, %v330_v21 }
 0x124   : > { %652 = vrsqrt.f32 %v331_v22  ;;  %vm338_vm3 = vweird.f32 %v331_v22 }
 0x12a   : > { %v653_v24 = vpop.eup %652 }
 0x12b   : > { %v333_v25 = vmul.f32 %v653_v24, %v331_v22  ;;  %vm339_vm2 = vweird.f32 %v653_v24 }
 0x12c   : > { %vm340_vm4 = vmor %vm338_vm3, %vm339_vm2 }
 0x12d   : > { %v334_v26 = vmul.f32 %v653_v24, %v333_v25 }
 0x12f   : > { %v335_v27 = vmul.f32 0.5, %v334_v26 }
 0x131   : > { %v336_v28 = vsub.f32 1.5, %v335_v27 }
 0x133   : > { %v337_v29 = vmul.f32 %v653_v24, %v336_v28 }
 0x135   : > { %v341_v31 = vsel %vm340_vm4, %v653_v24, %v337_v29 }
 0x136   : > { %v342_v32 = vmul.f32 %v341_v31, %v325_v11 }
 0x138   : > { %v346_v34 = vmul.f32 %v647_v30, %v342_v32 }
 0x13a   : > { %v350_v35 = vadd.f32 %v648_v33, %v346_v34 }
 0x13c   : > { %554 = vmatmul.msk.f32.vlgmr.msra.gmra.mxu0 %vm313_vm0, %v350_v35 }
 0x1b9   : > { %v379_v38 = vpop.f32.mrf.mxu0 }
 0x1ba   : > { %v380_v39 = vadd.f32 %v649_v37, %v379_v38 }
 0x1bc   : > { %559 = vmatmul.msk.f32.vlgmr.msra.gmra.mxu1 %vm313_vm0, %v380_v39 }
 0x239   : > { %v418_v40 = vpop.f32.mrf.mxu1 }
 0x23a   : > { %vm421_vm5 = vcmp.ne.f32.partialorder %v418_v40, 0.0 }
 0x23b   : > { %v422_v41 = vsel %vm421_vm5, %v380_v39, -1e+10 }
 0x23c   : > { %423 = vst.msk [vmem:[%s305_s16] sm:$0xff] %vm313_vm0, %v422_v41 }
 0x23d   : > { %801 = shalt.err (!%p798_p8)
}
 0x23e   : > { %580 = dma.vmem_to_hbm [thread:$0]  (%p930_p5), %s438_s17, 128, %s440_s12, %s425_s14  }
 0x23f PF: > { %p607_p9 = scmp.ge.s32.totalorder %s848_s24, 2  ;;  %s451_s20 = sand.u32 1, %s836_s21  }
 0x240   : > { %s452_s26 = scalar_lea.sflag [#allocation4], %s451_s20 }
 0x241   : > { %p596_p10 = pnand %p607_p9, %p934_p6 }
 0x243   : > { %p597_p11 = pneg %p596_p10 }
 0x245   : > { %831 = dma.done.wait (%p597_p11), %s452_s26, 128  }
 0x246   : > { %833 = vsyncadd (%p597_p11), %s452_s26, 4294967168  ;;  %p19_p12 = scmp.ge.s32.totalorder %s917_s27, 4   ;;  %s1051_s21 = smov %s840_s22 }
 0x247   : > { %s1052_s22 = smov %s844_s23  ;;  %s1053_s23 = smov %s928_s30 }
 0x248   : > { %s1054_s24 = smov %s917_s27  ;;  %21 = sbr.rel (!%p19_p12) target bundleno = 9 (0x9), region = 96 }
 0x24d   :  { %458 = vsyncpa [#allocation3], 1 }
 0x24e   :  { %460 = vsyncpa [#allocation3 + $0x1], 1 }
 0x24f   :  { %461 = vsyncpa [#allocation6], 1 }
 0x250   :  { %462 = vsyncpa [#allocation9], 1 }
 0x251   :  { %463 = vsyncpa [#allocation4], 1 }
 0x252   :  { %465 = vsyncpa [#allocation4 + $0x1], 1 }

</bundles_post_ra>
